<compile_context>
chip_gen: v7x
topology: tpu7x:2x2x1
jax: 0.10.0
libtpu: 0.0.40
codegen_flags: <defaults>
</compile_context>

<pallas_src>
import functools

import jax
import jax.numpy as jnp
from jax.experimental import pallas as pl
from jax.experimental.pallas import tpu as pltpu

CP = 128          # lane width: every channel dimension is zero-padded to this
BN_EPS = 1e-5


def _round_up(n, m):
    return ((n + m - 1) // m) * m


# --------------------------------------------------------------------------- kernel

def basic_block_kernel(p_ref, w1_ref, b1_ref, w2_ref, b2_ref, res_ref, o_ref,
                       *, batch, ho, wo):
    """Fused BasicBlock: relu(bn2(conv2(relu(bn1(conv1(x))))) + shortcut).

    Row layout of p_ref / res_ref / o_ref is (y, b, x), so the conv2 "ky" taps are
    aligned static row slices of the VMEM-resident conv1 output.  p_ref holds the conv1
    im2col patches on an H-extended grid (one all-zero image row above and below, forced
    to zero in-kernel), so conv2's zero padding in H comes for free.
    """
    row_w = batch * wo             # rows per image row of the (extended) grid; power of two
    m_out = batch * ho * wo        # output rows
    m_ext = m_out + 2 * row_w      # conv1 rows (H-extended grid)
    lg_row_w = row_w.bit_length() - 1

    # ---- conv1 (+ folded BN1) + ReLU: one lane-dense MXU matmul, f32 accumulate ------
    h = jnp.dot(p_ref[...], w1_ref[...], preferred_element_type=jnp.float32)
    h = jnp.maximum(h + b1_ref[...], 0.0)
    # zero the two H-padding ring rows (extended y == 0 and y == ho + 1)
    yext = jax.lax.broadcasted_iota(jnp.int32, (m_ext, 1), 0) >> lg_row_w
    h = jnp.where((yext >= 1) & (yext <= ho), h, 0.0)
    hb = h.astype(jnp.bfloat16)

    # x-coordinate of every output row (wo is a power of two)
    xx = jax.lax.broadcasted_iota(jnp.int32, (m_out, 1), 0) & (wo - 1)

    # Exact one-hot row-shift operator for the kx = +-1 taps, built from iota/compare and
    # applied on the otherwise-idle MXU: unambiguous semantics and no sublane-alignment
    # constraints.  (For large spatial extents replace with pltpu.roll on the XLU.)
    diff = (jax.lax.broadcasted_iota(jnp.int32, (m_out, m_out), 1)
            - jax.lax.broadcasted_iota(jnp.int32, (m_out, m_out), 0))

    # ---- conv2 (+ folded BN2): 3x3, stride 1, pad 1, taps grouped by kx ---------------
    acc = jnp.zeros((m_out, CP), jnp.float32)
    for dxi in range(3):                                        # kx = dxi - 1
        g = jnp.zeros((m_out, CP), jnp.float32)
        for dyi in range(3):                                    # ky = dyi - 1
            piece = hb[dyi * row_w:dyi * row_w + m_out, :]      # aligned static slice
            g = g + jnp.dot(piece, w2_ref[dyi * 3 + dxi],
                            preferred_element_type=jnp.float32)
        kx = dxi - 1
        if kx == 0:
            acc = acc + g
        else:
            shift = jnp.where(diff == kx, 1.0, 0.0)             # (m_out, m_out) one-hot
            shifted = jnp.dot(shift, g, preferred_element_type=jnp.float32)
            valid = (xx + kx >= 0) & (xx + kx < wo)
            acc = acc + jnp.where(valid, shifted, 0.0)

    # ---- + shortcut, ReLU (f32 epilogue, lane-dense (m_out, 128) store) ---------------
    o_ref[...] = jnp.maximum(acc + b2_ref[...] + res_ref[...], 0.0)


# --------------------------------------------------------------------------- pallas wrapper

def _fused_basic_block(patches, w1, b1, w2, b2, res, *, batch, ho, wo):
    m_out = batch * ho * wo
    m_ext, k1p = patches.shape
    kernel = functools.partial(basic_block_kernel, batch=batch, ho=ho, wo=wo)
    return pl.pallas_call(
        kernel,
        out_shape=jax.ShapeDtypeStruct((m_out, CP), jnp.float32),
        grid=(1,),   # the whole block fits comfortably in VMEM: one grid step, no re-streaming
        in_specs=[
            pl.BlockSpec((m_ext, k1p), lambda i: (0, 0)),
            pl.BlockSpec((k1p, CP), lambda i: (0, 0)),
            pl.BlockSpec((1, CP), lambda i: (0, 0)),
            pl.BlockSpec((9, CP, CP), lambda i: (0, 0, 0)),
            pl.BlockSpec((1, CP), lambda i: (0, 0)),
            pl.BlockSpec((m_out, CP), lambda i: (0, 0)),
        ],
        out_specs=pl.BlockSpec((m_out, CP), lambda i: (0, 0)),
        compiler_params=pltpu.CompilerParams(dimension_semantics=("arbitrary",)),
    )(patches, w1, b1, w2, b2, res)


def basic_block_apply(x_nchw, kp, *, in_planes, planes, stride):
    """One BasicBlock forward.  x_nchw: (B, in_planes, H, W) float32 (PyTorch layout)."""
    batch, cin, hin, win = x_nchw.shape
    assert cin == in_planes
    ho = (hin + 2 - 3) // stride + 1
    wo = (win + 2 - 3) // stride + 1
    row_w = batch * wo
    # kernel layout assumptions (hold for the CIFAR-style shapes used here)
    assert wo & (wo - 1) == 0 and row_w & (row_w - 1) == 0 and row_w >= 16

    x = jnp.transpose(x_nchw, (0, 2, 3, 1)).astype(jnp.float32)          # NHWC

    # conv1 im2col patches in the (y, b, x) row layout; K zero-padded to a multiple of
    # 128, plus one all-zero image row above/below (conv2's H padding ring).  Stride is a
    # plain Python int (fix for the previous "Slice entries must be static" failure).
    xp = jnp.pad(x, ((0, 0), (1, 1), (1, 1), (0, 0)))
    cols = [xp[:, dy:dy + stride * (ho - 1) + 1:stride,
               dx:dx + stride * (wo - 1) + 1:stride, :]
            for dy in range(3) for dx in range(3)]
    patches = jnp.concatenate(cols, axis=-1)                              # (B, ho, wo, 9*cin)
    patches = jnp.transpose(patches, (1, 0, 2, 3)).reshape(batch * ho * wo, 9 * cin)
    k1p = kp['w1'].shape[0]
    patches = jnp.pad(patches, ((row_w, row_w), (0, k1p - 9 * cin))).astype(jnp.bfloat16)

    # shortcut: identity, or option-'A' (x[:, :, ::2, ::2] + zero channel padding)
    if stride != 1 or in_planes != planes:
        pc = planes // 4
        assert in_planes + 2 * pc == planes
        sc = jnp.pad(x[:, ::2, ::2, :], ((0, 0), (0, 0), (0, 0), (pc, CP - in_planes - pc)))
    else:
        sc = jnp.pad(x, ((0, 0), (0, 0), (0, 0), (0, CP - in_planes)))
    res = jnp.transpose(sc, (1, 0, 2, 3)).reshape(batch * ho * wo, CP)

    out = _fused_basic_block(patches, kp['w1'], kp['b1'], kp['w2'], kp['b2'], res,
                             batch=batch, ho=ho, wo=wo)                   # (ho*B*wo, CP)
    out = out.reshape(ho, batch, wo, CP)[:, :, :, :planes]
    return jnp.transpose(out, (1, 3, 0, 2))                               # back to NCHW


# --------------------------------------------------------------------------- parameters

def init_basic_block_params(key, in_planes, planes):
    """Deterministic synthetic parameters matching the PyTorch module's shapes."""
    kw1, kw2, kbn = jax.random.split(key, 3)

    def conv_w(k, cin, cout):
        # kaiming_normal_(mode='fan_out', nonlinearity='relu'): std = sqrt(2 / (9 * cout))
        return jax.random.normal(k, (3, 3, cin, cout), jnp.float32) * (2.0 / (9 * cout)) ** 0.5

    def bn_stats(k, c):
        kg, kb, km, kv = jax.random.split(k, 4)
        gamma = 0.8 + 0.4 * jax.random.uniform(kg, (c,), jnp.float32)
        beta = 0.1 * jax.random.normal(kb, (c,), jnp.float32)
        mean = 0.1 * jax.random.normal(km, (c,), jnp.float32)
        var = 0.5 + jax.random.uniform(kv, (c,), jnp.float32)
        return gamma, beta, mean, var

    return {
        'w1': conv_w(kw1, in_planes, planes),     # HWIO layout
        'w2': conv_w(kw2, planes, planes),
        'bn1': bn_stats(jax.random.fold_in(kbn, 1), planes),
        'bn2': bn_stats(jax.random.fold_in(kbn, 2), planes),
    }


def prep_block_for_kernel(raw, in_planes, planes):
    """Fold eval-mode BN into conv weights / per-channel bias, pad to MXU/lane-friendly
    shapes, and cast matmul operands to bf16.  Runs once at parameter-prep time."""
    def fold(bn):
        gamma, beta, mean, var = bn
        scale = gamma * jax.lax.rsqrt(var + BN_EPS)
        return scale, beta - mean * scale

    s1, b1 = fold(raw['bn1'])
    s2, b2 = fold(raw['bn2'])
    k1 = 9 * in_planes
    k1p = _round_up(k1, 128)
    w1 = (raw['w1'] * s1[None, None, None, :]).reshape(k1, planes)
    w1 = jnp.pad(w1, ((0, k1p - k1), (0, CP - planes))).astype(jnp.bfloat16)
    w2 = (raw['w2'] * s2[None, None, None, :]).reshape(9, planes, planes)
    w2 = jnp.pad(w2, ((0, 0), (0, CP - planes), (0, CP - planes))).astype(jnp.bfloat16)
    return {
        'w1': w1,
        'b1': jnp.pad(b1, (0, CP - planes)).reshape(1, CP).astype(jnp.float32),
        'w2': w2,
        'b2': jnp.pad(b2, (0, CP - planes)).reshape(1, CP).astype(jnp.float32),
    }


# --------------------------------------------------------------------------- pure-JAX reference

def _conv_ref(x_nchw, w_hwio, stride):
    return jax.lax.conv_general_dilated(
        x_nchw, w_hwio, (stride, stride), ((1, 1), (1, 1)),
        dimension_numbers=('NCHW', 'HWIO', 'NCHW'))


def _bn_ref(x_nchw, bn):
    gamma, beta, mean, var = bn
    scale = gamma / jnp.sqrt(var + BN_EPS)
    return x_nchw * scale[None, :, None, None] + (beta - mean * scale)[None, :, None, None]


def reference_basic_block(x, raw, in_planes, planes, stride):
    out = jax.nn.relu(_bn_ref(_conv_ref(x, raw['w1'], stride), raw['bn1']))
    out = _bn_ref(_conv_ref(out, raw['w2'], 1), raw['bn2'])
    if stride != 1 or in_planes != planes:
        pc = planes // 4
        shortcut = jnp.pad(x[:, :, ::2, ::2], ((0, 0), (pc, pc), (0, 0), (0, 0)))
    else:
        shortcut = x
    return jax.nn.relu(out + shortcut)


# --------------------------------------------------------------------------- forward / main

def forward(x, kparams):
    # two BasicBlock instances exercising both shortcut paths of the module
    y = basic_block_apply(x, kparams['block1'], in_planes=16, planes=16, stride=1)
    y = basic_block_apply(y, kparams['block2'], in_planes=16, planes=32, stride=2)
    return y


if __name__ == "__main__":
    key = jax.random.PRNGKey(0)
    kx, kp1, kp2 = jax.random.split(key, 3)

    # Input in the PyTorch NCHW convention: (batch=2, channels=16, H=16, W=16)
    x = jax.random.normal(kx, (2, 16, 16, 16), jnp.float32)

    raw1 = init_basic_block_params(kp1, 16, 16)       # identity shortcut
    raw2 = init_basic_block_params(kp2, 16, 32)       # stride-2, option-'A' shortcut
    kparams = {'block1': prep_block_for_kernel(raw1, 16, 16),
               'block2': prep_block_for_kernel(raw2, 16, 32)}

    out = jax.jit(forward)(x, kparams)
    jax.block_until_ready(out)
    assert out.shape == (2, 32, 8, 8)
    assert bool(jnp.all(jnp.isfinite(out)))

    # validate the fused kernels against an un-folded eval-mode BN + lax.conv reference;
    # tolerance covers the bf16 MXU operands.
    ref = reference_basic_block(x, raw1, 16, 16, 1)
    ref = reference_basic_block(ref, raw2, 16, 32, 2)
    assert float(jnp.max(jnp.abs(out - ref))) < 1e-1

    print("KERNEL_OK")
</pallas_src>

<mosaic_0001>
module attributes {stable_mosaic.version = 11 : i64} {
  func.func @basic_block_kernel(%arg0: i32, %arg1: memref<576x256xbf16, #tpu.memory_space<vmem>>, %arg2: memref<256x128xbf16, #tpu.memory_space<vmem>>, %arg3: memref<1x128xf32, #tpu.memory_space<vmem>>, %arg4: memref<9x128x128xbf16, #tpu.memory_space<vmem>>, %arg5: memref<1x128xf32, #tpu.memory_space<vmem>>, %arg6: memref<512x128xf32, #tpu.memory_space<vmem>>, %arg7: memref<512x128xf32, #tpu.memory_space<vmem>>) attributes {dimension_semantics = [#tpu.dimension_semantics<arbitrary>], iteration_bounds = array<i64: 1>, scalar_prefetch = 0 : i64, scratch_operands = 0 : i64, tpu.core_type = #tpu.core_type<tc>, window_params = [{pipeline_mode = #tpu.pipeline_mode<synchronous>, transform_indices = @transform_0, window_bounds = array<i64: 576, 256>}, {pipeline_mode = #tpu.pipeline_mode<synchronous>, transform_indices = @transform_1, window_bounds = array<i64: 256, 128>}, {pipeline_mode = #tpu.pipeline_mode<synchronous>, transform_indices = @transform_2, window_bounds = array<i64: 1, 128>}, {pipeline_mode = #tpu.pipeline_mode<synchronous>, transform_indices = @transform_3, window_bounds = array<i64: 9, 128, 128>}, {pipeline_mode = #tpu.pipeline_mode<synchronous>, transform_indices = @transform_4, window_bounds = array<i64: 1, 128>}, {pipeline_mode = #tpu.pipeline_mode<synchronous>, transform_indices = @transform_5, window_bounds = array<i64: 512, 128>}, {pipeline_mode = #tpu.pipeline_mode<synchronous>, transform_indices = @transform_6, window_bounds = array<i64: 512, 128>}]} {
    %c0 = arith.constant 0 : index
    %c0_0 = arith.constant 0 : index
    %0 = vector.load %arg1[%c0, %c0_0] : memref<576x256xbf16, #tpu.memory_space<vmem>>, vector<576x256xbf16>
    %c0_1 = arith.constant 0 : index
    %c0_2 = arith.constant 0 : index
    %1 = vector.load %arg2[%c0_1, %c0_2] : memref<256x128xbf16, #tpu.memory_space<vmem>>, vector<256x128xbf16>
    %cst = arith.constant dense<0.000000e+00> : vector<576x128xf32>
    %2 = tpu.matmul %0, %1, %cst {dimension_numbers = #tpu.dot_dimension_numbers<[1], [0], [0], [1], [0, 0, 1, 1], [], []>} : vector<576x256xbf16>, vector<256x128xbf16>, vector<576x128xf32> -> vector<576x128xf32>
    %c0_3 = arith.constant 0 : index
    %c0_4 = arith.constant 0 : index
    %3 = vector.load %arg3[%c0_3, %c0_4] : memref<1x128xf32, #tpu.memory_space<vmem>>, vector<1x128xf32>
    %4 = vector.broadcast %3 : vector<1x128xf32> to vector<576x128xf32>
    %5 = arith.addf %2, %4 : vector<576x128xf32>
    %cst_5 = arith.constant 0.000000e+00 : f32
    %6 = vector.broadcast %cst_5 : f32 to vector<576x128xf32>
    %7 = arith.maximumf %5, %6 : vector<576x128xf32>
    %8 = tpu.iota {dimensions = array<i32: 0>} : vector<576x1xi32>
    %c5_i32 = arith.constant 5 : i32
    %9 = vector.broadcast %c5_i32 : i32 to vector<576x1xi32>
    %10 = arith.shrsi %8, %9 : vector<576x1xi32>
    %c1_i32 = arith.constant 1 : i32
    %11 = vector.broadcast %c1_i32 : i32 to vector<576x1xi32>
    %12 = arith.cmpi sge, %10, %11 : vector<576x1xi32>
    %c16_i32 = arith.constant 16 : i32
    %13 = vector.broadcast %c16_i32 : i32 to vector<576x1xi32>
    %14 = arith.cmpi sle, %10, %13 : vector<576x1xi32>
    %15 = arith.andi %12, %14 : vector<576x1xi1>
    %cst_6 = arith.constant 0.000000e+00 : f32
    %16 = vector.shape_cast %15 : vector<576x1xi1> to vector<576x1xi1>
    %17 = vector.broadcast %16 : vector<576x1xi1> to vector<576x128xi1>
    %18 = vector.broadcast %cst_6 : f32 to vector<576x128xf32>
    %19 = arith.select %17, %7, %18 : vector<576x128xi1>, vector<576x128xf32>
    %20 = arith.truncf %19 : vector<576x128xf32> to vector<576x128xbf16>
    %21 = tpu.iota {dimensions = array<i32: 0>} : vector<512x1xi32>
    %c15_i32 = arith.constant 15 : i32
    %22 = vector.broadcast %c15_i32 : i32 to vector<512x1xi32>
    %23 = arith.andi %21, %22 : vector<512x1xi32>
    %24 = tpu.iota {dimensions = array<i32: 1>} : vector<512x512xi32>
    %25 = tpu.iota {dimensions = array<i32: 0>} : vector<512x512xi32>
    %26 = arith.subi %24, %25 : vector<512x512xi32>
    %cst_7 = arith.constant 0.000000e+00 : f32
    %27 = vector.broadcast %cst_7 : f32 to vector<512x128xf32>
    %cst_8 = arith.constant 0.000000e+00 : f32
    %28 = vector.broadcast %cst_8 : f32 to vector<512x128xf32>
    %29 = vector.extract_strided_slice %20 {offsets = [0, 0], sizes = [512, 128], strides = [1, 1]} : vector<576x128xbf16> to vector<512x128xbf16>
    %c0_9 = arith.constant 0 : index
    %c0_10 = arith.constant 0 : index
    %c0_11 = arith.constant 0 : index
    %30 = vector.load %arg4[%c0_9, %c0_10, %c0_11] : memref<9x128x128xbf16, #tpu.memory_space<vmem>>, vector<1x128x128xbf16>
    %31 = vector.shape_cast %30 : vector<1x128x128xbf16> to vector<128x128xbf16>
    %cst_12 = arith.constant dense<0.000000e+00> : vector<512x128xf32>
    %32 = tpu.matmul %29, %31, %cst_12 {dimension_numbers = #tpu.dot_dimension_numbers<[1], [0], [0], [1], [0, 0, 1, 1], [], []>} : vector<512x128xbf16>, vector<128x128xbf16>, vector<512x128xf32> -> vector<512x128xf32>
    %33 = arith.addf %28, %32 : vector<512x128xf32>
    %34 = vector.extract_strided_slice %20 {offsets = [32, 0], sizes = [512, 128], strides = [1, 1]} : vector<576x128xbf16> to vector<512x128xbf16>
    %c3 = arith.constant 3 : index
    %c0_13 = arith.constant 0 : index
    %c0_14 = arith.constant 0 : index
    %35 = vector.load %arg4[%c3, %c0_13, %c0_14] : memref<9x128x128xbf16, #tpu.memory_space<vmem>>, vector<1x128x128xbf16>
    %36 = vector.shape_cast %35 : vector<1x128x128xbf16> to vector<128x128xbf16>
    %cst_15 = arith.constant dense<0.000000e+00> : vector<512x128xf32>
    %37 = tpu.matmul %34, %36, %cst_15 {dimension_numbers = #tpu.dot_dimension_numbers<[1], [0], [0], [1], [0, 0, 1, 1], [], []>} : vector<512x128xbf16>, vector<128x128xbf16>, vector<512x128xf32> -> vector<512x128xf32>
    %38 = arith.addf %33, %37 : vector<512x128xf32>
    %39 = vector.extract_strided_slice %20 {offsets = [64, 0], sizes = [512, 128], strides = [1, 1]} : vector<576x128xbf16> to vector<512x128xbf16>
    %c6 = arith.constant 6 : index
    %c0_16 = arith.constant 0 : index
    %c0_17 = arith.constant 0 : index
    %40 = vector.load %arg4[%c6, %c0_16, %c0_17] : memref<9x128x128xbf16, #tpu.memory_space<vmem>>, vector<1x128x128xbf16>
    %41 = vector.shape_cast %40 : vector<1x128x128xbf16> to vector<128x128xbf16>
    %cst_18 = arith.constant dense<0.000000e+00> : vector<512x128xf32>
    %42 = tpu.matmul %39, %41, %cst_18 {dimension_numbers = #tpu.dot_dimension_numbers<[1], [0], [0], [1], [0, 0, 1, 1], [], []>} : vector<512x128xbf16>, vector<128x128xbf16>, vector<512x128xf32> -> vector<512x128xf32>
    %43 = arith.addf %38, %42 : vector<512x128xf32>
    %c-1_i32 = arith.constant -1 : i32
    %44 = vector.broadcast %c-1_i32 : i32 to vector<512x512xi32>
    %45 = arith.cmpi eq, %26, %44 : vector<512x512xi32>
    %cst_19 = arith.constant 1.000000e+00 : f32
    %cst_20 = arith.constant 0.000000e+00 : f32
    %46 = vector.broadcast %cst_19 : f32 to vector<512x512xf32>
    %47 = vector.broadcast %cst_20 : f32 to vector<512x512xf32>
    %48 = arith.select %45, %46, %47 : vector<512x512xi1>, vector<512x512xf32>
    %cst_21 = arith.constant dense<0.000000e+00> : vector<512x128xf32>
    %49 = tpu.matmul %48, %43, %cst_21 {dimension_numbers = #tpu.dot_dimension_numbers<[1], [0], [0], [1], [0, 0, 1, 1], [], []>} : vector<512x512xf32>, vector<512x128xf32>, vector<512x128xf32> -> vector<512x128xf32>
    %c-1_i32_22 = arith.constant -1 : i32
    %50 = vector.broadcast %c-1_i32_22 : i32 to vector<512x1xi32>
    %51 = arith.addi %23, %50 : vector<512x1xi32>
    %c0_i32 = arith.constant 0 : i32
    %52 = vector.broadcast %c0_i32 : i32 to vector<512x1xi32>
    %53 = arith.cmpi sge, %51, %52 : vector<512x1xi32>
    %c-1_i32_23 = arith.constant -1 : i32
    %54 = vector.broadcast %c-1_i32_23 : i32 to vector<512x1xi32>
    %55 = arith.addi %23, %54 : vector<512x1xi32>
    %c16_i32_24 = arith.constant 16 : i32
    %56 = vector.broadcast %c16_i32_24 : i32 to vector<512x1xi32>
    %57 = arith.cmpi slt, %55, %56 : vector<512x1xi32>
    %58 = arith.andi %53, %57 : vector<512x1xi1>
    %cst_25 = arith.constant 0.000000e+00 : f32
    %59 = vector.shape_cast %58 : vector<512x1xi1> to vector<512x1xi1>
    %60 = vector.broadcast %59 : vector<512x1xi1> to vector<512x128xi1>
    %61 = vector.broadcast %cst_25 : f32 to vector<512x128xf32>
    %62 = arith.select %60, %49, %61 : vector<512x128xi1>, vector<512x128xf32>
    %63 = arith.addf %27, %62 : vector<512x128xf32>
    %cst_26 = arith.constant 0.000000e+00 : f32
    %64 = vector.broadcast %cst_26 : f32 to vector<512x128xf32>
    %65 = vector.extract_strided_slice %20 {offsets = [0, 0], sizes = [512, 128], strides = [1, 1]} : vector<576x128xbf16> to vector<512x128xbf16>
    %c1 = arith.constant 1 : index
    %c0_27 = arith.constant 0 : index
    %c0_28 = arith.constant 0 : index
    %66 = vector.load %arg4[%c1, %c0_27, %c0_28] : memref<9x128x128xbf16, #tpu.memory_space<vmem>>, vector<1x128x128xbf16>
    %67 = vector.shape_cast %66 : vector<1x128x128xbf16> to vector<128x128xbf16>
    %cst_29 = arith.constant dense<0.000000e+00> : vector<512x128xf32>
    %68 = tpu.matmul %65, %67, %cst_29 {dimension_numbers = #tpu.dot_dimension_numbers<[1], [0], [0], [1], [0, 0, 1, 1], [], []>} : vector<512x128xbf16>, vector<128x128xbf16>, vector<512x128xf32> -> vector<512x128xf32>
    %69 = arith.addf %64, %68 : vector<512x128xf32>
    %70 = vector.extract_strided_slice %20 {offsets = [32, 0], sizes = [512, 128], strides = [1, 1]} : vector<576x128xbf16> to vector<512x128xbf16>
    %c4 = arith.constant 4 : index
    %c0_30 = arith.constant 0 : index
    %c0_31 = arith.constant 0 : index
    %71 = vector.load %arg4[%c4, %c0_30, %c0_31] : memref<9x128x128xbf16, #tpu.memory_space<vmem>>, vector<1x128x128xbf16>
    %72 = vector.shape_cast %71 : vector<1x128x128xbf16> to vector<128x128xbf16>
    %cst_32 = arith.constant dense<0.000000e+00> : vector<512x128xf32>
    %73 = tpu.matmul %70, %72, %cst_32 {dimension_numbers = #tpu.dot_dimension_numbers<[1], [0], [0], [1], [0, 0, 1, 1], [], []>} : vector<512x128xbf16>, vector<128x128xbf16>, vector<512x128xf32> -> vector<512x128xf32>
    %74 = arith.addf %69, %73 : vector<512x128xf32>
    %75 = vector.extract_strided_slice %20 {offsets = [64, 0], sizes = [512, 128], strides = [1, 1]} : vector<576x128xbf16> to vector<512x128xbf16>
    %c7 = arith.constant 7 : index
    %c0_33 = arith.constant 0 : index
    %c0_34 = arith.constant 0 : index
    %76 = vector.load %arg4[%c7, %c0_33, %c0_34] : memref<9x128x128xbf16, #tpu.memory_space<vmem>>, vector<1x128x128xbf16>
    %77 = vector.shape_cast %76 : vector<1x128x128xbf16> to vector<128x128xbf16>
    %cst_35 = arith.constant dense<0.000000e+00> : vector<512x128xf32>
    %78 = tpu.matmul %75, %77, %cst_35 {dimension_numbers = #tpu.dot_dimension_numbers<[1], [0], [0], [1], [0, 0, 1, 1], [], []>} : vector<512x128xbf16>, vector<128x128xbf16>, vector<512x128xf32> -> vector<512x128xf32>
    %79 = arith.addf %74, %78 : vector<512x128xf32>
    %80 = arith.addf %63, %79 : vector<512x128xf32>
    %cst_36 = arith.constant 0.000000e+00 : f32
    %81 = vector.broadcast %cst_36 : f32 to vector<512x128xf32>
    %82 = vector.extract_strided_slice %20 {offsets = [0, 0], sizes = [512, 128], strides = [1, 1]} : vector<576x128xbf16> to vector<512x128xbf16>
    %c2 = arith.constant 2 : index
    %c0_37 = arith.constant 0 : index
    %c0_38 = arith.constant 0 : index
    %83 = vector.load %arg4[%c2, %c0_37, %c0_38] : memref<9x128x128xbf16, #tpu.memory_space<vmem>>, vector<1x128x128xbf16>
    %84 = vector.shape_cast %83 : vector<1x128x128xbf16> to vector<128x128xbf16>
    %cst_39 = arith.constant dense<0.000000e+00> : vector<512x128xf32>
    %85 = tpu.matmul %82, %84, %cst_39 {dimension_numbers = #tpu.dot_dimension_numbers<[1], [0], [0], [1], [0, 0, 1, 1], [], []>} : vector<512x128xbf16>, vector<128x128xbf16>, vector<512x128xf32> -> vector<512x128xf32>
    %86 = arith.addf %81, %85 : vector<512x128xf32>
    %87 = vector.extract_strided_slice %20 {offsets = [32, 0], sizes = [512, 128], strides = [1, 1]} : vector<576x128xbf16> to vector<512x128xbf16>
    %c5 = arith.constant 5 : index
    %c0_40 = arith.constant 0 : index
    %c0_41 = arith.constant 0 : index
    %88 = vector.load %arg4[%c5, %c0_40, %c0_41] : memref<9x128x128xbf16, #tpu.memory_space<vmem>>, vector<1x128x128xbf16>
    %89 = vector.shape_cast %88 : vector<1x128x128xbf16> to vector<128x128xbf16>
    %cst_42 = arith.constant dense<0.000000e+00> : vector<512x128xf32>
    %90 = tpu.matmul %87, %89, %cst_42 {dimension_numbers = #tpu.dot_dimension_numbers<[1], [0], [0], [1], [0, 0, 1, 1], [], []>} : vector<512x128xbf16>, vector<128x128xbf16>, vector<512x128xf32> -> vector<512x128xf32>
    %91 = arith.addf %86, %90 : vector<512x128xf32>
    %92 = vector.extract_strided_slice %20 {offsets = [64, 0], sizes = [512, 128], strides = [1, 1]} : vector<576x128xbf16> to vector<512x128xbf16>
    %c8 = arith.constant 8 : index
    %c0_43 = arith.constant 0 : index
    %c0_44 = arith.constant 0 : index
    %93 = vector.load %arg4[%c8, %c0_43, %c0_44] : memref<9x128x128xbf16, #tpu.memory_space<vmem>>, vector<1x128x128xbf16>
    %94 = vector.shape_cast %93 : vector<1x128x128xbf16> to vector<128x128xbf16>
    %cst_45 = arith.constant dense<0.000000e+00> : vector<512x128xf32>
    %95 = tpu.matmul %92, %94, %cst_45 {dimension_numbers = #tpu.dot_dimension_numbers<[1], [0], [0], [1], [0, 0, 1, 1], [], []>} : vector<512x128xbf16>, vector<128x128xbf16>, vector<512x128xf32> -> vector<512x128xf32>
    %96 = arith.addf %91, %95 : vector<512x128xf32>
    %c1_i32_46 = arith.constant 1 : i32
    %97 = vector.broadcast %c1_i32_46 : i32 to vector<512x512xi32>
    %98 = arith.cmpi eq, %26, %97 : vector<512x512xi32>
    %cst_47 = arith.constant 1.000000e+00 : f32
    %cst_48 = arith.constant 0.000000e+00 : f32
    %99 = vector.broadcast %cst_47 : f32 to vector<512x512xf32>
    %100 = vector.broadcast %cst_48 : f32 to vector<512x512xf32>
    %101 = arith.select %98, %99, %100 : vector<512x512xi1>, vector<512x512xf32>
    %cst_49 = arith.constant dense<0.000000e+00> : vector<512x128xf32>
    %102 = tpu.matmul %101, %96, %cst_49 {dimension_numbers = #tpu.dot_dimension_numbers<[1], [0], [0], [1], [0, 0, 1, 1], [], []>} : vector<512x512xf32>, vector<512x128xf32>, vector<512x128xf32> -> vector<512x128xf32>
    %c1_i32_50 = arith.constant 1 : i32
    %103 = vector.broadcast %c1_i32_50 : i32 to vector<512x1xi32>
    %104 = arith.addi %23, %103 : vector<512x1xi32>
    %c0_i32_51 = arith.constant 0 : i32
    %105 = vector.broadcast %c0_i32_51 : i32 to vector<512x1xi32>
    %106 = arith.cmpi sge, %104, %105 : vector<512x1xi32>
    %c1_i32_52 = arith.constant 1 : i32
    %107 = vector.broadcast %c1_i32_52 : i32 to vector<512x1xi32>
    %108 = arith.addi %23, %107 : vector<512x1xi32>
    %c16_i32_53 = arith.constant 16 : i32
    %109 = vector.broadcast %c16_i32_53 : i32 to vector<512x1xi32>
    %110 = arith.cmpi slt, %108, %109 : vector<512x1xi32>
    %111 = arith.andi %106, %110 : vector<512x1xi1>
    %cst_54 = arith.constant 0.000000e+00 : f32
    %112 = vector.shape_cast %111 : vector<512x1xi1> to vector<512x1xi1>
    %113 = vector.broadcast %112 : vector<512x1xi1> to vector<512x128xi1>
    %114 = vector.broadcast %cst_54 : f32 to vector<512x128xf32>
    %115 = arith.select %113, %102, %114 : vector<512x128xi1>, vector<512x128xf32>
    %116 = arith.addf %80, %115 : vector<512x128xf32>
    %c0_55 = arith.constant 0 : index
    %c0_56 = arith.constant 0 : index
    %117 = vector.load %arg5[%c0_55, %c0_56] : memref<1x128xf32, #tpu.memory_space<vmem>>, vector<1x128xf32>
    %118 = vector.broadcast %117 : vector<1x128xf32> to vector<512x128xf32>
    %119 = arith.addf %116, %118 : vector<512x128xf32>
    %c0_57 = arith.constant 0 : index
    %c0_58 = arith.constant 0 : index
    %120 = vector.load %arg6[%c0_57, %c0_58] : memref<512x128xf32, #tpu.memory_space<vmem>>, vector<512x128xf32>
    %121 = arith.addf %119, %120 : vector<512x128xf32>
    %cst_59 = arith.constant 0.000000e+00 : f32
    %122 = vector.broadcast %cst_59 : f32 to vector<512x128xf32>
    %123 = arith.maximumf %121, %122 : vector<512x128xf32>
    %c0_60 = arith.constant 0 : index
    %c0_61 = arith.constant 0 : index
    %124 = vector.load %arg7[%c0_60, %c0_61] : memref<512x128xf32, #tpu.memory_space<vmem>>, vector<512x128xf32>
    tpu.vector_store %arg7[%c0_60, %c0_61], %123 {strides = array<i32>} : memref<512x128xf32, #tpu.memory_space<vmem>>, vector<512x128xf32>,
    return
  }
  func.func @transform_0(%arg0: i32) -> (i32, i32) {
    %c0_i32 = arith.constant 0 : i32
    %c0_i32_0 = arith.constant 0 : i32
    %c0_i32_1 = arith.constant 0 : i32
    return %c0_i32, %c0_i32_0 : i32, i32
  }
  func.func @transform_1(%arg0: i32) -> (i32, i32) {
    %c0_i32 = arith.constant 0 : i32
    %c0_i32_0 = arith.constant 0 : i32
    %c0_i32_1 = arith.constant 0 : i32
    return %c0_i32, %c0_i32_0 : i32, i32
  }
  func.func @transform_2(%arg0: i32) -> (i32, i32) {
    %c0_i32 = arith.constant 0 : i32
    %c0_i32_0 = arith.constant 0 : i32
    %c0_i32_1 = arith.constant 0 : i32
    return %c0_i32, %c0_i32_0 : i32, i32
  }
  func.func @transform_3(%arg0: i32) -> (i32, i32, i32) {
    %c0_i32 = arith.constant 0 : i32
    %c0_i32_0 = arith.constant 0 : i32
    %c0_i32_1 = arith.constant 0 : i32
    %c0_i32_2 = arith.constant 0 : i32
    return %c0_i32, %c0_i32_0, %c0_i32_1 : i32, i32, i32
  }
  func.func @transform_4(%arg0: i32) -> (i32, i32) {
    %c0_i32 = arith.constant 0 : i32
    %c0_i32_0 = arith.constant 0 : i32
    %c0_i32_1 = arith.constant 0 : i32
    return %c0_i32, %c0_i32_0 : i32, i32
  }
  func.func @transform_5(%arg0: i32) -> (i32, i32) {
    %c0_i32 = arith.constant 0 : i32
    %c0_i32_0 = arith.constant 0 : i32
    %c0_i32_1 = arith.constant 0 : i32
    return %c0_i32, %c0_i32_0 : i32, i32
  }
  func.func @transform_6(%arg0: i32) -> (i32, i32) {
    %c0_i32 = arith.constant 0 : i32
    %c0_i32_0 = arith.constant 0 : i32
    %c0_i32_1 = arith.constant 0 : i32
    return %c0_i32, %c0_i32_0 : i32, i32
  }
}

module attributes {stable_mosaic.version = 11 : i64} {
  func.func @basic_block_kernel(%arg0: i32, %arg1: memref<160x256xbf16, #tpu.memory_space<vmem>>, %arg2: memref<256x128xbf16, #tpu.memory_space<vmem>>, %arg3: memref<1x128xf32, #tpu.memory_space<vmem>>, %arg4: memref<9x128x128xbf16, #tpu.memory_space<vmem>>, %arg5: memref<1x128xf32, #tpu.memory_space<vmem>>, %arg6: memref<128x128xf32, #tpu.memory_space<vmem>>, %arg7: memref<128x128xf32, #tpu.memory_space<vmem>>) attributes {dimension_semantics = [#tpu.dimension_semantics<arbitrary>], iteration_bounds = array<i64: 1>, scalar_prefetch = 0 : i64, scratch_operands = 0 : i64, tpu.core_type = #tpu.core_type<tc>, window_params = [{pipeline_mode = #tpu.pipeline_mode<synchronous>, transform_indices = @transform_0, window_bounds = array<i64: 160, 256>}, {pipeline_mode = #tpu.pipeline_mode<synchronous>, transform_indices = @transform_1, window_bounds = array<i64: 256, 128>}, {pipeline_mode = #tpu.pipeline_mode<synchronous>, transform_indices = @transform_2, window_bounds = array<i64: 1, 128>}, {pipeline_mode = #tpu.pipeline_mode<synchronous>, transform_indices = @transform_3, window_bounds = array<i64: 9, 128, 128>}, {pipeline_mode = #tpu.pipeline_mode<synchronous>, transform_indices = @transform_4, window_bounds = array<i64: 1, 128>}, {pipeline_mode = #tpu.pipeline_mode<synchronous>, transform_indices = @transform_5, window_bounds = array<i64: 128, 128>}, {pipeline_mode = #tpu.pipeline_mode<synchronous>, transform_indices = @transform_6, window_bounds = array<i64: 128, 128>}]} {
    %c0 = arith.constant 0 : index
    %c0_0 = arith.constant 0 : index
    %0 = vector.load %arg1[%c0, %c0_0] : memref<160x256xbf16, #tpu.memory_space<vmem>>, vector<160x256xbf16>
    %c0_1 = arith.constant 0 : index
    %c0_2 = arith.constant 0 : index
    %1 = vector.load %arg2[%c0_1, %c0_2] : memref<256x128xbf16, #tpu.memory_space<vmem>>, vector<256x128xbf16>
    %cst = arith.constant dense<0.000000e+00> : vector<160x128xf32>
    %2 = tpu.matmul %0, %1, %cst {dimension_numbers = #tpu.dot_dimension_numbers<[1], [0], [0], [1], [0, 0, 1, 1], [], []>} : vector<160x256xbf16>, vector<256x128xbf16>, vector<160x128xf32> -> vector<160x128xf32>
    %c0_3 = arith.constant 0 : index
    %c0_4 = arith.constant 0 : index
    %3 = vector.load %arg3[%c0_3, %c0_4] : memref<1x128xf32, #tpu.memory_space<vmem>>, vector<1x128xf32>
    %4 = vector.broadcast %3 : vector<1x128xf32> to vector<160x128xf32>
    %5 = arith.addf %2, %4 : vector<160x128xf32>
    %cst_5 = arith.constant 0.000000e+00 : f32
    %6 = vector.broadcast %cst_5 : f32 to vector<160x128xf32>
    %7 = arith.maximumf %5, %6 : vector<160x128xf32>
    %8 = tpu.iota {dimensions = array<i32: 0>} : vector<160x1xi32>
    %c4_i32 = arith.constant 4 : i32
    %9 = vector.broadcast %c4_i32 : i32 to vector<160x1xi32>
    %10 = arith.shrsi %8, %9 : vector<160x1xi32>
    %c1_i32 = arith.constant 1 : i32
    %11 = vector.broadcast %c1_i32 : i32 to vector<160x1xi32>
    %12 = arith.cmpi sge, %10, %11 : vector<160x1xi32>
    %c8_i32 = arith.constant 8 : i32
    %13 = vector.broadcast %c8_i32 : i32 to vector<160x1xi32>
    %14 = arith.cmpi sle, %10, %13 : vector<160x1xi32>
    %15 = arith.andi %12, %14 : vector<160x1xi1>
    %cst_6 = arith.constant 0.000000e+00 : f32
    %16 = vector.shape_cast %15 : vector<160x1xi1> to vector<160x1xi1>
    %17 = vector.broadcast %16 : vector<160x1xi1> to vector<160x128xi1>
    %18 = vector.broadcast %cst_6 : f32 to vector<160x128xf32>
    %19 = arith.select %17, %7, %18 : vector<160x128xi1>, vector<160x128xf32>
    %20 = arith.truncf %19 : vector<160x128xf32> to vector<160x128xbf16>
    %21 = tpu.iota {dimensions = array<i32: 0>} : vector<128x1xi32>
    %c7_i32 = arith.constant 7 : i32
    %22 = vector.broadcast %c7_i32 : i32 to vector<128x1xi32>
    %23 = arith.andi %21, %22 : vector<128x1xi32>
    %24 = tpu.iota {dimensions = array<i32: 1>} : vector<128x128xi32>
    %25 = tpu.iota {dimensions = array<i32: 0>} : vector<128x128xi32>
    %26 = arith.subi %24, %25 : vector<128x128xi32>
    %cst_7 = arith.constant 0.000000e+00 : f32
    %27 = vector.broadcast %cst_7 : f32 to vector<128x128xf32>
    %cst_8 = arith.constant 0.000000e+00 : f32
    %28 = vector.broadcast %cst_8 : f32 to vector<128x128xf32>
    %29 = vector.extract_strided_slice %20 {offsets = [0, 0], sizes = [128, 128], strides = [1, 1]} : vector<160x128xbf16> to vector<128x128xbf16>
    %c0_9 = arith.constant 0 : index
    %c0_10 = arith.constant 0 : index
    %c0_11 = arith.constant 0 : index
    %30 = vector.load %arg4[%c0_9, %c0_10, %c0_11] : memref<9x128x128xbf16, #tpu.memory_space<vmem>>, vector<1x128x128xbf16>
    %31 = vector.shape_cast %30 : vector<1x128x128xbf16> to vector<128x128xbf16>
    %cst_12 = arith.constant dense<0.000000e+00> : vector<128x128xf32>
    %32 = tpu.matmul %29, %31, %cst_12 {dimension_numbers = #tpu.dot_dimension_numbers<[1], [0], [0], [1], [0, 0, 1, 1], [], []>} : vector<128x128xbf16>, vector<128x128xbf16>, vector<128x128xf32> -> vector<128x128xf32>
    %33 = arith.addf %28, %32 : vector<128x128xf32>
    %34 = vector.extract_strided_slice %20 {offsets = [16, 0], sizes = [128, 128], strides = [1, 1]} : vector<160x128xbf16> to vector<128x128xbf16>
    %c3 = arith.constant 3 : index
    %c0_13 = arith.constant 0 : index
    %c0_14 = arith.constant 0 : index
    %35 = vector.load %arg4[%c3, %c0_13, %c0_14] : memref<9x128x128xbf16, #tpu.memory_space<vmem>>, vector<1x128x128xbf16>
    %36 = vector.shape_cast %35 : vector<1x128x128xbf16> to vector<128x128xbf16>
    %cst_15 = arith.constant dense<0.000000e+00> : vector<128x128xf32>
    %37 = tpu.matmul %34, %36, %cst_15 {dimension_numbers = #tpu.dot_dimension_numbers<[1], [0], [0], [1], [0, 0, 1, 1], [], []>} : vector<128x128xbf16>, vector<128x128xbf16>, vector<128x128xf32> -> vector<128x128xf32>
    %38 = arith.addf %33, %37 : vector<128x128xf32>
    %39 = vector.extract_strided_slice %20 {offsets = [32, 0], sizes = [128, 128], strides = [1, 1]} : vector<160x128xbf16> to vector<128x128xbf16>
    %c6 = arith.constant 6 : index
    %c0_16 = arith.constant 0 : index
    %c0_17 = arith.constant 0 : index
    %40 = vector.load %arg4[%c6, %c0_16, %c0_17] : memref<9x128x128xbf16, #tpu.memory_space<vmem>>, vector<1x128x128xbf16>
    %41 = vector.shape_cast %40 : vector<1x128x128xbf16> to vector<128x128xbf16>
    %cst_18 = arith.constant dense<0.000000e+00> : vector<128x128xf32>
    %42 = tpu.matmul %39, %41, %cst_18 {dimension_numbers = #tpu.dot_dimension_numbers<[1], [0], [0], [1], [0, 0, 1, 1], [], []>} : vector<128x128xbf16>, vector<128x128xbf16>, vector<128x128xf32> -> vector<128x128xf32>
    %43 = arith.addf %38, %42 : vector<128x128xf32>
    %c-1_i32 = arith.constant -1 : i32
    %44 = vector.broadcast %c-1_i32 : i32 to vector<128x128xi32>
    %45 = arith.cmpi eq, %26, %44 : vector<128x128xi32>
    %cst_19 = arith.constant 1.000000e+00 : f32
    %cst_20 = arith.constant 0.000000e+00 : f32
    %46 = vector.broadcast %cst_19 : f32 to vector<128x128xf32>
    %47 = vector.broadcast %cst_20 : f32 to vector<128x128xf32>
    %48 = arith.select %45, %46, %47 : vector<128x128xi1>, vector<128x128xf32>
    %cst_21 = arith.constant dense<0.000000e+00> : vector<128x128xf32>
    %49 = tpu.matmul %48, %43, %cst_21 {dimension_numbers = #tpu.dot_dimension_numbers<[1], [0], [0], [1], [0, 0, 1, 1], [], []>} : vector<128x128xf32>, vector<128x128xf32>, vector<128x128xf32> -> vector<128x128xf32>
    %c-1_i32_22 = arith.constant -1 : i32
    %50 = vector.broadcast %c-1_i32_22 : i32 to vector<128x1xi32>
    %51 = arith.addi %23, %50 : vector<128x1xi32>
    %c0_i32 = arith.constant 0 : i32
    %52 = vector.broadcast %c0_i32 : i32 to vector<128x1xi32>
    %53 = arith.cmpi sge, %51, %52 : vector<128x1xi32>
    %c-1_i32_23 = arith.constant -1 : i32
    %54 = vector.broadcast %c-1_i32_23 : i32 to vector<128x1xi32>
    %55 = arith.addi %23, %54 : vector<128x1xi32>
    %c8_i32_24 = arith.constant 8 : i32
    %56 = vector.broadcast %c8_i32_24 : i32 to vector<128x1xi32>
    %57 = arith.cmpi slt, %55, %56 : vector<128x1xi32>
    %58 = arith.andi %53, %57 : vector<128x1xi1>
    %cst_25 = arith.constant 0.000000e+00 : f32
    %59 = vector.shape_cast %58 : vector<128x1xi1> to vector<128x1xi1>
    %60 = vector.broadcast %59 : vector<128x1xi1> to vector<128x128xi1>
    %61 = vector.broadcast %cst_25 : f32 to vector<128x128xf32>
    %62 = arith.select %60, %49, %61 : vector<128x128xi1>, vector<128x128xf32>
    %63 = arith.addf %27, %62 : vector<128x128xf32>
    %cst_26 = arith.constant 0.000000e+00 : f32
    %64 = vector.broadcast %cst_26 : f32 to vector<128x128xf32>
    %65 = vector.extract_strided_slice %20 {offsets = [0, 0], sizes = [128, 128], strides = [1, 1]} : vector<160x128xbf16> to vector<128x128xbf16>
    %c1 = arith.constant 1 : index
    %c0_27 = arith.constant 0 : index
    %c0_28 = arith.constant 0 : index
    %66 = vector.load %arg4[%c1, %c0_27, %c0_28] : memref<9x128x128xbf16, #tpu.memory_space<vmem>>, vector<1x128x128xbf16>
    %67 = vector.shape_cast %66 : vector<1x128x128xbf16> to vector<128x128xbf16>
    %cst_29 = arith.constant dense<0.000000e+00> : vector<128x128xf32>
    %68 = tpu.matmul %65, %67, %cst_29 {dimension_numbers = #tpu.dot_dimension_numbers<[1], [0], [0], [1], [0, 0, 1, 1], [], []>} : vector<128x128xbf16>, vector<128x128xbf16>, vector<128x128xf32> -> vector<128x128xf32>
    %69 = arith.addf %64, %68 : vector<128x128xf32>
    %70 = vector.extract_strided_slice %20 {offsets = [16, 0], sizes = [128, 128], strides = [1, 1]} : vector<160x128xbf16> to vector<128x128xbf16>
    %c4 = arith.constant 4 : index
    %c0_30 = arith.constant 0 : index
    %c0_31 = arith.constant 0 : index
    %71 = vector.load %arg4[%c4, %c0_30, %c0_31] : memref<9x128x128xbf16, #tpu.memory_space<vmem>>, vector<1x128x128xbf16>
    %72 = vector.shape_cast %71 : vector<1x128x128xbf16> to vector<128x128xbf16>
    %cst_32 = arith.constant dense<0.000000e+00> : vector<128x128xf32>
    %73 = tpu.matmul %70, %72, %cst_32 {dimension_numbers = #tpu.dot_dimension_numbers<[1], [0], [0], [1], [0, 0, 1, 1], [], []>} : vector<128x128xbf16>, vector<128x128xbf16>, vector<128x128xf32> -> vector<128x128xf32>
    %74 = arith.addf %69, %73 : vector<128x128xf32>
    %75 = vector.extract_strided_slice %20 {offsets = [32, 0], sizes = [128, 128], strides = [1, 1]} : vector<160x128xbf16> to vector<128x128xbf16>
    %c7 = arith.constant 7 : index
    %c0_33 = arith.constant 0 : index
    %c0_34 = arith.constant 0 : index
    %76 = vector.load %arg4[%c7, %c0_33, %c0_34] : memref<9x128x128xbf16, #tpu.memory_space<vmem>>, vector<1x128x128xbf16>
    %77 = vector.shape_cast %76 : vector<1x128x128xbf16> to vector<128x128xbf16>
    %cst_35 = arith.constant dense<0.000000e+00> : vector<128x128xf32>
    %78 = tpu.matmul %75, %77, %cst_35 {dimension_numbers = #tpu.dot_dimension_numbers<[1], [0], [0], [1], [0, 0, 1, 1], [], []>} : vector<128x128xbf16>, vector<128x128xbf16>, vector<128x128xf32> -> vector<128x128xf32>
    %79 = arith.addf %74, %78 : vector<128x128xf32>
    %80 = arith.addf %63, %79 : vector<128x128xf32>
    %cst_36 = arith.constant 0.000000e+00 : f32
    %81 = vector.broadcast %cst_36 : f32 to vector<128x128xf32>
    %82 = vector.extract_strided_slice %20 {offsets = [0, 0], sizes = [128, 128], strides = [1, 1]} : vector<160x128xbf16> to vector<128x128xbf16>
    %c2 = arith.constant 2 : index
    %c0_37 = arith.constant 0 : index
    %c0_38 = arith.constant 0 : index
    %83 = vector.load %arg4[%c2, %c0_37, %c0_38] : memref<9x128x128xbf16, #tpu.memory_space<vmem>>, vector<1x128x128xbf16>
    %84 = vector.shape_cast %83 : vector<1x128x128xbf16> to vector<128x128xbf16>
    %cst_39 = arith.constant dense<0.000000e+00> : vector<128x128xf32>
    %85 = tpu.matmul %82, %84, %cst_39 {dimension_numbers = #tpu.dot_dimension_numbers<[1], [0], [0], [1], [0, 0, 1, 1], [], []>} : vector<128x128xbf16>, vector<128x128xbf16>, vector<128x128xf32> -> vector<128x128xf32>
    %86 = arith.addf %81, %85 : vector<128x128xf32>
    %87 = vector.extract_strided_slice %20 {offsets = [16, 0], sizes = [128, 128], strides = [1, 1]} : vector<160x128xbf16> to vector<128x128xbf16>
    %c5 = arith.constant 5 : index
    %c0_40 = arith.constant 0 : index
    %c0_41 = arith.constant 0 : index
    %88 = vector.load %arg4[%c5, %c0_40, %c0_41] : memref<9x128x128xbf16, #tpu.memory_space<vmem>>, vector<1x128x128xbf16>
    %89 = vector.shape_cast %88 : vector<1x128x128xbf16> to vector<128x128xbf16>
    %cst_42 = arith.constant dense<0.000000e+00> : vector<128x128xf32>
    %90 = tpu.matmul %87, %89, %cst_42 {dimension_numbers = #tpu.dot_dimension_numbers<[1], [0], [0], [1], [0, 0, 1, 1], [], []>} : vector<128x128xbf16>, vector<128x128xbf16>, vector<128x128xf32> -> vector<128x128xf32>
    %91 = arith.addf %86, %90 : vector<128x128xf32>
    %92 = vector.extract_strided_slice %20 {offsets = [32, 0], sizes = [128, 128], strides = [1, 1]} : vector<160x128xbf16> to vector<128x128xbf16>
    %c8 = arith.constant 8 : index
    %c0_43 = arith.constant 0 : index
    %c0_44 = arith.constant 0 : index
    %93 = vector.load %arg4[%c8, %c0_43, %c0_44] : memref<9x128x128xbf16, #tpu.memory_space<vmem>>, vector<1x128x128xbf16>
    %94 = vector.shape_cast %93 : vector<1x128x128xbf16> to vector<128x128xbf16>
    %cst_45 = arith.constant dense<0.000000e+00> : vector<128x128xf32>
    %95 = tpu.matmul %92, %94, %cst_45 {dimension_numbers = #tpu.dot_dimension_numbers<[1], [0], [0], [1], [0, 0, 1, 1], [], []>} : vector<128x128xbf16>, vector<128x128xbf16>, vector<128x128xf32> -> vector<128x128xf32>
    %96 = arith.addf %91, %95 : vector<128x128xf32>
    %c1_i32_46 = arith.constant 1 : i32
    %97 = vector.broadcast %c1_i32_46 : i32 to vector<128x128xi32>
    %98 = arith.cmpi eq, %26, %97 : vector<128x128xi32>
    %cst_47 = arith.constant 1.000000e+00 : f32
    %cst_48 = arith.constant 0.000000e+00 : f32
    %99 = vector.broadcast %cst_47 : f32 to vector<128x128xf32>
    %100 = vector.broadcast %cst_48 : f32 to vector<128x128xf32>
    %101 = arith.select %98, %99, %100 : vector<128x128xi1>, vector<128x128xf32>
    %cst_49 = arith.constant dense<0.000000e+00> : vector<128x128xf32>
    %102 = tpu.matmul %101, %96, %cst_49 {dimension_numbers = #tpu.dot_dimension_numbers<[1], [0], [0], [1], [0, 0, 1, 1], [], []>} : vector<128x128xf32>, vector<128x128xf32>, vector<128x128xf32> -> vector<128x128xf32>
    %c1_i32_50 = arith.constant 1 : i32
    %103 = vector.broadcast %c1_i32_50 : i32 to vector<128x1xi32>
    %104 = arith.addi %23, %103 : vector<128x1xi32>
    %c0_i32_51 = arith.constant 0 : i32
    %105 = vector.broadcast %c0_i32_51 : i32 to vector<128x1xi32>
    %106 = arith.cmpi sge, %104, %105 : vector<128x1xi32>
    %c1_i32_52 = arith.constant 1 : i32
    %107 = vector.broadcast %c1_i32_52 : i32 to vector<128x1xi32>
    %108 = arith.addi %23, %107 : vector<128x1xi32>
    %c8_i32_53 = arith.constant 8 : i32
    %109 = vector.broadcast %c8_i32_53 : i32 to vector<128x1xi32>
    %110 = arith.cmpi slt, %108, %109 : vector<128x1xi32>
    %111 = arith.andi %106, %110 : vector<128x1xi1>
    %cst_54 = arith.constant 0.000000e+00 : f32
    %112 = vector.shape_cast %111 : vector<128x1xi1> to vector<128x1xi1>
    %113 = vector.broadcast %112 : vector<128x1xi1> to vector<128x128xi1>
    %114 = vector.broadcast %cst_54 : f32 to vector<128x128xf32>
    %115 = arith.select %113, %102, %114 : vector<128x128xi1>, vector<128x128xf32>
    %116 = arith.addf %80, %115 : vector<128x128xf32>
    %c0_55 = arith.constant 0 : index
    %c0_56 = arith.constant 0 : index
    %117 = vector.load %arg5[%c0_55, %c0_56] : memref<1x128xf32, #tpu.memory_space<vmem>>, vector<1x128xf32>
    %118 = vector.broadcast %117 : vector<1x128xf32> to vector<128x128xf32>
    %119 = arith.addf %116, %118 : vector<128x128xf32>
    %c0_57 = arith.constant 0 : index
    %c0_58 = arith.constant 0 : index
    %120 = vector.load %arg6[%c0_57, %c0_58] : memref<128x128xf32, #tpu.memory_space<vmem>>, vector<128x128xf32>
    %121 = arith.addf %119, %120 : vector<128x128xf32>
    %cst_59 = arith.constant 0.000000e+00 : f32
    %122 = vector.broadcast %cst_59 : f32 to vector<128x128xf32>
    %123 = arith.maximumf %121, %122 : vector<128x128xf32>
    %c0_60 = arith.constant 0 : index
    %c0_61 = arith.constant 0 : index
    %124 = vector.load %arg7[%c0_60, %c0_61] : memref<128x128xf32, #tpu.memory_space<vmem>>, vector<128x128xf32>
    tpu.vector_store %arg7[%c0_60, %c0_61], %123 {strides = array<i32>} : memref<128x128xf32, #tpu.memory_space<vmem>>, vector<128x128xf32>,
    return
  }
  func.func @transform_0(%arg0: i32) -> (i32, i32) {
    %c0_i32 = arith.constant 0 : i32
    %c0_i32_0 = arith.constant 0 : i32
    %c0_i32_1 = arith.constant 0 : i32
    return %c0_i32, %c0_i32_0 : i32, i32
  }
  func.func @transform_1(%arg0: i32) -> (i32, i32) {
    %c0_i32 = arith.constant 0 : i32
    %c0_i32_0 = arith.constant 0 : i32
    %c0_i32_1 = arith.constant 0 : i32
    return %c0_i32, %c0_i32_0 : i32, i32
  }
  func.func @transform_2(%arg0: i32) -> (i32, i32) {
    %c0_i32 = arith.constant 0 : i32
    %c0_i32_0 = arith.constant 0 : i32
    %c0_i32_1 = arith.constant 0 : i32
    return %c0_i32, %c0_i32_0 : i32, i32
  }
  func.func @transform_3(%arg0: i32) -> (i32, i32, i32) {
    %c0_i32 = arith.constant 0 : i32
    %c0_i32_0 = arith.constant 0 : i32
    %c0_i32_1 = arith.constant 0 : i32
    %c0_i32_2 = arith.constant 0 : i32
    return %c0_i32, %c0_i32_0, %c0_i32_1 : i32, i32, i32
  }
  func.func @transform_4(%arg0: i32) -> (i32, i32) {
    %c0_i32 = arith.constant 0 : i32
    %c0_i32_0 = arith.constant 0 : i32
    %c0_i32_1 = arith.constant 0 : i32
    return %c0_i32, %c0_i32_0 : i32, i32
  }
  func.func @transform_5(%arg0: i32) -> (i32, i32) {
    %c0_i32 = arith.constant 0 : i32
    %c0_i32_0 = arith.constant 0 : i32
    %c0_i32_1 = arith.constant 0 : i32
    return %c0_i32, %c0_i32_0 : i32, i32
  }
  func.func @transform_6(%arg0: i32) -> (i32, i32) {
    %c0_i32 = arith.constant 0 : i32
    %c0_i32_0 = arith.constant 0 : i32
    %c0_i32_1 = arith.constant 0 : i32
    return %c0_i32, %c0_i32_0 : i32, i32
  }
}

</mosaic_0001>

<bundles_post_ra>
// kernel: forward.3
= control target key start
LH: loop header
LB: loop body
LE: loop exit
PB: predicated region body
PF: predicated region fallthrough
CT: control target
= control target key end

     0   :  { %v412_v45 = vlaneseq  ;;  %s5701_s1 = inlined_call_operand.vmem [shape: bf16[256,128], index: 1, kind: input, shape index: {}]   ;;  %s5702_s0 = inlined_call_operand.vmem [shape: bf16[160,256], index: 0, kind: input, shape index: {}]   ;;  %s5703_s3 = inlined_call_operand.vmem [shape: bf16[9,128,128], index: 3, kind: input, shape index: {}]   ;;  %s5704_s2 = inlined_call_operand.vmem [shape: f32[1,128], index: 2, kind: input, shape index: {}]   ;;  %s5705_s4 = inlined_call_operand.vmem [shape: f32[1,128], index: 4, kind: input, shape index: {}]   ;;  %s5706_s5 = inlined_call_operand.vmem [shape: f32[128,128], index: 5, kind: input, shape index: {}]   ;;  %s5707_s6 = inlined_call_operand.vmem [shape: f32[128,128], index: 6, kind: output, shape index: {}]  }
   0x1   :  { %v4186_v0 = vld [vmem:[%s5701_s1 + $0x40] sm:$0xff]   ;;  %v4188_v2 = vld [vmem:[%s5701_s1 + $0x48] sm:$0xff]   ;;  %v4190_v4 = vld [vmem:[%s5701_s1 + $0x50] sm:$0xff]  }
   0x2   :  { %v4187_v1 = vld [vmem:[%s5701_s1] sm:$0xff]   ;;  %3325 = vmatprep.subr.bf16.mxu0 %v4186_v0  ;;  %v4189_v3 = vld [vmem:[%s5701_s1 + $0x8] sm:$0xff]   ;;  %v4191_v5 = vld [vmem:[%s5701_s1 + $0x10] sm:$0xff]   ;;  %v4479_v46 = vshrl.u32 %v412_v45, 7 }
   0x3   :  { %3326 = vmatpush3.bf16.msra.mxu0 %v4187_v1  ;;  %v4192_v6 = vld [vmem:[%s5701_s1 + $0x58] sm:$0xff]   ;;  %v4194_v8 = vld [vmem:[%s5701_s1 + $0x60] sm:$0xff]   ;;  %v4196_v10 = vld [vmem:[%s5701_s1 + $0x68] sm:$0xff]  }
   0x4   :  { %3327 = vmatprep.subr.bf16.mxu0 %v4188_v2  ;;  %v4193_v7 = vld [vmem:[%s5701_s1 + $0x18] sm:$0xff]   ;;  %v4195_v9 = vld [vmem:[%s5701_s1 + $0x20] sm:$0xff]   ;;  %v4197_v12 = vld [vmem:[%s5701_s1 + $0x28] sm:$0xff]   ;;  %v4487_v50 = vadd.s32 16, %v4479_v46  ;;  %v4490_v54 = vadd.s32 24, %v4479_v46 }
   0x5   :  { %v4204_v11 = vld [vmem:[%s5702_s0 + $0x4] ss:$8 sps:$4 sm:$0xff]   ;;  %v4198_v13 = vld [vmem:[%s5701_s1 + $0x70] sm:$0xff]   ;;  %v4200_v15 = vld [vmem:[%s5701_s1 + $0x78] sm:$0xff]  }
   0x6   :  { %311 = vmatprep.mubr.bf16.mxu0 %v4204_v11  ;;  %v4199_v14 = vld [vmem:[%s5701_s1 + $0x30] sm:$0xff]   ;;  %v4201_v16 = vld [vmem:[%s5701_s1 + $0x38] sm:$0xff]   ;;  %v4202_v17 = vld [vmem:[%s5702_s0] ss:$8 sps:$4 sm:$0xff]   ;;  %v435_v57 = vshra.s32 %v4487_v50, 4  ;;  %v436_v59 = vshra.s32 %v4490_v54, 4 }
   0x7   :  { %3328 = vmatpush3.bf16.msra.mxu0 %v4189_v3  ;;  %v4205_v18 = vld [vmem:[%s5702_s0 + $0x14] ss:$8 sps:$4 sm:$0xff]   ;;  %v4232_v19 = vld [vmem:[%s5703_s3 + $0xc0] sm:$0xff]   ;;  %v4207_v20 = vld [vmem:[%s5702_s0 + $0x10] ss:$8 sps:$4 sm:$0xff]  }
   0x8   :  { %3329 = vmatprep.subr.bf16.mxu0 %v4190_v4  ;;  %3609 = vmatprep.subr.bf16.mxu1 %v4232_v19  ;;  %v4208_v21 = vld [vmem:[%s5702_s0 + $0x24] ss:$8 sps:$4 sm:$0xff]   ;;  %v4210_v22 = vld [vmem:[%s5702_s0 + $0x20] ss:$8 sps:$4 sm:$0xff]   ;;  %v4211_v23 = vld [vmem:[%s5702_s0 + $0x34] ss:$8 sps:$4 sm:$0xff]  }
   0x9   :  { %3610 = vmatpush3.bf16.msra.mxu1 %v4232_v19  ;;  %v4213_v24 = vld [vmem:[%s5702_s0 + $0x30] ss:$8 sps:$4 sm:$0xff]   ;;  %v4214_v25 = vld [vmem:[%s5702_s0 + $0x44] ss:$8 sps:$4 sm:$0xff]   ;;  %v4216_v26 = vld [vmem:[%s5702_s0 + $0x40] ss:$8 sps:$4 sm:$0xff]  }
   0xa   :  { %v4217_v27 = vld [vmem:[%s5702_s0 + $0x54] ss:$8 sps:$4 sm:$0xff]   ;;  %v4219_v28 = vld [vmem:[%s5702_s0 + $0x50] ss:$8 sps:$4 sm:$0xff]   ;;  %v4220_v29 = vld [vmem:[%s5702_s0 + $0x64] ss:$8 sps:$4 sm:$0xff]  }
   0xb   :  { %3330 = vmatpush3.bf16.msra.mxu0 %v4191_v5  ;;  %v4222_v30 = vld [vmem:[%s5702_s0 + $0x60] ss:$8 sps:$4 sm:$0xff]   ;;  %v4223_v31 = vld [vmem:[%s5702_s0 + $0x74] ss:$8 sps:$4 sm:$0xff]   ;;  %v4225_v32 = vld [vmem:[%s5702_s0 + $0x70] ss:$8 sps:$4 sm:$0xff]  }
   0xc   :  { %3331 = vmatprep.subr.bf16.mxu0 %v4192_v6  ;;  %v4226_v33 = vld [vmem:[%s5702_s0 + $0x84] ss:$8 sps:$4 sm:$0xff]   ;;  %v4228_v34 = vld [vmem:[%s5702_s0 + $0x80] ss:$8 sps:$4 sm:$0xff]   ;;  %v4229_v35 = vld [vmem:[%s5702_s0 + $0x94] ss:$8 sps:$4 sm:$0xff]  }
   0xd   :  { %v4231_v36 = vld [vmem:[%s5702_s0 + $0x90] ss:$8 sps:$4 sm:$0xff]   ;;  %v4233_v37 = vld [vmem:[%s5703_s3 + $0xc8] sm:$0xff]   ;;  %v4236_v40 = vld [vmem:[%s5703_s3 + $0xe0] sm:$0xff]   ;;  %vm4496_vm0 = vcmp.ge.s32.totalorder %v435_v57, 1  ;;  %vm4502_vm1 = vcmp.le.s32.totalorder %v435_v57, 8 }
   0xe   :  { %3611 = vmatprep.subr.bf16.mxu1 %v4233_v37  ;;  %v4234_v38 = vld [vmem:[%s5703_s3 + $0xd0] sm:$0xff]   ;;  %v4235_v39 = vld [vmem:[%s5703_s3 + $0xd8] sm:$0xff]   ;;  %v4237_v41 = vld [vmem:[%s5703_s3 + $0xe8] sm:$0xff]   ;;  %v4507_v5 = vadd.s32 32, %v4479_v46  ;;  %vm4509_vm2 = vcmp.ge.s32.totalorder %v436_v59, 1  ;;  %vm476_vm3 = vcmp.le.s32.totalorder %v436_v59, 8 }
   0xf   :  { %3332 = vmatpush3.bf16.msra.mxu0 %v4193_v7  ;;  %3612 = vmatpush3.bf16.msra.mxu1 %v4233_v37  ;;  %v4238_v42 = vld [vmem:[%s5703_s3 + $0xf0] sm:$0xff]   ;;  %v4239_v43 = vld [vmem:[%s5703_s3 + $0xf8] sm:$0xff]   ;;  %v4475_v44 = vld [vmem:[%s5703_s3] sm:$0xff]   ;;  %v4531_v19 = vadd.s32 48, %v4479_v46 }
  0x10   :  { %3333 = vmatprep.subr.bf16.mxu0 %v4194_v8  ;;  %3613 = vmatprep.subr.bf16.mxu1 %v4234_v38  ;;  %v4484_v48 = vld [vmem:[%s5704_s2] ss:$0 sm:$0xff]  ;;  %v4514_v8 = vadd.s32 40, %v4479_v46  ;;  %vm495_vm4 = vmand %vm4496_vm0, %vm4502_vm1 }
  0x11   :  { %vm496_vm5 = vmand %vm4509_vm2, %vm476_vm3 }
  0x12   :  { %vm4526_vm6 = vmpackc.low %vm496_vm5, %vm495_vm4 }
  0x13   :  { %3334 = vmatpush3.bf16.msra.mxu0 %v4195_v9  ;;  %3614 = vmatpush3.bf16.msra.mxu1 %v4234_v38 }
  0x14   :  { %3335 = vmatprep.subr.bf16.mxu0 %v4196_v10  ;;  %3615 = vmatprep.subr.bf16.mxu1 %v4235_v39 }
  0x17   :  { %3336 = vmatpush3.bf16.msra.mxu0 %v4197_v12  ;;  %3616 = vmatpush3.bf16.msra.mxu1 %v4235_v39  ;;  %v437_v12 = vshra.s32 %v4507_v5, 4 }
  0x18   :  { %3337 = vmatprep.subr.bf16.mxu0 %v4198_v13  ;;  %3617 = vmatprep.subr.bf16.mxu1 %v4236_v40  ;;  %v438_v13 = vshra.s32 %v4514_v8, 4 }
  0x19   :  { %vm4535_vm7 = vcmp.ge.s32.totalorder %v437_v12, 1  ;;  %vm4539_vm8 = vcmp.le.s32.totalorder %v437_v12, 8 }
  0x1a   :  { %vm4543_vm9 = vcmp.ge.s32.totalorder %v438_v13, 1  ;;  %vm4547_vm10 = vcmp.le.s32.totalorder %v438_v13, 8  ;;  %vm497_vm11 = vmand %vm4535_vm7, %vm4539_vm8  ;;  %v4254_v13 = vld [vmem:[%s5703_s3 + $0x1b0] sm:$0xff]  }
  0x1b   :  { %3338 = vmatpush3.bf16.msra.mxu0 %v4199_v14  ;;  %3618 = vmatpush3.bf16.msra.mxu1 %v4236_v40  ;;  %vm498_vm12 = vmand %vm4543_vm9, %vm4547_vm10 }
  0x1c   :  { %3339 = vmatprep.subr.bf16.mxu0 %v4200_v15  ;;  %3619 = vmatprep.subr.bf16.mxu1 %v4237_v41  ;;  %vm4569_vm13 = vmpackc.low %vm498_vm12, %vm497_vm11 }
  0x1f   :  { %3340 = vmatpush3.bf16.msra.mxu0 %v4201_v16  ;;  %3620 = vmatpush3.bf16.msra.mxu1 %v4237_v41 }
  0x20   :  { %3621 = vmatprep.subr.bf16.mxu1 %v4238_v42 }
  0x22   :  { %312 = vmatmul.mubr.bf16.vlgmr.msra.gmra.mrb[0].mxu0 %v4202_v17 }
  0x23   :  { %319 = vmatprep.mubr.bf16.mxu0 %v4205_v18  ;;  %3622 = vmatpush3.bf16.msra.mxu1 %v4238_v42  ;;  %v4299_v18 = vld [vmem:[%s5703_s3 + $0x218] sm:$0xff]  }
  0x24   :  { %3623 = vmatprep.subr.bf16.mxu1 %v4239_v43 }
  0x27   :  { %3624 = vmatpush3.bf16.msra.mxu1 %v4239_v43  ;;  %v4697_v43 = vadd.s32 104, %v4479_v46 }
  0x28   :  { %3641 = vmatprep.subr.bf16.mxu1 %v4475_v44 }
  0x2a   :  { %320 = vmatmul.mubr.bf16.gmra.mrb[4].mxu0 %v4207_v20 }
  0x2b   :  { %327 = vmatprep.mubr.bf16.mxu0 %v4208_v21 }
  0x32   :  { %328 = vmatmul.mubr.bf16.gmra.mrb[8].mxu0 %v4210_v22 }
  0x33   :  { %335 = vmatprep.mubr.bf16.mxu0 %v4211_v23  ;;  %v4244_v23 = vld [vmem:[%s5703_s3 + $0x20] sm:$0xff]  }
  0x3a   :  { %336 = vmatmul.mubr.bf16.gmra.mrb[12].mxu0 %v4213_v24 }
  0x3b   :  { %343 = vmatprep.mubr.bf16.mxu0 %v4214_v25 }
  0x42   :  { %344 = vmatmul.mubr.bf16.gmra.mrb[16].mxu0 %v4216_v26 }
  0x43   :  { %351 = vmatprep.mubr.bf16.mxu0 %v4217_v27 }
  0x4a   :  { %352 = vmatmul.mubr.bf16.gmra.mrb[20].mxu0 %v4219_v28  ;;  %v4552_v28 = vadd.s32 56, %v4479_v46 }
  0x4b   :  { %359 = vmatprep.mubr.bf16.mxu0 %v4220_v29 }
  0x52   :  { %360 = vmatmul.mubr.bf16.gmra.mrb[24].mxu0 %v4222_v30 }
  0x53   :  { %367 = vmatprep.mubr.bf16.mxu0 %v4223_v31  ;;  %v439_v31 = vshra.s32 %v4531_v19, 4 }
  0x55   :  { %vm4573_vm14 = vcmp.ge.s32.totalorder %v439_v31, 1  ;;  %vm4579_vm15 = vcmp.le.s32.totalorder %v439_v31, 8  ;;  %v5788_v31 = vmov 0 }
  0x56   :  { %vm499_vm2 = vmand %vm4573_vm14, %vm4579_vm15 }
  0x5a   :  { %368 = vmatmul.mubr.bf16.gmra.mrb[28].mxu0 %v4225_v32 }
  0x5b   :  { %375 = vmatprep.mubr.bf16.mxu0 %v4226_v33  ;;  %v440_v33 = vshra.s32 %v4552_v28, 4 }
  0x5d   :  { %vm4589_vm0 = vcmp.ge.s32.totalorder %v440_v33, 1  ;;  %vm4593_vm1 = vcmp.le.s32.totalorder %v440_v33, 8 }
  0x5e   :  { %vm500_vm3 = vmand %vm4589_vm0, %vm4593_vm1 }
  0x5f   :  { %vm4619_vm4 = vmpackc.low %vm500_vm3, %vm499_vm2 }
  0x62   :  { %376 = vmatmul.mubr.bf16.gmra.mrb[32].mxu0 %v4228_v34 }
  0x63   :  { %383 = vmatprep.mubr.bf16.mxu0 %v4229_v35 }
  0x6a   :  { %384 = vmatmul.mubr.bf16.gmra.mrb[36].mxu0 %v4231_v36 }
  0xf5   :  { %v3341_v47 = vpop.f32.mrb[0].mxu0 }
  0xf6   :  { %v3342_v49 = vpop.f32.mrb[1].mxu0 }
  0xf7   :  { %v3343_v51 = vadd.f32 %v3342_v49, %v3341_v47  ;;  %v3344_v52 = vpop.f32.mrb[2].mxu0  ;;  %v4584_v47 = vadd.s32 64, %v4479_v46  ;;  %v4241_v49 = vld [vmem:[%s5703_s3 + $0x8] sm:$0xff]  }
  0xf8   :  { %v3345_v53 = vpop.f32.mrb[3].mxu0 }
  0xf9   :  { %v314_v55 = vadd.f32 %v3343_v51, %v4484_v48  ;;  %v3346_v56 = vadd.f32 %v3345_v53, %v3344_v52  ;;  %v441_v59 = vshra.s32 %v4584_v47, 4 }
  0xfb   :  { %v317_v58 = vadd.f32 %v3346_v56, %v4484_v48  ;;  %v392_v60 = vmax.f32 %v314_v55, 0.0  ;;  %v4598_v55 = vadd.s32 72, %v4479_v46  ;;  %vm4628_vm5 = vcmp.ge.s32.totalorder %v441_v59, 1 }
  0xfc   :  { %vm4632_vm7 = vcmp.le.s32.totalorder %v441_v59, 8 }
  0xfd   :  { %v393_v61 = vmax.f32 %v317_v58, 0.0  ;;  %v3347_v62 = vpop.f32.mrb[4].mxu0  ;;  %vm501_vm10 = vmand %vm4628_vm5, %vm4632_vm7 }
  0xfe   :  { %v3348_v63 = vpop.f32.mrb[5].mxu0 }
  0xff   :  { %v4500_v1 = vpack.c.bf16 %v393_v61, %v392_v60  ;;  %v3349_v2 = vadd.f32 %v3348_v63, %v3347_v62  ;;  %v3350_v3 = vpop.f32.mrb[6].mxu0  ;;  %v4242_v60 = vld [vmem:[%s5703_s3 + $0x10] sm:$0xff]   ;;  %v442_v61 = vshra.s32 %v4598_v55, 4 }
 0x100   :  { %v3351_v6 = vpop.f32.mrb[7].mxu0 }
 0x101   :  { %v322_v9 = vadd.f32 %v3349_v2, %v4484_v48  ;;  %v3352_v10 = vadd.f32 %v3351_v6, %v3350_v3  ;;  %v4624_v3 = vadd.s32 80, %v4479_v46  ;;  %vm4639_vm8 = vcmp.ge.s32.totalorder %v442_v61, 1 }
 0x102   :  { %vm4643_vm9 = vcmp.le.s32.totalorder %v442_v61, 8  ;;  %v586_v2 = vand.u32 7, %v4490_v54 }
 0x103   :  { %v325_v11 = vadd.f32 %v3352_v10, %v4484_v48  ;;  %v394_v14 = vmax.f32 %v322_v9, 0.0  ;;  %vm502_vm11 = vmand %vm4639_vm8, %vm4643_vm9  ;;  %v4247_v10 = vld [vmem:[%s5703_s3 + $0x38] sm:$0xff]  }
 0x104   :  { %vm4668_vm12 = vmpackc.low %vm502_vm11, %vm501_vm10 }
 0x105   :  { %v395_v15 = vmax.f32 %v325_v11, 0.0  ;;  %v3353_v16 = vpop.f32.mrb[8].mxu0  ;;  %v4243_v11 = vld [vmem:[%s5703_s3 + $0x18] sm:$0xff]  }
 0x106   :  { %v3354_v17 = vpop.f32.mrb[9].mxu0 }
 0x107   :  { %v4533_v20 = vpack.c.bf16 %v395_v15, %v394_v14  ;;  %v3355_v21 = vadd.f32 %v3354_v17, %v3353_v16  ;;  %v3356_v22 = vpop.f32.mrb[10].mxu0  ;;  %v4648_v15 = vadd.s32 88, %v4479_v46  ;;  %v4746_v14 = vadd.s32 120, %v4479_v46 }
 0x108   :  { %v3357_v25 = vpop.f32.mrb[11].mxu0 }
 0x109   :  { %v330_v29 = vadd.f32 %v3355_v21, %v4484_v48  ;;  %v3358_v30 = vadd.f32 %v3357_v25, %v3356_v22  ;;  %3625 = vmatprep.mubr.msk.bf16.mxu1 %vm4526_vm6, %v4533_v20  ;;  %v443_v21 = vshra.s32 %v4624_v3, 4  ;;  %v444_v24 = vshra.s32 %v4648_v15, 4 }
 0x10b   :  { %v333_v32 = vadd.f32 %v3358_v30, %v4484_v48  ;;  %v396_v34 = vmax.f32 %v330_v29, 0.0  ;;  %v5768_v30 = vmov 0  ;;  %vm4672_vm14 = vcmp.ge.s32.totalorder %v443_v21, 1 }
 0x10c   :  { %v5769_v30 = vsel %vm4668_vm12, 4294967295, %v5768_v30  ;;  %vm4678_vm15 = vcmp.le.s32.totalorder %v443_v21, 8  ;;  %vm4688_vm0 = vcmp.ge.s32.totalorder %v444_v24, 1  ;;  %vm4692_vm1 = vcmp.le.s32.totalorder %v444_v24, 8 }
 0x10d   :  { %v397_v35 = vmax.f32 %v333_v32, 0.0  ;;  %v3359_v36 = vpop.f32.mrb[12].mxu0  ;;  %vm503_vm2 = vmand %vm4672_vm14, %vm4678_vm15  ;;  %v448_v24 = vshra.s32 %v4746_v14, 4 }
 0x10e   :  { %v3360_v37 = vpop.f32.mrb[13].mxu0  ;;  %vm504_vm3 = vmand %vm4688_vm0, %vm4692_vm1 }
 0x10f   :  { %v4577_v40 = vpack.c.bf16 %v397_v35, %v396_v34  ;;  %v3361_v41 = vadd.f32 %v3360_v37, %v3359_v36  ;;  %v3362_v42 = vpop.f32.mrb[14].mxu0  ;;  %v4683_v36 = vadd.s32 96, %v4479_v46  ;;  %v4245_v37 = vld [vmem:[%s5703_s3 + $0x28] sm:$0xff]   ;;  %vm4717_vm5 = vmpackc.low %vm504_vm3, %vm503_vm2  ;;  %vm4785_vm2 = vcmp.ge.s32.totalorder %v448_v24, 1 }
 0x110   :  { %v3363_v51 = vpop.f32.mrb[15].mxu0  ;;  %vm4789_vm3 = vcmp.le.s32.totalorder %v448_v24, 8  ;;  %v4258_v24 = vld [vmem:[%s5703_s3 + $0x110] sm:$0xff]  }
 0x111   :  { %v338_v56 = vadd.f32 %v3361_v41, %v4484_v48  ;;  %v3364_v57 = vadd.f32 %v3363_v51, %v3362_v42  ;;  %3626 = vmatmul.mubr.msk.bf16.vlgmr.msra.gmra.mrb[0].mxu1 %vm4569_vm13, %v4577_v40  ;;  %v445_v53 = vshra.s32 %v4683_v36, 4  ;;  %v430_v42 = vadd.s32 136, %v4479_v46 }
 0x112   :  { %3642 = vmatpush3.bf16.msra.mxu1 %v4475_v44 }
 0x113   :  { %v341_v58 = vadd.f32 %v3364_v57, %v4484_v48  ;;  %3643 = vmatprep.subr.bf16.mxu1 %v4241_v49  ;;  %v398_v62 = vmax.f32 %v338_v56, 0.0  ;;  %v4246_v56 = vld [vmem:[%s5703_s3 + $0x30] sm:$0xff]   ;;  %v446_v57 = vshra.s32 %v4697_v43, 4  ;;  %vm4726_vm7 = vcmp.ge.s32.totalorder %v445_v53, 1 }
 0x114   :  { %vm4730_vm8 = vcmp.le.s32.totalorder %v445_v53, 8 }
 0x115   :  { %v399_v63 = vmax.f32 %v341_v58, 0.0  ;;  %v3365_v0 = vpop.f32.mrb[16].mxu0  ;;  %vm4737_vm9 = vcmp.ge.s32.totalorder %v446_v57, 1  ;;  %vm4741_vm10 = vcmp.le.s32.totalorder %v446_v57, 8  ;;  %vm505_vm11 = vmand %vm4726_vm7, %vm4730_vm8  ;;  %v4798_v57 = vadd.s32 8, %v4479_v46 }
 0x116   :  { %v3366_v44 = vpop.f32.mrb[17].mxu0  ;;  %3644 = vmatpush3.bf16.msra.mxu1 %v4241_v49  ;;  %vm506_vm14 = vmand %vm4737_vm9, %vm4741_vm10 }
 0x117   :  { %v4626_v4 = vpack.c.bf16 %v399_v63, %v398_v62  ;;  %v3367_v6 = vadd.f32 %v3366_v44, %v3365_v0  ;;  %v3368_v7 = vpop.f32.mrb[18].mxu0  ;;  %3645 = vmatprep.subr.bf16.mxu1 %v4242_v60  ;;  %v5778_v62 = vmov 0  ;;  %v4722_v63 = vadd.s32 112, %v4479_v46  ;;  %vm4768_vm15 = vmpackc.low %vm506_vm14, %vm505_vm11 }
 0x118   :  { %v3369_v12 = vpop.f32.mrb[19].mxu0  ;;  %v5779_v62 = vsel %vm4717_vm5, 4294967295, %v5778_v62  ;;  %v5789_v31 = vsel %vm4768_vm15, 4294967295, %v5788_v31  ;;  %vm508_vm8 = vmand %vm4785_vm2, %vm4789_vm3  ;;  %v434_v9 = vshra.s32 %v4798_v57, 4  ;;  %v584_v38 = vand.u32 7, %v4798_v57 }
 0x119   :  { %v346_v16 = vadd.f32 %v3367_v6, %v4484_v48  ;;  %v3370_v17 = vadd.f32 %v3369_v12, %v3368_v7  ;;  %3629 = vmatprep.mubr.msk.bf16.mxu1 %vm4619_vm4, %v4626_v4  ;;  %v447_v21 = vshra.s32 %v4722_v63, 4  ;;  %v4253_v12 = vld [vmem:[%s5703_s3 + $0x1a8] sm:$0xff]  }
 0x11a   :  { %3646 = vmatpush3.bf16.msra.mxu1 %v4242_v60 }
 0x11b   :  { %v349_v22 = vadd.f32 %v3370_v17, %v4484_v48  ;;  %3647 = vmatprep.subr.bf16.mxu1 %v4243_v11  ;;  %v400_v25 = vmax.f32 %v346_v16, 0.0  ;;  %vm4772_vm0 = vcmp.ge.s32.totalorder %v447_v21, 1  ;;  %vm4779_vm1 = vcmp.le.s32.totalorder %v447_v21, 8 }
 0x11c   :  { %vm507_vm7 = vmand %vm4772_vm0, %vm4779_vm1 }
 0x11d   :  { %v401_v26 = vmax.f32 %v349_v22, 0.0  ;;  %v3371_v27 = vpop.f32.mrb[20].mxu0  ;;  %vm4811_vm9 = vmpackc.low %vm508_vm8, %vm507_vm7  ;;  %vm454_vm7 = vcmp.ge.s32.totalorder %v434_v9, 1  ;;  %vm474_vm8 = vcmp.le.s32.totalorder %v434_v9, 8 }
 0x11e   :  { %v3372_v29 = vpop.f32.mrb[21].mxu0  ;;  %3648 = vmatpush3.bf16.msra.mxu1 %v4243_v11 }
 0x11f   :  { %v4676_v32 = vpack.c.bf16 %v401_v26, %v400_v25  ;;  %v3373_v33 = vadd.f32 %v3372_v29, %v3371_v27  ;;  %v3374_v34 = vpop.f32.mrb[22].mxu0  ;;  %3649 = vmatprep.subr.bf16.mxu1 %v4244_v23 }
 0x120   :  { %v3375_v39 = vpop.f32.mrb[23].mxu0 }
 0x121   :  { %v354_v49 = vadd.f32 %v3373_v33, %v4484_v48  ;;  %v3376_v51 = vadd.f32 %v3375_v39, %v3374_v34  ;;  %3630 = vmatmul.mubr.msk.bf16.gmra.mrb[4].mxu1 %vm4668_vm12, %v4676_v32  ;;  %v429_v34 = vadd.s32 128, %v4479_v46 }
 0x122   :  { %3650 = vmatpush3.bf16.msra.mxu1 %v4244_v23  ;;  %v4765_v23 = vld [vmem:[%s5703_s3 + $0x180] sm:$0xff]  }
 0x123   :  { %v357_v52 = vadd.f32 %v3376_v51, %v4484_v48  ;;  %3651 = vmatprep.subr.bf16.mxu1 %v4245_v37  ;;  %v402_v58 = vmax.f32 %v354_v49, 0.0 }
 0x125   :  { %v403_v59 = vmax.f32 %v357_v52, 0.0  ;;  %v3377_v60 = vpop.f32.mrb[24].mxu0  ;;  %v4297_v52 = vld [vmem:[%s5703_s3 + $0x208] sm:$0xff]  }
 0x126   :  { %v3378_v61 = vpop.f32.mrb[25].mxu0  ;;  %3652 = vmatpush3.bf16.msra.mxu1 %v4245_v37 }
 0x127   :  { %v4724_v0 = vpack.c.bf16 %v403_v59, %v402_v58  ;;  %v3379_v44 = vadd.f32 %v3378_v61, %v3377_v60  ;;  %v3380_v6 = vpop.f32.mrb[26].mxu0  ;;  %3653 = vmatprep.subr.bf16.mxu1 %v4246_v56  ;;  %v449_v58 = vshra.s32 %v429_v34, 4  ;;  %v450_v60 = vshra.s32 %v430_v42, 4 }
 0x128   :  { %v3381_v11 = vpop.f32.mrb[27].mxu0  ;;  %v433_v61 = vshra.s32 %v4479_v46, 4 }
 0x129   :  { %v362_v16 = vadd.f32 %v3379_v44, %v4484_v48  ;;  %v3382_v17 = vadd.f32 %v3381_v11, %v3380_v6  ;;  %3633 = vmatprep.mubr.msk.bf16.mxu1 %vm4717_vm5, %v4724_v0  ;;  %v5798_v11 = vmov 0  ;;  %vm4815_vm10 = vcmp.ge.s32.totalorder %v449_v58, 1 }
 0x12a   :  { %3654 = vmatpush3.bf16.msra.mxu1 %v4246_v56  ;;  %v5799_v11 = vsel %vm4811_vm9, 4294967295, %v5798_v11  ;;  %vm4819_vm11 = vcmp.le.s32.totalorder %v449_v58, 8  ;;  %vm4825_vm14 = vcmp.ge.s32.totalorder %v450_v60, 1  ;;  %vm4829_vm0 = vcmp.le.s32.totalorder %v450_v60, 8 }
 0x12b   :  { %v365_v22 = vadd.f32 %v3382_v17, %v4484_v48  ;;  %3655 = vmatprep.subr.bf16.mxu1 %v4247_v10  ;;  %v404_v25 = vmax.f32 %v362_v16, 0.0  ;;  %vm4833_vm1 = vcmp.ge.s32.totalorder %v433_v61, 1  ;;  %vm4837_vm2 = vcmp.le.s32.totalorder %v433_v61, 8  ;;  %vm509_vm3 = vmand %vm4815_vm10, %vm4819_vm11 }
 0x12c   :  { %vm493_vm5 = vmand %vm4833_vm1, %vm4837_vm2  ;;  %vm5819_vm11 = vnez %v5799_v11 }
 0x12d   :  { %v405_v26 = vmax.f32 %v365_v22, 0.0  ;;  %v3383_v27 = vpop.f32.mrb[28].mxu0  ;;  %v4257_v22 = vld [vmem:[%s5703_s3 + $0x108] sm:$0xff]  }
 0x12e   :  { %v3384_v29 = vpop.f32.mrb[29].mxu0  ;;  %3656 = vmatpush3.bf16.msra.mxu1 %v4247_v10 }
 0x12f   :  { %v4777_v35 = vpack.c.bf16 %v405_v26, %v404_v25  ;;  %v3385_v37 = vadd.f32 %v3384_v29, %v3383_v27  ;;  %v3386_v39 = vpop.f32.mrb[30].mxu0  ;;  %3673 = vmatprep.subr.bf16.mxu1 %v4765_v23  ;;  %v431_v26 = vadd.s32 144, %v4479_v46  ;;  %v432_v27 = vadd.s32 152, %v4479_v46 }
 0x130   :  { %v3387_v49 = vpop.f32.mrb[31].mxu0 }
 0x131   :  { %v370_v53 = vadd.f32 %v3385_v37, %v4484_v48  ;;  %v3388_v56 = vadd.f32 %v3387_v49, %v3386_v39  ;;  %3634 = vmatmul.mubr.msk.bf16.gmra.mrb[8].mxu1 %vm4768_vm15, %v4777_v35  ;;  %vm510_vm15 = vmand %vm4825_vm14, %vm4829_vm0 }
 0x132   :  { %vm4858_vm12 = vmpackc.low %vm510_vm15, %vm509_vm3  ;;  %vm5817_vm15 = vnez %v5779_v62  ;;  %v1298_v62 = vadd.s32 4294967295, %v586_v2 }
 0x133   :  { %v373_v59 = vadd.f32 %v3388_v56, %v4484_v48  ;;  %v406_v44 = vmax.f32 %v370_v53, 0.0 }
 0x135   :  { %v407_v6 = vmax.f32 %v373_v59, 0.0  ;;  %v3389_v7 = vpop.f32.mrb[32].mxu0 }
 0x136   :  { %v3390_v10 = vpop.f32.mrb[33].mxu0 }
 0x137   :  { %v4823_v16 = vpack.c.bf16 %v407_v6, %v406_v44  ;;  %v3391_v17 = vadd.f32 %v3390_v10, %v3389_v7  ;;  %v3392_v21 = vpop.f32.mrb[34].mxu0  ;;  %v4249_v7 = vld [vmem:[%s5703_s3 + $0x188] sm:$0xff]   ;;  %v4251_v10 = vld [vmem:[%s5703_s3 + $0x198] sm:$0xff]  }
 0x138   :  { %v3393_v25 = vpop.f32.mrb[35].mxu0 }
 0x139   :  { %v378_v29 = vadd.f32 %v3391_v17, %v4484_v48  ;;  %v3394_v33 = vadd.f32 %v3393_v25, %v3392_v21  ;;  %3637 = vmatprep.mubr.msk.bf16.mxu1 %vm4811_vm9, %v4823_v16  ;;  %vm494_vm9 = vmand %vm454_vm7, %vm474_vm8  ;;  %v4255_v17 = vld [vmem:[%s5703_s3 + $0x1b8] sm:$0xff]   ;;  %v4256_v21 = vld [vmem:[%s5703_s3 + $0x100] sm:$0xff]  }
 0x13a   :  { %vm4864_vm10 = vmpackc.low %vm494_vm9, %vm493_vm5  ;;  %vm5816_vm5 = vnez %v5769_v30  ;;  %vm5818_vm9 = vnez %v5789_v31  ;;  %v4259_v25 = vld [vmem:[%s5703_s3 + $0x118] sm:$0xff]   ;;  %v1296_v30 = vadd.s32 4294967295, %v584_v38  ;;  %v588_v31 = vand.u32 7, %v4514_v8 }
 0x13b   :  { %v381_v34 = vadd.f32 %v3394_v33, %v4484_v48  ;;  %v408_v37 = vmax.f32 %v378_v29, 0.0  ;;  %v4260_v29 = vld [vmem:[%s5703_s3 + $0x120] sm:$0xff]   ;;  %v451_v33 = vshra.s32 %v431_v26, 4 }
 0x13d   :  { %v409_v39 = vmax.f32 %v381_v34, 0.0  ;;  %v3395_v41 = vpop.f32.mrb[36].mxu0  ;;  %v452_v34 = vshra.s32 %v432_v27, 4  ;;  %vm471_vm14 = vcmp.ge.s32.totalorder %v451_v33, 1  ;;  %vm491_vm0 = vcmp.le.s32.totalorder %v451_v33, 8 }
 0x13e   :  { %v3396_v49 = vpop.f32.mrb[37].mxu0  ;;  %vm511_vm3 = vmand %vm471_vm14, %vm491_vm0 }
 0x13f   :  { %v4862_v51 = vpack.c.bf16 %v409_v39, %v408_v37  ;;  %v3397_v53 = vadd.f32 %v3396_v49, %v3395_v41  ;;  %v3398_v56 = vpop.f32.mrb[38].mxu0  ;;  %v4261_v37 = vld [vmem:[%s5703_s3 + $0x128] sm:$0xff]   ;;  %vm472_vm1 = vcmp.ge.s32.totalorder %v452_v34, 1  ;;  %vm492_vm2 = vcmp.le.s32.totalorder %v452_v34, 8  ;;  %v4262_v39 = vld [vmem:[%s5703_s3 + $0x130] sm:$0xff]   ;;  %v4263_v49 = vld [vmem:[%s5703_s3 + $0x138] sm:$0xff]  }
 0x140   :  { %v3399_v58 = vpop.f32.mrb[39].mxu0  ;;  %vm512_vm7 = vmand %vm472_vm1, %vm492_vm2 }
 0x141   :  { %3638 = vmatmul.mubr.msk.bf16.gmra.mrb[12].mxu1 %vm4858_vm12, %v4862_v51  ;;  %v386_v59 = vadd.f32 %v3397_v53, %v4484_v48  ;;  %v3400_v60 = vadd.f32 %v3399_v58, %v3398_v56  ;;  %vm4965_vm8 = vmpackc.low %vm512_vm7, %vm511_vm3  ;;  %v4264_v53 = vld [vmem:[%s5703_s3 + $0x40] sm:$0xff]   ;;  %v4265_v56 = vld [vmem:[%s5703_s3 + $0x48] sm:$0xff]  }
 0x142   :  { %3657 = vmatprep.mubr.msk.bf16.mxu1 %vm4864_vm10, %v4500_v1  ;;  %v4266_v58 = vld [vmem:[%s5703_s3 + $0x50] sm:$0xff]  }
 0x143   :  { %v410_v61 = vmax.f32 %v386_v59, 0.0  ;;  %v389_v44 = vadd.f32 %v3400_v60, %v4484_v48  ;;  %v4250_v48 = vld [vmem:[%s5703_s3 + $0x190] sm:$0xff]   ;;  %v4267_v59 = vld [vmem:[%s5703_s3 + $0x58] sm:$0xff]   ;;  %v4268_v60 = vld [vmem:[%s5703_s3 + $0x60] sm:$0xff]  }
 0x145   :  { %v411_v6 = vmax.f32 %v389_v44, 0.0  ;;  %v4270_v44 = vld [vmem:[%s5703_s3 + $0x70] sm:$0xff]  }
 0x147   :  { %v4879_v9 = vpack.c.bf16 %v411_v6, %v410_v61  ;;  %v4269_v61 = vld [vmem:[%s5703_s3 + $0x68] sm:$0xff]   ;;  %v4271_v6 = vld [vmem:[%s5703_s3 + $0x78] sm:$0xff]  }
 0x149   :  { %3658 = vmatmul.mubr.msk.bf16.vlgmr.msra.gmra.mrb[0].mxu1 %vm4526_vm6, %v4533_v20 }
 0x14a   :  { %3661 = vmatprep.mubr.msk.bf16.mxu1 %vm4569_vm13, %v4577_v40  ;;  %3674 = vmatpush3.bf16.msra.mxu1 %v4765_v23  ;;  %v4252_v23 = vld [vmem:[%s5703_s3 + $0x1a0] sm:$0xff]  }
 0x14b   :  { %3675 = vmatprep.subr.bf16.mxu1 %v4249_v7 }
 0x14e   :  { %3676 = vmatpush3.bf16.msra.mxu1 %v4249_v7  ;;  %v4272_v7 = vld [vmem:[%s5703_s3 + $0x1c0] sm:$0xff]  }
 0x14f   :  { %3677 = vmatprep.subr.bf16.mxu1 %v4250_v48 }
 0x151   :  { %3662 = vmatmul.mubr.msk.bf16.gmra.mrb[4].mxu1 %vm4619_vm4, %v4626_v4 }
 0x152   :  { %3665 = vmatprep.mubr.msk.bf16.mxu1 %vm5816_vm5, %v4676_v32  ;;  %3678 = vmatpush3.bf16.msra.mxu1 %v4250_v48  ;;  %v4273_v48 = vld [vmem:[%s5703_s3 + $0x1c8] sm:$0xff]  }
 0x153   :  { %3679 = vmatprep.subr.bf16.mxu1 %v4251_v10 }
 0x156   :  { %3680 = vmatpush3.bf16.msra.mxu1 %v4251_v10  ;;  %v4274_v10 = vld [vmem:[%s5703_s3 + $0x1d0] sm:$0xff]  }
 0x157   :  { %3681 = vmatprep.subr.bf16.mxu1 %v4252_v23 }
 0x159   :  { %3666 = vmatmul.mubr.msk.bf16.gmra.mrb[8].mxu1 %vm5817_vm15, %v4724_v0 }
 0x15a   :  { %3669 = vmatprep.mubr.msk.bf16.mxu1 %vm5818_vm9, %v4777_v35  ;;  %3682 = vmatpush3.bf16.msra.mxu1 %v4252_v23  ;;  %v4275_v23 = vld [vmem:[%s5703_s3 + $0x1d8] sm:$0xff]  }
 0x15b   :  { %3683 = vmatprep.subr.bf16.mxu1 %v4253_v12 }
 0x15e   :  { %3684 = vmatpush3.bf16.msra.mxu1 %v4253_v12  ;;  %v4276_v12 = vld [vmem:[%s5703_s3 + $0x1e0] sm:$0xff]  }
 0x15f   :  { %3685 = vmatprep.subr.bf16.mxu1 %v4254_v13 }
 0x161   :  { %3670 = vmatmul.mubr.msk.bf16.gmra.mrb[12].mxu1 %vm5819_vm11, %v4823_v16 }
 0x162   :  { %3686 = vmatpush3.bf16.msra.mxu1 %v4254_v13  ;;  %3689 = vmatprep.mubr.msk.bf16.mxu1 %vm4569_vm13, %v4577_v40  ;;  %v4277_v13 = vld [vmem:[%s5703_s3 + $0x1e8] sm:$0xff]  }
 0x163   :  { %3687 = vmatprep.subr.bf16.mxu1 %v4255_v17 }
 0x166   :  { %3688 = vmatpush3.bf16.msra.mxu1 %v4255_v17  ;;  %v4278_v17 = vld [vmem:[%s5703_s3 + $0x1f0] sm:$0xff]  }
 0x167   :  { %3761 = vmatprep.subr.bf16.mxu1 %v4256_v21 }
 0x169   :  { %3690 = vmatmul.mubr.msk.bf16.vlgmr.msra.gmra.mrb[0].mxu1 %vm4619_vm4, %v4626_v4 }
 0x16a   :  { %3693 = vmatprep.mubr.msk.bf16.mxu1 %vm5816_vm5, %v4676_v32  ;;  %3762 = vmatpush3.bf16.msra.mxu1 %v4256_v21  ;;  %v4279_v21 = vld [vmem:[%s5703_s3 + $0x1f8] sm:$0xff]  }
 0x16b   :  { %3763 = vmatprep.subr.bf16.mxu1 %v4257_v22 }
 0x16e   :  { %3764 = vmatpush3.bf16.msra.mxu1 %v4257_v22  ;;  %v5093_v22 = vand.u32 127, %v412_v45 }
 0x16f   :  { %3765 = vmatprep.subr.bf16.mxu1 %v4258_v24 }
 0x171   :  { %3694 = vmatmul.mubr.msk.bf16.gmra.mrb[4].mxu1 %vm5817_vm15, %v4724_v0 }
 0x172   :  { %3697 = vmatprep.mubr.msk.bf16.mxu1 %vm5818_vm9, %v4777_v35  ;;  %3766 = vmatpush3.bf16.msra.mxu1 %v4258_v24  ;;  %v5097_v24 = vsub.s32 %v5093_v22, %v4479_v46 }
 0x173   :  { %3767 = vmatprep.subr.bf16.mxu1 %v4259_v25 }
 0x174   :  { %vm1118_vm14 = vcmp.eq.s32.totalorder %v5097_v24, 4294967295 }
 0x176   :  { %3768 = vmatpush3.bf16.msra.mxu1 %v4259_v25  ;;  %v5716_v25 = vmov 1.0  }
 0x177   :  { %3769 = vmatprep.subr.bf16.mxu1 %v4260_v29  ;;  %3737 = vmatprep.mubr.msk.f32.mxu0 %vm1118_vm14, %v5716_v25 }
 0x179   :  { %3698 = vmatmul.mubr.msk.bf16.gmra.mrb[8].mxu1 %vm5819_vm11, %v4823_v16 }
 0x17a   :  { %3701 = vmatprep.mubr.msk.bf16.mxu1 %vm4858_vm12, %v4862_v51  ;;  %3770 = vmatpush3.bf16.msra.mxu1 %v4260_v29 }
 0x17b   :  { %3771 = vmatprep.subr.bf16.mxu1 %v4261_v37 }
 0x17e   :  { %3772 = vmatpush3.bf16.msra.mxu1 %v4261_v37 }
 0x17f   :  { %3773 = vmatprep.subr.bf16.mxu1 %v4262_v39 }
 0x181   :  { %3702 = vmatmul.mubr.msk.bf16.gmra.mrb[12].mxu1 %vm4965_vm8, %v4879_v9 }
 0x182   :  { %3774 = vmatpush3.bf16.msra.mxu1 %v4262_v39  ;;  %3777 = vmatprep.mubr.msk.bf16.mxu1 %vm4526_vm6, %v4533_v20 }
 0x183   :  { %3775 = vmatprep.subr.bf16.mxu1 %v4263_v49 }
 0x186   :  { %3776 = vmatpush3.bf16.msra.mxu1 %v4263_v49 }
 0x187   :  { %3793 = vmatprep.subr.bf16.mxu1 %v4264_v53 }
 0x189   :  { %3778 = vmatmul.mubr.msk.bf16.vlgmr.msra.gmra.mrb[16].mxu1 %vm4569_vm13, %v4577_v40 }
 0x18a   :  { %3781 = vmatprep.mubr.msk.bf16.mxu1 %vm4619_vm4, %v4626_v4  ;;  %3794 = vmatpush3.bf16.msra.mxu1 %v4264_v53 }
 0x18b   :  { %3795 = vmatprep.subr.bf16.mxu1 %v4265_v56 }
 0x18e   :  { %3796 = vmatpush3.bf16.msra.mxu1 %v4265_v56 }
 0x18f   :  { %3797 = vmatprep.subr.bf16.mxu1 %v4266_v58 }
 0x191   :  { %3782 = vmatmul.mubr.msk.bf16.gmra.mrb[20].mxu1 %vm5816_vm5, %v4676_v32 }
 0x192   :  { %3785 = vmatprep.mubr.msk.bf16.mxu1 %vm5817_vm15, %v4724_v0  ;;  %3798 = vmatpush3.bf16.msra.mxu1 %v4266_v58 }
 0x193   :  { %3799 = vmatprep.subr.bf16.mxu1 %v4267_v59 }
 0x196   :  { %3800 = vmatpush3.bf16.msra.mxu1 %v4267_v59 }
 0x197   :  { %3801 = vmatprep.subr.bf16.mxu1 %v4268_v60 }
 0x199   :  { %3786 = vmatmul.mubr.msk.bf16.gmra.mrb[24].mxu1 %vm5818_vm9, %v4777_v35 }
 0x19a   :  { %3789 = vmatprep.mubr.msk.bf16.mxu1 %vm5819_vm11, %v4823_v16  ;;  %3802 = vmatpush3.bf16.msra.mxu1 %v4268_v60 }
 0x19b   :  { %3803 = vmatprep.subr.bf16.mxu1 %v4269_v61 }
 0x19e   :  { %3804 = vmatpush3.bf16.msra.mxu1 %v4269_v61 }
 0x19f   :  { %3805 = vmatprep.subr.bf16.mxu1 %v4270_v44 }
 0x1a1   :  { %3790 = vmatmul.mubr.msk.bf16.gmra.mrb[28].mxu1 %vm4858_vm12, %v4862_v51 }
 0x1a2   :  { %3806 = vmatpush3.bf16.msra.mxu1 %v4270_v44  ;;  %3809 = vmatprep.mubr.msk.bf16.mxu1 %vm4864_vm10, %v4500_v1 }
 0x1a3   :  { %3807 = vmatprep.subr.bf16.mxu1 %v4271_v6 }
 0x1a6   :  { %3808 = vmatpush3.bf16.msra.mxu1 %v4271_v6 }
 0x1a7   :  { %3825 = vmatprep.subr.bf16.mxu1 %v4272_v7 }
 0x1a9   :  { %3810 = vmatmul.mubr.msk.bf16.vlgmr.msra.gmra.mrb[16].mxu1 %vm4526_vm6, %v4533_v20 }
 0x1aa   :  { %3813 = vmatprep.mubr.msk.bf16.mxu1 %vm4569_vm13, %v4577_v40  ;;  %3826 = vmatpush3.bf16.msra.mxu1 %v4272_v7 }
 0x1ab   :  { %3827 = vmatprep.subr.bf16.mxu1 %v4273_v48 }
 0x1ae   :  { %3828 = vmatpush3.bf16.msra.mxu1 %v4273_v48 }
 0x1af   :  { %3829 = vmatprep.subr.bf16.mxu1 %v4274_v10 }
 0x1b1   :  { %3814 = vmatmul.mubr.msk.bf16.gmra.mrb[20].mxu1 %vm4619_vm4, %v4626_v4 }
 0x1b2   :  { %3817 = vmatprep.mubr.msk.bf16.mxu1 %vm5816_vm5, %v4676_v32  ;;  %3830 = vmatpush3.bf16.msra.mxu1 %v4274_v10 }
 0x1b3   :  { %3831 = vmatprep.subr.bf16.mxu1 %v4275_v23 }
 0x1b6   :  { %3832 = vmatpush3.bf16.msra.mxu1 %v4275_v23 }
 0x1b7   :  { %3833 = vmatprep.subr.bf16.mxu1 %v4276_v12 }
 0x1b9   :  { %3818 = vmatmul.mubr.msk.bf16.gmra.mrb[24].mxu1 %vm5817_vm15, %v4724_v0 }
 0x1ba   :  { %3821 = vmatprep.mubr.msk.bf16.mxu1 %vm5818_vm9, %v4777_v35  ;;  %3834 = vmatpush3.bf16.msra.mxu1 %v4276_v12 }
 0x1bb   :  { %3835 = vmatprep.subr.bf16.mxu1 %v4277_v13 }
 0x1be   :  { %3836 = vmatpush3.bf16.msra.mxu1 %v4277_v13 }
 0x1bf   :  { %3837 = vmatprep.subr.bf16.mxu1 %v4278_v17 }
 0x1c1   :  { %3822 = vmatmul.mubr.msk.bf16.gmra.mrb[28].mxu1 %vm5819_vm11, %v4823_v16 }
 0x1c2   :  { %3838 = vmatpush3.bf16.msra.mxu1 %v4278_v17  ;;  %3841 = vmatprep.mubr.msk.bf16.mxu1 %vm4569_vm13, %v4577_v40 }
 0x1c3   :  { %3839 = vmatprep.subr.bf16.mxu1 %v4279_v21 }
 0x1c6   :  { %3840 = vmatpush3.bf16.msra.mxu1 %v4279_v21  ;;  %v5106_v21 = vsub.s32 %v5093_v22, %v4798_v57  ;;  %v5833_v57 = vand.u32 7, %v4531_v19 }
 0x1c8   :  { %vm1119_vm0 = vcmp.eq.s32.totalorder %v5106_v21, 4294967295 }
 0x1c9   :  { %3842 = vmatmul.mubr.msk.bf16.vlgmr.msra.gmra.mrb[16].mxu1 %vm4619_vm4, %v4626_v4 }
 0x1ca   :  { %3845 = vmatprep.mubr.msk.bf16.mxu1 %vm5816_vm5, %v4676_v32 }
 0x1d1   :  { %3846 = vmatmul.mubr.msk.bf16.gmra.mrb[20].mxu1 %vm5817_vm15, %v4724_v0 }
 0x1d2   :  { %3849 = vmatprep.mubr.msk.bf16.mxu1 %vm5818_vm9, %v4777_v35 }
 0x1d9   :  { %3850 = vmatmul.mubr.msk.bf16.gmra.mrb[24].mxu1 %vm5819_vm11, %v4823_v16 }
 0x1da   :  { %3853 = vmatprep.mubr.msk.bf16.mxu1 %vm4858_vm12, %v4862_v51 }
 0x1e1   :  { %3854 = vmatmul.mubr.msk.bf16.gmra.mrb[28].mxu1 %vm4965_vm8, %v4879_v9 }
 0x23c   :  { %v3691_v26 = vpop.f32.mrb[0].mxu1 }
 0x23d   :  { %v1039_v27 = vpop.f32.mrb[1].mxu1 }
 0x23e   :  { %v3692_v29 = vpop.f32.mrb[2].mxu1 }
 0x23f   :  { %v4013_v33 = vpack.c.bf16 %v3692_v29, %v3691_v26  ;;  %v1042_v34 = vpop.f32.mrb[3].mxu1  ;;  %v4280_v26 = vld [vmem:[%s5703_s3 + $0x140] sm:$0xff]   ;;  %v5118_v29 = vsub.s32 %v5093_v22, %v4490_v54 }
 0x240   :  { %v4009_v45 = vpack.c.bf16 %v1042_v34, %v1039_v27  ;;  %v5113_v27 = vsub.s32 %v5093_v22, %v4487_v50  ;;  %v5126_v34 = vsub.s32 %v5093_v22, %v4507_v5  ;;  %v5526_v54 = vld [vmem:[%s5705_s4] ss:$0 sm:$0xff] }
 0x241   :  { %vm1121_vm2 = vcmp.eq.s32.totalorder %v5118_v29, 4294967295 }
 0x242   :  { %4010 = vmatprep.subr.bf16.mxu0 %v4009_v45  ;;  %vm1120_vm1 = vcmp.eq.s32.totalorder %v5113_v27, 4294967295  ;;  %vm1122_vm3 = vcmp.eq.s32.totalorder %v5126_v34, 4294967295 }
 0x243   :  { %4012 = vmatpush3.bf16.msra.mxu0 %v4009_v45  ;;  %v5133_v45 = vsub.s32 %v5093_v22, %v4514_v8  ;;  %v5834_v8 = vand.u32 7, %v4598_v55 }
 0x244   :  { %v3695_v37 = vpop.f32.mrb[4].mxu1  ;;  %4014 = vmatprep.subr.bf16.mxu0 %v4013_v33 }
 0x245   :  { %v1055_v39 = vpop.f32.mrb[5].mxu1  ;;  %vm1123_vm7 = vcmp.eq.s32.totalorder %v5133_v45, 4294967295 }
 0x246   :  { %v3696_v49 = vpop.f32.mrb[6].mxu1 }
 0x247   :  { %v4021_v53 = vpack.c.bf16 %v3696_v49, %v3695_v37  ;;  %v1058_v56 = vpop.f32.mrb[7].mxu1  ;;  %4016 = vmatpush3.bf16.msra.mxu0 %v4013_v33  ;;  %v4281_v33 = vld [vmem:[%s5703_s3 + $0x148] sm:$0xff]   ;;  %v4282_v37 = vld [vmem:[%s5703_s3 + $0x150] sm:$0xff]   ;;  %v5148_v49 = vsub.s32 %v5093_v22, %v4552_v28 }
 0x248   :  { %v4017_v58 = vpack.c.bf16 %v1058_v56, %v1055_v39  ;;  %v5141_v39 = vsub.s32 %v5093_v22, %v4531_v19  ;;  %v5156_v56 = vsub.s32 %v5093_v22, %v4584_v47 }
 0x24a   :  { %4018 = vmatprep.subr.bf16.mxu0 %v4017_v58  ;;  %vm1124_vm14 = vcmp.eq.s32.totalorder %v5141_v39, 4294967295 }
 0x24b   :  { %4020 = vmatpush3.bf16.msra.mxu0 %v4017_v58  ;;  %v5163_v58 = vsub.s32 %v5093_v22, %v4598_v55 }
 0x24c   :  { %v3699_v59 = vpop.f32.mrb[8].mxu1  ;;  %4022 = vmatprep.subr.bf16.mxu0 %v4021_v53 }
 0x24d   :  { %v1071_v60 = vpop.f32.mrb[9].mxu1 }
 0x24e   :  { %v3700_v61 = vpop.f32.mrb[10].mxu1 }
 0x24f   :  { %v4029_v44 = vpack.c.bf16 %v3700_v61, %v3699_v59  ;;  %v1074_v6 = vpop.f32.mrb[11].mxu1  ;;  %4024 = vmatpush3.bf16.msra.mxu0 %v4021_v53  ;;  %v4283_v53 = vld [vmem:[%s5703_s3 + $0x158] sm:$0xff]   ;;  %v4284_v59 = vld [vmem:[%s5703_s3 + $0x160] sm:$0xff]   ;;  %v5178_v61 = vsub.s32 %v5093_v22, %v4648_v15 }
 0x250   :  { %v4025_v7 = vpack.c.bf16 %v1074_v6, %v1071_v60  ;;  %v5171_v60 = vsub.s32 %v5093_v22, %v4624_v3  ;;  %v5186_v6 = vsub.s32 %v5093_v22, %v4683_v36 }
 0x252   :  { %4026 = vmatprep.subr.bf16.mxu0 %v4025_v7  ;;  %5822 = vst [vmem:[#allocation2_spill] sm:$0xff] %v5186_v6 }
 0x253   :  { %4028 = vmatpush3.bf16.msra.mxu0 %v4025_v7  ;;  %v5193_v7 = vsub.s32 %v5093_v22, %v4697_v43 }
 0x254   :  { %v3703_v48 = vpop.f32.mrb[12].mxu1  ;;  %4030 = vmatprep.subr.bf16.mxu0 %v4029_v44 }
 0x255   :  { %v1087_v10 = vpop.f32.mrb[13].mxu1  ;;  %5823 = vst [vmem:[#allocation3_spill] sm:$0xff] %v5193_v7 }
 0x256   :  { %v3704_v23 = vpop.f32.mrb[14].mxu1 }
 0x257   :  { %v4037_v12 = vpack.c.bf16 %v3704_v23, %v3703_v48  ;;  %v1090_v13 = vpop.f32.mrb[15].mxu1  ;;  %4032 = vmatpush3.bf16.msra.mxu0 %v4029_v44  ;;  %v4285_v44 = vld [vmem:[%s5703_s3 + $0x168] sm:$0xff]   ;;  %v4286_v48 = vld [vmem:[%s5703_s3 + $0x170] sm:$0xff]   ;;  %v5208_v23 = vsub.s32 %v5093_v22, %v4746_v14 }
 0x258   :  { %v4033_v17 = vpack.c.bf16 %v1090_v13, %v1087_v10  ;;  %v5201_v10 = vsub.s32 %v5093_v22, %v4722_v63  ;;  %v4288_v22 = vld [vmem:[%s5703_s3 + $0x80] sm:$0xff]   ;;  %v4289_v13 = vld [vmem:[%s5703_s3 + $0x88] sm:$0xff]  }
 0x259   :  { %5825 = vst [vmem:[#allocation5_spill] sm:$0xff] %v5208_v23 }
 0x25a   :  { %4034 = vmatprep.subr.bf16.mxu0 %v4033_v17  ;;  %5824 = vst [vmem:[#allocation4_spill] sm:$0xff] %v5201_v10 }
 0x25b   :  { %4036 = vmatpush3.bf16.msra.mxu0 %v4033_v17  ;;  %v4290_v17 = vld [vmem:[%s5703_s3 + $0x90] sm:$0xff]  }
 0x25c   :  { %4038 = vmatprep.subr.bf16.mxu0 %v4037_v12 }
 0x25f   :  { %4040 = vmatpush3.bf16.msra.mxu0 %v4037_v12  ;;  %v4287_v12 = vld [vmem:[%s5703_s3 + $0x178] sm:$0xff]  }
 0x260   :  { %3857 = vmatprep.subr.bf16.mxu0 %v4280_v26 }
 0x262   :  { %3738 = vmatmul.mubr.msk.f32.vlgmr.msra.gmra.mrb[40].mxu0 %vm1119_vm0, %v5716_v25  ;;  %vm1125_vm0 = vcmp.eq.s32.totalorder %v5148_v49, 4294967295 }
 0x263   :  { %3858 = vmatpush3.bf16.msra.mxu0 %v4280_v26  ;;  %3740 = vmatprep.mubr.msk.f32.mxu0 %vm1120_vm1, %v5716_v25  ;;  %vm1126_vm1 = vcmp.eq.s32.totalorder %v5156_v56, 4294967295  ;;  %v4291_v26 = vld [vmem:[%s5703_s3 + $0x98] sm:$0xff]  }
 0x264   :  { %3859 = vmatprep.subr.bf16.mxu0 %v4281_v33 }
 0x266   :  { %3741 = vmatmul.mubr.msk.f32.gmra.mrb[42].mxu0 %vm1121_vm2, %v5716_v25  ;;  %vm1127_vm2 = vcmp.eq.s32.totalorder %v5163_v58, 4294967295 }
 0x267   :  { %3860 = vmatpush3.bf16.msra.mxu0 %v4281_v33  ;;  %3743 = vmatprep.mubr.msk.f32.mxu0 %vm1122_vm3, %v5716_v25  ;;  %vm1128_vm3 = vcmp.eq.s32.totalorder %v5171_v60, 4294967295  ;;  %v4292_v33 = vld [vmem:[%s5703_s3 + $0xa0] sm:$0xff]  }
 0x268   :  { %3861 = vmatprep.subr.bf16.mxu0 %v4282_v37 }
 0x26a   :  { %3744 = vmatmul.mubr.msk.f32.gmra.mrb[44].mxu0 %vm1123_vm7, %v5716_v25  ;;  %vm1129_vm7 = vcmp.eq.s32.totalorder %v5178_v61, 4294967295 }
 0x26b   :  { %3862 = vmatpush3.bf16.msra.mxu0 %v4282_v37  ;;  %3746 = vmatprep.mubr.msk.f32.mxu0 %vm1124_vm14, %v5716_v25  ;;  %vm1130_vm14 = vcmp.eq.s32.totalorder %v5186_v6, 4294967295  ;;  %v4293_v37 = vld [vmem:[%s5703_s3 + $0xa8] sm:$0xff]   ;;  %v4303_v6 = vld [vmem:[%s5703_s3 + $0x238] sm:$0xff]  }
 0x26c   :  { %3863 = vmatprep.subr.bf16.mxu0 %v4283_v53 }
 0x26e   :  { %3747 = vmatmul.mubr.msk.f32.gmra.mrb[46].mxu0 %vm1125_vm0, %v5716_v25  ;;  %vm1131_vm0 = vcmp.eq.s32.totalorder %v5193_v7, 4294967295 }
 0x26f   :  { %3864 = vmatpush3.bf16.msra.mxu0 %v4283_v53  ;;  %3749 = vmatprep.mubr.msk.f32.mxu0 %vm1126_vm1, %v5716_v25  ;;  %vm1132_vm1 = vcmp.eq.s32.totalorder %v5201_v10, 4294967295  ;;  %v4294_v53 = vld [vmem:[%s5703_s3 + $0xb0] sm:$0xff]  }
 0x270   :  { %3865 = vmatprep.subr.bf16.mxu0 %v4284_v59 }
 0x272   :  { %3750 = vmatmul.mubr.msk.f32.gmra.mrb[48].mxu0 %vm1127_vm2, %v5716_v25  ;;  %vm1133_vm2 = vcmp.eq.s32.totalorder %v5208_v23, 4294967295 }
 0x273   :  { %3866 = vmatpush3.bf16.msra.mxu0 %v4284_v59  ;;  %3752 = vmatprep.mubr.msk.f32.mxu0 %vm1128_vm3, %v5716_v25  ;;  %v4295_v59 = vld [vmem:[%s5703_s3 + $0xb8] sm:$0xff]  }
 0x274   :  { %3867 = vmatprep.subr.bf16.mxu0 %v4285_v44 }
 0x276   :  { %3753 = vmatmul.mubr.msk.f32.gmra.mrb[50].mxu0 %vm1129_vm7, %v5716_v25 }
 0x277   :  { %3868 = vmatpush3.bf16.msra.mxu0 %v4285_v44  ;;  %3755 = vmatprep.mubr.msk.f32.mxu0 %vm1130_vm14, %v5716_v25 }
 0x278   :  { %3869 = vmatprep.subr.bf16.mxu0 %v4286_v48 }
 0x27a   :  { %3756 = vmatmul.mubr.msk.f32.gmra.mrb[52].mxu0 %vm1131_vm0, %v5716_v25 }
 0x27b   :  { %3870 = vmatpush3.bf16.msra.mxu0 %v4286_v48  ;;  %3758 = vmatprep.mubr.msk.f32.mxu0 %vm1132_vm1, %v5716_v25  ;;  %v4296_v48 = vld [vmem:[%s5703_s3 + $0x200] sm:$0xff]  }
 0x27c   :  { %3871 = vmatprep.subr.bf16.mxu0 %v4287_v12 }
 0x27e   :  { %3759 = vmatmul.mubr.msk.f32.gmra.mrb[54].mxu0 %vm1133_vm2, %v5716_v25  ;;  %v4301_v25 = vld [vmem:[%s5703_s3 + $0x228] sm:$0xff]  }
 0x27f   :  { %3872 = vmatpush3.bf16.msra.mxu0 %v4287_v12  ;;  %3873 = vmatprep.mubr.msk.bf16.mxu0 %vm4526_vm6, %v4533_v20 }
 0x280   :  { %3889 = vmatprep.subr.bf16.mxu0 %v4288_v22 }
 0x282   :  { %3874 = vmatmul.mubr.msk.bf16.vlgmr.msra.gmra.mrb[56].mxu0 %vm4569_vm13, %v4577_v40 }
 0x283   :  { %3877 = vmatprep.mubr.msk.bf16.mxu0 %vm4619_vm4, %v4626_v4  ;;  %3890 = vmatpush3.bf16.msra.mxu0 %v4288_v22 }
 0x284   :  { %3891 = vmatprep.subr.bf16.mxu0 %v4289_v13 }
 0x287   :  { %3892 = vmatpush3.bf16.msra.mxu0 %v4289_v13 }
 0x288   :  { %3893 = vmatprep.subr.bf16.mxu0 %v4290_v17 }
 0x28a   :  { %3878 = vmatmul.mubr.msk.bf16.gmra.mrb[60].mxu0 %vm5816_vm5, %v4676_v32 }
 0x28b   :  { %3881 = vmatprep.mubr.msk.bf16.mxu0 %vm5817_vm15, %v4724_v0  ;;  %3894 = vmatpush3.bf16.msra.mxu0 %v4290_v17  ;;  %v4298_v17 = vld [vmem:[%s5703_s3 + $0x210] sm:$0xff]  }
 0x28c   :  { %3895 = vmatprep.subr.bf16.mxu0 %v4291_v26 }
 0x28f   :  { %3896 = vmatpush3.bf16.msra.mxu0 %v4291_v26 }
 0x290   :  { %3897 = vmatprep.subr.bf16.mxu0 %v4292_v33 }
 0x292   :  { %3882 = vmatmul.mubr.msk.bf16.gmra.mrb[64].mxu0 %vm5818_vm9, %v4777_v35 }
 0x293   :  { %3885 = vmatprep.mubr.msk.bf16.mxu0 %vm5819_vm11, %v4823_v16  ;;  %3898 = vmatpush3.bf16.msra.mxu0 %v4292_v33 }
 0x294   :  { %3899 = vmatprep.subr.bf16.mxu0 %v4293_v37 }
 0x297   :  { %3900 = vmatpush3.bf16.msra.mxu0 %v4293_v37 }
 0x298   :  { %3901 = vmatprep.subr.bf16.mxu0 %v4294_v53 }
 0x29a   :  { %3886 = vmatmul.mubr.msk.bf16.gmra.mrb[68].mxu0 %vm4858_vm12, %v4862_v51 }
 0x29b   :  { %3902 = vmatpush3.bf16.msra.mxu0 %v4294_v53  ;;  %3905 = vmatprep.mubr.msk.bf16.mxu0 %vm4864_vm10, %v4500_v1  ;;  %v4300_v53 = vld [vmem:[%s5703_s3 + $0x220] sm:$0xff]   ;;  %vm2443_vm10 = vcmp.eq.s32.totalorder %v5097_v24, 1  ;;  %v5726_v24 = vand.u32 7, %v4598_v55 }
 0x29c   :  { %v5269_v44 = vpop.f32.mrb[16].mxu1  ;;  %3903 = vmatprep.subr.bf16.mxu0 %v4295_v59 }
 0x29d   :  { %v5274_v12 = vpop.f32.mrb[17].mxu1 }
 0x29e   :  { %v5276_v22 = vpop.f32.mrb[18].mxu1 }
 0x29f   :  { %v5278_v13 = vpop.f32.mrb[19].mxu1  ;;  %3904 = vmatpush3.bf16.msra.mxu0 %v4295_v59 }
 0x2a0   :  { %3921 = vmatprep.subr.bf16.mxu0 %v4296_v48 }
 0x2a2   :  { %3906 = vmatmul.mubr.msk.bf16.vlgmr.msra.gmra.mrb[56].mxu0 %vm4526_vm6, %v4533_v20  ;;  %vm1312_vm6 = vcmp.ge.s32.totalorder %v1296_v30, 0 }
 0x2a3   :  { %3909 = vmatprep.mubr.msk.bf16.mxu0 %vm4569_vm13, %v4577_v40  ;;  %3922 = vmatpush3.bf16.msra.mxu0 %v4296_v48 }
 0x2a4   :  { %v5289_v1 = vpop.f32.mrb[20].mxu1  ;;  %3923 = vmatprep.subr.bf16.mxu0 %v4297_v52 }
 0x2a5   :  { %v5294_v26 = vpop.f32.mrb[21].mxu1 }
 0x2a6   :  { %v5296_v33 = vpop.f32.mrb[22].mxu1 }
 0x2a7   :  { %v5298_v37 = vpop.f32.mrb[23].mxu1  ;;  %3924 = vmatpush3.bf16.msra.mxu0 %v4297_v52 }
 0x2a8   :  { %3925 = vmatprep.subr.bf16.mxu0 %v4298_v17 }
 0x2aa   :  { %3910 = vmatmul.mubr.msk.bf16.gmra.mrb[60].mxu0 %vm4619_vm4, %v4626_v4 }
 0x2ab   :  { %3913 = vmatprep.mubr.msk.bf16.mxu0 %vm5816_vm5, %v4676_v32  ;;  %3926 = vmatpush3.bf16.msra.mxu0 %v4298_v17 }
 0x2ac   :  { %v5309_v20 = vpop.f32.mrb[24].mxu1  ;;  %3927 = vmatprep.subr.bf16.mxu0 %v4299_v18 }
 0x2ad   :  { %v5314_v59 = vpop.f32.mrb[25].mxu1 }
 0x2ae   :  { %v5316_v48 = vpop.f32.mrb[26].mxu1 }
 0x2af   :  { %v5318_v52 = vpop.f32.mrb[27].mxu1  ;;  %3928 = vmatpush3.bf16.msra.mxu0 %v4299_v18  ;;  %v4302_v18 = vld [vmem:[%s5703_s3 + $0x230] sm:$0xff]  }
 0x2b0   :  { %3929 = vmatprep.subr.bf16.mxu0 %v4300_v53 }
 0x2b2   :  { %3914 = vmatmul.mubr.msk.bf16.gmra.mrb[64].mxu0 %vm5817_vm15, %v4724_v0 }
 0x2b3   :  { %3917 = vmatprep.mubr.msk.bf16.mxu0 %vm5818_vm9, %v4777_v35  ;;  %3930 = vmatpush3.bf16.msra.mxu0 %v4300_v53 }
 0x2b4   :  { %v5329_v17 = vpop.f32.mrb[28].mxu1  ;;  %3931 = vmatprep.subr.bf16.mxu0 %v4301_v25 }
 0x2b5   :  { %v5334_v23 = vpop.f32.mrb[29].mxu1 }
 0x2b6   :  { %v5336_v10 = vpop.f32.mrb[30].mxu1 }
 0x2b7   :  { %v5338_v7 = vpop.f32.mrb[31].mxu1  ;;  %3932 = vmatpush3.bf16.msra.mxu0 %v4301_v25 }
 0x2b8   :  { %3933 = vmatprep.subr.bf16.mxu0 %v4302_v18 }
 0x2ba   :  { %3918 = vmatmul.mubr.msk.bf16.gmra.mrb[68].mxu0 %vm5819_vm11, %v4823_v16 }
 0x2bb   :  { %3934 = vmatpush3.bf16.msra.mxu0 %v4302_v18  ;;  %3937 = vmatprep.mubr.msk.bf16.mxu0 %vm4569_vm13, %v4577_v40  ;;  %v583_v40 = vand.u32 7, %v4479_v46  ;;  %v5722_v18 = vand.u32 7, %v4531_v19  ;;  %v5835_v46 = vand.u32 7, %v4584_v47  ;;  %v5836_v19 = vand.u32 7, %v4624_v3 }
 0x2bc   :  { %3935 = vmatprep.subr.bf16.mxu0 %v4303_v6 }
 0x2bf   :  { %3936 = vmatpush3.bf16.msra.mxu0 %v4303_v6  ;;  %v5724_v6 = vand.u32 7, %v4552_v28 }
 0x2c2   :  { %3938 = vmatmul.mubr.msk.bf16.vlgmr.msra.gmra.mrb[56].mxu0 %vm4619_vm4, %v4626_v4  ;;  %v5723_v4 = vand.u32 7, %v4487_v50  ;;  %vm1314_vm4 = vcmp.ge.s32.totalorder %v1298_v62, 0 }
 0x2c3   :  { %3941 = vmatprep.mubr.msk.bf16.mxu0 %vm5816_vm5, %v4676_v32  ;;  %v1295_v32 = vadd.s32 4294967295, %v583_v40  ;;  %vm2447_vm5 = vcmp.eq.s32.totalorder %v5126_v34, 1 }
 0x2c5   :  { %vm1311_vm13 = vcmp.ge.s32.totalorder %v1295_v32, 0  ;;  %v5826_v32 = vmov 1.0  }
 0x2c6   :  { %3991 = vmatprep.mubr.msk.f32.mxu1 %vm2447_vm5, %v5826_v32  ;;  %vm2449_vm5 = vcmp.eq.s32.totalorder %v5141_v39, 1  ;;  %v2621_v39 = vadd.s32 1, %v584_v38  ;;  %v2626_v38 = vadd.s32 1, %v5833_v57 }
 0x2ca   :  { %3942 = vmatmul.mubr.msk.bf16.gmra.mrb[60].mxu0 %vm5817_vm15, %v4724_v0  ;;  %v1297_v0 = vadd.s32 4294967295, %v5723_v4 }
 0x2cb   :  { %3945 = vmatprep.mubr.msk.bf16.mxu0 %vm5818_vm9, %v4777_v35  ;;  %v587_v35 = vand.u32 7, %v4507_v5  ;;  %v5521_v5 = vadd.s32 1, %v5835_v46 }
 0x2cd   :  { %v1299_v25 = vadd.s32 4294967295, %v587_v35 }
 0x2cf   :  { %vm1315_vm9 = vcmp.ge.s32.totalorder %v1299_v25, 0 }
 0x2d2   :  { %3946 = vmatmul.mubr.msk.bf16.gmra.mrb[64].mxu0 %vm5819_vm11, %v4823_v16 }
 0x2d3   :  { %3949 = vmatprep.mubr.msk.bf16.mxu0 %vm4858_vm12, %v4862_v51  ;;  %vm1313_vm12 = vcmp.ge.s32.totalorder %v1297_v0, 0  ;;  %v1300_v51 = vadd.s32 4294967295, %v588_v31  ;;  %v594_v0 = vand.u32 7, %v4648_v15 }
 0x2d5   :  { %vm1316_vm15 = vcmp.ge.s32.totalorder %v1300_v51, 0 }
 0x2da   :  { %3950 = vmatmul.mubr.msk.bf16.gmra.mrb[68].mxu0 %vm4965_vm8, %v4879_v9 }
 0x2db   :  { %3985 = vmatprep.mubr.msk.f32.mxu0 %vm2443_vm10, %v5826_v32  ;;  %vm2445_vm10 = vcmp.eq.s32.totalorder %v5113_v27, 1  ;;  %v5828_v27 = vld [vmem:[#allocation3_spill] sm:$0xff] }
 0x335   :  { %v3739_v11 = vpop.f32.mrb[40].mxu0 }
 0x336   :  { %v1392_v16 = vsel %vm1312_vm6, %v3739_v11, 0.0  ;;  %v1216_v42 = vpop.f32.mrb[41].mxu0 }
 0x337   :  { %v5387_v9 = vadd.f32 %v5278_v13, %v1392_v16  ;;  %v1391_v41 = vsel %vm1311_vm13, %v1216_v42, 0.0  ;;  %v1302_v16 = vadd.s32 4294967295, %v5724_v6  ;;  %v1301_v42 = vadd.s32 4294967295, %v5722_v18 }
 0x338   :  { %v5393_v53 = vadd.f32 %v5274_v12, %v1391_v41  ;;  %v5725_v41 = vand.u32 7, %v4584_v47 }
 0x339   :  { %v3742_v30 = vpop.f32.mrb[42].mxu0  ;;  %vm1318_vm11 = vcmp.ge.s32.totalorder %v1302_v16, 0  ;;  %vm1317_vm8 = vcmp.ge.s32.totalorder %v1301_v42, 0 }
 0x33a   :  { %v1394_v13 = vsel %vm1314_vm4, %v3742_v30, 0.0  ;;  %v1226_v62 = vpop.f32.mrb[43].mxu0  ;;  %vm2448_vm4 = vcmp.eq.s32.totalorder %v5133_v45, 1  ;;  %v5830_v45 = vld [vmem:[#allocation5_spill] sm:$0xff] }
 0x33b   :  { %v5401_v11 = vadd.f32 %v5276_v22, %v1394_v13  ;;  %v1393_v12 = vsel %vm1313_vm12, %v1226_v62, 0.0  ;;  %vm2444_vm12 = vcmp.eq.s32.totalorder %v5106_v21, 1  ;;  %v5827_v21 = vld [vmem:[#allocation2_spill] sm:$0xff] }
 0x33c   :  { %v5408_v34 = vadd.f32 %v5269_v44, %v1393_v12  ;;  %v1304_v44 = vadd.s32 4294967295, %v5726_v24  ;;  %v1303_v12 = vadd.s32 4294967295, %v5725_v41 }
 0x33d   :  { %v3745_v51 = vpop.f32.mrb[44].mxu0 }
 0x33e   :  { %v1396_v30 = vsel %vm1316_vm15, %v3745_v51, 0.0  ;;  %v1236_v22 = vpop.f32.mrb[45].mxu0  ;;  %v5727_v51 = vand.u32 7, %v4624_v3  ;;  %vm1320_vm3 = vcmp.ge.s32.totalorder %v1304_v44, 0  ;;  %vm1319_vm7 = vcmp.ge.s32.totalorder %v1303_v12, 0 }
 0x33f   :  { %v5415_v13 = vadd.f32 %v5298_v37, %v1396_v30  ;;  %v1395_v62 = vsel %vm1315_vm9, %v1236_v22, 0.0  ;;  %v1306_v37 = vadd.s32 4294967295, %v594_v0  ;;  %vm2446_vm15 = vcmp.eq.s32.totalorder %v5118_v29, 1  ;;  %v5829_v29 = vld [vmem:[#allocation4_spill] sm:$0xff] }
 0x340   :  { %v5420_v25 = vadd.f32 %v5294_v26, %v1395_v62  ;;  %v5729_v26 = vand.u32 7, %v4697_v43  ;;  %v1305_v22 = vadd.s32 4294967295, %v5727_v51  ;;  %vm2450_vm9 = vcmp.eq.s32.totalorder %v5148_v49, 1 }
 0x341   :  { %v3748_v18 = vpop.f32.mrb[46].mxu0  ;;  %vm1322_vm14 = vcmp.ge.s32.totalorder %v1306_v37, 0  ;;  %v2625_v49 = vadd.s32 1, %v588_v31  ;;  %v5517_v31 = vadd.s32 1, %v5834_v8 }
 0x342   :  { %v1398_v4 = vsel %vm1318_vm11, %v3748_v18, 0.0  ;;  %v1246_v6 = vpop.f32.mrb[47].mxu0  ;;  %v5728_v18 = vand.u32 7, %v4683_v36  ;;  %vm1321_vm0 = vcmp.ge.s32.totalorder %v1305_v22, 0  ;;  %vm2451_vm11 = vcmp.eq.s32.totalorder %v5156_v56, 1 }
 0x343   :  { %v5428_v16 = vadd.f32 %v5296_v33, %v1398_v4  ;;  %v1397_v30 = vsel %vm1317_vm8, %v1246_v6, 0.0  ;;  %v1308_v6 = vadd.s32 4294967295, %v5729_v26  ;;  %vm2452_vm8 = vcmp.eq.s32.totalorder %v5163_v58, 1 }
 0x344   :  { %v5432_v42 = vadd.f32 %v5289_v1, %v1397_v30  ;;  %v5731_v1 = vand.u32 7, %v4746_v14  ;;  %v1307_v12 = vadd.s32 4294967295, %v5728_v18  ;;  %v5730_v30 = vand.u32 7, %v4722_v63 }
 0x345   :  { %v3751_v62 = vpop.f32.mrb[48].mxu0  ;;  %vm1324_vm1 = vcmp.ge.s32.totalorder %v1308_v6, 0  ;;  %v2620_v56 = vadd.s32 1, %v583_v40  ;;  %v2624_v58 = vadd.s32 1, %v587_v35 }
 0x346   :  { %v1400_v41 = vsel %vm1320_vm3, %v3751_v62, 0.0  ;;  %v1256_v24 = vpop.f32.mrb[49].mxu0  ;;  %vm1323_vm2 = vcmp.ge.s32.totalorder %v1307_v12, 0  ;;  %v1309_v22 = vadd.s32 4294967295, %v5730_v30  ;;  %vm2453_vm3 = vcmp.eq.s32.totalorder %v5171_v60, 1 }
 0x347   :  { %v5438_v33 = vadd.f32 %v5318_v52, %v1400_v41  ;;  %v1399_v4 = vsel %vm1319_vm7, %v1256_v24, 0.0  ;;  %v1310_v41 = vadd.s32 4294967295, %v5731_v1  ;;  %vm2454_vm7 = vcmp.eq.s32.totalorder %v5178_v61, 1 }
 0x348   :  { %v5444_v44 = vadd.f32 %v5314_v59, %v1399_v4  ;;  %vm1325_vm13 = vcmp.ge.s32.totalorder %v1309_v22, 0  ;;  %v2623_v60 = vadd.s32 1, %v586_v2  ;;  %v5831_v61 = vand.u32 7, %v4552_v28 }
 0x349   :  { %v3754_v62 = vpop.f32.mrb[50].mxu0  ;;  %vm1326_vm6 = vcmp.ge.s32.totalorder %v1310_v41, 0  ;;  %v5534_v28 = vadd.s32 1, %v5836_v19 }
 0x34a   :  { %v1402_v37 = vsel %vm1322_vm14, %v3754_v62, 0.0  ;;  %v1266_v51 = vpop.f32.mrb[51].mxu0  ;;  %vm2455_vm14 = vcmp.eq.s32.totalorder %v5827_v21, 1 }
 0x34b   :  { %v5450_v52 = vadd.f32 %v5316_v48, %v1402_v37  ;;  %v1401_v24 = vsel %vm1321_vm0, %v1266_v51, 0.0  ;;  %vm2456_vm0 = vcmp.eq.s32.totalorder %v5828_v27, 1 }
 0x34c   :  { %v5455_v59 = vadd.f32 %v5309_v20, %v1401_v24 }
 0x34d   :  { %v3757_v4 = vpop.f32.mrb[52].mxu0 }
 0x34e   :  { %v1404_v18 = vsel %vm1324_vm1, %v3757_v4, 0.0  ;;  %v1276_v26 = vpop.f32.mrb[53].mxu0  ;;  %vm2457_vm1 = vcmp.eq.s32.totalorder %v5829_v29, 1 }
 0x34f   :  { %v5460_v62 = vadd.f32 %v5338_v7, %v1404_v18  ;;  %v1403_v48 = vsel %vm1323_vm2, %v1276_v26, 0.0  ;;  %vm2458_vm2 = vcmp.eq.s32.totalorder %v5830_v45, 1 }
 0x350   :  { %v5463_v51 = vadd.f32 %v5334_v23, %v1403_v48 }
 0x351   :  { %v3760_v6 = vpop.f32.mrb[54].mxu0 }
 0x352   :  { %v1406_v37 = vsel %vm1326_vm6, %v3760_v6, 0.0  ;;  %v1286_v20 = vpop.f32.mrb[55].mxu0  ;;  %vm2653_vm6 = vcmp.lt.s32.totalorder %v2621_v39, 8 }
 0x353   :  { %v5466_v12 = vadd.f32 %v5336_v10, %v1406_v37  ;;  %v1405_v24 = vsel %vm1325_vm13, %v1286_v20, 0.0  ;;  %vm2657_vm13 = vcmp.lt.s32.totalorder %v2625_v49, 8 }
 0x354   :  { %v5469_v30 = vadd.f32 %v5329_v17, %v1405_v24 }
 0x395   :  { %v3939_v4 = vpop.f32.mrb[56].mxu0 }
 0x396   :  { %v2364_v1 = vpop.f32.mrb[57].mxu0 }
 0x397   :  { %v3940_v7 = vpop.f32.mrb[58].mxu0 }
 0x398   :  { %v4045_v18 = vpack.c.bf16 %v3940_v7, %v3939_v4  ;;  %v2367_v26 = vpop.f32.mrb[59].mxu0 }
 0x399   :  { %v4041_v41 = vpack.c.bf16 %v2367_v26, %v2364_v1 }
 0x39b   :  { %4042 = vmatprep.subr.bf16.mxu0 %v4041_v41  ;;  %4073 = vmatprep.subr.bf16.mxu1 %v4041_v41 }
 0x39c   :  { %4044 = vmatpush3.bf16.msra.mxu0 %v4041_v41  ;;  %4081 = vmatpush3.bf16.msra.mxu1 %v4041_v41 }
 0x39d   :  { %v3943_v23 = vpop.f32.mrb[60].mxu0  ;;  %4046 = vmatprep.subr.bf16.mxu0 %v4045_v18  ;;  %4074 = vmatprep.subr.bf16.mxu1 %v4045_v18 }
 0x39e   :  { %v2380_v22 = vpop.f32.mrb[61].mxu0 }
 0x39f   :  { %v3944_v10 = vpop.f32.mrb[62].mxu0 }
 0x3a0   :  { %v4053_v48 = vpack.c.bf16 %v3944_v10, %v3943_v23  ;;  %v2383_v6 = vpop.f32.mrb[63].mxu0  ;;  %4048 = vmatpush3.bf16.msra.mxu0 %v4045_v18  ;;  %4082 = vmatpush3.bf16.msra.mxu1 %v4045_v18 }
 0x3a1   :  { %v4049_v17 = vpack.c.bf16 %v2383_v6, %v2380_v22 }
 0x3a3   :  { %4050 = vmatprep.subr.bf16.mxu0 %v4049_v17  ;;  %4075 = vmatprep.subr.bf16.mxu1 %v4049_v17 }
 0x3a4   :  { %4052 = vmatpush3.bf16.msra.mxu0 %v4049_v17  ;;  %4083 = vmatpush3.bf16.msra.mxu1 %v4049_v17 }
 0x3a5   :  { %v3947_v37 = vpop.f32.mrb[64].mxu0  ;;  %4054 = vmatprep.subr.bf16.mxu0 %v4053_v48  ;;  %4076 = vmatprep.subr.bf16.mxu1 %v4053_v48 }
 0x3a6   :  { %v2396_v1 = vpop.f32.mrb[65].mxu0 }
 0x3a7   :  { %v3948_v20 = vpop.f32.mrb[66].mxu0 }
 0x3a8   :  { %v4061_v24 = vpack.c.bf16 %v3948_v20, %v3947_v37  ;;  %v2399_v4 = vpop.f32.mrb[67].mxu0  ;;  %4056 = vmatpush3.bf16.msra.mxu0 %v4053_v48  ;;  %4084 = vmatpush3.bf16.msra.mxu1 %v4053_v48  ;;  %v2627_v48 = vadd.s32 1, %v5831_v61  ;;  %v2776_v20 = vld [vmem:[%s5706_s5 + $0x28] sm:$0xff] }
 0x3a9   :  { %v4057_v7 = vpack.c.bf16 %v2399_v4, %v2396_v1  ;;  %v2772_v1 = vld [vmem:[%s5706_s5 + $0x8] sm:$0xff] }
 0x3ab   :  { %4058 = vmatprep.subr.bf16.mxu0 %v4057_v7  ;;  %4077 = vmatprep.subr.bf16.mxu1 %v4057_v7 }
 0x3ac   :  { %4060 = vmatpush3.bf16.msra.mxu0 %v4057_v7  ;;  %4085 = vmatpush3.bf16.msra.mxu1 %v4057_v7  ;;  %v2771_v7 = vld [vmem:[%s5706_s5] sm:$0xff] }
 0x3ad   :  { %v3951_v18 = vpop.f32.mrb[68].mxu0  ;;  %4062 = vmatprep.subr.bf16.mxu0 %v4061_v24  ;;  %4078 = vmatprep.subr.bf16.mxu1 %v4061_v24 }
 0x3ae   :  { %v2412_v26 = vpop.f32.mrb[69].mxu0 }
 0x3af   :  { %v3952_v41 = vpop.f32.mrb[70].mxu0 }
 0x3b0   :  { %v4069_v23 = vpack.c.bf16 %v3952_v41, %v3951_v18  ;;  %v2415_v22 = vpop.f32.mrb[71].mxu0  ;;  %4064 = vmatpush3.bf16.msra.mxu0 %v4061_v24  ;;  %4086 = vmatpush3.bf16.msra.mxu1 %v4061_v24  ;;  %v2775_v18 = vld [vmem:[%s5706_s5 + $0x20] sm:$0xff] }
 0x3b1   :  { %v4065_v10 = vpack.c.bf16 %v2415_v22, %v2412_v26 }
 0x3b3   :  { %4066 = vmatprep.subr.bf16.mxu0 %v4065_v10  ;;  %4079 = vmatprep.subr.bf16.mxu1 %v4065_v10 }
 0x3b4   :  { %4068 = vmatpush3.bf16.msra.mxu0 %v4065_v10  ;;  %4087 = vmatpush3.bf16.msra.mxu1 %v4065_v10 }
 0x3b5   :  { %4070 = vmatprep.subr.bf16.mxu0 %v4069_v23  ;;  %4080 = vmatprep.subr.bf16.mxu1 %v4069_v23 }
 0x3b8   :  { %4072 = vmatpush3.bf16.msra.mxu0 %v4069_v23  ;;  %4088 = vmatpush3.bf16.msra.mxu1 %v4069_v23  ;;  %v5838_v23 = vand.u32 7, %v4683_v36 }
 0x3ba   :  { %v5566_v22 = vadd.s32 1, %v5838_v23 }
 0x3bb   :  { %3986 = vmatmul.mubr.msk.f32.vlgmr.msra.gmra.mrb[72].mxu0 %vm2444_vm12, %v5826_v32  ;;  %3992 = vmatmul.mubr.msk.f32.vlgmr.msra.gmra.mrb[32].mxu1 %vm2448_vm4, %v5826_v32  ;;  %vm2652_vm4 = vcmp.lt.s32.totalorder %v2620_v56, 8  ;;  %vm2656_vm12 = vcmp.lt.s32.totalorder %v2624_v58, 8 }
 0x3bc   :  { %3988 = vmatprep.mubr.msk.f32.mxu0 %vm2445_vm10, %v5826_v32  ;;  %3994 = vmatprep.mubr.msk.f32.mxu1 %vm2449_vm5, %v5826_v32  ;;  %vm2655_vm10 = vcmp.lt.s32.totalorder %v2623_v60, 8  ;;  %vm2659_vm5 = vcmp.lt.s32.totalorder %v2627_v48, 8  ;;  %v2778_v60 = vld [vmem:[%s5706_s5 + $0x38] sm:$0xff] }
 0x3bf   :  { %3989 = vmatmul.mubr.msk.f32.gmra.mrb[74].mxu0 %vm2446_vm15, %v5826_v32  ;;  %3995 = vmatmul.mubr.msk.f32.gmra.mrb[34].mxu1 %vm2450_vm9, %v5826_v32  ;;  %vm2658_vm9 = vcmp.lt.s32.totalorder %v2626_v38, 8 }
 0x3c0   :  { %3997 = vmatprep.mubr.msk.f32.mxu1 %vm2451_vm11, %v5826_v32  ;;  %vm2661_vm11 = vcmp.lt.s32.totalorder %v5517_v31, 8 }
 0x3c3   :  { %3998 = vmatmul.mubr.msk.f32.gmra.mrb[36].mxu1 %vm2452_vm8, %v5826_v32  ;;  %vm2660_vm8 = vcmp.lt.s32.totalorder %v5521_v5, 8  ;;  %v2780_v5 = vld [vmem:[%s5706_s5 + $0x48] sm:$0xff] }
 0x3c4   :  { %4000 = vmatprep.mubr.msk.f32.mxu1 %vm2453_vm3, %v5826_v32 }
 0x3c7   :  { %4001 = vmatmul.mubr.msk.f32.gmra.mrb[38].mxu1 %vm2454_vm7, %v5826_v32  ;;  %vm2662_vm7 = vcmp.lt.s32.totalorder %v5534_v28, 8  ;;  %v5840_v28 = vand.u32 7, %v4722_v63 }
 0x3c8   :  { %4003 = vmatprep.mubr.msk.f32.mxu1 %vm2455_vm14, %v5826_v32 }
 0x3cb   :  { %4004 = vmatmul.mubr.msk.f32.gmra.mrb[40].mxu1 %vm2456_vm0, %v5826_v32  ;;  %vm2664_vm0 = vcmp.lt.s32.totalorder %v5566_v22, 8  ;;  %v2783_v22 = vld [vmem:[%s5706_s5 + $0x60] sm:$0xff] }
 0x3cc   :  { %4006 = vmatprep.mubr.msk.f32.mxu1 %vm2457_vm1, %v5826_v32 }
 0x3cf   :  { %4007 = vmatmul.mubr.msk.f32.gmra.mrb[42].mxu1 %vm2458_vm2, %v5826_v32  ;;  %v5832_v32 = vand.u32 7, %v4487_v50  ;;  %v5530_v50 = vadd.s32 1, %v594_v0 }
 0x3d1   :  { %v2622_v6 = vadd.s32 1, %v5832_v32  ;;  %vm2663_vm3 = vcmp.lt.s32.totalorder %v5530_v50, 8  ;;  %v2774_v32 = vld [vmem:[%s5706_s5 + $0x18] sm:$0xff] }
 0x3d3   :  { %vm2654_vm15 = vcmp.lt.s32.totalorder %v2622_v6, 8 }
 0x48e   :  { %v3987_v47 = vpop.f32.mrb[72].mxu0  ;;  %v3993_v55 = vpop.f32.mrb[32].mxu1 }
 0x48f   :  { %v2717_v40 = vsel %vm2653_vm6, %v3987_v47, 0.0  ;;  %v2721_v2 = vsel %vm2657_vm13, %v3993_v55, 0.0  ;;  %v2541_v35 = vpop.f32.mrb[73].mxu0  ;;  %v2561_v17 = vpop.f32.mrb[33].mxu1 }
 0x490   :  { %v2733_v15 = vadd.f32 %v2717_v40, %v5387_v9  ;;  %v2737_v3 = vadd.f32 %v2721_v2, %v5415_v13  ;;  %v2716_v0 = vsel %vm2652_vm4, %v2541_v35, 0.0  ;;  %v2720_v37 = vsel %vm2656_vm12, %v2561_v17, 0.0  ;;  %v2773_v17 = vld [vmem:[%s5706_s5 + $0x10] sm:$0xff] }
 0x491   :  { %v2732_v24 = vadd.f32 %v2716_v0, %v5393_v53  ;;  %v2736_v4 = vadd.f32 %v2720_v37, %v5420_v25  ;;  %v5837_v25 = vand.u32 7, %v4697_v43 }
 0x492   :  { %v2756_v9 = vadd.f32 %v5526_v54, %v2733_v15  ;;  %v2760_v13 = vadd.f32 %v5526_v54, %v2737_v3  ;;  %v3990_v26 = vpop.f32.mrb[74].mxu0  ;;  %v3996_v53 = vpop.f32.mrb[34].mxu1 }
 0x493   :  { %v5562_v41 = vadd.s32 1, %v5837_v25  ;;  %v2755_v10 = vadd.f32 %v5526_v54, %v2732_v24  ;;  %v2759_v21 = vadd.f32 %v5526_v54, %v2736_v4  ;;  %v2719_v27 = vsel %vm2655_vm10, %v3990_v26, 0.0  ;;  %v2551_v45 = vpop.f32.mrb[75].mxu0  ;;  %v2571_v39 = vpop.f32.mrb[35].mxu1  ;;  %v2779_v24 = vld [vmem:[%s5706_s5 + $0x40] sm:$0xff] }
 0x494   :  { %v2723_v29 = vsel %vm2659_vm5, %v3996_v53, 0.0  ;;  %v2788_v49 = vadd.f32 %v2772_v1, %v2756_v9  ;;  %v2792_v56 = vadd.f32 %v2776_v20, %v2760_v13  ;;  %v2735_v43 = vadd.f32 %v2719_v27, %v5401_v11 }
 0x495   :  { %v2739_v58 = vadd.f32 %v2723_v29, %v5428_v16  ;;  %v2787_v61 = vadd.f32 %v2771_v7, %v2755_v10  ;;  %v2791_v36 = vadd.f32 %v2775_v18, %v2759_v21  ;;  %v2718_v48 = vsel %vm2654_vm15, %v2551_v45, 0.0  ;;  %v2782_v29 = vld [vmem:[%s5706_s5 + $0x58] sm:$0xff] }
 0x496   :  { %v2722_v57 = vsel %vm2658_vm9, %v2571_v39, 0.0  ;;  %v2804_v8 = vmax.f32 %v2788_v49, 0.0  ;;  %v2808_v46 = vmax.f32 %v2792_v56, 0.0  ;;  %v2758_v11 = vadd.f32 %v5526_v54, %v2735_v43  ;;  %v3999_v19 = vpop.f32.mrb[36].mxu1  ;;  %v2781_v56 = vld [vmem:[%s5706_s5 + $0x50] sm:$0xff] }
 0x497   :  { %v2762_v16 = vadd.f32 %v5526_v54, %v2739_v58  ;;  %v2803_v47 = vmax.f32 %v2787_v61, 0.0  ;;  %v2807_v55 = vmax.f32 %v2791_v36, 0.0  ;;  %v2734_v40 = vadd.f32 %v2718_v48, %v5408_v34  ;;  %v2581_v35 = vpop.f32.mrb[37].mxu1  ;;  %v2777_v34 = vld [vmem:[%s5706_s5 + $0x30] sm:$0xff] }
 0x498   :  { %v2738_v2 = vadd.f32 %v2722_v57, %v5432_v42  ;;  %2820 = vst [vmem:[%s5707_s6 + $0x8] sm:$0xff] %v2804_v8  ;;  %2824 = vst [vmem:[%s5707_s6 + $0x28] sm:$0xff] %v2808_v46  ;;  %v2790_v6 = vadd.f32 %v2774_v32, %v2758_v11  ;;  %v2725_v42 = vsel %vm2661_vm11, %v3999_v19, 0.0  ;;  %v2724_v15 = vsel %vm2660_vm8, %v2581_v35, 0.0 }
 0x499   :  { %v2794_v38 = vadd.f32 %v2778_v60, %v2762_v16  ;;  %2819 = vst [vmem:[%s5707_s6] sm:$0xff] %v2803_v47  ;;  %2823 = vst [vmem:[%s5707_s6 + $0x20] sm:$0xff] %v2807_v55  ;;  %v2757_v3 = vadd.f32 %v5526_v54, %v2734_v40  ;;  %v2741_v37 = vadd.f32 %v2725_v42, %v5438_v33  ;;  %v5839_v9 = vand.u32 7, %v4746_v14  ;;  %v2786_v40 = vld [vmem:[%s5706_s5 + $0x78] sm:$0xff] }
 0x49a   :  { %v2761_v0 = vadd.f32 %v5526_v54, %v2738_v2  ;;  %v2740_v31 = vadd.f32 %v2724_v15, %v5444_v44  ;;  %v2806_v1 = vmax.f32 %v2790_v6, 0.0  ;;  %v4002_v4 = vpop.f32.mrb[38].mxu1  ;;  %vm2665_vm14 = vcmp.lt.s32.totalorder %v5562_v41, 8  ;;  %v2784_v41 = vld [vmem:[%s5706_s5 + $0x68] sm:$0xff] }
 0x49b   :  { %v2810_v20 = vmax.f32 %v2794_v38, 0.0  ;;  %v2635_v13 = vadd.s32 1, %v5839_v9  ;;  %v2789_v7 = vadd.f32 %v2773_v17, %v2757_v3  ;;  %v2764_v33 = vadd.f32 %v5526_v54, %v2741_v37  ;;  %v2591_v26 = vpop.f32.mrb[39].mxu1  ;;  %v2785_v17 = vld [vmem:[%s5706_s5 + $0x70] sm:$0xff] }
 0x49c   :  { %v2793_v18 = vadd.f32 %v2777_v34, %v2761_v0  ;;  %v2763_v44 = vadd.f32 %v5526_v54, %v2740_v31  ;;  %2822 = vst [vmem:[%s5707_s6 + $0x18] sm:$0xff] %v2806_v1  ;;  %v2727_v53 = vsel %vm2663_vm3, %v4002_v4, 0.0  ;;  %v2726_v14 = vsel %vm2662_vm7, %v2591_v26, 0.0 }
 0x49d   :  { %2826 = vst [vmem:[%s5707_s6 + $0x38] sm:$0xff] %v2810_v20  ;;  %v2805_v25 = vmax.f32 %v2789_v7, 0.0  ;;  %v2796_v10 = vadd.f32 %v2780_v5, %v2764_v33  ;;  %v2743_v27 = vadd.f32 %v2727_v53, %v5450_v52  ;;  %v2742_v50 = vadd.f32 %v2726_v14, %v5455_v59 }
 0x49e   :  { %v2809_v23 = vmax.f32 %v2793_v18, 0.0  ;;  %v2795_v21 = vadd.f32 %v2779_v24, %v2763_v44  ;;  %v4005_v45 = vpop.f32.mrb[40].mxu1  ;;  %v2634_v39 = vadd.s32 1, %v5840_v28  ;;  %vm2667_vm1 = vcmp.lt.s32.totalorder %v2635_v13, 8 }
 0x49f   :  { %2821 = vst [vmem:[%s5707_s6 + $0x10] sm:$0xff] %v2805_v25  ;;  %v2812_v49 = vmax.f32 %v2796_v10, 0.0  ;;  %v2729_v59 = vsel %vm2665_vm14, %v4005_v45, 0.0  ;;  %v2601_v43 = vpop.f32.mrb[41].mxu1  ;;  %v2766_v63 = vadd.f32 %v5526_v54, %v2743_v27  ;;  %v2765_v58 = vadd.f32 %v5526_v54, %v2742_v50 }
 0x4a0   :  { %2825 = vst [vmem:[%s5707_s6 + $0x30] sm:$0xff] %v2809_v23  ;;  %v2811_v52 = vmax.f32 %v2795_v21, 0.0  ;;  %v2745_v61 = vadd.f32 %v2729_v59, %v5460_v62  ;;  %v2728_v36 = vsel %vm2664_vm0, %v2601_v43, 0.0  ;;  %vm2666_vm2 = vcmp.lt.s32.totalorder %v2634_v39, 8 }
 0x4a1   :  { %2828 = vst [vmem:[%s5707_s6 + $0x48] sm:$0xff] %v2812_v49  ;;  %v2744_v32 = vadd.f32 %v2728_v36, %v5463_v51  ;;  %v2798_v60 = vadd.f32 %v2782_v29, %v2766_v63  ;;  %v2797_v48 = vadd.f32 %v2781_v56, %v2765_v58 }
 0x4a2   :  { %2827 = vst [vmem:[%s5707_s6 + $0x40] sm:$0xff] %v2811_v52  ;;  %v2768_v62 = vadd.f32 %v5526_v54, %v2745_v61  ;;  %v4008_v57 = vpop.f32.mrb[42].mxu1 }
 0x4a3   :  { %v2767_v8 = vadd.f32 %v5526_v54, %v2744_v32  ;;  %v2731_v46 = vsel %vm2667_vm1, %v4008_v57, 0.0  ;;  %v2611_v11 = vpop.f32.mrb[43].mxu1  ;;  %v2814_v16 = vmax.f32 %v2798_v60, 0.0  ;;  %v2813_v19 = vmax.f32 %v2797_v48, 0.0 }
 0x4a4   :  { %v2800_v47 = vadd.f32 %v2784_v41, %v2768_v62  ;;  %v2747_v51 = vadd.f32 %v2731_v46, %v5466_v12  ;;  %v2730_v2 = vsel %vm2666_vm2, %v2611_v11, 0.0 }
 0x4a5   :  { %v2799_v55 = vadd.f32 %v2783_v22, %v2767_v8  ;;  %2830 = vst [vmem:[%s5707_s6 + $0x58] sm:$0xff] %v2814_v16  ;;  %2829 = vst [vmem:[%s5707_s6 + $0x50] sm:$0xff] %v2813_v19  ;;  %v2746_v38 = vadd.f32 %v2730_v2, %v5469_v30 }
 0x4a6   :  { %v2816_v35 = vmax.f32 %v2800_v47, 0.0  ;;  %v2770_v6 = vadd.f32 %v5526_v54, %v2747_v51 }
 0x4a7   :  { %v2815_v12 = vmax.f32 %v2799_v55, 0.0  ;;  %v2769_v42 = vadd.f32 %v5526_v54, %v2746_v38 }
 0x4a8   :  { %2832 = vst [vmem:[%s5707_s6 + $0x68] sm:$0xff] %v2816_v35  ;;  %v2802_v34 = vadd.f32 %v2786_v40, %v2770_v6 }
 0x4a9   :  { %2831 = vst [vmem:[%s5707_s6 + $0x60] sm:$0xff] %v2815_v12  ;;  %v2801_v3 = vadd.f32 %v2785_v17, %v2769_v42 }
 0x4aa   :  { %v2818_v15 = vmax.f32 %v2802_v34, 0.0 }
 0x4ab   :  { %v2817_v30 = vmax.f32 %v2801_v3, 0.0 }
 0x4ac   :  { %2834 = vst [vmem:[%s5707_s6 + $0x78] sm:$0xff] %v2818_v15 }
 0x4ad   :  { %2833 = vst [vmem:[%s5707_s6 + $0x70] sm:$0xff] %v2817_v30 }

// kernel: forward.2
= control target key start
LH: loop header
LB: loop body
LE: loop exit
PB: predicated region body
PF: predicated region fallthrough
CT: control target
= control target key end

     0   :  { %v12692_v0 = vmov 0   ;;  %s17409_s1 = inlined_call_operand.vmem [shape: bf16[256,128], index: 1, kind: input, shape index: {}]   ;;  %s17410_s0 = inlined_call_operand.vmem [shape: bf16[576,256], index: 0, kind: input, shape index: {}]   ;;  %s17411_s3 = inlined_call_operand.vmem [shape: bf16[9,128,128], index: 3, kind: input, shape index: {}]   ;;  %s17412_s2 = inlined_call_operand.vmem [shape: f32[1,128], index: 2, kind: input, shape index: {}]   ;;  %s17413_s4 = inlined_call_operand.vmem [shape: f32[1,128], index: 4, kind: input, shape index: {}]   ;;  %s17414_s5 = inlined_call_operand.vmem [shape: f32[512,128], index: 5, kind: input, shape index: {}]   ;;  %s17415_s6 = inlined_call_operand.vmem [shape: f32[512,128], index: 6, kind: output, shape index: {}]  }
   0x1   :  { %591 = vmatprep.subr.bf16.mxu0 %v12692_v0  ;;  %v12494_v1 = vld [vmem:[%s17409_s1] sm:$0xff]   ;;  %v12495_v2 = vld [vmem:[%s17409_s1 + $0x8] sm:$0xff]   ;;  %v12496_v3 = vld [vmem:[%s17409_s1 + $0x10] sm:$0xff]  }
   0x2   :  { %592 = vmatpush1.bf16.msra.mxu0 %v12494_v1  ;;  %v12497_v4 = vld [vmem:[%s17409_s1 + $0x18] sm:$0xff]   ;;  %v12498_v5 = vld [vmem:[%s17409_s1 + $0x20] sm:$0xff]   ;;  %v12499_v7 = vld [vmem:[%s17409_s1 + $0x28] sm:$0xff]  }
   0x3   :  { %593 = vmatprep.subr.bf16.mxu0 %v12692_v0  ;;  %v12512_v6 = vld [vmem:[%s17410_s0 + $0x4] ss:$8 sps:$4 sm:$0xff]   ;;  %v12500_v8 = vld [vmem:[%s17409_s1 + $0x30] sm:$0xff]   ;;  %v12501_v9 = vld [vmem:[%s17409_s1 + $0x38] sm:$0xff]  }
   0x4   :  { %623 = vmatprep.mubr.bf16.mxu0 %v12512_v6  ;;  %v12502_v10 = vld [vmem:[%s17409_s1 + $0x40] sm:$0xff]   ;;  %v12503_v11 = vld [vmem:[%s17409_s1 + $0x48] sm:$0xff]   ;;  %v12504_v12 = vld [vmem:[%s17409_s1 + $0x50] sm:$0xff]  }
   0x5   :  { %v12505_v13 = vld [vmem:[%s17409_s1 + $0x58] sm:$0xff]   ;;  %v12506_v14 = vld [vmem:[%s17409_s1 + $0x60] sm:$0xff]   ;;  %v12507_v15 = vld [vmem:[%s17409_s1 + $0x68] sm:$0xff]  }
   0x6   :  { %594 = vmatpush1.bf16.msra.mxu0 %v12495_v2  ;;  %v12508_v16 = vld [vmem:[%s17409_s1 + $0x70] sm:$0xff]   ;;  %v12509_v17 = vld [vmem:[%s17409_s1 + $0x78] sm:$0xff]   ;;  %v12510_v18 = vld [vmem:[%s17410_s0] ss:$8 sps:$4 sm:$0xff]  }
   0x7   :  { %595 = vmatprep.subr.bf16.mxu0 %v12692_v0  ;;  %v12513_v19 = vld [vmem:[%s17410_s0 + $0x14] ss:$8 sps:$4 sm:$0xff]   ;;  %v12515_v20 = vld [vmem:[%s17410_s0 + $0x10] ss:$8 sps:$4 sm:$0xff]   ;;  %v12516_v21 = vld [vmem:[%s17410_s0 + $0x24] ss:$8 sps:$4 sm:$0xff]  }
   0x8   :  { %v12518_v22 = vld [vmem:[%s17410_s0 + $0x20] ss:$8 sps:$4 sm:$0xff]   ;;  %v12519_v23 = vld [vmem:[%s17410_s0 + $0x34] ss:$8 sps:$4 sm:$0xff]   ;;  %v12521_v24 = vld [vmem:[%s17410_s0 + $0x30] ss:$8 sps:$4 sm:$0xff]  }
   0x9   :  { %v12522_v25 = vld [vmem:[%s17410_s0 + $0x44] ss:$8 sps:$4 sm:$0xff]   ;;  %v12524_v26 = vld [vmem:[%s17410_s0 + $0x40] ss:$8 sps:$4 sm:$0xff]   ;;  %v12525_v27 = vld [vmem:[%s17410_s0 + $0x54] ss:$8 sps:$4 sm:$0xff]  }
   0xa   :  { %596 = vmatpush1.bf16.msra.mxu0 %v12496_v3  ;;  %v12527_v28 = vld [vmem:[%s17410_s0 + $0x50] ss:$8 sps:$4 sm:$0xff]   ;;  %v12528_v29 = vld [vmem:[%s17410_s0 + $0x64] ss:$8 sps:$4 sm:$0xff]   ;;  %v12530_v30 = vld [vmem:[%s17410_s0 + $0x60] ss:$8 sps:$4 sm:$0xff]  }
   0xb   :  { %597 = vmatprep.subr.bf16.mxu0 %v12692_v0  ;;  %v12531_v31 = vld [vmem:[%s17410_s0 + $0x74] ss:$8 sps:$4 sm:$0xff]   ;;  %v12533_v32 = vld [vmem:[%s17410_s0 + $0x70] ss:$8 sps:$4 sm:$0xff]   ;;  %v12534_v33 = vld [vmem:[%s17410_s0 + $0x84] ss:$8 sps:$4 sm:$0xff]  }
   0xc   :  { %v12536_v34 = vld [vmem:[%s17410_s0 + $0x80] ss:$8 sps:$4 sm:$0xff]   ;;  %v12537_v35 = vld [vmem:[%s17410_s0 + $0x94] ss:$8 sps:$4 sm:$0xff]   ;;  %v12539_v36 = vld [vmem:[%s17410_s0 + $0x90] ss:$8 sps:$4 sm:$0xff]  }
   0xd   :  { %v12540_v37 = vld [vmem:[%s17410_s0 + $0xa4] ss:$8 sps:$4 sm:$0xff]   ;;  %v12542_v38 = vld [vmem:[%s17410_s0 + $0xa0] ss:$8 sps:$4 sm:$0xff]   ;;  %v12543_v39 = vld [vmem:[%s17410_s0 + $0xb4] ss:$8 sps:$4 sm:$0xff]  }
   0xe   :  { %598 = vmatpush1.bf16.msra.mxu0 %v12497_v4  ;;  %v12545_v40 = vld [vmem:[%s17410_s0 + $0xb0] ss:$8 sps:$4 sm:$0xff]   ;;  %v12591_v41 = vld [vmem:[%s17411_s3 + $0xc0] sm:$0xff]   ;;  %v12595_v43 = vld [vmem:[%s17411_s3 + $0xc8] sm:$0xff]  }
   0xf   :  { %599 = vmatprep.subr.bf16.mxu0 %v12692_v0  ;;  %10930 = vmatprep.subr.bf16.mxu1 %v12591_v41  ;;  %v12546_v42 = vld [vmem:[%s17410_s0 + $0xc4] ss:$8 sps:$4 sm:$0xff]   ;;  %v12548_v44 = vld [vmem:[%s17410_s0 + $0xc0] ss:$8 sps:$4 sm:$0xff]   ;;  %v12596_v45 = vld [vmem:[%s17411_s3 + $0xd0] sm:$0xff]  }
  0x10   :  { %10931 = vmatpush3.bf16.msra.mxu1 %v12591_v41  ;;  %v12549_v46 = vld [vmem:[%s17410_s0 + $0xd4] ss:$8 sps:$4 sm:$0xff]   ;;  %v12601_v48 = vld [vmem:[%s17411_s3 + $0xe0] sm:$0xff]   ;;  %v12551_v49 = vld [vmem:[%s17410_s0 + $0xd0] ss:$8 sps:$4 sm:$0xff]  }
  0x11   :  { %10932 = vmatprep.subr.bf16.mxu1 %v12595_v43  ;;  %v12600_v47 = vld [vmem:[%s17411_s3 + $0xd8] sm:$0xff]   ;;  %v12552_v50 = vld [vmem:[%s17410_s0 + $0xe4] ss:$8 sps:$4 sm:$0xff]   ;;  %v12606_v52 = vld [vmem:[%s17411_s3 + $0xf0] sm:$0xff]  }
  0x12   :  { %600 = vmatpush1.bf16.msra.mxu0 %v12498_v5  ;;  %v12605_v51 = vld [vmem:[%s17411_s3 + $0xe8] sm:$0xff]   ;;  %v12555_v54 = vld [vmem:[%s17410_s0 + $0xf4] ss:$8 sps:$4 sm:$0xff]   ;;  %v12557_v56 = vld [vmem:[%s17410_s0 + $0xf0] ss:$8 sps:$4 sm:$0xff]  }
  0x13   :  { %601 = vmatprep.subr.bf16.mxu0 %v12692_v0  ;;  %v12554_v53 = vld [vmem:[%s17410_s0 + $0xe0] ss:$8 sps:$4 sm:$0xff]   ;;  %v12610_v55 = vld [vmem:[%s17411_s3 + $0xf8] sm:$0xff]   ;;  %v12558_v57 = vld [vmem:[%s17410_s0 + $0x104] ss:$8 sps:$4 sm:$0xff]  }
  0x14   :  { %10933 = vmatpush3.bf16.msra.mxu1 %v12595_v43  ;;  %v12560_v58 = vld [vmem:[%s17410_s0 + $0x100] ss:$8 sps:$4 sm:$0xff]   ;;  %v12561_v59 = vld [vmem:[%s17410_s0 + $0x114] ss:$8 sps:$4 sm:$0xff]   ;;  %v12563_v60 = vld [vmem:[%s17410_s0 + $0x110] ss:$8 sps:$4 sm:$0xff]  }
  0x15   :  { %10934 = vmatprep.subr.bf16.mxu1 %v12596_v45  ;;  %v12564_v61 = vld [vmem:[%s17410_s0 + $0x124] ss:$8 sps:$4 sm:$0xff]   ;;  %v12566_v62 = vld [vmem:[%s17410_s0 + $0x120] ss:$8 sps:$4 sm:$0xff]   ;;  %v12567_v63 = vld [vmem:[%s17410_s0 + $0x134] ss:$8 sps:$4 sm:$0xff]  }
  0x16   :  { %602 = vmatpush1.bf16.msra.mxu0 %v12499_v7  ;;  %v12570_v1 = vld [vmem:[%s17410_s0 + $0x144] ss:$8 sps:$4 sm:$0xff]   ;;  %v12572_v2 = vld [vmem:[%s17410_s0 + $0x140] ss:$8 sps:$4 sm:$0xff]   ;;  %v12573_v3 = vld [vmem:[%s17410_s0 + $0x154] ss:$8 sps:$4 sm:$0xff]  }
  0x17   :  { %603 = vmatprep.subr.bf16.mxu0 %v12692_v0  ;;  %v12575_v4 = vld [vmem:[%s17410_s0 + $0x150] ss:$8 sps:$4 sm:$0xff]   ;;  %v12576_v5 = vld [vmem:[%s17410_s0 + $0x164] ss:$8 sps:$4 sm:$0xff]   ;;  %v12578_v6 = vld [vmem:[%s17410_s0 + $0x160] ss:$8 sps:$4 sm:$0xff]  }
  0x18   :  { %10935 = vmatpush3.bf16.msra.mxu1 %v12596_v45  ;;  %v12579_v7 = vld [vmem:[%s17410_s0 + $0x174] ss:$8 sps:$4 sm:$0xff]  }
  0x19   :  { %10936 = vmatprep.subr.bf16.mxu1 %v12600_v47 }
  0x1a   :  { %604 = vmatpush1.bf16.msra.mxu0 %v12500_v8  ;;  %v12581_v8 = vld [vmem:[%s17410_s0 + $0x170] ss:$8 sps:$4 sm:$0xff]  }
  0x1b   :  { %605 = vmatprep.subr.bf16.mxu0 %v12692_v0 }
  0x1c   :  { %10937 = vmatpush3.bf16.msra.mxu1 %v12600_v47 }
  0x1d   :  { %10938 = vmatprep.subr.bf16.mxu1 %v12601_v48 }
  0x1e   :  { %606 = vmatpush1.bf16.msra.mxu0 %v12501_v9  ;;  %v12582_v9 = vld [vmem:[%s17410_s0 + $0x184] ss:$8 sps:$4 sm:$0xff]  }
  0x1f   :  { %607 = vmatprep.subr.bf16.mxu0 %v12692_v0 }
  0x20   :  { %10939 = vmatpush3.bf16.msra.mxu1 %v12601_v48 }
  0x21   :  { %10940 = vmatprep.subr.bf16.mxu1 %v12605_v51 }
  0x22   :  { %608 = vmatpush1.bf16.msra.mxu0 %v12502_v10  ;;  %v12584_v10 = vld [vmem:[%s17410_s0 + $0x180] ss:$8 sps:$4 sm:$0xff]  }
  0x23   :  { %609 = vmatprep.subr.bf16.mxu0 %v12692_v0 }
  0x24   :  { %10941 = vmatpush3.bf16.msra.mxu1 %v12605_v51 }
  0x25   :  { %10942 = vmatprep.subr.bf16.mxu1 %v12606_v52 }
  0x26   :  { %610 = vmatpush1.bf16.msra.mxu0 %v12503_v11  ;;  %v12585_v11 = vld [vmem:[%s17410_s0 + $0x194] ss:$8 sps:$4 sm:$0xff]  }
  0x27   :  { %611 = vmatprep.subr.bf16.mxu0 %v12692_v0 }
  0x28   :  { %10943 = vmatpush3.bf16.msra.mxu1 %v12606_v52 }
  0x29   :  { %10944 = vmatprep.subr.bf16.mxu1 %v12610_v55 }
  0x2a   :  { %612 = vmatpush1.bf16.msra.mxu0 %v12504_v12  ;;  %v12587_v12 = vld [vmem:[%s17410_s0 + $0x190] ss:$8 sps:$4 sm:$0xff]  }
  0x2b   :  { %613 = vmatprep.subr.bf16.mxu0 %v12692_v0 }
  0x2c   :  { %10945 = vmatpush3.bf16.msra.mxu1 %v12610_v55 }
  0x2e   :  { %614 = vmatpush1.bf16.msra.mxu0 %v12505_v13  ;;  %v12588_v13 = vld [vmem:[%s17410_s0 + $0x1a4] ss:$8 sps:$4 sm:$0xff]  }
  0x2f   :  { %615 = vmatprep.subr.bf16.mxu0 %v12692_v0 }
  0x32   :  { %616 = vmatpush1.bf16.msra.mxu0 %v12506_v14  ;;  %v12590_v14 = vld [vmem:[%s17410_s0 + $0x1a0] ss:$8 sps:$4 sm:$0xff]  }
  0x33   :  { %617 = vmatprep.subr.bf16.mxu0 %v12692_v0 }
  0x36   :  { %618 = vmatpush1.bf16.msra.mxu0 %v12507_v15  ;;  %v12592_v15 = vld [vmem:[%s17410_s0 + $0x1b4] ss:$8 sps:$4 sm:$0xff]  }
  0x37   :  { %619 = vmatprep.subr.bf16.mxu0 %v12692_v0 }
  0x3a   :  { %620 = vmatpush1.bf16.msra.mxu0 %v12508_v16  ;;  %v12971_v16 = vld [vmem:[%s17412_s2] ss:$0 sm:$0xff] }
  0x3b   :  { %621 = vmatprep.subr.bf16.mxu0 %v12692_v0  ;;  %v12569_v0 = vld [vmem:[%s17410_s0 + $0x130] ss:$8 sps:$4 sm:$0xff]  }
  0x3e   :  { %622 = vmatpush1.bf16.msra.mxu0 %v12509_v17  ;;  %v17418_v17 = vlaneseq }
  0x41   :  { %624 = vmatmul.mubr.bf16.vlgmr.msra.gmra.mrb[0].mxu0 %v12510_v18 }
  0x42   :  { %631 = vmatprep.mubr.bf16.mxu0 %v12513_v19 }
  0x49   :  { %632 = vmatmul.mubr.bf16.gmra.mrb[4].mxu0 %v12515_v20 }
  0x4a   :  { %639 = vmatprep.mubr.bf16.mxu0 %v12516_v21  ;;  %v12594_v21 = vld [vmem:[%s17410_s0 + $0x1b0] ss:$8 sps:$4 sm:$0xff]  }
  0x51   :  { %640 = vmatmul.mubr.bf16.gmra.mrb[8].mxu0 %v12518_v22 }
  0x52   :  { %647 = vmatprep.mubr.bf16.mxu0 %v12519_v23  ;;  %v12597_v23 = vld [vmem:[%s17410_s0 + $0x1c4] ss:$8 sps:$4 sm:$0xff]  }
  0x59   :  { %648 = vmatmul.mubr.bf16.gmra.mrb[12].mxu0 %v12521_v24 }
  0x5a   :  { %655 = vmatprep.mubr.bf16.mxu0 %v12522_v25 }
  0x61   :  { %656 = vmatmul.mubr.bf16.gmra.mrb[16].mxu0 %v12524_v26  ;;  %v12982_v26 = vshrl.u32 %v17418_v17, 7 }
  0x62   :  { %663 = vmatprep.mubr.bf16.mxu0 %v12525_v27 }
  0x63   :  { %17885 = vst [vmem:[#allocation2_spill] sm:$0xff] %v12982_v26  ;;  %v13013_v47 = vadd.s32 48, %v12982_v26  ;;  %v13024_v51 = vadd.s32 56, %v12982_v26 }
  0x65   :  { %17894 = vst [vmem:[#allocation7_spill] sm:$0xff] %v13013_v47  ;;  %17899 = vst [vmem:[#allocation8_spill] sm:$0xff] %v13024_v51 }
  0x69   :  { %664 = vmatmul.mubr.bf16.gmra.mrb[20].mxu0 %v12527_v28 }
  0x6a   :  { %671 = vmatprep.mubr.bf16.mxu0 %v12528_v29 }
  0x71   :  { %672 = vmatmul.mubr.bf16.gmra.mrb[24].mxu0 %v12530_v30  ;;  %v12987_v30 = vadd.s32 32, %v12982_v26 }
  0x72   :  { %679 = vmatprep.mubr.bf16.mxu0 %v12531_v31 }
  0x73   :  { %17887 = vst [vmem:[#allocation4_spill] sm:$0xff] %v12987_v30 }
  0x79   :  { %680 = vmatmul.mubr.bf16.gmra.mrb[28].mxu0 %v12533_v32  ;;  %v12990_v32 = vadd.s32 40, %v12982_v26 }
  0x7a   :  { %687 = vmatprep.mubr.bf16.mxu0 %v12534_v33 }
  0x7b   :  { %17888 = vst [vmem:[#allocation5_spill] sm:$0xff] %v12990_v32  ;;  %v1062_v41 = vshra.s32 %v12990_v32, 5  ;;  %v18200_v32 = vmov 0 }
  0x7d   :  { %vm13015_vm2 = vcmp.ge.s32.totalorder %v1062_v41, 1  ;;  %vm13019_vm3 = vcmp.le.s32.totalorder %v1062_v41, 16 }
  0x7e   :  { %vm1278_vm5 = vmand %vm13015_vm2, %vm13019_vm3 }
  0x81   :  { %688 = vmatmul.mubr.bf16.gmra.mrb[32].mxu0 %v12536_v34 }
  0x82   :  { %695 = vmatprep.mubr.bf16.mxu0 %v12537_v35  ;;  %v12599_v35 = vld [vmem:[%s17410_s0 + $0x1c0] ss:$8 sps:$4 sm:$0xff]  }
  0x89   :  { %696 = vmatmul.mubr.bf16.gmra.mrb[36].mxu0 %v12539_v36 }
  0x8a   :  { %703 = vmatprep.mubr.bf16.mxu0 %v12540_v37  ;;  %v12602_v37 = vld [vmem:[%s17410_s0 + $0x1d4] ss:$8 sps:$4 sm:$0xff]  }
  0x91   :  { %704 = vmatmul.mubr.bf16.gmra.mrb[40].mxu0 %v12542_v38 }
  0x92   :  { %711 = vmatprep.mubr.bf16.mxu0 %v12543_v39 }
  0x99   :  { %712 = vmatmul.mubr.bf16.gmra.mrb[44].mxu0 %v12545_v40  ;;  %v1061_v40 = vshra.s32 %v12987_v30, 5 }
  0x9a   :  { %719 = vmatprep.mubr.bf16.mxu0 %v12546_v42 }
  0x9b   :  { %vm13004_vm0 = vcmp.ge.s32.totalorder %v1061_v40, 1  ;;  %vm13008_vm1 = vcmp.le.s32.totalorder %v1061_v40, 16 }
  0x9c   :  { %vm1277_vm4 = vmand %vm13004_vm0, %vm13008_vm1 }
  0x9d   :  { %vm13044_vm6 = vmpackc.low %vm1278_vm5, %vm1277_vm4 }
  0xa1   :  { %720 = vmatmul.mubr.bf16.gmra.mrb[48].mxu0 %v12548_v44 }
  0xa2   :  { %727 = vmatprep.mubr.bf16.mxu0 %v12549_v46  ;;  %v17928_v46 = vmov 0 }
  0xa9   :  { %728 = vmatmul.mubr.bf16.gmra.mrb[52].mxu0 %v12551_v49  ;;  %v13263_v49 = vadd.s32 136, %v12982_v26 }
  0xaa   :  { %735 = vmatprep.mubr.bf16.mxu0 %v12552_v50 }
  0xab   :  { %17967 = vst [vmem:[#allocation26_spill] sm:$0xff] %v13263_v49 }
  0xb1   :  { %736 = vmatmul.mubr.bf16.gmra.mrb[56].mxu0 %v12554_v53 }
  0xb2   :  { %743 = vmatprep.mubr.bf16.mxu0 %v12555_v54  ;;  %v12604_v54 = vld [vmem:[%s17410_s0 + $0x1d0] ss:$8 sps:$4 sm:$0xff]  }
  0xb9   :  { %744 = vmatmul.mubr.bf16.gmra.mrb[60].mxu0 %v12557_v56  ;;  %v12607_v56 = vld [vmem:[%s17410_s0 + $0x1e4] ss:$8 sps:$4 sm:$0xff]  }
  0xba   :  { %751 = vmatprep.mubr.bf16.mxu0 %v12558_v57 }
  0xc1   :  { %752 = vmatmul.mubr.bf16.gmra.mrb[64].mxu0 %v12560_v58 }
  0xc2   :  { %759 = vmatprep.mubr.bf16.mxu0 %v12561_v59  ;;  %v1063_v59 = vshra.s32 %v13013_v47, 5 }
  0xc4   :  { %vm13050_vm7 = vcmp.ge.s32.totalorder %v1063_v59, 1  ;;  %vm13054_vm8 = vcmp.le.s32.totalorder %v1063_v59, 16  ;;  %v12616_v59 = vld [vmem:[%s17410_s0 + $0x200] ss:$8 sps:$4 sm:$0xff]  }
  0xc5   :  { %vm1279_vm11 = vmand %vm13050_vm7, %vm13054_vm8 }
  0xc9   :  { %760 = vmatmul.mubr.bf16.gmra.mrb[68].mxu0 %v12563_v60  ;;  %v1064_v60 = vshra.s32 %v13024_v51, 5  ;;  %v18186_v51 = vmov 0 }
  0xca   :  { %767 = vmatprep.mubr.bf16.mxu0 %v12564_v61 }
  0xcb   :  { %vm13061_vm9 = vcmp.ge.s32.totalorder %v1064_v60, 1  ;;  %vm13065_vm10 = vcmp.le.s32.totalorder %v1064_v60, 16 }
  0xcc   :  { %vm1280_vm12 = vmand %vm13061_vm9, %vm13065_vm10 }
  0xcd   :  { %vm13093_vm13 = vmpackc.low %vm1280_vm12, %vm1279_vm11 }
  0xd1   :  { %768 = vmatmul.mubr.bf16.gmra.mrb[72].mxu0 %v12566_v62 }
  0xd2   :  { %775 = vmatprep.mubr.bf16.mxu0 %v12567_v63  ;;  %v17900_v63 = vmov 0 }
  0xd3   :  { %v17901_v63 = vsel %vm13044_vm6, 4294967295, %v17900_v63 }
  0xd4   :  { %17902 = vst [vmem:[#allocation9_spill] sm:$0xff] %v17901_v63 }
  0xd9   :  { %776 = vmatmul.mubr.bf16.gmra.mrb[76].mxu0 %v12569_v0 }
  0xda   :  { %783 = vmatprep.mubr.bf16.mxu0 %v12570_v1 }
  0xe1   :  { %784 = vmatmul.mubr.bf16.gmra.mrb[80].mxu0 %v12572_v2 }
  0xe2   :  { %791 = vmatprep.mubr.bf16.mxu0 %v12573_v3  ;;  %v13059_v3 = vadd.s32 64, %v12982_v26 }
  0xe4   :  { %17908 = vst [vmem:[#allocation11_spill] sm:$0xff] %v13059_v3 }
  0xe9   :  { %792 = vmatmul.mubr.bf16.gmra.mrb[84].mxu0 %v12575_v4 }
  0xea   :  { %799 = vmatprep.mubr.bf16.mxu0 %v12576_v5 }
  0xf1   :  { %800 = vmatmul.mubr.bf16.gmra.mrb[88].mxu0 %v12578_v6 }
  0xf2   :  { %807 = vmatprep.mubr.bf16.mxu0 %v12579_v7  ;;  %v13070_v7 = vadd.s32 72, %v12982_v26 }
  0xf4   :  { %17913 = vst [vmem:[#allocation12_spill] sm:$0xff] %v13070_v7 }
  0xf9   :  { %808 = vmatmul.mubr.bf16.gmra.mrb[92].mxu0 %v12581_v8 }
  0xfa   :  { %815 = vmatprep.mubr.bf16.mxu0 %v12582_v9 }
 0x101   :  { %816 = vmatmul.mubr.bf16.gmra.mrb[96].mxu0 %v12584_v10  ;;  %v12609_v10 = vld [vmem:[%s17410_s0 + $0x1e0] ss:$8 sps:$4 sm:$0xff]  }
 0x102   :  { %823 = vmatprep.mubr.bf16.mxu0 %v12585_v11 }
 0x109   :  { %824 = vmatmul.mubr.bf16.gmra.mrb[100].mxu0 %v12587_v12  ;;  %v12611_v12 = vld [vmem:[%s17410_s0 + $0x1f4] ss:$8 sps:$4 sm:$0xff]  }
 0x10a   :  { %831 = vmatprep.mubr.bf16.mxu0 %v12588_v13 }
 0x111   :  { %832 = vmatmul.mubr.bf16.gmra.mrb[104].mxu0 %v12590_v14 }
 0x112   :  { %839 = vmatprep.mubr.bf16.mxu0 %v12592_v15  ;;  %v1065_v15 = vshra.s32 %v13059_v3, 5 }
 0x114   :  { %v625_v18 = vpop.f32.mrb[0].mxu0  ;;  %vm13099_vm14 = vcmp.ge.s32.totalorder %v1065_v15, 1  ;;  %vm13103_vm15 = vcmp.le.s32.totalorder %v1065_v15, 16 }
 0x115   :  { %v626_v19 = vadd.f32 %v12971_v16, %v625_v18  ;;  %v627_v20 = vpop.f32.mrb[1].mxu0  ;;  %v1066_v18 = vshra.s32 %v13070_v7, 5  ;;  %vm1281_vm2 = vmand %vm13099_vm14, %vm13103_vm15  ;;  %v18172_v7 = vmov 0 }
 0x116   :  { %v628_v22 = vpop.f32.mrb[2].mxu0 }
 0x117   :  { %v629_v24 = vadd.f32 %v12971_v16, %v628_v22  ;;  %v630_v25 = vpop.f32.mrb[3].mxu0  ;;  %v912_v27 = vmax.f32 %v626_v19, 0.0  ;;  %vm13110_vm0 = vcmp.ge.s32.totalorder %v1066_v18, 1  ;;  %vm13114_vm1 = vcmp.le.s32.totalorder %v1066_v18, 16 }
 0x118   :  { %v13108_v25 = vadd.s32 80, %v12982_v26  ;;  %vm1282_vm3 = vmand %vm13110_vm0, %vm13114_vm1  ;;  %v13217_v18 = vadd.s32 120, %v12982_v26 }
 0x119   :  { %v913_v28 = vmax.f32 %v629_v24, 0.0  ;;  %840 = vmatmul.mubr.bf16.gmra.mrb[108].mxu0 %v12594_v21  ;;  %v17914_v21 = vmov 0  ;;  %vm13142_vm4 = vmpackc.low %vm1282_vm3, %vm1281_vm2 }
 0x11a   :  { %847 = vmatprep.mubr.bf16.mxu0 %v12597_v23  ;;  %v17915_v21 = vsel %vm13093_vm13, 4294967295, %v17914_v21  ;;  %17922 = vst [vmem:[#allocation15_spill] sm:$0xff] %v13108_v25  ;;  %v1067_v41 = vshra.s32 %v13108_v25, 5  ;;  %v17929_v46 = vsel %vm13142_vm4, 4294967295, %v17928_v46  ;;  %17954 = vst [vmem:[#allocation23_spill] sm:$0xff] %v13217_v18 }
 0x11b   :  { %v12984_v29 = vpack.c.bf16 %v913_v28, %v912_v27  ;;  %17916 = vst [vmem:[#allocation13_spill] sm:$0xff] %v17915_v21  ;;  %17930 = vst [vmem:[#allocation17_spill] sm:$0xff] %v17929_v46  ;;  %v12619_v23 = vld [vmem:[%s17410_s0 + $0x210] ss:$8 sps:$4 sm:$0xff]  }
 0x11c   :  { %v633_v31 = vpop.f32.mrb[4].mxu0  ;;  %vm13148_vm5 = vcmp.ge.s32.totalorder %v1067_v41, 1  ;;  %vm13152_vm7 = vcmp.le.s32.totalorder %v1067_v41, 16  ;;  %v13252_v41 = vadd.s32 128, %v12982_v26 }
 0x11d   :  { %17886 = vst [vmem:[#allocation3_spill] sm:$0xff] %v12984_v29  ;;  %v634_v33 = vadd.f32 %v12971_v16, %v633_v31  ;;  %v635_v34 = vpop.f32.mrb[5].mxu0  ;;  %vm1283_vm10 = vmand %vm13148_vm5, %vm13152_vm7 }
 0x11e   :  { %v636_v36 = vpop.f32.mrb[6].mxu0  ;;  %17962 = vst [vmem:[#allocation25_spill] sm:$0xff] %v13252_v41 }
 0x11f   :  { %v637_v38 = vadd.f32 %v12971_v16, %v636_v36  ;;  %v638_v39 = vpop.f32.mrb[7].mxu0  ;;  %v914_v42 = vmax.f32 %v634_v33, 0.0  ;;  %v13119_v33 = vadd.s32 88, %v12982_v26  ;;  %v12613_v36 = vld [vmem:[%s17410_s0 + $0x1f0] ss:$8 sps:$4 sm:$0xff]  }
 0x121   :  { %v915_v43 = vmax.f32 %v637_v38, 0.0  ;;  %848 = vmatmul.mubr.bf16.gmra.mrb[112].mxu0 %v12599_v35  ;;  %17927 = vst [vmem:[#allocation16_spill] sm:$0xff] %v13119_v33  ;;  %v12614_v38 = vld [vmem:[%s17410_s0 + $0x204] ss:$8 sps:$4 sm:$0xff]  }
 0x122   :  { %855 = vmatprep.mubr.bf16.mxu0 %v12602_v37 }
 0x123   :  { %v13002_v44 = vpack.c.bf16 %v915_v43, %v914_v42  ;;  %v1068_v42 = vshra.s32 %v13119_v33, 5  ;;  %v18158_v33 = vmov 0 }
 0x124   :  { %v641_v48 = vpop.f32.mrb[8].mxu0 }
 0x125   :  { %17889 = vst [vmem:[#allocation6_spill] sm:$0xff] %v13002_v44  ;;  %v642_v52 = vadd.f32 %v12971_v16, %v641_v48  ;;  %v643_v53 = vpop.f32.mrb[9].mxu0  ;;  %vm13159_vm8 = vcmp.ge.s32.totalorder %v1068_v42, 1  ;;  %vm13163_vm9 = vcmp.le.s32.totalorder %v1068_v42, 16 }
 0x126   :  { %v644_v55 = vpop.f32.mrb[10].mxu0  ;;  %vm1284_vm11 = vmand %vm13159_vm8, %vm13163_vm9 }
 0x127   :  { %v645_v57 = vadd.f32 %v12971_v16, %v644_v55  ;;  %v646_v58 = vpop.f32.mrb[11].mxu0  ;;  %v916_v61 = vmax.f32 %v642_v52, 0.0  ;;  %v13157_v52 = vadd.s32 96, %v12982_v26  ;;  %vm13191_vm12 = vmpackc.low %vm1284_vm11, %vm1283_vm10 }
 0x129   :  { %v917_v62 = vmax.f32 %v645_v57, 0.0  ;;  %856 = vmatmul.mubr.bf16.gmra.mrb[116].mxu0 %v12604_v54  ;;  %17936 = vst [vmem:[#allocation19_spill] sm:$0xff] %v13157_v52  ;;  %v1069_v2 = vshra.s32 %v13157_v52, 5 }
 0x12a   :  { %863 = vmatprep.mubr.bf16.mxu0 %v12607_v56  ;;  %v13168_v56 = vadd.s32 104, %v12982_v26 }
 0x12b   :  { %v13048_v0 = vpack.c.bf16 %v917_v62, %v916_v61  ;;  %v12617_v61 = vld [vmem:[%s17410_s0 + $0x214] ss:$8 sps:$4 sm:$0xff]   ;;  %vm13197_vm14 = vcmp.ge.s32.totalorder %v1069_v2, 1  ;;  %vm13201_vm15 = vcmp.le.s32.totalorder %v1069_v2, 16 }
 0x12c   :  { %v649_v4 = vpop.f32.mrb[12].mxu0  ;;  %17941 = vst [vmem:[#allocation20_spill] sm:$0xff] %v13168_v56  ;;  %vm1285_vm2 = vmand %vm13197_vm14, %vm13201_vm15 }
 0x12d   :  { %17903 = vst [vmem:[#allocation10_spill] sm:$0xff] %v13048_v0  ;;  %v650_v8 = vadd.f32 %v12971_v16, %v649_v4  ;;  %v651_v9 = vpop.f32.mrb[13].mxu0  ;;  %10946 = vmatprep.mubr.msk.bf16.mxu1 %vm13044_vm6, %v13048_v0  ;;  %v1070_v4 = vshra.s32 %v13168_v56, 5  ;;  %v18144_v56 = vmov 0 }
 0x12e   :  { %v652_v11 = vpop.f32.mrb[14].mxu0 }
 0x12f   :  { %v653_v13 = vadd.f32 %v12971_v16, %v652_v11  ;;  %v654_v14 = vpop.f32.mrb[15].mxu0  ;;  %v918_v19 = vmax.f32 %v650_v8, 0.0  ;;  %v17942_v8 = vmov 0  ;;  %vm13208_vm0 = vcmp.ge.s32.totalorder %v1070_v4, 1 }
 0x130   :  { %v17943_v8 = vsel %vm13191_vm12, 4294967295, %v17942_v8  ;;  %vm13212_vm1 = vcmp.le.s32.totalorder %v1070_v4, 16  ;;  %v17995_v4 = vmov 0 }
 0x131   :  { %v919_v20 = vmax.f32 %v653_v13, 0.0  ;;  %864 = vmatmul.mubr.bf16.gmra.mrb[120].mxu0 %v12609_v10  ;;  %17944 = vst [vmem:[#allocation21_spill] sm:$0xff] %v17943_v8  ;;  %vm1286_vm3 = vmand %vm13208_vm0, %vm13212_vm1  ;;  %v12679_v8 = vld [vmem:[%s17411_s3 + $0xa8] sm:$0xff]  }
 0x132   :  { %871 = vmatprep.mubr.bf16.mxu0 %v12611_v12  ;;  %v13206_v12 = vadd.s32 112, %v12982_v26  ;;  %vm13237_vm5 = vmpackc.low %vm1286_vm3, %vm1285_vm2 }
 0x133   :  { %v13097_v22 = vpack.c.bf16 %v919_v20, %v918_v19 }
 0x134   :  { %v657_v27 = vpop.f32.mrb[16].mxu0  ;;  %17949 = vst [vmem:[#allocation22_spill] sm:$0xff] %v13206_v12  ;;  %v1071_v31 = vshra.s32 %v13206_v12, 5 }
 0x135   :  { %17917 = vst [vmem:[#allocation14_spill] sm:$0xff] %v13097_v22  ;;  %v658_v34 = vadd.f32 %v12971_v16, %v657_v27  ;;  %v659_v35 = vpop.f32.mrb[17].mxu0  ;;  %10947 = vmatmul.mubr.msk.bf16.vlgmr.msra.gmra.mrb[0].mxu1 %vm13093_vm13, %v13097_v22 }
 0x136   :  { %v660_v37 = vpop.f32.mrb[18].mxu0  ;;  %vm13243_vm7 = vcmp.ge.s32.totalorder %v1071_v31, 1  ;;  %vm13247_vm8 = vcmp.le.s32.totalorder %v1071_v31, 16 }
 0x137   :  { %v661_v39 = vadd.f32 %v12971_v16, %v660_v37  ;;  %v662_v40 = vpop.f32.mrb[19].mxu0  ;;  %v920_v43 = vmax.f32 %v658_v34, 0.0  ;;  %v1072_v34 = vshra.s32 %v13217_v18, 5  ;;  %v17955_v37 = vmov 0  ;;  %vm1287_vm11 = vmand %vm13243_vm7, %vm13247_vm8 }
 0x138   :  { %v17956_v37 = vsel %vm13237_vm5, 4294967295, %v17955_v37  ;;  %v13338_v40 = vadd.s32 160, %v12982_v26  ;;  %v18130_v18 = vmov 0 }
 0x139   :  { %v921_v45 = vmax.f32 %v661_v39, 0.0  ;;  %872 = vmatmul.mubr.bf16.gmra.mrb[124].mxu0 %v12613_v36  ;;  %17957 = vst [vmem:[#allocation24_spill] sm:$0xff] %v17956_v37  ;;  %vm13254_vm9 = vcmp.ge.s32.totalorder %v1072_v34, 1  ;;  %vm13258_vm10 = vcmp.le.s32.totalorder %v1072_v34, 16  ;;  %v17981_v34 = vmov 0 }
 0x13a   :  { %879 = vmatprep.mubr.bf16.mxu0 %v12614_v38  ;;  %vm1288_vm14 = vmand %vm13254_vm9, %vm13258_vm10  ;;  %17989 = vst [vmem:[#allocation32_spill] sm:$0xff] %v13338_v40 }
 0x13b   :  { %v13146_v48 = vpack.c.bf16 %v921_v45, %v920_v43  ;;  %vm13280_vm15 = vmpackc.low %vm1288_vm14, %vm1287_vm11 }
 0x13c   :  { %v665_v53 = vpop.f32.mrb[20].mxu0 }
 0x13d   :  { %17931 = vst [vmem:[#allocation18_spill] sm:$0xff] %v13146_v48  ;;  %v666_v57 = vadd.f32 %v12971_v16, %v665_v53  ;;  %v667_v58 = vpop.f32.mrb[21].mxu0  ;;  %10950 = vmatprep.mubr.msk.bf16.mxu1 %vm13142_vm4, %v13146_v48 }
 0x13e   :  { %v668_v60 = vpop.f32.mrb[22].mxu0  ;;  %v1073_v58 = vshra.s32 %v13252_v41, 5 }
 0x13f   :  { %v669_v62 = vadd.f32 %v12971_v16, %v668_v60  ;;  %v670_v1 = vpop.f32.mrb[23].mxu0  ;;  %v922_v5 = vmax.f32 %v666_v57, 0.0 }
 0x140   :  { %vm13286_vm0 = vcmp.ge.s32.totalorder %v1073_v58, 1  ;;  %vm13290_vm1 = vcmp.le.s32.totalorder %v1073_v58, 16 }
 0x141   :  { %v923_v6 = vmax.f32 %v669_v62, 0.0  ;;  %880 = vmatmul.mubr.bf16.gmra.mrb[128].mxu0 %v12616_v59  ;;  %v1074_v59 = vshra.s32 %v13263_v49, 5  ;;  %v17968_v62 = vmov 0  ;;  %vm1289_vm7 = vmand %vm13286_vm0, %vm13290_vm1 }
 0x142   :  { %887 = vmatprep.mubr.bf16.mxu0 %v12617_v61  ;;  %v17969_v62 = vsel %vm13280_vm15, 4294967295, %v17968_v62 }
 0x143   :  { %v13195_v9 = vpack.c.bf16 %v923_v6, %v922_v5  ;;  %17970 = vst [vmem:[#allocation27_spill] sm:$0xff] %v17969_v62  ;;  %v13295_v5 = vadd.s32 144, %v12982_v26  ;;  %vm13297_vm2 = vcmp.ge.s32.totalorder %v1074_v59, 1  ;;  %vm13301_vm3 = vcmp.le.s32.totalorder %v1074_v59, 16 }
 0x144   :  { %v673_v13 = vpop.f32.mrb[24].mxu0  ;;  %vm1290_vm8 = vmand %vm13297_vm2, %vm13301_vm3  ;;  %v1077_v59 = vshra.s32 %v13338_v40, 5 }
 0x145   :  { %v674_v19 = vadd.f32 %v12971_v16, %v673_v13  ;;  %v675_v20 = vpop.f32.mrb[25].mxu0  ;;  %10951 = vmatmul.mubr.msk.bf16.gmra.mrb[4].mxu1 %vm13191_vm12, %v13195_v9  ;;  %17975 = vst [vmem:[#allocation28_spill] sm:$0xff] %v13295_v5  ;;  %v13306_v13 = vadd.s32 152, %v12982_v26  ;;  %vm13323_vm9 = vmpackc.low %vm1290_vm8, %vm1289_vm7 }
 0x146   :  { %v676_v24 = vpop.f32.mrb[26].mxu0  ;;  %v17982_v34 = vsel %vm13323_vm9, 4294967295, %v17981_v34  ;;  %vm13372_vm7 = vcmp.ge.s32.totalorder %v1077_v59, 1  ;;  %vm13376_vm8 = vcmp.le.s32.totalorder %v1077_v59, 16 }
 0x147   :  { %v677_v27 = vadd.f32 %v12971_v16, %v676_v24  ;;  %v678_v28 = vpop.f32.mrb[27].mxu0  ;;  %v924_v35 = vmax.f32 %v674_v19, 0.0  ;;  %17980 = vst [vmem:[#allocation29_spill] sm:$0xff] %v13306_v13  ;;  %v1075_v24 = vshra.s32 %v13295_v5, 5  ;;  %17983 = vst [vmem:[#allocation30_spill] sm:$0xff] %v17982_v34 }
 0x149   :  { %v925_v36 = vmax.f32 %v677_v27, 0.0  ;;  %888 = vmatmul.mubr.bf16.gmra.mrb[132].mxu0 %v12619_v23  ;;  %v1076_v27 = vshra.s32 %v13306_v13, 5  ;;  %vm13329_vm10 = vcmp.ge.s32.totalorder %v1075_v24, 1  ;;  %vm13333_vm11 = vcmp.le.s32.totalorder %v1075_v24, 16 }
 0x14a   :  { %vm1291_vm1 = vmand %vm13329_vm10, %vm13333_vm11 }
 0x14b   :  { %v13241_v38 = vpack.c.bf16 %v925_v36, %v924_v35  ;;  %vm13340_vm14 = vcmp.ge.s32.totalorder %v1076_v27, 1  ;;  %vm13344_vm0 = vcmp.le.s32.totalorder %v1076_v27, 16 }
 0x14c   :  { %v681_v42 = vpop.f32.mrb[28].mxu0  ;;  %vm1292_vm2 = vmand %vm13340_vm14, %vm13344_vm0 }
 0x14d   :  { %v682_v50 = vadd.f32 %v12971_v16, %v681_v42  ;;  %v683_v53 = vpop.f32.mrb[29].mxu0  ;;  %10954 = vmatprep.mubr.msk.bf16.mxu1 %vm13237_vm5, %v13241_v38  ;;  %vm13366_vm3 = vmpackc.low %vm1292_vm2, %vm1291_vm1 }
 0x14e   :  { %v684_v54 = vpop.f32.mrb[30].mxu0  ;;  %v17996_v4 = vsel %vm13366_vm3, 4294967295, %v17995_v4  ;;  %vm1293_vm14 = vmand %vm13372_vm7, %vm13376_vm8 }
 0x14f   :  { %v685_v55 = vadd.f32 %v12971_v16, %v684_v54  ;;  %v686_v57 = vpop.f32.mrb[31].mxu0  ;;  %v926_v60 = vmax.f32 %v682_v50, 0.0  ;;  %v13349_v50 = vadd.s32 168, %v12982_v26 }
 0x151   :  { %v927_v61 = vmax.f32 %v685_v55, 0.0  ;;  %17994 = vst [vmem:[#allocation33_spill] sm:$0xff] %v13349_v50 }
 0x153   :  { %v13284_v1 = vpack.c.bf16 %v927_v61, %v926_v60  ;;  %v1078_v60 = vshra.s32 %v13349_v50, 5 }
 0x154   :  { %v689_v6 = vpop.f32.mrb[32].mxu0 }
 0x155   :  { %v690_v14 = vadd.f32 %v12971_v16, %v689_v6  ;;  %v691_v15 = vpop.f32.mrb[33].mxu0  ;;  %10955 = vmatmul.mubr.msk.bf16.gmra.mrb[8].mxu1 %vm13280_vm15, %v13284_v1  ;;  %vm13383_vm10 = vcmp.ge.s32.totalorder %v1078_v60, 1  ;;  %vm13387_vm11 = vcmp.le.s32.totalorder %v1078_v60, 16  ;;  %v13478_v60 = vadd.s32 216, %v12982_v26 }
 0x156   :  { %v692_v19 = vpop.f32.mrb[34].mxu0  ;;  %vm1294_vm0 = vmand %vm13383_vm10, %vm13387_vm11 }
 0x157   :  { %v693_v20 = vadd.f32 %v12971_v16, %v692_v19  ;;  %v694_v23 = vpop.f32.mrb[35].mxu0  ;;  %v928_v28 = vmax.f32 %v690_v14, 0.0  ;;  %v13381_v14 = vadd.s32 176, %v12982_v26  ;;  %vm13409_vm1 = vmpackc.low %vm1294_vm0, %vm1293_vm14  ;;  %18032 = vst [vmem:[#allocation41_spill] sm:$0xff] %v13478_v60 }
 0x158   :  { %v13392_v23 = vadd.s32 184, %v12982_v26 }
 0x159   :  { %v929_v31 = vmax.f32 %v693_v20, 0.0  ;;  %18001 = vst [vmem:[#allocation34_spill] sm:$0xff] %v13381_v14  ;;  %v1079_v39 = vshra.s32 %v13381_v14, 5 }
 0x15a   :  { %18006 = vst [vmem:[#allocation35_spill] sm:$0xff] %v13392_v23 }
 0x15b   :  { %v13327_v35 = vpack.c.bf16 %v929_v31, %v928_v28  ;;  %vm13415_vm2 = vcmp.ge.s32.totalorder %v1079_v39, 1  ;;  %vm13419_vm7 = vcmp.le.s32.totalorder %v1079_v39, 16 }
 0x15c   :  { %v697_v42 = vpop.f32.mrb[36].mxu0  ;;  %vm1295_vm11 = vmand %vm13415_vm2, %vm13419_vm7 }
 0x15d   :  { %17984 = vst [vmem:[#allocation31_spill] sm:$0xff] %v13327_v35  ;;  %v698_v53 = vadd.f32 %v12971_v16, %v697_v42  ;;  %v699_v54 = vpop.f32.mrb[37].mxu0  ;;  %10958 = vmatprep.mubr.msk.bf16.mxu1 %vm13323_vm9, %v13327_v35  ;;  %v1080_v42 = vshra.s32 %v13392_v23, 5 }
 0x15e   :  { %v700_v55 = vpop.f32.mrb[38].mxu0 }
 0x15f   :  { %v701_v57 = vadd.f32 %v12971_v16, %v700_v55  ;;  %v702_v58 = vpop.f32.mrb[39].mxu0  ;;  %v930_v61 = vmax.f32 %v698_v53, 0.0  ;;  %v18007_v53 = vmov 0  ;;  %vm13426_vm8 = vcmp.ge.s32.totalorder %v1080_v42, 1 }
 0x160   :  { %v18008_v53 = vsel %vm13409_vm1, 4294967295, %v18007_v53  ;;  %v13424_v58 = vadd.s32 192, %v12982_v26  ;;  %vm13430_vm10 = vcmp.le.s32.totalorder %v1080_v42, 16 }
 0x161   :  { %v931_v2 = vmax.f32 %v701_v57, 0.0  ;;  %18009 = vst [vmem:[#allocation36_spill] sm:$0xff] %v18008_v53  ;;  %vm1296_vm14 = vmand %vm13426_vm8, %vm13430_vm10  ;;  %v13510_v57 = vadd.s32 224, %v12982_v26 }
 0x162   :  { %18014 = vst [vmem:[#allocation37_spill] sm:$0xff] %v13424_v58  ;;  %vm13452_vm0 = vmpackc.low %vm1296_vm14, %vm1295_vm11 }
 0x163   :  { %v13370_v6 = vpack.c.bf16 %v931_v2, %v930_v61  ;;  %v13435_v2 = vadd.s32 200, %v12982_v26  ;;  %18041 = vst [vmem:[#allocation44_spill] sm:$0xff] %v13510_v57 }
 0x164   :  { %v705_v15 = vpop.f32.mrb[40].mxu0 }
 0x165   :  { %v706_v24 = vadd.f32 %v12971_v16, %v705_v15  ;;  %v707_v27 = vpop.f32.mrb[41].mxu0  ;;  %10959 = vmatmul.mubr.msk.bf16.gmra.mrb[12].mxu1 %vm13366_vm3, %v13370_v6  ;;  %18019 = vst [vmem:[#allocation38_spill] sm:$0xff] %v13435_v2 }
 0x166   :  { %v708_v28 = vpop.f32.mrb[42].mxu0  ;;  %v1082_v27 = vshra.s32 %v13435_v2, 5  ;;  %v18061_v2 = vmov 0 }
 0x167   :  { %v709_v31 = vadd.f32 %v12971_v16, %v708_v28  ;;  %v710_v36 = vpop.f32.mrb[43].mxu0  ;;  %v932_v43 = vmax.f32 %v706_v24, 0.0  ;;  %v1081_v24 = vshra.s32 %v13424_v58, 5 }
 0x168   :  { %v18020_v36 = vmov 0  ;;  %vm13469_vm8 = vcmp.ge.s32.totalorder %v1082_v27, 1  ;;  %vm13473_vm10 = vcmp.le.s32.totalorder %v1082_v27, 16 }
 0x169   :  { %v933_v45 = vmax.f32 %v709_v31, 0.0  ;;  %v18021_v36 = vsel %vm13452_vm0, 4294967295, %v18020_v36  ;;  %vm13458_vm2 = vcmp.ge.s32.totalorder %v1081_v24, 1  ;;  %vm13462_vm7 = vcmp.le.s32.totalorder %v1081_v24, 16  ;;  %vm1298_vm14 = vmand %vm13469_vm8, %vm13473_vm10 }
 0x16a   :  { %18022 = vst [vmem:[#allocation39_spill] sm:$0xff] %v18021_v36  ;;  %vm1297_vm11 = vmand %vm13458_vm2, %vm13462_vm7  ;;  %v1084_v24 = vshra.s32 %v13478_v60, 5  ;;  %v18047_v60 = vmov 0 }
 0x16b   :  { %v13413_v54 = vpack.c.bf16 %v933_v45, %v932_v43  ;;  %v13467_v45 = vadd.s32 208, %v12982_v26 }
 0x16c   :  { %v713_v59 = vpop.f32.mrb[44].mxu0  ;;  %vm13512_vm8 = vcmp.ge.s32.totalorder %v1084_v24, 1  ;;  %vm13516_vm10 = vcmp.le.s32.totalorder %v1084_v24, 16 }
 0x16d   :  { %v714_v10 = vadd.f32 %v12971_v16, %v713_v59  ;;  %v715_v11 = vpop.f32.mrb[45].mxu0  ;;  %10962 = vmatprep.mubr.msk.bf16.mxu1 %vm13409_vm1, %v13413_v54  ;;  %18027 = vst [vmem:[#allocation40_spill] sm:$0xff] %v13467_v45 }
 0x16e   :  { %v716_v15 = vpop.f32.mrb[46].mxu0 }
 0x16f   :  { %v717_v19 = vadd.f32 %v12971_v16, %v716_v15  ;;  %v718_v20 = vpop.f32.mrb[47].mxu0  ;;  %v934_v28 = vmax.f32 %v714_v10, 0.0 }
 0x170   :  { %v1083_v20 = vshra.s32 %v13467_v45, 5 }
 0x171   :  { %v935_v31 = vmax.f32 %v717_v19, 0.0 }
 0x172   :  { %vm13501_vm2 = vcmp.ge.s32.totalorder %v1083_v20, 1  ;;  %vm13505_vm7 = vcmp.le.s32.totalorder %v1083_v20, 16 }
 0x173   :  { %v13456_v39 = vpack.c.bf16 %v935_v31, %v934_v28  ;;  %v18033_v31 = vmov 0 }
 0x174   :  { %v721_v55 = vpop.f32.mrb[48].mxu0 }
 0x175   :  { %v722_v61 = vadd.f32 %v12971_v16, %v721_v55  ;;  %v723_v10 = vpop.f32.mrb[49].mxu0  ;;  %10963 = vmatmul.mubr.msk.bf16.gmra.mrb[16].mxu1 %vm13452_vm0, %v13456_v39  ;;  %vm13495_vm0 = vmpackc.low %vm1298_vm14, %vm1297_vm11 }
 0x176   :  { %v724_v11 = vpop.f32.mrb[50].mxu0  ;;  %v18034_v31 = vsel %vm13495_vm0, 4294967295, %v18033_v31  ;;  %vm1299_vm11 = vmand %vm13501_vm2, %vm13505_vm7 }
 0x177   :  { %v725_v15 = vadd.f32 %v12971_v16, %v724_v11  ;;  %v726_v19 = vpop.f32.mrb[51].mxu0  ;;  %v936_v27 = vmax.f32 %v722_v61, 0.0  ;;  %18035 = vst [vmem:[#allocation42_spill] sm:$0xff] %v18034_v31  ;;  %v13521_v11 = vadd.s32 232, %v12982_v26  ;;  %vm1300_vm14 = vmand %vm13512_vm8, %vm13516_vm10  ;;  %v13553_v61 = vadd.s32 240, %v12982_v26 }
 0x179   :  { %v937_v28 = vmax.f32 %v725_v15, 0.0  ;;  %18046 = vst [vmem:[#allocation45_spill] sm:$0xff] %v13521_v11  ;;  %18055 = vst [vmem:[#allocation48_spill] sm:$0xff] %v13553_v61 }
 0x17b   :  { %v13499_v42 = vpack.c.bf16 %v937_v28, %v936_v27  ;;  %v1085_v28 = vshra.s32 %v13510_v57, 5 }
 0x17c   :  { %v729_v59 = vpop.f32.mrb[52].mxu0 }
 0x17d   :  { %18036 = vst [vmem:[#allocation43_spill] sm:$0xff] %v13499_v42  ;;  %v730_v15 = vadd.f32 %v12971_v16, %v729_v59  ;;  %v731_v19 = vpop.f32.mrb[53].mxu0  ;;  %10966 = vmatprep.mubr.msk.bf16.mxu1 %vm13495_vm0, %v13499_v42  ;;  %v1086_v59 = vshra.s32 %v13521_v11, 5  ;;  %vm13538_vm0 = vmpackc.low %vm1300_vm14, %vm1299_vm11  ;;  %vm13544_vm2 = vcmp.ge.s32.totalorder %v1085_v28, 1  ;;  %vm13548_vm7 = vcmp.le.s32.totalorder %v1085_v28, 16 }
 0x17e   :  { %v732_v20 = vpop.f32.mrb[54].mxu0  ;;  %v18048_v60 = vsel %vm13538_vm0, 4294967295, %v18047_v60  ;;  %vm1301_vm11 = vmand %vm13544_vm2, %vm13548_vm7 }
 0x17f   :  { %v733_v24 = vadd.f32 %v12971_v16, %v732_v20  ;;  %v734_v27 = vpop.f32.mrb[55].mxu0  ;;  %v938_v19 = vmax.f32 %v730_v15, 0.0  ;;  %18049 = vst [vmem:[#allocation46_spill] sm:$0xff] %v18048_v60  ;;  %vm13555_vm8 = vcmp.ge.s32.totalorder %v1086_v59, 1  ;;  %vm13559_vm10 = vcmp.le.s32.totalorder %v1086_v59, 16 }
 0x180   :  { %vm1302_vm14 = vmand %vm13555_vm8, %vm13559_vm10  ;;  %v13596_v15 = vadd.s32 256, %v12982_v26 }
 0x181   :  { %v939_v17 = vmax.f32 %v733_v24, 0.0  ;;  %v12620_v24 = vld [vmem:[%s17411_s3] sm:$0xff]  }
 0x182   :  { %18069 = vst [vmem:[#allocation52_spill] sm:$0xff] %v13596_v15  ;;  %11010 = vmatprep.subr.bf16.mxu1 %v12620_v24 }
 0x183   :  { %v13542_v43 = vpack.c.bf16 %v939_v17, %v938_v19  ;;  %v13564_v17 = vadd.s32 248, %v12982_v26  ;;  %11011 = vmatpush3.bf16.msra.mxu1 %v12620_v24  ;;  %v18075_v24 = vmov 0 }
 0x184   :  { %v737_v20 = vpop.f32.mrb[56].mxu0 }
 0x185   :  { %18050 = vst [vmem:[#allocation47_spill] sm:$0xff] %v13542_v43  ;;  %18060 = vst [vmem:[#allocation49_spill] sm:$0xff] %v13564_v17  ;;  %v738_v27 = vadd.f32 %v12971_v16, %v737_v20  ;;  %v739_v28 = vpop.f32.mrb[57].mxu0  ;;  %10967 = vmatmul.mubr.msk.bf16.gmra.mrb[20].mxu1 %vm13538_vm0, %v13542_v43  ;;  %v1087_v20 = vshra.s32 %v13553_v61, 5 }
 0x186   :  { %v740_v19 = vpop.f32.mrb[58].mxu0  ;;  %v1088_v28 = vshra.s32 %v13564_v17, 5  ;;  %vm13581_vm0 = vmpackc.low %vm1302_vm14, %vm1301_vm11 }
 0x187   :  { %v741_v59 = vadd.f32 %v12971_v16, %v740_v19  ;;  %v742_v11 = vpop.f32.mrb[59].mxu0  ;;  %v940_v57 = vmax.f32 %v738_v27, 0.0  ;;  %v18062_v2 = vsel %vm13581_vm0, 4294967295, %v18061_v2  ;;  %vm13587_vm2 = vcmp.ge.s32.totalorder %v1087_v20, 1 }
 0x188   :  { %18063 = vst [vmem:[#allocation50_spill] sm:$0xff] %v18062_v2  ;;  %vm13591_vm7 = vcmp.le.s32.totalorder %v1087_v20, 16  ;;  %vm13601_vm8 = vcmp.ge.s32.totalorder %v1088_v28, 1  ;;  %vm13605_vm10 = vcmp.le.s32.totalorder %v1088_v28, 16 }
 0x189   :  { %v941_v45 = vmax.f32 %v741_v59, 0.0  ;;  %vm1303_vm11 = vmand %vm13587_vm2, %vm13591_vm7 }
 0x18a   :  { %vm1304_vm14 = vmand %vm13601_vm8, %vm13605_vm10 }
 0x18b   :  { %v13585_v55 = vpack.c.bf16 %v941_v45, %v940_v57  ;;  %v13610_v57 = vadd.s32 264, %v12982_v26  ;;  %vm13630_vm2 = vmpackc.low %vm1304_vm14, %vm1303_vm11  ;;  %v13645_v45 = vadd.s32 272, %v12982_v26 }
 0x18c   :  { %v745_v27 = vpop.f32.mrb[60].mxu0  ;;  %v18076_v24 = vsel %vm13630_vm2, 4294967295, %v18075_v24 }
 0x18d   :  { %18064 = vst [vmem:[#allocation51_spill] sm:$0xff] %v13585_v55  ;;  %18074 = vst [vmem:[#allocation53_spill] sm:$0xff] %v13610_v57  ;;  %v746_v59 = vadd.f32 %v12971_v16, %v745_v27  ;;  %v747_v20 = vpop.f32.mrb[61].mxu0  ;;  %10970 = vmatprep.mubr.msk.bf16.mxu1 %vm13581_vm0, %v13585_v55  ;;  %v1089_v27 = vshra.s32 %v13596_v15, 5  ;;  %v1090_v11 = vshra.s32 %v13610_v57, 5 }
 0x18e   :  { %v748_v17 = vpop.f32.mrb[62].mxu0  ;;  %v12621_v20 = vld [vmem:[%s17411_s3 + $0x8] sm:$0xff]   ;;  %18077 = vst [vmem:[#allocation54_spill] sm:$0xff] %v18076_v24  ;;  %18082 = vst [vmem:[#allocation55_spill] sm:$0xff] %v13645_v45 }
 0x18f   :  { %v749_v28 = vadd.f32 %v12971_v16, %v748_v17  ;;  %v750_v61 = vpop.f32.mrb[63].mxu0  ;;  %v942_v58 = vmax.f32 %v746_v59, 0.0  ;;  %11012 = vmatprep.subr.bf16.mxu1 %v12621_v20  ;;  %vm13636_vm7 = vcmp.ge.s32.totalorder %v1089_v27, 1  ;;  %vm13640_vm8 = vcmp.le.s32.totalorder %v1089_v27, 16  ;;  %v12622_v59 = vld [vmem:[%s17411_s3 + $0x10] sm:$0xff]  }
 0x190   :  { %11013 = vmatpush3.bf16.msra.mxu1 %v12621_v20  ;;  %vm13650_vm10 = vcmp.ge.s32.totalorder %v1090_v11, 1  ;;  %vm13654_vm11 = vcmp.le.s32.totalorder %v1090_v11, 16  ;;  %v13659_v27 = vadd.s32 280, %v12982_v26  ;;  %vm1305_vm14 = vmand %vm13636_vm7, %vm13640_vm8 }
 0x191   :  { %v943_v10 = vmax.f32 %v749_v28, 0.0  ;;  %11014 = vmatprep.subr.bf16.mxu1 %v12622_v59  ;;  %vm1306_vm0 = vmand %vm13650_vm10, %vm13654_vm11 }
 0x192   :  { %18087 = vst [vmem:[#allocation56_spill] sm:$0xff] %v13659_v27  ;;  %v1092_v19 = vshra.s32 %v13659_v27, 5  ;;  %vm13679_vm7 = vmpackc.low %vm1306_vm0, %vm1305_vm14 }
 0x193   :  { %v13634_v61 = vpack.c.bf16 %v943_v10, %v942_v58  ;;  %v13694_v58 = vadd.s32 288, %v12982_v26 }
 0x194   :  { %v753_v28 = vpop.f32.mrb[64].mxu0  ;;  %11015 = vmatpush3.bf16.msra.mxu1 %v12622_v59  ;;  %v18088_v59 = vmov 0  ;;  %vm13699_vm0 = vcmp.ge.s32.totalorder %v1092_v19, 1  ;;  %vm13703_vm11 = vcmp.le.s32.totalorder %v1092_v19, 16 }
 0x195   :  { %v754_v10 = vadd.f32 %v12971_v16, %v753_v28  ;;  %v755_v57 = vpop.f32.mrb[65].mxu0  ;;  %10971 = vmatmul.mubr.msk.bf16.gmra.mrb[24].mxu1 %vm13630_vm2, %v13634_v61  ;;  %v12623_v28 = vld [vmem:[%s17411_s3 + $0x18] sm:$0xff]   ;;  %v18089_v59 = vsel %vm13679_vm7, 4294967295, %v18088_v59  ;;  %18096 = vst [vmem:[#allocation59_spill] sm:$0xff] %v13694_v58  ;;  %vm1308_vm2 = vmand %vm13699_vm0, %vm13703_vm11 }
 0x196   :  { %v756_v15 = vpop.f32.mrb[66].mxu0  ;;  %v1091_v57 = vshra.s32 %v13645_v45, 5  ;;  %11016 = vmatprep.subr.bf16.mxu1 %v12623_v28  ;;  %18090 = vst [vmem:[#allocation57_spill] sm:$0xff] %v18089_v59 }
 0x197   :  { %v757_v11 = vadd.f32 %v12971_v16, %v756_v15  ;;  %v758_v23 = vpop.f32.mrb[67].mxu0  ;;  %v944_v14 = vmax.f32 %v754_v10, 0.0  ;;  %v12624_v10 = vld [vmem:[%s17411_s3 + $0x20] sm:$0xff]  }
 0x198   :  { %11017 = vmatpush3.bf16.msra.mxu1 %v12623_v28  ;;  %vm13685_vm8 = vcmp.ge.s32.totalorder %v1091_v57, 1  ;;  %vm13689_vm10 = vcmp.le.s32.totalorder %v1091_v57, 16  ;;  %v13708_v57 = vadd.s32 296, %v12982_v26 }
 0x199   :  { %v945_v17 = vmax.f32 %v757_v11, 0.0  ;;  %11018 = vmatprep.subr.bf16.mxu1 %v12624_v10  ;;  %vm1307_vm14 = vmand %vm13685_vm8, %vm13689_vm10 }
 0x19a   :  { %18101 = vst [vmem:[#allocation60_spill] sm:$0xff] %v13708_v57  ;;  %v1094_v20 = vshra.s32 %v13708_v57, 5  ;;  %vm13728_vm8 = vmpackc.low %vm1308_vm2, %vm1307_vm14 }
 0x19b   :  { %v13683_v23 = vpack.c.bf16 %v945_v17, %v944_v14  ;;  %v13743_v14 = vadd.s32 304, %v12982_v26 }
 0x19c   :  { %v761_v11 = vpop.f32.mrb[68].mxu0  ;;  %11019 = vmatpush3.bf16.msra.mxu1 %v12624_v10  ;;  %v18102_v10 = vmov 0  ;;  %vm13748_vm2 = vcmp.ge.s32.totalorder %v1094_v20, 1  ;;  %vm13752_vm11 = vcmp.le.s32.totalorder %v1094_v20, 16  ;;  %v12627_v20 = vld [vmem:[%s17411_s3 + $0x38] sm:$0xff]  }
 0x19d   :  { %18091 = vst [vmem:[#allocation58_spill] sm:$0xff] %v13683_v23  ;;  %v762_v17 = vadd.f32 %v12971_v16, %v761_v11  ;;  %v763_v27 = vpop.f32.mrb[69].mxu0  ;;  %10974 = vmatprep.mubr.msk.bf16.mxu1 %vm13679_vm7, %v13683_v23  ;;  %v12625_v11 = vld [vmem:[%s17411_s3 + $0x28] sm:$0xff]   ;;  %v18103_v10 = vsel %vm13728_vm8, 4294967295, %v18102_v10  ;;  %18110 = vst [vmem:[#allocation63_spill] sm:$0xff] %v13743_v14 }
 0x19e   :  { %v764_v45 = vpop.f32.mrb[70].mxu0  ;;  %v1093_v27 = vshra.s32 %v13694_v58, 5  ;;  %11020 = vmatprep.subr.bf16.mxu1 %v12625_v11  ;;  %18104 = vst [vmem:[#allocation61_spill] sm:$0xff] %v18103_v10 }
 0x19f   :  { %v765_v19 = vadd.f32 %v12971_v16, %v764_v45  ;;  %v766_v50 = vpop.f32.mrb[71].mxu0  ;;  %v946_v40 = vmax.f32 %v762_v17, 0.0  ;;  %v12626_v17 = vld [vmem:[%s17411_s3 + $0x30] sm:$0xff]  }
 0x1a0   :  { %11021 = vmatpush3.bf16.msra.mxu1 %v12625_v11  ;;  %vm13734_vm10 = vcmp.ge.s32.totalorder %v1093_v27, 1  ;;  %vm13738_vm0 = vcmp.le.s32.totalorder %v1093_v27, 16  ;;  %v13757_v27 = vadd.s32 312, %v12982_v26 }
 0x1a1   :  { %v947_v15 = vmax.f32 %v765_v19, 0.0  ;;  %11022 = vmatprep.subr.bf16.mxu1 %v12626_v17  ;;  %vm1309_vm14 = vmand %vm13734_vm10, %vm13738_vm0 }
 0x1a2   :  { %18115 = vst [vmem:[#allocation64_spill] sm:$0xff] %v13757_v27  ;;  %v1096_v28 = vshra.s32 %v13757_v27, 5 }
 0x1a3   :  { %v13732_v50 = vpack.c.bf16 %v947_v15, %v946_v40  ;;  %v13792_v40 = vadd.s32 320, %v12982_v26 }
 0x1a4   :  { %v769_v19 = vpop.f32.mrb[72].mxu0  ;;  %11023 = vmatpush3.bf16.msra.mxu1 %v12626_v17  ;;  %v18116_v17 = vmov 0 }
 0x1a5   :  { %18105 = vst [vmem:[#allocation62_spill] sm:$0xff] %v13732_v50  ;;  %v770_v15 = vadd.f32 %v12971_v16, %v769_v19  ;;  %v771_v57 = vpop.f32.mrb[73].mxu0  ;;  %10975 = vmatmul.mubr.msk.bf16.gmra.mrb[28].mxu1 %vm13728_vm8, %v13732_v50  ;;  %vm1310_vm8 = vmand %vm13748_vm2, %vm13752_vm11  ;;  %11024 = vmatprep.subr.bf16.mxu1 %v12627_v20  ;;  %vm13794_vm2 = vcmp.ge.s32.totalorder %v1096_v28, 1 }
 0x1a6   :  { %v772_v58 = vpop.f32.mrb[74].mxu0  ;;  %v1095_v57 = vshra.s32 %v13743_v14, 5  ;;  %vm13777_vm10 = vmpackc.low %vm1310_vm8, %vm1309_vm14  ;;  %18124 = vst [vmem:[#allocation67_spill] sm:$0xff] %v13792_v40  ;;  %vm13798_vm8 = vcmp.le.s32.totalorder %v1096_v28, 16 }
 0x1a7   :  { %v773_v13 = vadd.f32 %v12971_v16, %v772_v58  ;;  %v774_v19 = vpop.f32.mrb[75].mxu0  ;;  %v948_v45 = vmax.f32 %v770_v15, 0.0  ;;  %v18117_v17 = vsel %vm13777_vm10, 4294967295, %v18116_v17  ;;  %vm1312_vm14 = vmand %vm13794_vm2, %vm13798_vm8 }
 0x1a8   :  { %18118 = vst [vmem:[#allocation65_spill] sm:$0xff] %v18117_v17  ;;  %11025 = vmatpush3.bf16.msra.mxu1 %v12627_v20  ;;  %vm13783_vm0 = vcmp.ge.s32.totalorder %v1095_v57, 1  ;;  %vm13787_vm7 = vcmp.le.s32.totalorder %v1095_v57, 16 }
 0x1a9   :  { %v949_v5 = vmax.f32 %v773_v13, 0.0  ;;  %vm1311_vm11 = vmand %vm13783_vm0, %vm13787_vm7  ;;  %v13835_v13 = vadd.s32 336, %v12982_v26 }
 0x1ab   :  { %v13781_v49 = vpack.c.bf16 %v949_v5, %v948_v45  ;;  %v13803_v5 = vadd.s32 328, %v12982_v26  ;;  %18138 = vst [vmem:[#allocation71_spill] sm:$0xff] %v13835_v13 }
 0x1ac   :  { %v777_v15 = vpop.f32.mrb[76].mxu0 }
 0x1ad   :  { %18119 = vst [vmem:[#allocation66_spill] sm:$0xff] %v13781_v49  ;;  %18129 = vst [vmem:[#allocation68_spill] sm:$0xff] %v13803_v5  ;;  %v778_v19 = vadd.f32 %v12971_v16, %v777_v15  ;;  %v779_v57 = vpop.f32.mrb[77].mxu0  ;;  %10978 = vmatprep.mubr.msk.bf16.mxu1 %vm13777_vm10, %v13781_v49  ;;  %v1097_v15 = vshra.s32 %v13792_v40, 5 }
 0x1ae   :  { %v780_v45 = vpop.f32.mrb[78].mxu0  ;;  %v1098_v57 = vshra.s32 %v13803_v5, 5  ;;  %vm13820_vm10 = vmpackc.low %vm1312_vm14, %vm1311_vm11 }
 0x1af   :  { %v781_v28 = vadd.f32 %v12971_v16, %v780_v45  ;;  %v782_v27 = vpop.f32.mrb[79].mxu0  ;;  %v950_v14 = vmax.f32 %v778_v19, 0.0  ;;  %v18131_v18 = vsel %vm13820_vm10, 4294967295, %v18130_v18  ;;  %vm13826_vm7 = vcmp.ge.s32.totalorder %v1097_v15, 1 }
 0x1b0   :  { %18132 = vst [vmem:[#allocation69_spill] sm:$0xff] %v18131_v18  ;;  %vm13830_vm0 = vcmp.le.s32.totalorder %v1097_v15, 16  ;;  %vm13837_vm2 = vcmp.ge.s32.totalorder %v1098_v57, 1  ;;  %vm13841_vm8 = vcmp.le.s32.totalorder %v1098_v57, 16  ;;  %v13878_v19 = vadd.s32 352, %v12982_v26 }
 0x1b1   :  { %v951_v41 = vmax.f32 %v781_v28, 0.0  ;;  %vm1313_vm11 = vmand %vm13826_vm7, %vm13830_vm0 }
 0x1b2   :  { %vm1314_vm14 = vmand %vm13837_vm2, %vm13841_vm8  ;;  %18152 = vst [vmem:[#allocation75_spill] sm:$0xff] %v13878_v19 }
 0x1b3   :  { %v13824_v58 = vpack.c.bf16 %v951_v41, %v950_v14  ;;  %v13846_v41 = vadd.s32 344, %v12982_v26 }
 0x1b4   :  { %v785_v20 = vpop.f32.mrb[80].mxu0 }
 0x1b5   :  { %18133 = vst [vmem:[#allocation70_spill] sm:$0xff] %v13824_v58  ;;  %18143 = vst [vmem:[#allocation72_spill] sm:$0xff] %v13846_v41  ;;  %v786_v14 = vadd.f32 %v12971_v16, %v785_v20  ;;  %v787_v28 = vpop.f32.mrb[81].mxu0  ;;  %10979 = vmatmul.mubr.msk.bf16.gmra.mrb[32].mxu1 %vm13820_vm10, %v13824_v58  ;;  %v1099_v20 = vshra.s32 %v13835_v13, 5 }
 0x1b6   :  { %v788_v15 = vpop.f32.mrb[82].mxu0  ;;  %v1100_v28 = vshra.s32 %v13846_v41, 5  ;;  %vm13863_vm10 = vmpackc.low %vm1314_vm14, %vm1313_vm11  ;;  %v12630_v41 = vld [vmem:[%s17410_s0 + $0x220] ss:$8 sps:$4 sm:$0xff]  }
 0x1b7   :  { %v789_v57 = vadd.f32 %v12971_v16, %v788_v15  ;;  %v790_v5 = vpop.f32.mrb[83].mxu0  ;;  %v952_v40 = vmax.f32 %v786_v14, 0.0  ;;  %v18145_v56 = vsel %vm13863_vm10, 4294967295, %v18144_v56  ;;  %vm13869_vm7 = vcmp.ge.s32.totalorder %v1099_v20, 1 }
 0x1b8   :  { %18146 = vst [vmem:[#allocation73_spill] sm:$0xff] %v18145_v56  ;;  %vm13873_vm0 = vcmp.le.s32.totalorder %v1099_v20, 16  ;;  %vm13880_vm2 = vcmp.ge.s32.totalorder %v1100_v28, 1  ;;  %vm13884_vm8 = vcmp.le.s32.totalorder %v1100_v28, 16  ;;  %v12628_v28 = vld [vmem:[%s17410_s0 + $0x224] ss:$8 sps:$4 sm:$0xff]  }
 0x1b9   :  { %v953_v12 = vmax.f32 %v789_v57, 0.0  ;;  %vm1315_vm11 = vmand %vm13869_vm7, %vm13873_vm0  ;;  %v1101_v5 = vshra.s32 %v13878_v19, 5  ;;  %895 = vmatprep.mubr.bf16.mxu0 %v12628_v28  ;;  %v13927_v15 = vadd.s32 368, %v12982_v26  ;;  %v13981_v28 = vadd.s32 384, %v12982_v26 }
 0x1ba   :  { %vm1316_vm14 = vmand %vm13880_vm2, %vm13884_vm8  ;;  %896 = vmatmul.mubr.bf16.gmra.mrb[136].mxu0 %v12630_v41 }
 0x1bb   :  { %v13867_v11 = vpack.c.bf16 %v953_v12, %v952_v40  ;;  %v13889_v12 = vadd.s32 360, %v12982_v26  ;;  %vm13912_vm7 = vmpackc.low %vm1316_vm14, %vm1315_vm11  ;;  %vm13918_vm0 = vcmp.ge.s32.totalorder %v1101_v5, 1  ;;  %18166 = vst [vmem:[#allocation79_spill] sm:$0xff] %v13927_v15 }
 0x1bc   :  { %v793_v45 = vpop.f32.mrb[84].mxu0  ;;  %v18159_v33 = vsel %vm13912_vm7, 4294967295, %v18158_v33  ;;  %18180 = vst [vmem:[#allocation83_spill] sm:$0xff] %v13981_v28 }
 0x1bd   :  { %18147 = vst [vmem:[#allocation74_spill] sm:$0xff] %v13867_v11  ;;  %18157 = vst [vmem:[#allocation76_spill] sm:$0xff] %v13889_v12  ;;  %v794_v40 = vadd.f32 %v12971_v16, %v793_v45  ;;  %v795_v57 = vpop.f32.mrb[85].mxu0  ;;  %10982 = vmatprep.mubr.msk.bf16.mxu1 %vm13863_vm10, %v13867_v11  ;;  %v1102_v27 = vshra.s32 %v13889_v12, 5  ;;  %vm13922_vm10 = vcmp.le.s32.totalorder %v1101_v5, 16 }
 0x1be   :  { %v796_v20 = vpop.f32.mrb[86].mxu0  ;;  %18160 = vst [vmem:[#allocation77_spill] sm:$0xff] %v18159_v33  ;;  %vm1317_vm11 = vmand %vm13918_vm0, %vm13922_vm10  ;;  %v12631_v5 = vld [vmem:[%s17410_s0 + $0x234] ss:$8 sps:$4 sm:$0xff]  }
 0x1bf   :  { %v797_v45 = vadd.f32 %v12971_v16, %v796_v20  ;;  %v798_v57 = vpop.f32.mrb[87].mxu0  ;;  %v954_v13 = vmax.f32 %v794_v40, 0.0  ;;  %vm13929_vm2 = vcmp.ge.s32.totalorder %v1102_v27, 1  ;;  %vm13933_vm8 = vcmp.le.s32.totalorder %v1102_v27, 16  ;;  %v12633_v27 = vld [vmem:[%s17410_s0 + $0x230] ss:$8 sps:$4 sm:$0xff]   ;;  %903 = vmatprep.mubr.bf16.mxu0 %v12631_v5 }
 0x1c0   :  { %vm1318_vm10 = vmand %vm13929_vm2, %vm13933_vm8  ;;  %v1103_v20 = vshra.s32 %v13927_v15, 5  ;;  %v14024_v5 = vadd.s32 400, %v12982_v26 }
 0x1c1   :  { %v955_v52 = vmax.f32 %v797_v45, 0.0  ;;  %vm13966_vm14 = vmpackc.low %vm1318_vm10, %vm1317_vm11 }
 0x1c2   :  { %904 = vmatmul.mubr.bf16.gmra.mrb[140].mxu0 %v12633_v27  ;;  %v18173_v7 = vsel %vm13966_vm14, 4294967295, %v18172_v7  ;;  %vm13972_vm0 = vcmp.ge.s32.totalorder %v1103_v20, 1  ;;  %18194 = vst [vmem:[#allocation87_spill] sm:$0xff] %v14024_v5 }
 0x1c3   :  { %v13916_v25 = vpack.c.bf16 %v955_v52, %v954_v13  ;;  %v13938_v52 = vadd.s32 376, %v12982_v26  ;;  %18174 = vst [vmem:[#allocation81_spill] sm:$0xff] %v18173_v7 }
 0x1c4   :  { %v801_v40 = vpop.f32.mrb[88].mxu0 }
 0x1c5   :  { %18161 = vst [vmem:[#allocation78_spill] sm:$0xff] %v13916_v25  ;;  %18171 = vst [vmem:[#allocation80_spill] sm:$0xff] %v13938_v52  ;;  %v802_v13 = vadd.f32 %v12971_v16, %v801_v40  ;;  %v803_v45 = vpop.f32.mrb[89].mxu0  ;;  %10983 = vmatmul.mubr.msk.bf16.gmra.mrb[36].mxu1 %vm13912_vm7, %v13916_v25  ;;  %v13957_v16 = vld [vmem:[%s17412_s2] ss:$0 sm:$0xff]  ;;  %v1104_v14 = vshra.s32 %v13938_v52, 5 }
 0x1c6   :  { %v804_v57 = vpop.f32.mrb[90].mxu0  ;;  %vm13976_vm7 = vcmp.le.s32.totalorder %v1103_v20, 16 }
 0x1c7   :  { %v805_v40 = vadd.f32 %v13957_v16, %v804_v57  ;;  %v806_v45 = vpop.f32.mrb[91].mxu0  ;;  %v956_v12 = vmax.f32 %v802_v13, 0.0  ;;  %vm13983_vm2 = vcmp.ge.s32.totalorder %v1104_v14, 1  ;;  %vm13987_vm8 = vcmp.le.s32.totalorder %v1104_v14, 16  ;;  %vm1319_vm11 = vmand %vm13972_vm0, %vm13976_vm7 }
 0x1c8   :  { %vm1320_vm10 = vmand %vm13983_vm2, %vm13987_vm8 }
 0x1c9   :  { %v957_v19 = vmax.f32 %v805_v40, 0.0  ;;  %v18620_v46 = vld [vmem:[#allocation87_spill] sm:$0xff] }
 0x1cb   :  { %v13970_v3 = vpack.c.bf16 %v957_v19, %v956_v12  ;;  %v13992_v19 = vadd.s32 392, %v12982_v26 }
 0x1cc   :  { %v809_v13 = vpop.f32.mrb[92].mxu0 }
 0x1cd   :  { %18175 = vst [vmem:[#allocation82_spill] sm:$0xff] %v13970_v3  ;;  %18185 = vst [vmem:[#allocation84_spill] sm:$0xff] %v13992_v19  ;;  %v810_v12 = vadd.f32 %v13957_v16, %v809_v13  ;;  %v811_v40 = vpop.f32.mrb[93].mxu0  ;;  %10986 = vmatprep.mubr.msk.bf16.mxu1 %vm13966_vm14, %v13970_v3  ;;  %v1105_v13 = vshra.s32 %v13981_v28, 5 }
 0x1ce   :  { %v812_v45 = vpop.f32.mrb[94].mxu0  ;;  %v1106_v40 = vshra.s32 %v13992_v19, 5  ;;  %vm14009_vm14 = vmpackc.low %vm1320_vm10, %vm1319_vm11 }
 0x1cf   :  { %v813_v20 = vadd.f32 %v13957_v16, %v812_v45  ;;  %v814_v14 = vpop.f32.mrb[95].mxu0  ;;  %v958_v52 = vmax.f32 %v810_v12, 0.0  ;;  %v18187_v51 = vsel %vm14009_vm14, 4294967295, %v18186_v51  ;;  %vm14015_vm7 = vcmp.ge.s32.totalorder %v1105_v13, 1 }
 0x1d0   :  { %18188 = vst [vmem:[#allocation85_spill] sm:$0xff] %v18187_v51  ;;  %vm14019_vm0 = vcmp.le.s32.totalorder %v1105_v13, 16  ;;  %vm14026_vm2 = vcmp.ge.s32.totalorder %v1106_v40, 1  ;;  %vm14030_vm8 = vcmp.le.s32.totalorder %v1106_v40, 16  ;;  %v14067_v12 = vadd.s32 416, %v12982_v26 }
 0x1d1   :  { %v959_v15 = vmax.f32 %v813_v20, 0.0  ;;  %vm1321_vm11 = vmand %vm14015_vm7, %vm14019_vm0 }
 0x1d2   :  { %vm1322_vm10 = vmand %vm14026_vm2, %vm14030_vm8  ;;  %18208 = vst [vmem:[#allocation91_spill] sm:$0xff] %v14067_v12 }
 0x1d3   :  { %v14013_v57 = vpack.c.bf16 %v959_v15, %v958_v52  ;;  %v14035_v15 = vadd.s32 408, %v12982_v26 }
 0x1d4   :  { %v817_v45 = vpop.f32.mrb[96].mxu0 }
 0x1d5   :  { %18189 = vst [vmem:[#allocation86_spill] sm:$0xff] %v14013_v57  ;;  %18199 = vst [vmem:[#allocation88_spill] sm:$0xff] %v14035_v15  ;;  %v818_v52 = vadd.f32 %v13957_v16, %v817_v45  ;;  %v819_v14 = vpop.f32.mrb[97].mxu0  ;;  %10987 = vmatmul.mubr.msk.bf16.gmra.mrb[40].mxu1 %vm14009_vm14, %v14013_v57  ;;  %v1107_v45 = vshra.s32 %v14024_v5, 5 }
 0x1d6   :  { %v820_v13 = vpop.f32.mrb[98].mxu0  ;;  %v1108_v14 = vshra.s32 %v14035_v15, 5  ;;  %vm14052_vm14 = vmpackc.low %vm1322_vm10, %vm1321_vm11 }
 0x1d7   :  { %v821_v40 = vadd.f32 %v13957_v16, %v820_v13  ;;  %v822_v19 = vpop.f32.mrb[99].mxu0  ;;  %v960_v28 = vmax.f32 %v818_v52, 0.0  ;;  %v18201_v32 = vsel %vm14052_vm14, 4294967295, %v18200_v32  ;;  %vm14058_vm7 = vcmp.ge.s32.totalorder %v1107_v45, 1 }
 0x1d8   :  { %18202 = vst [vmem:[#allocation89_spill] sm:$0xff] %v18201_v32  ;;  %vm14062_vm0 = vcmp.le.s32.totalorder %v1107_v45, 16  ;;  %vm14069_vm2 = vcmp.ge.s32.totalorder %v1108_v14, 1  ;;  %vm14073_vm8 = vcmp.le.s32.totalorder %v1108_v14, 16  ;;  %v18214_v32 = vmov 0 }
 0x1d9   :  { %v961_v47 = vmax.f32 %v821_v40, 0.0  ;;  %vm1323_vm11 = vmand %vm14058_vm7, %vm14062_vm0  ;;  %v14110_v52 = vadd.s32 432, %v12982_v26 }
 0x1da   :  { %vm1324_vm10 = vmand %vm14069_vm2, %vm14073_vm8 }
 0x1db   :  { %v14056_v41 = vpack.c.bf16 %v961_v47, %v960_v28  ;;  %v14078_v47 = vadd.s32 424, %v12982_v26  ;;  %18222 = vst [vmem:[#allocation95_spill] sm:$0xff] %v14110_v52 }
 0x1dc   :  { %v825_v20 = vpop.f32.mrb[100].mxu0 }
 0x1dd   :  { %18203 = vst [vmem:[#allocation90_spill] sm:$0xff] %v14056_v41  ;;  %18213 = vst [vmem:[#allocation92_spill] sm:$0xff] %v14078_v47  ;;  %v826_v28 = vadd.f32 %v13957_v16, %v825_v20  ;;  %v827_v40 = vpop.f32.mrb[101].mxu0  ;;  %10990 = vmatprep.mubr.msk.bf16.mxu1 %vm14052_vm14, %v14056_v41  ;;  %v1109_v20 = vshra.s32 %v14067_v12, 5  ;;  %v18296_v41 = vmov 0 }
 0x1de   :  { %v828_v45 = vpop.f32.mrb[102].mxu0  ;;  %v1110_v40 = vshra.s32 %v14078_v47, 5  ;;  %vm14095_vm14 = vmpackc.low %vm1324_vm10, %vm1323_vm11 }
 0x1df   :  { %v829_v14 = vadd.f32 %v13957_v16, %v828_v45  ;;  %v830_v15 = vpop.f32.mrb[103].mxu0  ;;  %v962_v5 = vmax.f32 %v826_v28, 0.0  ;;  %v18215_v32 = vsel %vm14095_vm14, 4294967295, %v18214_v32  ;;  %vm14101_vm7 = vcmp.ge.s32.totalorder %v1109_v20, 1 }
 0x1e0   :  { %18216 = vst [vmem:[#allocation93_spill] sm:$0xff] %v18215_v32  ;;  %vm14105_vm0 = vcmp.le.s32.totalorder %v1109_v20, 16  ;;  %vm14112_vm2 = vcmp.ge.s32.totalorder %v1110_v40, 1  ;;  %vm14116_vm8 = vcmp.le.s32.totalorder %v1110_v40, 16  ;;  %v14153_v28 = vadd.s32 448, %v12982_v26 }
 0x1e1   :  { %v963_v30 = vmax.f32 %v829_v14, 0.0  ;;  %vm1325_vm11 = vmand %vm14101_vm7, %vm14105_vm0 }
 0x1e2   :  { %vm1326_vm10 = vmand %vm14112_vm2, %vm14116_vm8  ;;  %18236 = vst [vmem:[#allocation99_spill] sm:$0xff] %v14153_v28 }
 0x1e3   :  { %v14099_v27 = vpack.c.bf16 %v963_v30, %v962_v5  ;;  %v14121_v30 = vadd.s32 440, %v12982_v26 }
 0x1e4   :  { %v833_v13 = vpop.f32.mrb[104].mxu0 }
 0x1e5   :  { %18217 = vst [vmem:[#allocation94_spill] sm:$0xff] %v14099_v27  ;;  %18227 = vst [vmem:[#allocation96_spill] sm:$0xff] %v14121_v30  ;;  %v834_v5 = vadd.f32 %v13957_v16, %v833_v13  ;;  %v835_v14 = vpop.f32.mrb[105].mxu0  ;;  %10991 = vmatmul.mubr.msk.bf16.gmra.mrb[44].mxu1 %vm14095_vm14, %v14099_v27  ;;  %v1111_v13 = vshra.s32 %v14110_v52, 5  ;;  %v18228_v27 = vmov 0 }
 0x1e6   :  { %v836_v20 = vpop.f32.mrb[106].mxu0  ;;  %v1112_v14 = vshra.s32 %v14121_v30, 5  ;;  %vm14138_vm14 = vmpackc.low %vm1326_vm10, %vm1325_vm11 }
 0x1e7   :  { %v837_v40 = vadd.f32 %v13957_v16, %v836_v20  ;;  %v838_v47 = vpop.f32.mrb[107].mxu0  ;;  %v964_v12 = vmax.f32 %v834_v5, 0.0  ;;  %v18229_v27 = vsel %vm14138_vm14, 4294967295, %v18228_v27  ;;  %vm14144_vm7 = vcmp.ge.s32.totalorder %v1111_v13, 1 }
 0x1e8   :  { %18230 = vst [vmem:[#allocation97_spill] sm:$0xff] %v18229_v27  ;;  %vm14148_vm0 = vcmp.le.s32.totalorder %v1111_v13, 16  ;;  %vm14155_vm2 = vcmp.ge.s32.totalorder %v1112_v14, 1  ;;  %vm14159_vm8 = vcmp.le.s32.totalorder %v1112_v14, 16  ;;  %v14196_v5 = vadd.s32 464, %v12982_v26 }
 0x1e9   :  { %v965_v32 = vmax.f32 %v837_v40, 0.0  ;;  %vm1327_vm11 = vmand %vm14144_vm7, %vm14148_vm0 }
 0x1ea   :  { %vm1328_vm10 = vmand %vm14155_vm2, %vm14159_vm8  ;;  %18250 = vst [vmem:[#allocation103_spill] sm:$0xff] %v14196_v5 }
 0x1eb   :  { %v14142_v19 = vpack.c.bf16 %v965_v32, %v964_v12  ;;  %v14164_v32 = vadd.s32 456, %v12982_v26 }
 0x1ec   :  { %v841_v45 = vpop.f32.mrb[108].mxu0 }
 0x1ed   :  { %18231 = vst [vmem:[#allocation98_spill] sm:$0xff] %v14142_v19  ;;  %18241 = vst [vmem:[#allocation100_spill] sm:$0xff] %v14164_v32  ;;  %v842_v12 = vadd.f32 %v13957_v16, %v841_v45  ;;  %v843_v40 = vpop.f32.mrb[109].mxu0  ;;  %10994 = vmatprep.mubr.msk.bf16.mxu1 %vm14138_vm14, %v14142_v19  ;;  %v1113_v45 = vshra.s32 %v14153_v28, 5  ;;  %v18242_v19 = vmov 0 }
 0x1ee   :  { %v844_v13 = vpop.f32.mrb[110].mxu0  ;;  %v1114_v40 = vshra.s32 %v14164_v32, 5  ;;  %vm14181_vm14 = vmpackc.low %vm1328_vm10, %vm1327_vm11 }
 0x1ef   :  { %v845_v14 = vadd.f32 %v13957_v16, %v844_v13  ;;  %v846_v30 = vpop.f32.mrb[111].mxu0  ;;  %v966_v52 = vmax.f32 %v842_v12, 0.0  ;;  %v18243_v19 = vsel %vm14181_vm14, 4294967295, %v18242_v19  ;;  %vm14187_vm7 = vcmp.ge.s32.totalorder %v1113_v45, 1 }
 0x1f0   :  { %18244 = vst [vmem:[#allocation101_spill] sm:$0xff] %v18243_v19  ;;  %vm14191_vm0 = vcmp.le.s32.totalorder %v1113_v45, 16  ;;  %vm14198_vm2 = vcmp.ge.s32.totalorder %v1114_v40, 1  ;;  %vm14202_vm8 = vcmp.le.s32.totalorder %v1114_v40, 16  ;;  %v14239_v12 = vadd.s32 480, %v12982_v26 }
 0x1f1   :  { %v967_v27 = vmax.f32 %v845_v14, 0.0  ;;  %vm1329_vm11 = vmand %vm14187_vm7, %vm14191_vm0 }
 0x1f2   :  { %vm1330_vm10 = vmand %vm14198_vm2, %vm14202_vm8  ;;  %18264 = vst [vmem:[#allocation107_spill] sm:$0xff] %v14239_v12 }
 0x1f3   :  { %v14185_v15 = vpack.c.bf16 %v967_v27, %v966_v52  ;;  %v14207_v27 = vadd.s32 472, %v12982_v26 }
 0x1f4   :  { %v849_v20 = vpop.f32.mrb[112].mxu0 }
 0x1f5   :  { %18245 = vst [vmem:[#allocation102_spill] sm:$0xff] %v14185_v15  ;;  %18255 = vst [vmem:[#allocation104_spill] sm:$0xff] %v14207_v27  ;;  %v850_v52 = vadd.f32 %v13957_v16, %v849_v20  ;;  %v851_v14 = vpop.f32.mrb[113].mxu0  ;;  %10995 = vmatmul.mubr.msk.bf16.gmra.mrb[48].mxu1 %vm14181_vm14, %v14185_v15  ;;  %v1115_v20 = vshra.s32 %v14196_v5, 5  ;;  %v18256_v15 = vmov 0 }
 0x1f6   :  { %v852_v45 = vpop.f32.mrb[114].mxu0  ;;  %v1116_v14 = vshra.s32 %v14207_v27, 5  ;;  %vm14224_vm14 = vmpackc.low %vm1330_vm10, %vm1329_vm11 }
 0x1f7   :  { %v853_v40 = vadd.f32 %v13957_v16, %v852_v45  ;;  %v854_v32 = vpop.f32.mrb[115].mxu0  ;;  %v968_v28 = vmax.f32 %v850_v52, 0.0  ;;  %v18257_v15 = vsel %vm14224_vm14, 4294967295, %v18256_v15  ;;  %vm14230_vm7 = vcmp.ge.s32.totalorder %v1115_v20, 1 }
 0x1f8   :  { %18258 = vst [vmem:[#allocation105_spill] sm:$0xff] %v18257_v15  ;;  %vm14234_vm0 = vcmp.le.s32.totalorder %v1115_v20, 16  ;;  %vm14241_vm2 = vcmp.ge.s32.totalorder %v1116_v14, 1  ;;  %vm14245_vm8 = vcmp.le.s32.totalorder %v1116_v14, 16  ;;  %v14282_v52 = vadd.s32 496, %v12982_v26 }
 0x1f9   :  { %v969_v19 = vmax.f32 %v853_v40, 0.0  ;;  %vm1331_vm11 = vmand %vm14230_vm7, %vm14234_vm0 }
 0x1fa   :  { %vm1332_vm10 = vmand %vm14241_vm2, %vm14245_vm8  ;;  %18278 = vst [vmem:[#allocation111_spill] sm:$0xff] %v14282_v52 }
 0x1fb   :  { %v14228_v47 = vpack.c.bf16 %v969_v19, %v968_v28  ;;  %v14250_v19 = vadd.s32 488, %v12982_v26 }
 0x1fc   :  { %v857_v13 = vpop.f32.mrb[116].mxu0 }
 0x1fd   :  { %18259 = vst [vmem:[#allocation106_spill] sm:$0xff] %v14228_v47  ;;  %18269 = vst [vmem:[#allocation108_spill] sm:$0xff] %v14250_v19  ;;  %v858_v28 = vadd.f32 %v13957_v16, %v857_v13  ;;  %v859_v40 = vpop.f32.mrb[117].mxu0  ;;  %10998 = vmatprep.mubr.msk.bf16.mxu1 %vm14224_vm14, %v14228_v47  ;;  %v1117_v13 = vshra.s32 %v14239_v12, 5  ;;  %v18270_v47 = vmov 0 }
 0x1fe   :  { %v860_v20 = vpop.f32.mrb[118].mxu0  ;;  %v1118_v40 = vshra.s32 %v14250_v19, 5  ;;  %vm14267_vm14 = vmpackc.low %vm1332_vm10, %vm1331_vm11 }
 0x1ff   :  { %v861_v14 = vadd.f32 %v13957_v16, %v860_v20  ;;  %v862_v27 = vpop.f32.mrb[119].mxu0  ;;  %v970_v5 = vmax.f32 %v858_v28, 0.0  ;;  %v18271_v47 = vsel %vm14267_vm14, 4294967295, %v18270_v47  ;;  %vm14273_vm7 = vcmp.ge.s32.totalorder %v1117_v13, 1  ;;  %v14328_v20 = vld [vmem:[%s17411_s3 + $0x180] sm:$0xff]  }
 0x200   :  { %18272 = vst [vmem:[#allocation109_spill] sm:$0xff] %v18271_v47  ;;  %vm14277_vm0 = vcmp.le.s32.totalorder %v1117_v13, 16  ;;  %vm14284_vm2 = vcmp.ge.s32.totalorder %v1118_v40, 1  ;;  %vm14288_vm8 = vcmp.le.s32.totalorder %v1118_v40, 16  ;;  %v1049_v28 = vadd.s32 512, %v12982_v26  ;;  %11090 = vmatprep.subr.bf16.mxu1 %v14328_v20 }
 0x201   :  { %v971_v15 = vmax.f32 %v861_v14, 0.0  ;;  %vm1333_vm11 = vmand %vm14273_vm7, %vm14277_vm0 }
 0x202   :  { %vm1334_vm10 = vmand %vm14284_vm2, %vm14288_vm8 }
 0x203   :  { %v14271_v30 = vpack.c.bf16 %v971_v15, %v970_v5  ;;  %v14293_v15 = vadd.s32 504, %v12982_v26 }
 0x204   :  { %v865_v45 = vpop.f32.mrb[120].mxu0 }
 0x205   :  { %18273 = vst [vmem:[#allocation110_spill] sm:$0xff] %v14271_v30  ;;  %18283 = vst [vmem:[#allocation112_spill] sm:$0xff] %v14293_v15  ;;  %v866_v5 = vadd.f32 %v13957_v16, %v865_v45  ;;  %v867_v14 = vpop.f32.mrb[121].mxu0  ;;  %10999 = vmatmul.mubr.msk.bf16.gmra.mrb[52].mxu1 %vm14267_vm14, %v14271_v30  ;;  %v1119_v45 = vshra.s32 %v14282_v52, 5  ;;  %v18284_v30 = vmov 0 }
 0x206   :  { %v868_v13 = vpop.f32.mrb[122].mxu0  ;;  %v1120_v14 = vshra.s32 %v14293_v15, 5  ;;  %vm14310_vm14 = vmpackc.low %vm1334_vm10, %vm1333_vm11 }
 0x207   :  { %v869_v40 = vadd.f32 %v13957_v16, %v868_v13  ;;  %v870_v19 = vpop.f32.mrb[123].mxu0  ;;  %v972_v12 = vmax.f32 %v866_v5, 0.0  ;;  %v18285_v30 = vsel %vm14310_vm14, 4294967295, %v18284_v30  ;;  %vm14316_vm7 = vcmp.ge.s32.totalorder %v1119_v45, 1 }
 0x208   :  { %18286 = vst [vmem:[#allocation113_spill] sm:$0xff] %v18285_v30  ;;  %vm14320_vm0 = vcmp.le.s32.totalorder %v1119_v45, 16  ;;  %vm14330_vm2 = vcmp.ge.s32.totalorder %v1120_v14, 1  ;;  %vm14334_vm8 = vcmp.le.s32.totalorder %v1120_v14, 16  ;;  %v1051_v19 = vadd.s32 528, %v12982_v26 }
 0x209   :  { %v973_v47 = vmax.f32 %v869_v40, 0.0  ;;  %vm1335_vm11 = vmand %vm14316_vm7, %vm14320_vm0 }
 0x20a   :  { %vm1336_vm10 = vmand %vm14330_vm2, %vm14334_vm8 }
 0x20b   :  { %v14314_v32 = vpack.c.bf16 %v973_v47, %v972_v12  ;;  %v1050_v12 = vadd.s32 520, %v12982_v26 }
 0x20c   :  { %v873_v5 = vpop.f32.mrb[124].mxu0 }
 0x20d   :  { %18287 = vst [vmem:[#allocation114_spill] sm:$0xff] %v14314_v32  ;;  %v874_v40 = vadd.f32 %v13957_v16, %v873_v5  ;;  %v875_v45 = vpop.f32.mrb[125].mxu0  ;;  %11002 = vmatprep.mubr.msk.bf16.mxu1 %vm14310_vm14, %v14314_v32  ;;  %v1121_v5 = vshra.s32 %v1049_v28, 5  ;;  %vm14353_vm14 = vmpackc.low %vm1336_vm10, %vm1335_vm11  ;;  %v1052_v28 = vadd.s32 536, %v12982_v26 }
 0x20e   :  { %v876_v15 = vpop.f32.mrb[126].mxu0  ;;  %v1122_v45 = vshra.s32 %v1050_v12, 5  ;;  %v18297_v41 = vsel %vm14353_vm14, 4294967295, %v18296_v41  ;;  %v14418_v12 = vadd.s32 16, %v12982_v26 }
 0x20f   :  { %v877_v14 = vadd.f32 %v13957_v16, %v876_v15  ;;  %v878_v52 = vpop.f32.mrb[127].mxu0  ;;  %v974_v30 = vmax.f32 %v874_v40, 0.0  ;;  %18298 = vst [vmem:[#allocation115_spill] sm:$0xff] %v18297_v41  ;;  %vm14360_vm7 = vcmp.ge.s32.totalorder %v1121_v5, 1  ;;  %vm14364_vm0 = vcmp.le.s32.totalorder %v1121_v5, 16 }
 0x210   :  { %vm14369_vm2 = vcmp.ge.s32.totalorder %v1122_v45, 1  ;;  %vm14373_vm8 = vcmp.le.s32.totalorder %v1122_v45, 16  ;;  %v14382_v40 = vadd.s32 8, %v12982_v26  ;;  %vm1337_vm11 = vmand %vm14360_vm7, %vm14364_vm0  ;;  %v1123_v5 = vshra.s32 %v1051_v19, 5  ;;  %18321 = vst [vmem:[#allocation120_spill] sm:$0xff] %v14418_v12 }
 0x211   :  { %v975_v32 = vmax.f32 %v877_v14, 0.0  ;;  %vm1338_vm10 = vmand %vm14369_vm2, %vm14373_vm8  ;;  %v18309_v52 = vmov 0  ;;  %v1059_v19 = vshra.s32 %v14418_v12, 5 }
 0x212   :  { %18308 = vst [vmem:[#allocation117_spill] sm:$0xff] %v14382_v40  ;;  %v1058_v57 = vshra.s32 %v14382_v40, 5  ;;  %vm14399_vm7 = vcmp.ge.s32.totalorder %v1123_v5, 1  ;;  %vm14403_vm0 = vcmp.le.s32.totalorder %v1123_v5, 16  ;;  %v18333_v5 = vmov 0 }
 0x213   :  { %v14358_v27 = vpack.c.bf16 %v975_v32, %v974_v30  ;;  %vm1339_vm1 = vmand %vm14399_vm7, %vm14403_vm0 }
 0x214   :  { %v881_v13 = vpop.f32.mrb[128].mxu0  ;;  %vm14439_vm3 = vcmp.ge.s32.totalorder %v1058_v57, 1  ;;  %vm1202_vm9 = vcmp.le.s32.totalorder %v1058_v57, 16 }
 0x215   :  { %18299 = vst [vmem:[#allocation116_spill] sm:$0xff] %v14358_v27  ;;  %v882_v30 = vadd.f32 %v13957_v16, %v881_v13  ;;  %v883_v32 = vpop.f32.mrb[129].mxu0  ;;  %11003 = vmatmul.mubr.msk.bf16.gmra.mrb[56].mxu1 %vm14353_vm14, %v14358_v27  ;;  %v1124_v13 = vshra.s32 %v1052_v28, 5  ;;  %vm14395_vm14 = vmpackc.low %vm1338_vm10, %vm1337_vm11  ;;  %v18329_v28 = vmov 0 }
 0x216   :  { %v884_v14 = vpop.f32.mrb[130].mxu0  ;;  %v1057_v32 = vshra.s32 %v12982_v26, 5  ;;  %v18310_v52 = vsel %vm14395_vm14, 4294967295, %v18309_v52  ;;  %vm1274_vm7 = vmand %vm14439_vm3, %vm1202_vm9 }
 0x217   :  { %v885_v45 = vadd.f32 %v13957_v16, %v884_v14  ;;  %v886_v51 = vpop.f32.mrb[131].mxu0  ;;  %v976_v41 = vmax.f32 %v882_v30, 0.0  ;;  %18311 = vst [vmem:[#allocation118_spill] sm:$0xff] %v18310_v52  ;;  %vm14409_vm2 = vcmp.ge.s32.totalorder %v1124_v13, 1  ;;  %vm14413_vm8 = vcmp.le.s32.totalorder %v1124_v13, 16  ;;  %v12636_v13 = vld [vmem:[%s17411_s3 + $0x190] sm:$0xff]  }
 0x218   :  { %vm14420_vm11 = vcmp.ge.s32.totalorder %v1057_v32, 1  ;;  %vm14424_vm10 = vcmp.le.s32.totalorder %v1057_v32, 16  ;;  %vm1340_vm15 = vmand %vm14409_vm2, %vm14413_vm8  ;;  %vm1131_vm8 = vcmp.ge.s32.totalorder %v1059_v19, 1  ;;  %v18336_v14 = vmov 0  ;;  %v18375_v52 = vld [vmem:[#allocation109_spill] sm:$0xff] }
 0x219   :  { %v977_v27 = vmax.f32 %v885_v45, 0.0  ;;  %vm14456_vm0 = vmpackc.low %vm1340_vm15, %vm1339_vm1  ;;  %vm18340_vm1 = vnez %v17969_v62 }
 0x21a   :  { %v18330_v28 = vsel %vm14456_vm0, 4294967295, %v18329_v28 }
 0x21b   :  { %v14407_v15 = vpack.c.bf16 %v977_v27, %v976_v41  ;;  %v14429_v41 = vadd.s32 24, %v12982_v26  ;;  %18331 = vst [vmem:[#allocation122_spill] sm:$0xff] %v18330_v28 }
 0x21c   :  { %v889_v30 = vpop.f32.mrb[132].mxu0 }
 0x21d   :  { %18316 = vst [vmem:[#allocation119_spill] sm:$0xff] %v14407_v15  ;;  %18326 = vst [vmem:[#allocation121_spill] sm:$0xff] %v14429_v41  ;;  %v890_v27 = vadd.f32 %v13957_v16, %v889_v30  ;;  %v891_v45 = vpop.f32.mrb[133].mxu0  ;;  %11006 = vmatprep.mubr.msk.bf16.mxu1 %vm14395_vm14, %v14407_v15  ;;  %v1060_v57 = vshra.s32 %v14429_v41, 5 }
 0x21e   :  { %v892_v32 = vpop.f32.mrb[134].mxu0  ;;  %vm1273_vm14 = vmand %vm14420_vm11, %vm14424_vm10  ;;  %vm1203_vm11 = vcmp.le.s32.totalorder %v1059_v19, 16  ;;  %v12640_v19 = vld [vmem:[%s17411_s3 + $0x1b0] sm:$0xff]  }
 0x21f   :  { %v893_v30 = vadd.f32 %v13957_v16, %v892_v32  ;;  %v894_v45 = vpop.f32.mrb[135].mxu0  ;;  %v978_v51 = vmax.f32 %v890_v27, 0.0  ;;  %vm14462_vm2 = vmpackc.low %vm1274_vm7, %vm1273_vm14  ;;  %vm1132_vm10 = vcmp.ge.s32.totalorder %v1060_v57, 1  ;;  %vm1204_vm5 = vcmp.le.s32.totalorder %v1060_v57, 16  ;;  %v12635_v27 = vld [vmem:[%s17411_s3 + $0x188] sm:$0xff]   ;;  %v12641_v57 = vld [vmem:[%s17411_s3 + $0x1b8] sm:$0xff]  }
 0x220   :  { %v18334_v5 = vsel %vm14462_vm2, 4294967295, %v18333_v5  ;;  %vm1275_vm15 = vmand %vm1131_vm8, %vm1203_vm11  ;;  %v12639_v45 = vld [vmem:[%s17411_s3 + $0x1a8] sm:$0xff]   ;;  %vm18341_vm14 = vnez %v17982_v34  ;;  %vm18342_vm7 = vnez %v17996_v4  ;;  %vm18343_vm8 = vnez %v18008_v53 }
 0x221   :  { %v979_v47 = vmax.f32 %v893_v30, 0.0  ;;  %18335 = vst [vmem:[#allocation124_spill] sm:$0xff] %v18334_v5  ;;  %vm1276_vm9 = vmand %vm1132_vm10, %vm1204_vm5  ;;  %v12637_v30 = vld [vmem:[%s17411_s3 + $0x198] sm:$0xff]   ;;  %vm18339_vm5 = vnez %v17956_v37  ;;  %vm18344_vm11 = vnez %v18021_v36  ;;  %vm18345_vm10 = vnez %v18034_v31 }
 0x222   :  { %vm14472_vm3 = vmpackc.low %vm1276_vm9, %vm1275_vm15  ;;  %vm18346_vm15 = vnez %v18048_v60  ;;  %vm18347_vm9 = vnez %v18062_v2  ;;  %v18372_v5 = vld [vmem:[#allocation105_spill] sm:$0xff] }
 0x223   :  { %v14460_v32 = vpack.c.bf16 %v979_v47, %v978_v51  ;;  %v18337_v14 = vsel %vm14472_vm3, 4294967295, %v18336_v14  ;;  %v18356_v51 = vld [vmem:[#allocation86_spill] sm:$0xff]  ;;  %v18357_v47 = vld [vmem:[#allocation85_spill] sm:$0xff] }
 0x224   :  { %18338 = vst [vmem:[#allocation125_spill] sm:$0xff] %v18337_v14  ;;  %v18369_v14 = vld [vmem:[#allocation101_spill] sm:$0xff] }
 0x225   :  { %18332 = vst [vmem:[#allocation123_spill] sm:$0xff] %v14460_v32  ;;  %11007 = vmatmul.mubr.msk.bf16.gmra.mrb[60].mxu1 %vm14456_vm0, %v14460_v32  ;;  %vm18352_vm0 = vnez %v18131_v18  ;;  %v18374_v32 = vld [vmem:[#allocation110_spill] sm:$0xff] }
 0x226   :  { %11026 = vmatprep.mubr.msk.bf16.mxu1 %vm14462_vm2, %v12984_v29  ;;  %vm18349_vm2 = vnez %v18089_v59 }
 0x22d   :  { %11027 = vmatmul.mubr.msk.bf16.vlgmr.msra.gmra.mrb[0].mxu1 %vm14472_vm3, %v13002_v44  ;;  %vm18348_vm3 = vnez %v18076_v24  ;;  %v18371_v44 = vld [vmem:[#allocation106_spill] sm:$0xff] }
 0x22e   :  { %11030 = vmatprep.mubr.msk.bf16.mxu1 %vm13044_vm6, %v13048_v0  ;;  %11091 = vmatpush3.bf16.msra.mxu1 %v14328_v20  ;;  %v12638_v20 = vld [vmem:[%s17411_s3 + $0x1a0] sm:$0xff]   ;;  %vm18351_vm6 = vnez %v18117_v17 }
 0x22f   :  { %11092 = vmatprep.subr.bf16.mxu1 %v12635_v27 }
 0x232   :  { %11093 = vmatpush3.bf16.msra.mxu1 %v12635_v27  ;;  %v18359_v27 = vld [vmem:[#allocation90_spill] sm:$0xff] }
 0x233   :  { %11094 = vmatprep.subr.bf16.mxu1 %v12636_v13 }
 0x235   :  { %11031 = vmatmul.mubr.msk.bf16.gmra.mrb[4].mxu1 %vm13093_vm13, %v13097_v22  ;;  %vm18350_vm13 = vnez %v18103_v10 }
 0x236   :  { %11034 = vmatprep.mubr.msk.bf16.mxu1 %vm13142_vm4, %v13146_v48  ;;  %11095 = vmatpush3.bf16.msra.mxu1 %v12636_v13  ;;  %v18360_v13 = vld [vmem:[#allocation89_spill] sm:$0xff] }
 0x237   :  { %11096 = vmatprep.subr.bf16.mxu1 %v12637_v30 }
 0x23a   :  { %11097 = vmatpush3.bf16.msra.mxu1 %v12637_v30  ;;  %v18362_v30 = vld [vmem:[#allocation94_spill] sm:$0xff] }
 0x23b   :  { %11098 = vmatprep.subr.bf16.mxu1 %v12638_v20 }
 0x23d   :  { %11035 = vmatmul.mubr.msk.bf16.gmra.mrb[8].mxu1 %vm13191_vm12, %v13195_v9 }
 0x23e   :  { %11038 = vmatprep.mubr.msk.bf16.mxu1 %vm18339_vm5, %v13241_v38  ;;  %11099 = vmatpush3.bf16.msra.mxu1 %v12638_v20  ;;  %v18363_v20 = vld [vmem:[#allocation93_spill] sm:$0xff] }
 0x23f   :  { %11100 = vmatprep.subr.bf16.mxu1 %v12639_v45 }
 0x242   :  { %11101 = vmatpush3.bf16.msra.mxu1 %v12639_v45  ;;  %v18365_v45 = vld [vmem:[#allocation98_spill] sm:$0xff] }
 0x243   :  { %11102 = vmatprep.subr.bf16.mxu1 %v12640_v19 }
 0x245   :  { %11039 = vmatmul.mubr.msk.bf16.gmra.mrb[12].mxu1 %vm18340_vm1, %v13284_v1 }
 0x246   :  { %11042 = vmatprep.mubr.msk.bf16.mxu1 %vm18341_vm14, %v13327_v35  ;;  %11103 = vmatpush3.bf16.msra.mxu1 %v12640_v19  ;;  %v18366_v19 = vld [vmem:[#allocation97_spill] sm:$0xff] }
 0x247   :  { %11104 = vmatprep.subr.bf16.mxu1 %v12641_v57 }
 0x24a   :  { %11105 = vmatpush3.bf16.msra.mxu1 %v12641_v57  ;;  %v18368_v57 = vld [vmem:[#allocation102_spill] sm:$0xff] }
 0x24d   :  { %11043 = vmatmul.mubr.msk.bf16.gmra.mrb[16].mxu1 %vm18342_vm7, %v13370_v6 }
 0x24e   :  { %11046 = vmatprep.mubr.msk.bf16.mxu1 %vm18343_vm8, %v13413_v54 }
 0x255   :  { %11047 = vmatmul.mubr.msk.bf16.gmra.mrb[20].mxu1 %vm18344_vm11, %v13456_v39 }
 0x256   :  { %11050 = vmatprep.mubr.msk.bf16.mxu1 %vm18345_vm10, %v13499_v42 }
 0x25d   :  { %11051 = vmatmul.mubr.msk.bf16.gmra.mrb[24].mxu1 %vm18346_vm15, %v13542_v43 }
 0x25e   :  { %11054 = vmatprep.mubr.msk.bf16.mxu1 %vm18347_vm9, %v13585_v55  ;;  %vm18353_vm9 = vnez %v18145_v56 }
 0x265   :  { %11055 = vmatmul.mubr.msk.bf16.gmra.mrb[28].mxu1 %vm18348_vm3, %v13634_v61  ;;  %vm18354_vm3 = vnez %v18159_v33 }
 0x266   :  { %11058 = vmatprep.mubr.msk.bf16.mxu1 %vm18349_vm2, %v13683_v23  ;;  %vm18355_vm2 = vnez %v18173_v7 }
 0x26d   :  { %11059 = vmatmul.mubr.msk.bf16.gmra.mrb[32].mxu1 %vm18350_vm13, %v13732_v50  ;;  %vm18358_vm13 = vnez %v18357_v47 }
 0x26e   :  { %11062 = vmatprep.mubr.msk.bf16.mxu1 %vm18351_vm6, %v13781_v49  ;;  %vm18361_vm6 = vnez %v18360_v13 }
 0x275   :  { %11063 = vmatmul.mubr.msk.bf16.gmra.mrb[36].mxu1 %vm18352_vm0, %v13824_v58  ;;  %vm18364_vm0 = vnez %v18363_v20 }
 0x276   :  { %11066 = vmatprep.mubr.msk.bf16.mxu1 %vm18353_vm9, %v13867_v11  ;;  %vm18367_vm9 = vnez %v18366_v19 }
 0x27d   :  { %11067 = vmatmul.mubr.msk.bf16.gmra.mrb[40].mxu1 %vm18354_vm3, %v13916_v25  ;;  %vm18370_vm3 = vnez %v18369_v14  ;;  %v18379_v14 = vld [vmem:[#allocation113_spill] sm:$0xff] }
 0x27e   :  { %11070 = vmatprep.mubr.msk.bf16.mxu1 %vm18355_vm2, %v13970_v3  ;;  %vm18373_vm2 = vnez %v18372_v5 }
 0x285   :  { %11071 = vmatmul.mubr.msk.bf16.gmra.mrb[44].mxu1 %vm18358_vm13, %v18356_v51 }
 0x286   :  { %11074 = vmatprep.mubr.msk.bf16.mxu1 %vm18361_vm6, %v18359_v27 }
 0x28d   :  { %11075 = vmatmul.mubr.msk.bf16.gmra.mrb[48].mxu1 %vm18364_vm0, %v18362_v30  ;;  %v897_v29 = vpop.f32.mrb[136].mxu0 }
 0x28e   :  { %11078 = vmatprep.mubr.msk.bf16.mxu1 %vm18367_vm9, %v18365_v45  ;;  %v898_v21 = vadd.f32 %v13957_v16, %v897_v29  ;;  %v899_v22 = vpop.f32.mrb[137].mxu0  ;;  %vm18376_vm9 = vnez %v18375_v52  ;;  %v18383_v52 = vld [vmem:[#allocation115_spill] sm:$0xff] }
 0x28f   :  { %v900_v63 = vpop.f32.mrb[138].mxu0 }
 0x290   :  { %v980_v0 = vmax.f32 %v898_v21, 0.0  ;;  %v901_v41 = vadd.f32 %v13957_v16, %v900_v63  ;;  %v902_v12 = vpop.f32.mrb[139].mxu0 }
 0x292   :  { %v981_v40 = vmax.f32 %v901_v41, 0.0 }
 0x294   :  { %v14588_v5 = vpack.c.bf16 %v981_v40, %v980_v0  ;;  %v18397_v40 = vld [vmem:[#allocation106_spill] sm:$0xff] }
 0x295   :  { %11079 = vmatmul.mubr.msk.bf16.gmra.mrb[52].mxu1 %vm18370_vm3, %v18368_v57  ;;  %v905_v28 = vpop.f32.mrb[140].mxu0  ;;  %v18382_v57 = vld [vmem:[#allocation116_spill] sm:$0xff] }
 0x296   :  { %11082 = vmatprep.mubr.msk.bf16.mxu1 %vm18373_vm2, %v18371_v44  ;;  %v906_v15 = vadd.f32 %v13957_v16, %v905_v28  ;;  %v907_v26 = vpop.f32.mrb[141].mxu0  ;;  %18377 = vst [vmem:[#allocation126_spill] sm:$0xff] %v14588_v5  ;;  %v18378_v44 = vld [vmem:[#allocation114_spill] sm:$0xff]  ;;  %vm18380_vm2 = vnez %v18379_v14 }
 0x297   :  { %v908_v29 = vpop.f32.mrb[142].mxu0  ;;  %v18395_v26 = vld [vmem:[#allocation102_spill] sm:$0xff] }
 0x298   :  { %v982_v21 = vmax.f32 %v906_v15, 0.0  ;;  %v909_v63 = vadd.f32 %v13957_v16, %v908_v29  ;;  %v910_v22 = vpop.f32.mrb[143].mxu0  ;;  %v17678_v16 = vmov 0.0|0.0   ;;  %v18398_v15 = vld [vmem:[#allocation105_spill] sm:$0xff]  ;;  %v18400_v28 = vld [vmem:[#allocation2_spill] sm:$0xff] }
 0x299   :  { %11650 = vmatprep.subr.bf16.mxu0 %v17678_v16  ;;  %11842 = vmatprep.subr.bf16.mxu1 %v17678_v16  ;;  %v1053_v29 = vadd.s32 544, %v18400_v28  ;;  %v1055_v0 = vadd.s32 560, %v18400_v28  ;;  %v1056_v16 = vadd.s32 568, %v18400_v28 }
 0x29a   :  { %v983_v12 = vmax.f32 %v909_v63, 0.0  ;;  %v1054_v63 = vadd.s32 552, %v18400_v28 }
 0x29b   :  { %v1125_v22 = vshra.s32 %v1053_v29, 5  ;;  %v1127_v14 = vshra.s32 %v1055_v0, 5  ;;  %v1128_v29 = vshra.s32 %v1056_v16, 5  ;;  %v18412_v0 = vmov 0 }
 0x29c   :  { %v14594_v41 = vpack.c.bf16 %v983_v12, %v982_v21  ;;  %v18401_v21 = vld [vmem:[#allocation109_spill] sm:$0xff]  ;;  %v1126_v12 = vshra.s32 %v1054_v63, 5  ;;  %v18406_v63 = vmov 0 }
 0x29d   :  { %11083 = vmatmul.mubr.msk.bf16.gmra.mrb[56].mxu1 %vm18376_vm9, %v18374_v32  ;;  %vm18384_vm9 = vnez %v18383_v52  ;;  %v18410_v52 = vld [vmem:[#allocation122_spill] sm:$0xff] }
 0x29e   :  { %11086 = vmatprep.mubr.msk.bf16.mxu1 %vm18380_vm2, %v18378_v44  ;;  %18381 = vst [vmem:[#allocation127_spill] sm:$0xff] %v14594_v41 }
 0x2a5   :  { %11087 = vmatmul.mubr.msk.bf16.gmra.mrb[60].mxu1 %vm18384_vm9, %v18382_v57 }
 0x2a6   :  { %11106 = vmatprep.mubr.msk.bf16.mxu1 %vm13142_vm4, %v13146_v48 }
 0x2ad   :  { %11107 = vmatmul.mubr.msk.bf16.vlgmr.msra.gmra.mrb[0].mxu1 %vm13191_vm12, %v13195_v9 }
 0x2ae   :  { %11110 = vmatprep.mubr.msk.bf16.mxu1 %vm18339_vm5, %v13241_v38 }
 0x2b5   :  { %11111 = vmatmul.mubr.msk.bf16.gmra.mrb[4].mxu1 %vm18340_vm1, %v13284_v1  ;;  %vm1272_vm1 = vcmp.le.s32.totalorder %v1128_v29, 16 }
 0x2b6   :  { %11114 = vmatprep.mubr.msk.bf16.mxu1 %vm18341_vm14, %v13327_v35  ;;  %vm18385_vm14 = vnez %v18062_v2 }
 0x2bd   :  { %11115 = vmatmul.mubr.msk.bf16.gmra.mrb[8].mxu1 %vm18342_vm7, %v13370_v6  ;;  %vm18386_vm7 = vnez %v18076_v24 }
 0x2be   :  { %11118 = vmatprep.mubr.msk.bf16.mxu1 %vm18343_vm8, %v13413_v54  ;;  %vm18387_vm8 = vnez %v18089_v59 }
 0x2c5   :  { %11119 = vmatmul.mubr.msk.bf16.gmra.mrb[12].mxu1 %vm18344_vm11, %v13456_v39  ;;  %vm18388_vm11 = vnez %v18103_v10 }
 0x2c6   :  { %11122 = vmatprep.mubr.msk.bf16.mxu1 %vm18345_vm10, %v13499_v42  ;;  %vm18389_vm10 = vnez %v18117_v17 }
 0x2cd   :  { %11123 = vmatmul.mubr.msk.bf16.gmra.mrb[16].mxu1 %vm18346_vm15, %v13542_v43  ;;  %vm18390_vm15 = vnez %v18131_v18 }
 0x2ce   :  { %11126 = vmatprep.mubr.msk.bf16.mxu1 %vm18385_vm14, %v13585_v55  ;;  %vm18391_vm14 = vnez %v18145_v56 }
 0x2d5   :  { %11127 = vmatmul.mubr.msk.bf16.gmra.mrb[20].mxu1 %vm18386_vm7, %v13634_v61  ;;  %vm18392_vm7 = vnez %v18159_v33 }
 0x2d6   :  { %11130 = vmatprep.mubr.msk.bf16.mxu1 %vm18387_vm8, %v13683_v23  ;;  %vm18393_vm8 = vnez %v18173_v7 }
 0x2dd   :  { %11131 = vmatmul.mubr.msk.bf16.gmra.mrb[24].mxu1 %vm18388_vm11, %v13732_v50  ;;  %vm1200_vm11 = vcmp.ge.s32.totalorder %v1128_v29, 1 }
 0x2de   :  { %11134 = vmatprep.mubr.msk.bf16.mxu1 %vm18389_vm10, %v13781_v49  ;;  %vm1271_vm10 = vcmp.le.s32.totalorder %v1127_v14, 16 }
 0x2e5   :  { %11135 = vmatmul.mubr.msk.bf16.gmra.mrb[28].mxu1 %vm18390_vm15, %v13824_v58  ;;  %vm1199_vm15 = vcmp.ge.s32.totalorder %v1127_v14, 1  ;;  %v17696_v14 = vmov 0.0  }
 0x2e6   :  { %11138 = vmatprep.mubr.msk.bf16.mxu1 %vm18391_vm14, %v13867_v11  ;;  %vm18394_vm14 = vnez %v18366_v19  ;;  %3623 = vmatprep.mubr.f32.mxu0 %v17696_v14 }
 0x2ed   :  { %11139 = vmatmul.mubr.msk.bf16.gmra.mrb[32].mxu1 %vm18392_vm7, %v13916_v25 }
 0x2ee   :  { %11142 = vmatprep.mubr.msk.bf16.mxu1 %vm18393_vm8, %v13970_v3 }
 0x2f5   :  { %11143 = vmatmul.mubr.msk.bf16.gmra.mrb[36].mxu1 %vm18358_vm13, %v18356_v51  ;;  %vm18399_vm13 = vnez %v18398_v15  ;;  %v18450_v15 = vld [vmem:[#allocation25_spill] sm:$0xff] }
 0x2f6   :  { %11146 = vmatprep.mubr.msk.bf16.mxu1 %vm18361_vm6, %v18359_v27 }
 0x2fd   :  { %11147 = vmatmul.mubr.msk.bf16.gmra.mrb[40].mxu1 %vm18364_vm0, %v18362_v30  ;;  %vm18402_vm0 = vnez %v18401_v21  ;;  %v18403_v21 = vld [vmem:[#allocation119_spill] sm:$0xff] }
 0x2fe   :  { %11150 = vmatprep.mubr.msk.bf16.mxu1 %vm18394_vm14, %v18365_v45  ;;  %vm1198_vm14 = vcmp.ge.s32.totalorder %v1126_v12, 1 }
 0x305   :  { %11151 = vmatmul.mubr.msk.bf16.gmra.mrb[44].mxu1 %vm18370_vm3, %v18395_v26  ;;  %vm1197_vm3 = vcmp.ge.s32.totalorder %v1125_v22, 1 }
 0x306   :  { %11154 = vmatprep.mubr.msk.bf16.mxu1 %vm18399_vm13, %v18397_v40  ;;  %vm1269_vm13 = vcmp.le.s32.totalorder %v1125_v22, 16  ;;  %v18409_v22 = vld [vmem:[#allocation123_spill] sm:$0xff] }
 0x307   :  { %vm1341_vm8 = vmand %vm1197_vm3, %vm1269_vm13 }
 0x308   :  { %vm1343_vm13 = vmand %vm1199_vm15, %vm1271_vm10 }
 0x309   :  { %vm1344_vm3 = vmand %vm1200_vm11, %vm1272_vm1 }
 0x30d   :  { %11155 = vmatmul.mubr.msk.bf16.gmra.mrb[48].mxu1 %vm18402_vm0, %v18374_v32  ;;  %vm1270_vm0 = vcmp.le.s32.totalorder %v1126_v12, 16  ;;  %v18404_v32 = vld [vmem:[#allocation118_spill] sm:$0xff] }
 0x30e   :  { %11158 = vmatprep.mubr.msk.bf16.mxu1 %vm18380_vm2, %v18378_v44  ;;  %vm18405_vm6 = vnez %v18404_v32  ;;  %vm1342_vm2 = vmand %vm1198_vm14, %vm1270_vm0  ;;  %v18420_v44 = vmov 0.0  }
 0x30f   :  { %vm14692_vm7 = vmpackc.low %vm1342_vm2, %vm1341_vm8 }
 0x310   :  { %v18407_v63 = vsel %vm14692_vm7, 4294967295, %v18406_v63  ;;  %vm14702_vm0 = vmpackc.low %vm1344_vm3, %vm1343_vm13 }
 0x311   :  { %18408 = vst [vmem:[#allocation128_spill] sm:$0xff] %v18407_v63  ;;  %v18413_v0 = vsel %vm14702_vm0, 4294967295, %v18412_v0 }
 0x312   :  { %18414 = vst [vmem:[#allocation129_spill] sm:$0xff] %v18413_v0 }
 0x315   :  { %11159 = vmatmul.mubr.msk.bf16.gmra.mrb[52].mxu1 %vm18384_vm9, %v18382_v57  ;;  %vm18411_vm9 = vnez %v18410_v52 }
 0x316   :  { %11162 = vmatprep.mubr.msk.bf16.mxu1 %vm18405_vm6, %v18403_v21 }
 0x31d   :  { %11163 = vmatmul.mubr.msk.bf16.gmra.mrb[56].mxu1 %vm18411_vm9, %v18409_v22  ;;  %v18415_v22 = vmov 0.0|0.0  }
 0x31e   :  { %11166 = vmatprep.mubr.msk.bf16.mxu1 %vm14692_vm7, %v14588_v5  ;;  %vm18498_vm7 = vnez %v18076_v24 }
 0x325   :  { %11167 = vmatmul.mubr.msk.bf16.gmra.mrb[60].mxu1 %vm14702_vm0, %v14594_v41  ;;  %vm18495_vm0 = vnez %v18034_v31 }
 0x326   :  { %3823 = vmatprep.mubr.f32.mxu1 %v17696_v14 }
 0x380   :  { %v11108_v16 = vpop.f32.mrb[0].mxu1 }
 0x381   :  { %v2728_v12 = vpop.f32.mrb[1].mxu1 }
 0x382   :  { %v11109_v29 = vpop.f32.mrb[2].mxu1 }
 0x383   :  { %v11654_v63 = vpack.c.bf16 %v11109_v29, %v11108_v16  ;;  %v2731_v5 = vpop.f32.mrb[3].mxu1 }
 0x384   :  { %v11651_v52 = vpack.c.bf16 %v2731_v5, %v2728_v12 }
 0x386   :  { %11652 = vmatpush1.bf16.msra.mxu0 %v11651_v52  ;;  %11858 = vmatpush1.bf16.msra.mxu1 %v11651_v52 }
 0x387   :  { %11653 = vmatprep.subr.bf16.mxu0 %v18415_v22  ;;  %11843 = vmatprep.subr.bf16.mxu1 %v18415_v22 }
 0x388   :  { %v11112_v32 = vpop.f32.mrb[4].mxu1 }
 0x389   :  { %v2744_v0 = vpop.f32.mrb[5].mxu1 }
 0x38a   :  { %v11113_v41 = vpop.f32.mrb[6].mxu1  ;;  %11655 = vmatpush1.bf16.msra.mxu0 %v11654_v63  ;;  %11859 = vmatpush1.bf16.msra.mxu1 %v11654_v63 }
 0x38b   :  { %v11660_v21 = vpack.c.bf16 %v11113_v41, %v11112_v32  ;;  %v2747_v57 = vpop.f32.mrb[7].mxu1  ;;  %11656 = vmatprep.subr.bf16.mxu0 %v18415_v22  ;;  %11844 = vmatprep.subr.bf16.mxu1 %v18415_v22 }
 0x38c   :  { %v11657_v16 = vpack.c.bf16 %v2747_v57, %v2744_v0 }
 0x38e   :  { %11658 = vmatpush1.bf16.msra.mxu0 %v11657_v16  ;;  %11860 = vmatpush1.bf16.msra.mxu1 %v11657_v16 }
 0x38f   :  { %11659 = vmatprep.subr.bf16.mxu0 %v18415_v22  ;;  %11845 = vmatprep.subr.bf16.mxu1 %v18415_v22 }
 0x390   :  { %v11116_v52 = vpop.f32.mrb[8].mxu1 }
 0x391   :  { %v2760_v5 = vpop.f32.mrb[9].mxu1 }
 0x392   :  { %v11117_v12 = vpop.f32.mrb[10].mxu1  ;;  %11661 = vmatpush1.bf16.msra.mxu0 %v11660_v21  ;;  %11861 = vmatpush1.bf16.msra.mxu1 %v11660_v21 }
 0x393   :  { %v11666_v29 = vpack.c.bf16 %v11117_v12, %v11116_v52  ;;  %v2763_v63 = vpop.f32.mrb[11].mxu1  ;;  %11662 = vmatprep.subr.bf16.mxu0 %v18415_v22  ;;  %11846 = vmatprep.subr.bf16.mxu1 %v18415_v22 }
 0x394   :  { %v11663_v32 = vpack.c.bf16 %v2763_v63, %v2760_v5 }
 0x396   :  { %11664 = vmatpush1.bf16.msra.mxu0 %v11663_v32  ;;  %11862 = vmatpush1.bf16.msra.mxu1 %v11663_v32 }
 0x397   :  { %11665 = vmatprep.subr.bf16.mxu0 %v18415_v22  ;;  %11847 = vmatprep.subr.bf16.mxu1 %v18415_v22 }
 0x398   :  { %v11120_v57 = vpop.f32.mrb[12].mxu1 }
 0x399   :  { %v2776_v41 = vpop.f32.mrb[13].mxu1 }
 0x39a   :  { %v11121_v0 = vpop.f32.mrb[14].mxu1  ;;  %11667 = vmatpush1.bf16.msra.mxu0 %v11666_v29  ;;  %11863 = vmatpush1.bf16.msra.mxu1 %v11666_v29 }
 0x39b   :  { %v11672_v16 = vpack.c.bf16 %v11121_v0, %v11120_v57  ;;  %v2779_v21 = vpop.f32.mrb[15].mxu1  ;;  %11668 = vmatprep.subr.bf16.mxu0 %v18415_v22  ;;  %11848 = vmatprep.subr.bf16.mxu1 %v18415_v22 }
 0x39c   :  { %v11669_v52 = vpack.c.bf16 %v2779_v21, %v2776_v41 }
 0x39e   :  { %11670 = vmatpush1.bf16.msra.mxu0 %v11669_v52  ;;  %11864 = vmatpush1.bf16.msra.mxu1 %v11669_v52 }
 0x39f   :  { %11671 = vmatprep.subr.bf16.mxu0 %v18415_v22  ;;  %11849 = vmatprep.subr.bf16.mxu1 %v18415_v22 }
 0x3a0   :  { %v11124_v5 = vpop.f32.mrb[16].mxu1 }
 0x3a1   :  { %v2792_v12 = vpop.f32.mrb[17].mxu1 }
 0x3a2   :  { %v11125_v63 = vpop.f32.mrb[18].mxu1  ;;  %11673 = vmatpush1.bf16.msra.mxu0 %v11672_v16  ;;  %11865 = vmatpush1.bf16.msra.mxu1 %v11672_v16 }
 0x3a3   :  { %v11678_v32 = vpack.c.bf16 %v11125_v63, %v11124_v5  ;;  %v2795_v29 = vpop.f32.mrb[19].mxu1  ;;  %11674 = vmatprep.subr.bf16.mxu0 %v18415_v22  ;;  %11850 = vmatprep.subr.bf16.mxu1 %v18415_v22 }
 0x3a4   :  { %v11675_v57 = vpack.c.bf16 %v2795_v29, %v2792_v12 }
 0x3a6   :  { %11676 = vmatpush1.bf16.msra.mxu0 %v11675_v57  ;;  %11866 = vmatpush1.bf16.msra.mxu1 %v11675_v57 }
 0x3a7   :  { %11677 = vmatprep.subr.bf16.mxu0 %v18415_v22  ;;  %11851 = vmatprep.subr.bf16.mxu1 %v18415_v22 }
 0x3a8   :  { %v11128_v41 = vpop.f32.mrb[20].mxu1 }
 0x3a9   :  { %v2808_v0 = vpop.f32.mrb[21].mxu1 }
 0x3aa   :  { %v11129_v21 = vpop.f32.mrb[22].mxu1  ;;  %11679 = vmatpush1.bf16.msra.mxu0 %v11678_v32  ;;  %11867 = vmatpush1.bf16.msra.mxu1 %v11678_v32 }
 0x3ab   :  { %v11684_v52 = vpack.c.bf16 %v11129_v21, %v11128_v41  ;;  %v2811_v16 = vpop.f32.mrb[23].mxu1  ;;  %11680 = vmatprep.subr.bf16.mxu0 %v18415_v22  ;;  %11852 = vmatprep.subr.bf16.mxu1 %v18415_v22 }
 0x3ac   :  { %v11681_v5 = vpack.c.bf16 %v2811_v16, %v2808_v0 }
 0x3ae   :  { %11682 = vmatpush1.bf16.msra.mxu0 %v11681_v5  ;;  %11868 = vmatpush1.bf16.msra.mxu1 %v11681_v5  ;;  %v18416_v5 = vlaneseq }
 0x3af   :  { %11683 = vmatprep.subr.bf16.mxu0 %v18415_v22  ;;  %11853 = vmatprep.subr.bf16.mxu1 %v18415_v22 }
 0x3b0   :  { %v11132_v12 = vpop.f32.mrb[24].mxu1 }
 0x3b1   :  { %v2824_v63 = vpop.f32.mrb[25].mxu1 }
 0x3b2   :  { %v11133_v29 = vpop.f32.mrb[26].mxu1  ;;  %11685 = vmatpush1.bf16.msra.mxu0 %v11684_v52  ;;  %11869 = vmatpush1.bf16.msra.mxu1 %v11684_v52  ;;  %v14738_v52 = vand.u32 127, %v18416_v5 }
 0x3b3   :  { %v11690_v57 = vpack.c.bf16 %v11133_v29, %v11132_v12  ;;  %v2827_v32 = vpop.f32.mrb[27].mxu1  ;;  %11686 = vmatprep.subr.bf16.mxu0 %v18415_v22  ;;  %11854 = vmatprep.subr.bf16.mxu1 %v18415_v22 }
 0x3b4   :  { %v11687_v41 = vpack.c.bf16 %v2827_v32, %v2824_v63  ;;  %v14744_v32 = vsub.s32 %v14738_v52, %v18400_v28  ;;  %v17714_v28 = vmov 1.0  }
 0x3b6   :  { %11688 = vmatpush1.bf16.msra.mxu0 %v11687_v41  ;;  %11870 = vmatpush1.bf16.msra.mxu1 %v11687_v41  ;;  %18417 = vst [vmem:[#allocation130_spill] sm:$0xff] %v14744_v32  ;;  %vm3047_vm2 = vcmp.eq.s32.totalorder %v14744_v32, 4294967295 }
 0x3b7   :  { %11689 = vmatprep.subr.bf16.mxu0 %v18415_v22  ;;  %11855 = vmatprep.subr.bf16.mxu1 %v18415_v22 }
 0x3b8   :  { %v11136_v0 = vpop.f32.mrb[28].mxu1 }
 0x3b9   :  { %v2840_v21 = vpop.f32.mrb[29].mxu1 }
 0x3ba   :  { %v11137_v16 = vpop.f32.mrb[30].mxu1  ;;  %11691 = vmatpush1.bf16.msra.mxu0 %v11690_v57  ;;  %11871 = vmatpush1.bf16.msra.mxu1 %v11690_v57  ;;  %v12642_v57 = vld [vmem:[%s17411_s3 + $0x100] sm:$0xff]  }
 0x3bb   :  { %v11696_v12 = vpack.c.bf16 %v11137_v16, %v11136_v0  ;;  %v2843_v29 = vpop.f32.mrb[31].mxu1  ;;  %11692 = vmatprep.subr.bf16.mxu0 %v18415_v22  ;;  %11856 = vmatprep.subr.bf16.mxu1 %v18415_v22 }
 0x3bc   :  { %v11693_v63 = vpack.c.bf16 %v2843_v29, %v2840_v21  ;;  %v18418_v21 = vld [vmem:[#allocation117_spill] sm:$0xff] }
 0x3bd   :  { %v14754_v5 = vsub.s32 %v14738_v52, %v18418_v21 }
 0x3be   :  { %11694 = vmatpush1.bf16.msra.mxu0 %v11693_v63  ;;  %11872 = vmatpush1.bf16.msra.mxu1 %v11693_v63 }
 0x3bf   :  { %11695 = vmatprep.subr.bf16.mxu0 %v18415_v22  ;;  %11857 = vmatprep.subr.bf16.mxu1 %v18415_v22  ;;  %18419 = vst [vmem:[#allocation131_spill] sm:$0xff] %v14754_v5  ;;  %vm3051_vm1 = vcmp.eq.s32.totalorder %v14754_v5, 4294967295 }
 0x3c0   :  { %v11140_v41 = vpop.f32.mrb[32].mxu1 }
 0x3c1   :  { %v2856_v0 = vpop.f32.mrb[33].mxu1 }
 0x3c2   :  { %v11141_v16 = vpop.f32.mrb[34].mxu1  ;;  %11697 = vmatpush1.bf16.msra.mxu0 %v11696_v12  ;;  %11873 = vmatpush1.bf16.msra.mxu1 %v11696_v12  ;;  %v18421_v12 = vld [vmem:[#allocation120_spill] sm:$0xff] }
 0x3c3   :  { %v11702_v29 = vpack.c.bf16 %v11141_v16, %v11140_v41  ;;  %v2859_v63 = vpop.f32.mrb[35].mxu1  ;;  %11698 = vmatprep.subr.bf16.mxu0 %v18415_v22  ;;  %11170 = vmatprep.subr.bf16.mxu1 %v12642_v57  ;;  %v14763_v21 = vsub.s32 %v14738_v52, %v18421_v12 }
 0x3c4   :  { %v11699_v14 = vpack.c.bf16 %v2859_v63, %v2856_v0  ;;  %v12643_v0 = vld [vmem:[%s17411_s3 + $0x108] sm:$0xff]   ;;  %v18423_v63 = vld [vmem:[#allocation121_spill] sm:$0xff] }
 0x3c5   :  { %9715 = vmatmul.mubr.msk.f32.vlgmr.msra.gmra.mrb[144].mxu0 %vm3047_vm2, %v17714_v28  ;;  %3824 = vmatmul.mubr.f32.vlgmr.msra.gmra.mrb[64].mxu1 %v18420_v44  ;;  %18422 = vst [vmem:[#allocation132_spill] sm:$0xff] %v14763_v21  ;;  %vm3055_vm14 = vcmp.eq.s32.totalorder %v14763_v21, 4294967295  ;;  %v14776_v5 = vsub.s32 %v14738_v52, %v18423_v63 }
 0x3c6   :  { %11700 = vmatpush1.bf16.msra.mxu0 %v11699_v14  ;;  %3628 = vmatprep.mubr.f32.mxu0 %v18420_v44 }
 0x3c7   :  { %3828 = vmatprep.mubr.f32.mxu1 %v18420_v44  ;;  %11701 = vmatprep.subr.bf16.mxu0 %v18415_v22  ;;  %18424 = vst [vmem:[#allocation133_spill] sm:$0xff] %v14776_v5  ;;  %vm3059_vm8 = vcmp.eq.s32.totalorder %v14776_v5, 4294967295 }
 0x3c8   :  { %v11144_v41 = vpop.f32.mrb[36].mxu1  ;;  %11171 = vmatpush3.bf16.msra.mxu1 %v12642_v57 }
 0x3c9   :  { %v2872_v16 = vpop.f32.mrb[37].mxu1  ;;  %9716 = vmatmul.mubr.msk.f32.gmra.mrb[146].mxu0 %vm3051_vm1, %v17714_v28  ;;  %3829 = vmatmul.mubr.f32.gmra.mrb[66].mxu1 %v18420_v44 }
 0x3ca   :  { %v11145_v14 = vpop.f32.mrb[38].mxu1  ;;  %11703 = vmatpush1.bf16.msra.mxu0 %v11702_v29  ;;  %3633 = vmatprep.mubr.f32.mxu0 %v18420_v44  ;;  %v18425_v29 = vld [vmem:[#allocation4_spill] sm:$0xff] }
 0x3cb   :  { %v11708_v57 = vpack.c.bf16 %v11145_v14, %v11144_v41  ;;  %v2875_v32 = vpop.f32.mrb[39].mxu1  ;;  %3833 = vmatprep.mubr.f32.mxu1 %v18420_v44  ;;  %11704 = vmatprep.subr.bf16.mxu0 %v18415_v22  ;;  %v14786_v63 = vsub.s32 %v14738_v52, %v18425_v29  ;;  %v18427_v14 = vld [vmem:[#allocation5_spill] sm:$0xff] }
 0x3cc   :  { %v11705_v12 = vpack.c.bf16 %v2875_v32, %v2872_v16  ;;  %11172 = vmatprep.subr.bf16.mxu1 %v12643_v0  ;;  %v12644_v32 = vld [vmem:[%s17411_s3 + $0x110] sm:$0xff]   ;;  %v14799_v5 = vsub.s32 %v14738_v52, %v18427_v14 }
 0x3cd   :  { %9717 = vmatmul.mubr.msk.f32.gmra.mrb[148].mxu0 %vm3055_vm14, %v17714_v28  ;;  %3834 = vmatmul.mubr.f32.gmra.mrb[68].mxu1 %v18420_v44  ;;  %18426 = vst [vmem:[#allocation134_spill] sm:$0xff] %v14786_v63  ;;  %vm3063_vm11 = vcmp.eq.s32.totalorder %v14786_v63, 4294967295 }
 0x3ce   :  { %11706 = vmatpush1.bf16.msra.mxu0 %v11705_v12  ;;  %3638 = vmatprep.mubr.f32.mxu0 %v18420_v44  ;;  %18428 = vst [vmem:[#allocation135_spill] sm:$0xff] %v14799_v5  ;;  %vm3067_vm10 = vcmp.eq.s32.totalorder %v14799_v5, 4294967295 }
 0x3cf   :  { %3838 = vmatprep.mubr.f32.mxu1 %v18420_v44  ;;  %11707 = vmatprep.subr.bf16.mxu0 %v18415_v22 }
 0x3d0   :  { %v11148_v41 = vpop.f32.mrb[40].mxu1  ;;  %11173 = vmatpush3.bf16.msra.mxu1 %v12643_v0 }
 0x3d1   :  { %v2888_v16 = vpop.f32.mrb[41].mxu1  ;;  %9718 = vmatmul.mubr.msk.f32.gmra.mrb[150].mxu0 %vm3059_vm8, %v17714_v28  ;;  %3839 = vmatmul.mubr.f32.gmra.mrb[70].mxu1 %v18420_v44 }
 0x3d2   :  { %v11149_v12 = vpop.f32.mrb[42].mxu1  ;;  %11709 = vmatpush1.bf16.msra.mxu0 %v11708_v57  ;;  %3643 = vmatprep.mubr.f32.mxu0 %v18420_v44  ;;  %v18429_v57 = vld [vmem:[#allocation7_spill] sm:$0xff] }
 0x3d3   :  { %v11714_v0 = vpack.c.bf16 %v11149_v12, %v11148_v41  ;;  %v2891_v21 = vpop.f32.mrb[43].mxu1  ;;  %3843 = vmatprep.mubr.f32.mxu1 %v18420_v44  ;;  %11710 = vmatprep.subr.bf16.mxu0 %v18415_v22  ;;  %v14809_v14 = vsub.s32 %v14738_v52, %v18429_v57  ;;  %v18431_v12 = vld [vmem:[#allocation8_spill] sm:$0xff] }
 0x3d4   :  { %v11711_v29 = vpack.c.bf16 %v2891_v21, %v2888_v16  ;;  %11174 = vmatprep.subr.bf16.mxu1 %v12644_v32  ;;  %v12645_v21 = vld [vmem:[%s17411_s3 + $0x118] sm:$0xff]   ;;  %v14822_v5 = vsub.s32 %v14738_v52, %v18431_v12 }
 0x3d5   :  { %9719 = vmatmul.mubr.msk.f32.gmra.mrb[152].mxu0 %vm3063_vm11, %v17714_v28  ;;  %3844 = vmatmul.mubr.f32.gmra.mrb[72].mxu1 %v18420_v44  ;;  %18430 = vst [vmem:[#allocation136_spill] sm:$0xff] %v14809_v14  ;;  %vm3071_vm15 = vcmp.eq.s32.totalorder %v14809_v14, 4294967295 }
 0x3d6   :  { %11712 = vmatpush1.bf16.msra.mxu0 %v11711_v29  ;;  %3648 = vmatprep.mubr.f32.mxu0 %v18420_v44  ;;  %18432 = vst [vmem:[#allocation137_spill] sm:$0xff] %v14822_v5  ;;  %vm3075_vm13 = vcmp.eq.s32.totalorder %v14822_v5, 4294967295 }
 0x3d7   :  { %3848 = vmatprep.mubr.f32.mxu1 %v18420_v44  ;;  %11713 = vmatprep.subr.bf16.mxu0 %v18415_v22 }
 0x3d8   :  { %v11152_v41 = vpop.f32.mrb[44].mxu1  ;;  %11175 = vmatpush3.bf16.msra.mxu1 %v12644_v32 }
 0x3d9   :  { %v2904_v16 = vpop.f32.mrb[45].mxu1  ;;  %9720 = vmatmul.mubr.msk.f32.gmra.mrb[154].mxu0 %vm3067_vm10, %v17714_v28  ;;  %3849 = vmatmul.mubr.f32.gmra.mrb[74].mxu1 %v18420_v44 }
 0x3da   :  { %v11153_v29 = vpop.f32.mrb[46].mxu1  ;;  %11715 = vmatpush1.bf16.msra.mxu0 %v11714_v0  ;;  %3653 = vmatprep.mubr.f32.mxu0 %v18420_v44  ;;  %v18433_v0 = vld [vmem:[#allocation11_spill] sm:$0xff] }
 0x3db   :  { %v11720_v32 = vpack.c.bf16 %v11153_v29, %v11152_v41  ;;  %v2907_v63 = vpop.f32.mrb[47].mxu1  ;;  %3853 = vmatprep.mubr.f32.mxu1 %v18420_v44  ;;  %11716 = vmatprep.subr.bf16.mxu0 %v18415_v22  ;;  %v14832_v12 = vsub.s32 %v14738_v52, %v18433_v0  ;;  %v18435_v29 = vld [vmem:[#allocation12_spill] sm:$0xff] }
 0x3dc   :  { %v11717_v57 = vpack.c.bf16 %v2907_v63, %v2904_v16  ;;  %11176 = vmatprep.subr.bf16.mxu1 %v12645_v21  ;;  %v12646_v63 = vld [vmem:[%s17411_s3 + $0x120] sm:$0xff]   ;;  %v14845_v5 = vsub.s32 %v14738_v52, %v18435_v29 }
 0x3dd   :  { %9721 = vmatmul.mubr.msk.f32.gmra.mrb[156].mxu0 %vm3071_vm15, %v17714_v28  ;;  %3854 = vmatmul.mubr.f32.gmra.mrb[76].mxu1 %v18420_v44  ;;  %18434 = vst [vmem:[#allocation138_spill] sm:$0xff] %v14832_v12  ;;  %vm3079_vm3 = vcmp.eq.s32.totalorder %v14832_v12, 4294967295 }
 0x3de   :  { %11718 = vmatpush1.bf16.msra.mxu0 %v11717_v57  ;;  %3658 = vmatprep.mubr.f32.mxu0 %v18420_v44  ;;  %18436 = vst [vmem:[#allocation139_spill] sm:$0xff] %v14845_v5  ;;  %vm3083_vm2 = vcmp.eq.s32.totalorder %v14845_v5, 4294967295 }
 0x3df   :  { %3858 = vmatprep.mubr.f32.mxu1 %v18420_v44  ;;  %11719 = vmatprep.subr.bf16.mxu0 %v18415_v22 }
 0x3e0   :  { %v11156_v41 = vpop.f32.mrb[48].mxu1  ;;  %11177 = vmatpush3.bf16.msra.mxu1 %v12645_v21 }
 0x3e1   :  { %v2920_v16 = vpop.f32.mrb[49].mxu1  ;;  %9722 = vmatmul.mubr.msk.f32.gmra.mrb[158].mxu0 %vm3075_vm13, %v17714_v28  ;;  %3859 = vmatmul.mubr.f32.gmra.mrb[78].mxu1 %v18420_v44 }
 0x3e2   :  { %v11157_v57 = vpop.f32.mrb[50].mxu1  ;;  %11721 = vmatpush1.bf16.msra.mxu0 %v11720_v32  ;;  %3663 = vmatprep.mubr.f32.mxu0 %v18420_v44  ;;  %v18437_v32 = vld [vmem:[#allocation15_spill] sm:$0xff] }
 0x3e3   :  { %v11726_v21 = vpack.c.bf16 %v11157_v57, %v11156_v41  ;;  %v2923_v14 = vpop.f32.mrb[51].mxu1  ;;  %3863 = vmatprep.mubr.f32.mxu1 %v18420_v44  ;;  %11722 = vmatprep.subr.bf16.mxu0 %v18415_v22  ;;  %v14855_v29 = vsub.s32 %v14738_v52, %v18437_v32  ;;  %v18439_v57 = vld [vmem:[#allocation16_spill] sm:$0xff] }
 0x3e4   :  { %v11723_v0 = vpack.c.bf16 %v2923_v14, %v2920_v16  ;;  %11178 = vmatprep.subr.bf16.mxu1 %v12646_v63  ;;  %v12647_v14 = vld [vmem:[%s17411_s3 + $0x128] sm:$0xff]   ;;  %v14868_v5 = vsub.s32 %v14738_v52, %v18439_v57 }
 0x3e5   :  { %9723 = vmatmul.mubr.msk.f32.gmra.mrb[160].mxu0 %vm3079_vm3, %v17714_v28  ;;  %3864 = vmatmul.mubr.f32.gmra.mrb[80].mxu1 %v18420_v44  ;;  %18438 = vst [vmem:[#allocation140_spill] sm:$0xff] %v14855_v29  ;;  %vm3087_vm1 = vcmp.eq.s32.totalorder %v14855_v29, 4294967295 }
 0x3e6   :  { %11724 = vmatpush1.bf16.msra.mxu0 %v11723_v0  ;;  %3668 = vmatprep.mubr.f32.mxu0 %v18420_v44  ;;  %18440 = vst [vmem:[#allocation141_spill] sm:$0xff] %v14868_v5  ;;  %vm3091_vm14 = vcmp.eq.s32.totalorder %v14868_v5, 4294967295 }
 0x3e7   :  { %3868 = vmatprep.mubr.f32.mxu1 %v18420_v44  ;;  %11725 = vmatprep.subr.bf16.mxu0 %v18415_v22 }
 0x3e8   :  { %v11160_v41 = vpop.f32.mrb[52].mxu1  ;;  %11179 = vmatpush3.bf16.msra.mxu1 %v12646_v63 }
 0x3e9   :  { %v2936_v16 = vpop.f32.mrb[53].mxu1  ;;  %9724 = vmatmul.mubr.msk.f32.gmra.mrb[162].mxu0 %vm3083_vm2, %v17714_v28  ;;  %3869 = vmatmul.mubr.f32.gmra.mrb[82].mxu1 %v18420_v44 }
 0x3ea   :  { %v11161_v0 = vpop.f32.mrb[54].mxu1  ;;  %11727 = vmatpush1.bf16.msra.mxu0 %v11726_v21  ;;  %3673 = vmatprep.mubr.f32.mxu0 %v18420_v44  ;;  %v18441_v21 = vld [vmem:[#allocation19_spill] sm:$0xff] }
 0x3eb   :  { %v11732_v63 = vpack.c.bf16 %v11161_v0, %v11160_v41  ;;  %v2939_v12 = vpop.f32.mrb[55].mxu1  ;;  %3873 = vmatprep.mubr.f32.mxu1 %v18420_v44  ;;  %11728 = vmatprep.subr.bf16.mxu0 %v18415_v22  ;;  %v14878_v57 = vsub.s32 %v14738_v52, %v18441_v21  ;;  %v18443_v0 = vld [vmem:[#allocation20_spill] sm:$0xff] }
 0x3ec   :  { %v11729_v32 = vpack.c.bf16 %v2939_v12, %v2936_v16  ;;  %11180 = vmatprep.subr.bf16.mxu1 %v12647_v14  ;;  %v12648_v12 = vld [vmem:[%s17411_s3 + $0x130] sm:$0xff]   ;;  %v14891_v5 = vsub.s32 %v14738_v52, %v18443_v0 }
 0x3ed   :  { %9725 = vmatmul.mubr.msk.f32.gmra.mrb[164].mxu0 %vm3087_vm1, %v17714_v28  ;;  %3874 = vmatmul.mubr.f32.gmra.mrb[84].mxu1 %v18420_v44  ;;  %18442 = vst [vmem:[#allocation142_spill] sm:$0xff] %v14878_v57  ;;  %vm3095_vm8 = vcmp.eq.s32.totalorder %v14878_v57, 4294967295 }
 0x3ee   :  { %11730 = vmatpush1.bf16.msra.mxu0 %v11729_v32  ;;  %3678 = vmatprep.mubr.f32.mxu0 %v18420_v44  ;;  %18444 = vst [vmem:[#allocation143_spill] sm:$0xff] %v14891_v5  ;;  %vm3099_vm11 = vcmp.eq.s32.totalorder %v14891_v5, 4294967295  ;;  %v18448_v5 = vld [vmem:[#allocation23_spill] sm:$0xff] }
 0x3ef   :  { %3878 = vmatprep.mubr.f32.mxu1 %v18420_v44  ;;  %11731 = vmatprep.subr.bf16.mxu0 %v18415_v22  ;;  %v14917_v57 = vsub.s32 %v14738_v52, %v18448_v5  ;;  %v18474_v5 = vld [vmem:[#allocation40_spill] sm:$0xff] }
 0x3f0   :  { %v11164_v41 = vpop.f32.mrb[56].mxu1  ;;  %11181 = vmatpush3.bf16.msra.mxu1 %v12647_v14 }
 0x3f1   :  { %v2952_v16 = vpop.f32.mrb[57].mxu1  ;;  %9726 = vmatmul.mubr.msk.f32.gmra.mrb[166].mxu0 %vm3091_vm14, %v17714_v28  ;;  %3879 = vmatmul.mubr.f32.gmra.mrb[86].mxu1 %v18420_v44  ;;  %18449 = vst [vmem:[#allocation146_spill] sm:$0xff] %v14917_v57  ;;  %vm3107_vm15 = vcmp.eq.s32.totalorder %v14917_v57, 4294967295 }
 0x3f2   :  { %v11165_v32 = vpop.f32.mrb[58].mxu1  ;;  %11733 = vmatpush1.bf16.msra.mxu0 %v11732_v63  ;;  %3683 = vmatprep.mubr.f32.mxu0 %v18420_v44  ;;  %v18445_v63 = vld [vmem:[#allocation22_spill] sm:$0xff] }
 0x3f3   :  { %v11738_v14 = vpack.c.bf16 %v11165_v32, %v11164_v41  ;;  %v2955_v29 = vpop.f32.mrb[59].mxu1  ;;  %3883 = vmatprep.mubr.f32.mxu1 %v18420_v44  ;;  %11734 = vmatprep.subr.bf16.mxu0 %v18415_v22  ;;  %v14901_v0 = vsub.s32 %v14738_v52, %v18445_v63 }
 0x3f4   :  { %v11735_v21 = vpack.c.bf16 %v2955_v29, %v2952_v16  ;;  %11182 = vmatprep.subr.bf16.mxu1 %v12648_v12  ;;  %v14906_v29 = vadd.s32 128, %v14738_v52 }
 0x3f5   :  { %9727 = vmatmul.mubr.msk.f32.gmra.mrb[168].mxu0 %vm3095_vm8, %v17714_v28  ;;  %3884 = vmatmul.mubr.f32.gmra.mrb[88].mxu1 %v18420_v44  ;;  %18446 = vst [vmem:[#allocation144_spill] sm:$0xff] %v14901_v0  ;;  %vm3103_vm10 = vcmp.eq.s32.totalorder %v14901_v0, 4294967295  ;;  %v18472_v0 = vld [vmem:[#allocation9_spill] sm:$0xff] }
 0x3f6   :  { %11736 = vmatpush1.bf16.msra.mxu0 %v11735_v21  ;;  %3688 = vmatprep.mubr.f32.mxu0 %v18420_v44  ;;  %18447 = vst [vmem:[#allocation145_spill] sm:$0xff] %v14906_v29  ;;  %v12649_v21 = vld [vmem:[%s17411_s3 + $0x138] sm:$0xff]  }
 0x3f7   :  { %3888 = vmatprep.mubr.f32.mxu1 %v18420_v44  ;;  %11737 = vmatprep.subr.bf16.mxu0 %v18415_v22 }
 0x3f8   :  { %v11168_v41 = vpop.f32.mrb[60].mxu1  ;;  %11183 = vmatpush3.bf16.msra.mxu1 %v12648_v12 }
 0x3f9   :  { %v2968_v16 = vpop.f32.mrb[61].mxu1  ;;  %9728 = vmatmul.mubr.msk.f32.gmra.mrb[170].mxu0 %vm3099_vm11, %v17714_v28  ;;  %3889 = vmatmul.mubr.f32.gmra.mrb[90].mxu1 %v18420_v44  ;;  %v14923_v28 = vsub.s32 %v14906_v29, %v18450_v15 }
 0x3fa   :  { %v11169_v32 = vpop.f32.mrb[62].mxu1  ;;  %11739 = vmatpush1.bf16.msra.mxu0 %v11738_v14  ;;  %3693 = vmatprep.mubr.f32.mxu0 %v18420_v44  ;;  %v18452_v14 = vmov 1.0  }
 0x3fb   :  { %v11744_v12 = vpack.c.bf16 %v11169_v32, %v11168_v41  ;;  %v2971_v63 = vpop.f32.mrb[63].mxu1  ;;  %3893 = vmatprep.mubr.f32.mxu1 %v18420_v44  ;;  %11740 = vmatprep.subr.bf16.mxu0 %v18415_v22  ;;  %18451 = vst [vmem:[#allocation147_spill] sm:$0xff] %v14923_v28  ;;  %v1730_v41 = vsub.s32 %v14738_v52, %v18450_v15  ;;  %vm3112_vm13 = vcmp.eq.s32.totalorder %v14923_v28, 4294967295 }
 0x3fc   :  { %v11741_v40 = vpack.c.bf16 %v2971_v63, %v2968_v16  ;;  %11184 = vmatprep.subr.bf16.mxu1 %v12649_v21  ;;  %v18453_v63 = vld [vmem:[#allocation26_spill] sm:$0xff] }
 0x3fd   :  { %9729 = vmatmul.mubr.msk.f32.gmra.mrb[172].mxu0 %vm3103_vm10, %v18452_v14  ;;  %3894 = vmatmul.mubr.f32.gmra.mrb[92].mxu1 %v18420_v44  ;;  %v14936_v16 = vsub.s32 %v14906_v29, %v18453_v63  ;;  %vm3111_vm3 = vcmp.eq.s32.totalorder %v1730_v41, 4294967295  ;;  %v18459_v63 = vld [vmem:[#allocation32_spill] sm:$0xff] }
 0x3fe   :  { %11742 = vmatpush1.bf16.msra.mxu0 %v11741_v40  ;;  %3698 = vmatprep.mubr.f32.mxu0 %v18420_v44  ;;  %v18455_v40 = vld [vmem:[#allocation28_spill] sm:$0xff] }
 0x3ff   :  { %3898 = vmatprep.mubr.f32.mxu1 %v18420_v44  ;;  %11743 = vmatprep.subr.bf16.mxu0 %v18415_v22  ;;  %18454 = vst [vmem:[#allocation148_spill] sm:$0xff] %v14936_v16  ;;  %vm3116_vm2 = vcmp.eq.s32.totalorder %v14936_v16, 4294967295  ;;  %v14945_v32 = vsub.s32 %v14906_v29, %v18455_v40  ;;  %v14967_v16 = vsub.s32 %v14906_v29, %v18459_v63  ;;  %v12652_v63 = vld [vmem:[%s17411_s3 + $0x50] sm:$0xff]  }
 0x400   :  { %11185 = vmatpush3.bf16.msra.mxu1 %v12649_v21  ;;  %v12650_v21 = vld [vmem:[%s17411_s3 + $0x40] sm:$0xff]   ;;  %v18521_v40 = vld [vmem:[#allocation116_spill] sm:$0xff] }
 0x401   :  { %9730 = vmatmul.mubr.msk.f32.gmra.mrb[174].mxu0 %vm3107_vm15, %v18452_v14  ;;  %3899 = vmatmul.mubr.f32.gmra.mrb[94].mxu1 %v18420_v44  ;;  %18456 = vst [vmem:[#allocation149_spill] sm:$0xff] %v14945_v32  ;;  %vm3120_vm1 = vcmp.eq.s32.totalorder %v14945_v32, 4294967295  ;;  %18460 = vst [vmem:[#allocation151_spill] sm:$0xff] %v14967_v16  ;;  %vm3128_vm8 = vcmp.eq.s32.totalorder %v14967_v16, 4294967295 }
 0x402   :  { %11745 = vmatpush1.bf16.msra.mxu0 %v11744_v12  ;;  %9731 = vmatprep.mubr.msk.f32.mxu0 %vm3112_vm13, %v18452_v14  ;;  %v18457_v12 = vld [vmem:[#allocation29_spill] sm:$0xff] }
 0x403   :  { %3903 = vmatprep.mubr.f32.mxu1 %v18420_v44  ;;  %11746 = vmatprep.subr.bf16.mxu0 %v18415_v22  ;;  %v14958_v41 = vsub.s32 %v14906_v29, %v18457_v12  ;;  %v18461_v12 = vld [vmem:[#allocation33_spill] sm:$0xff]  ;;  %v15023_v22 = vsub.s32 %v14906_v29, %v18474_v5 }
 0x404   :  { %11250 = vmatprep.subr.bf16.mxu1 %v12650_v21  ;;  %v14976_v32 = vsub.s32 %v14906_v29, %v18461_v12  ;;  %v18465_v12 = vld [vmem:[#allocation35_spill] sm:$0xff] }
 0x405   :  { %9732 = vmatmul.mubr.msk.f32.gmra.mrb[176].mxu0 %vm3111_vm3, %v18452_v14  ;;  %3904 = vmatmul.mubr.f32.gmra.mrb[96].mxu1 %v18420_v44  ;;  %18458 = vst [vmem:[#allocation150_spill] sm:$0xff] %v14958_v41  ;;  %vm3124_vm14 = vcmp.eq.s32.totalorder %v14958_v41, 4294967295  ;;  %v18463_v41 = vld [vmem:[#allocation34_spill] sm:$0xff]  ;;  %v14994_v16 = vsub.s32 %v14906_v29, %v18465_v12  ;;  %vm18473_vm3 = vnez %v18472_v0  ;;  %18475 = vst [vmem:[#allocation157_spill] sm:$0xff] %v15023_v22 }
 0x406   :  { %9733 = vmatprep.mubr.msk.f32.mxu0 %vm3116_vm2, %v18452_v14  ;;  %3908 = vmatprep.mubr.f32.mxu1 %v18420_v44  ;;  %18462 = vst [vmem:[#allocation152_spill] sm:$0xff] %v14976_v32  ;;  %vm3132_vm11 = vcmp.eq.s32.totalorder %v14976_v32, 4294967295  ;;  %v14985_v28 = vsub.s32 %v14906_v29, %v18463_v41  ;;  %v18467_v32 = vld [vmem:[#allocation37_spill] sm:$0xff]  ;;  %v18469_v12 = vld [vmem:[#allocation38_spill] sm:$0xff]  ;;  %v18481_v41 = vld [vmem:[#allocation44_spill] sm:$0xff] }
 0x407   :  { %18466 = vst [vmem:[#allocation154_spill] sm:$0xff] %v14994_v16  ;;  %vm3140_vm15 = vcmp.eq.s32.totalorder %v14994_v16, 4294967295  ;;  %v15003_v57 = vsub.s32 %v14906_v29, %v18467_v32  ;;  %v18471_v16 = vld [vmem:[#allocation10_spill] sm:$0xff]  ;;  %v18477_v32 = vld [vmem:[#allocation13_spill] sm:$0xff]  ;;  %v15049_v15 = vsub.s32 %v14906_v29, %v18481_v41 }
 0x408   :  { %18464 = vst [vmem:[#allocation153_spill] sm:$0xff] %v14985_v28  ;;  %vm3136_vm10 = vcmp.eq.s32.totalorder %v14985_v28, 4294967295  ;;  %v15012_v28 = vsub.s32 %v14906_v29, %v18469_v12  ;;  %v12651_v12 = vld [vmem:[%s17411_s3 + $0x48] sm:$0xff]  }
 0x409   :  { %3709 = vmatmul.mubr.f32.gmra.mrb[178].mxu0 %v18420_v44  ;;  %3909 = vmatmul.mubr.f32.gmra.mrb[98].mxu1 %v18420_v44  ;;  %18468 = vst [vmem:[#allocation155_spill] sm:$0xff] %v15003_v57  ;;  %vm3144_vm13 = vcmp.eq.s32.totalorder %v15003_v57, 4294967295  ;;  %v18476_v57 = vld [vmem:[#allocation14_spill] sm:$0xff]  ;;  %18482 = vst [vmem:[#allocation159_spill] sm:$0xff] %v15049_v15 }
 0x40a   :  { %9734 = vmatprep.mubr.msk.f32.mxu0 %vm3120_vm1, %v18452_v14  ;;  %3913 = vmatprep.mubr.f32.mxu1 %v18420_v44  ;;  %18470 = vst [vmem:[#allocation156_spill] sm:$0xff] %v15012_v28  ;;  %vm3148_vm2 = vcmp.eq.s32.totalorder %v15012_v28, 4294967295  ;;  %vm18478_vm1 = vnez %v18477_v32  ;;  %v18479_v28 = vld [vmem:[#allocation41_spill] sm:$0xff] }
 0x40b   :  { %v15039_v5 = vsub.s32 %v14906_v29, %v18479_v28 }
 0x40d   :  { %3714 = vmatmul.mubr.f32.gmra.mrb[180].mxu0 %v18420_v44  ;;  %3914 = vmatmul.mubr.f32.gmra.mrb[100].mxu1 %v18420_v44  ;;  %18480 = vst [vmem:[#allocation158_spill] sm:$0xff] %v15039_v5 }
 0x40e   :  { %9735 = vmatprep.mubr.msk.f32.mxu0 %vm3124_vm14, %v18452_v14  ;;  %3918 = vmatprep.mubr.f32.mxu1 %v18420_v44  ;;  %vm3152_vm14 = vcmp.eq.s32.totalorder %v15023_v22, 4294967295  ;;  %v18485_v22 = vld [vmem:[#allocation48_spill] sm:$0xff] }
 0x40f   :  { %v15075_v41 = vsub.s32 %v14906_v29, %v18485_v22 }
 0x411   :  { %3719 = vmatmul.mubr.f32.gmra.mrb[182].mxu0 %v18420_v44  ;;  %3919 = vmatmul.mubr.f32.gmra.mrb[102].mxu1 %v18420_v44  ;;  %18486 = vst [vmem:[#allocation161_spill] sm:$0xff] %v15075_v41 }
 0x412   :  { %9736 = vmatprep.mubr.msk.f32.mxu0 %vm3128_vm8, %v18452_v14  ;;  %3923 = vmatprep.mubr.f32.mxu1 %v18420_v44  ;;  %vm3156_vm8 = vcmp.eq.s32.totalorder %v15039_v5, 4294967295  ;;  %v12654_v5 = vld [vmem:[%s17411_s3 + $0x60] sm:$0xff]  }
 0x415   :  { %3724 = vmatmul.mubr.f32.gmra.mrb[184].mxu0 %v18420_v44  ;;  %3924 = vmatmul.mubr.f32.gmra.mrb[104].mxu1 %v18420_v44 }
 0x416   :  { %9737 = vmatprep.mubr.msk.f32.mxu0 %vm3132_vm11, %v18452_v14  ;;  %3928 = vmatprep.mubr.f32.mxu1 %v18420_v44  ;;  %vm3160_vm11 = vcmp.eq.s32.totalorder %v15049_v15, 4294967295  ;;  %v18491_v15 = vld [vmem:[#allocation52_spill] sm:$0xff] }
 0x417   :  { %v1795_v22 = vsub.s32 %v14906_v29, %v18491_v15 }
 0x419   :  { %3729 = vmatmul.mubr.f32.gmra.mrb[186].mxu0 %v18420_v44  ;;  %3929 = vmatmul.mubr.f32.gmra.mrb[106].mxu1 %v18420_v44 }
 0x41a   :  { %9738 = vmatprep.mubr.msk.f32.mxu0 %vm3136_vm10, %v18452_v14  ;;  %3933 = vmatprep.mubr.f32.mxu1 %v18420_v44 }
 0x41d   :  { %3734 = vmatmul.mubr.f32.gmra.mrb[188].mxu0 %v18420_v44  ;;  %3934 = vmatmul.mubr.f32.gmra.mrb[108].mxu1 %v18420_v44 }
 0x41e   :  { %9739 = vmatprep.mubr.msk.f32.mxu0 %vm3140_vm15, %v18452_v14  ;;  %3938 = vmatprep.mubr.f32.mxu1 %v18420_v44  ;;  %vm18487_vm15 = vnez %v17969_v62  ;;  %v12681_v62 = vld [vmem:[%s17411_s3 + $0xb8] sm:$0xff]  }
 0x421   :  { %3739 = vmatmul.mubr.f32.gmra.mrb[190].mxu0 %v18420_v44  ;;  %3939 = vmatmul.mubr.f32.gmra.mrb[110].mxu1 %v18420_v44 }
 0x422   :  { %11186 = vmatprep.mubr.msk.bf16.mxu1 %vm18473_vm3, %v18471_v16  ;;  %9740 = vmatprep.mubr.msk.f32.mxu0 %vm3144_vm13, %v18452_v14  ;;  %vm18488_vm13 = vnez %v17982_v34 }
 0x425   :  { %3744 = vmatmul.mubr.f32.gmra.mrb[192].mxu0 %v18420_v44  ;;  %11187 = vmatmul.mubr.msk.bf16.vlgmr.msra.gmra.mrb[112].mxu1 %vm18478_vm1, %v18476_v57 }
 0x426   :  { %11190 = vmatprep.mubr.msk.bf16.mxu1 %vm13142_vm4, %v13146_v48  ;;  %9741 = vmatprep.mubr.msk.f32.mxu0 %vm3148_vm2, %v18452_v14  ;;  %vm3168_vm2 = vcmp.eq.s32.totalorder %v15075_v41, 4294967295  ;;  %v18518_v41 = vld [vmem:[#allocation114_spill] sm:$0xff] }
 0x427   :  { %11251 = vmatpush3.bf16.msra.mxu1 %v12650_v21  ;;  %v12653_v21 = vld [vmem:[%s17411_s3 + $0x58] sm:$0xff]  }
 0x428   :  { %11252 = vmatprep.subr.bf16.mxu1 %v12651_v12 }
 0x429   :  { %3749 = vmatmul.mubr.f32.gmra.mrb[194].mxu0 %v18420_v44 }
 0x42a   :  { %9742 = vmatprep.mubr.msk.f32.mxu0 %vm3152_vm14, %v18452_v14 }
 0x42b   :  { %11253 = vmatpush3.bf16.msra.mxu1 %v12651_v12  ;;  %v18483_v12 = vld [vmem:[#allocation45_spill] sm:$0xff] }
 0x42c   :  { %11254 = vmatprep.subr.bf16.mxu1 %v12652_v63  ;;  %v15065_v28 = vsub.s32 %v14906_v29, %v18483_v12 }
 0x42d   :  { %3754 = vmatmul.mubr.f32.gmra.mrb[196].mxu0 %v18420_v44  ;;  %11191 = vmatmul.mubr.msk.bf16.gmra.mrb[116].mxu1 %vm13191_vm12, %v13195_v9 }
 0x42e   :  { %11194 = vmatprep.mubr.msk.bf16.mxu1 %vm18339_vm5, %v13241_v38  ;;  %9743 = vmatprep.mubr.msk.f32.mxu0 %vm3156_vm8, %v18452_v14  ;;  %18484 = vst [vmem:[#allocation160_spill] sm:$0xff] %v15065_v28  ;;  %vm3164_vm10 = vcmp.eq.s32.totalorder %v15065_v28, 4294967295  ;;  %v12656_v28 = vld [vmem:[%s17411_s3 + $0x70] sm:$0xff]   ;;  %vm18492_vm8 = vnez %v17996_v4 }
 0x42f   :  { %11255 = vmatpush3.bf16.msra.mxu1 %v12652_v63  ;;  %v12655_v63 = vld [vmem:[%s17411_s3 + $0x68] sm:$0xff]  }
 0x430   :  { %11256 = vmatprep.subr.bf16.mxu1 %v12653_v21 }
 0x431   :  { %3759 = vmatmul.mubr.f32.gmra.mrb[198].mxu0 %v18420_v44 }
 0x432   :  { %9744 = vmatprep.mubr.msk.f32.mxu0 %vm3160_vm11, %v18452_v14  ;;  %vm18493_vm11 = vnez %v18008_v53 }
 0x433   :  { %11257 = vmatpush3.bf16.msra.mxu1 %v12653_v21  ;;  %v18489_v21 = vld [vmem:[#allocation49_spill] sm:$0xff] }
 0x434   :  { %11258 = vmatprep.subr.bf16.mxu1 %v12654_v5  ;;  %v15091_v12 = vsub.s32 %v14906_v29, %v18489_v21  ;;  %v18515_v21 = vld [vmem:[#allocation110_spill] sm:$0xff]  ;;  %v18519_v29 = vld [vmem:[#allocation113_spill] sm:$0xff] }
 0x435   :  { %3764 = vmatmul.mubr.f32.gmra.mrb[200].mxu0 %v18420_v44  ;;  %11195 = vmatmul.mubr.msk.bf16.gmra.mrb[120].mxu1 %vm18487_vm15, %v13284_v1 }
 0x436   :  { %11198 = vmatprep.mubr.msk.bf16.mxu1 %vm18488_vm13, %v13327_v35  ;;  %9745 = vmatprep.mubr.msk.f32.mxu0 %vm3164_vm10, %v18452_v14  ;;  %18490 = vst [vmem:[#allocation162_spill] sm:$0xff] %v15091_v12  ;;  %vm3172_vm14 = vcmp.eq.s32.totalorder %v15091_v12, 4294967295  ;;  %vm3176_vm10 = vcmp.eq.s32.totalorder %v1795_v22, 4294967295  ;;  %v18510_v22 = vld [vmem:[#allocation101_spill] sm:$0xff] }
 0x437   :  { %11259 = vmatpush3.bf16.msra.mxu1 %v12654_v5  ;;  %v12657_v5 = vld [vmem:[%s17411_s3 + $0x78] sm:$0xff]  }
 0x438   :  { %11260 = vmatprep.subr.bf16.mxu1 %v12655_v63  ;;  %v18516_v12 = vld [vmem:[#allocation109_spill] sm:$0xff] }
 0x439   :  { %3769 = vmatmul.mubr.f32.gmra.mrb[202].mxu0 %v18420_v44 }
 0x43a   :  { %9746 = vmatprep.mubr.msk.f32.mxu0 %vm3168_vm2, %v18452_v14  ;;  %vm18494_vm2 = vnez %v18021_v36 }
 0x43b   :  { %11261 = vmatpush3.bf16.msra.mxu1 %v12655_v63  ;;  %v18512_v63 = vld [vmem:[#allocation106_spill] sm:$0xff] }
 0x43c   :  { %11262 = vmatprep.subr.bf16.mxu1 %v12656_v28 }
 0x43d   :  { %3774 = vmatmul.mubr.f32.gmra.mrb[204].mxu0 %v18420_v44  ;;  %11199 = vmatmul.mubr.msk.bf16.gmra.mrb[124].mxu1 %vm18492_vm8, %v13370_v6 }
 0x43e   :  { %11202 = vmatprep.mubr.msk.bf16.mxu1 %vm18493_vm11, %v13413_v54  ;;  %9747 = vmatprep.mubr.msk.f32.mxu0 %vm3172_vm14, %v18452_v14  ;;  %vm18496_vm14 = vnez %v18048_v60 }
 0x43f   :  { %11263 = vmatpush3.bf16.msra.mxu1 %v12656_v28  ;;  %v12658_v28 = vld [vmem:[%s17411_s3 + $0x1c0] sm:$0xff]  }
 0x440   :  { %11264 = vmatprep.subr.bf16.mxu1 %v12657_v5 }
 0x441   :  { %3779 = vmatmul.mubr.f32.gmra.mrb[206].mxu0 %v18420_v44 }
 0x442   :  { %9748 = vmatprep.mubr.msk.f32.mxu0 %vm3176_vm10, %v18452_v14  ;;  %vm18497_vm10 = vnez %v18062_v2 }
 0x443   :  { %11265 = vmatpush3.bf16.msra.mxu1 %v12657_v5  ;;  %v18513_v5 = vld [vmem:[#allocation105_spill] sm:$0xff] }
 0x444   :  { %11330 = vmatprep.subr.bf16.mxu1 %v12658_v28 }
 0x445   :  { %3784 = vmatmul.mubr.f32.gmra.mrb[208].mxu0 %v18420_v44  ;;  %11203 = vmatmul.mubr.msk.bf16.gmra.mrb[128].mxu1 %vm18494_vm2, %v13456_v39 }
 0x446   :  { %11206 = vmatprep.mubr.msk.bf16.mxu1 %vm18495_vm0, %v13499_v42  ;;  %3788 = vmatprep.mubr.f32.mxu0 %v18420_v44  ;;  %vm18499_vm0 = vnez %v18089_v59 }
 0x449   :  { %3789 = vmatmul.mubr.f32.gmra.mrb[210].mxu0 %v18420_v44 }
 0x44a   :  { %3793 = vmatprep.mubr.f32.mxu0 %v18420_v44 }
 0x44d   :  { %3794 = vmatmul.mubr.f32.gmra.mrb[212].mxu0 %v18420_v44  ;;  %11207 = vmatmul.mubr.msk.bf16.gmra.mrb[132].mxu1 %vm18496_vm14, %v13542_v43  ;;  %vm18501_vm14 = vnez %v18117_v17 }
 0x44e   :  { %11210 = vmatprep.mubr.msk.bf16.mxu1 %vm18497_vm10, %v13585_v55  ;;  %3798 = vmatprep.mubr.f32.mxu0 %v18420_v44  ;;  %vm18500_vm10 = vnez %v18103_v10 }
 0x451   :  { %3799 = vmatmul.mubr.f32.gmra.mrb[214].mxu0 %v18420_v44 }
 0x452   :  { %3803 = vmatprep.mubr.f32.mxu0 %v18420_v44 }
 0x455   :  { %3804 = vmatmul.mubr.f32.gmra.mrb[216].mxu0 %v18420_v44  ;;  %11211 = vmatmul.mubr.msk.bf16.gmra.mrb[136].mxu1 %vm18498_vm7, %v13634_v61  ;;  %vm18503_vm7 = vnez %v18145_v56 }
 0x456   :  { %11214 = vmatprep.mubr.msk.bf16.mxu1 %vm18499_vm0, %v13683_v23  ;;  %3808 = vmatprep.mubr.f32.mxu0 %v18420_v44  ;;  %vm18502_vm0 = vnez %v18131_v18 }
 0x459   :  { %3809 = vmatmul.mubr.f32.gmra.mrb[218].mxu0 %v18420_v44 }
 0x45a   :  { %3813 = vmatprep.mubr.f32.mxu0 %v18420_v44 }
 0x45d   :  { %3814 = vmatmul.mubr.f32.gmra.mrb[220].mxu0 %v18420_v44  ;;  %11215 = vmatmul.mubr.msk.bf16.gmra.mrb[140].mxu1 %vm18500_vm10, %v13732_v50  ;;  %vm18505_vm10 = vnez %v18173_v7 }
 0x45e   :  { %11218 = vmatprep.mubr.msk.bf16.mxu1 %vm18501_vm14, %v13781_v49  ;;  %3818 = vmatprep.mubr.f32.mxu0 %v18420_v44  ;;  %vm18504_vm14 = vnez %v18159_v33 }
 0x461   :  { %3819 = vmatmul.mubr.f32.gmra.mrb[222].mxu0 %v18420_v44 }
 0x462   :  { %4008 = vmatprep.mubr.f32.mxu0 %v18420_v44 }
 0x465   :  { %4009 = vmatmul.mubr.f32.vlgmr.msra.gmra.mrb[144].mxu0 %v18420_v44  ;;  %11219 = vmatmul.mubr.msk.bf16.gmra.mrb[144].mxu1 %vm18502_vm0, %v13824_v58  ;;  %vm18507_vm0 = vnez %v18360_v13 }
 0x466   :  { %11222 = vmatprep.mubr.msk.bf16.mxu1 %vm18503_vm7, %v13867_v11  ;;  %4013 = vmatprep.mubr.f32.mxu0 %v18420_v44  ;;  %vm18506_vm7 = vnez %v18357_v47 }
 0x469   :  { %4014 = vmatmul.mubr.f32.gmra.mrb[146].mxu0 %v18420_v44 }
 0x46a   :  { %4018 = vmatprep.mubr.f32.mxu0 %v18420_v44 }
 0x46d   :  { %4019 = vmatmul.mubr.f32.gmra.mrb[148].mxu0 %v18420_v44  ;;  %11223 = vmatmul.mubr.msk.bf16.gmra.mrb[148].mxu1 %vm18504_vm14, %v13916_v25  ;;  %vm18509_vm14 = vnez %v18366_v19 }
 0x46e   :  { %11226 = vmatprep.mubr.msk.bf16.mxu1 %vm18505_vm10, %v13970_v3  ;;  %4023 = vmatprep.mubr.f32.mxu0 %v18420_v44  ;;  %vm18508_vm10 = vnez %v18363_v20 }
 0x471   :  { %4024 = vmatmul.mubr.f32.gmra.mrb[150].mxu0 %v18420_v44 }
 0x472   :  { %4028 = vmatprep.mubr.f32.mxu0 %v18420_v44 }
 0x475   :  { %4029 = vmatmul.mubr.f32.gmra.mrb[152].mxu0 %v18420_v44  ;;  %11227 = vmatmul.mubr.msk.bf16.gmra.mrb[152].mxu1 %vm18506_vm7, %v18356_v51 }
 0x476   :  { %11230 = vmatprep.mubr.msk.bf16.mxu1 %vm18507_vm0, %v18359_v27  ;;  %4033 = vmatprep.mubr.f32.mxu0 %v18420_v44  ;;  %vm18511_vm0 = vnez %v18510_v22  ;;  %v18530_v22 = vld [vmem:[#allocation3_spill] sm:$0xff] }
 0x479   :  { %4034 = vmatmul.mubr.f32.gmra.mrb[154].mxu0 %v18420_v44 }
 0x47a   :  { %4038 = vmatprep.mubr.f32.mxu0 %v18420_v44 }
 0x47d   :  { %4039 = vmatmul.mubr.f32.gmra.mrb[156].mxu0 %v18420_v44  ;;  %11231 = vmatmul.mubr.msk.bf16.gmra.mrb[156].mxu1 %vm18508_vm10, %v18362_v30  ;;  %vm18514_vm10 = vnez %v18513_v5  ;;  %v18522_v5 = vld [vmem:[#allocation115_spill] sm:$0xff] }
 0x47e   :  { %11234 = vmatprep.mubr.msk.bf16.mxu1 %vm18509_vm14, %v18365_v45  ;;  %4043 = vmatprep.mubr.f32.mxu0 %v18420_v44  ;;  %vm18517_vm14 = vnez %v18516_v12 }
 0x481   :  { %4044 = vmatmul.mubr.f32.gmra.mrb[158].mxu0 %v18420_v44 }
 0x482   :  { %4048 = vmatprep.mubr.f32.mxu0 %v18420_v44 }
 0x485   :  { %4049 = vmatmul.mubr.f32.gmra.mrb[160].mxu0 %v18420_v44  ;;  %11235 = vmatmul.mubr.msk.bf16.gmra.mrb[160].mxu1 %vm18511_vm0, %v18395_v26  ;;  %vm18520_vm0 = vnez %v18519_v29 }
 0x486   :  { %11238 = vmatprep.mubr.msk.bf16.mxu1 %vm18514_vm10, %v18512_v63  ;;  %4053 = vmatprep.mubr.f32.mxu0 %v18420_v44  ;;  %vm18523_vm10 = vnez %v18522_v5  ;;  %v18524_v63 = vld [vmem:[#allocation119_spill] sm:$0xff] }
 0x487   :  { %v18528_v5 = vld [vmem:[#allocation123_spill] sm:$0xff] }
 0x489   :  { %4054 = vmatmul.mubr.f32.gmra.mrb[162].mxu0 %v18420_v44 }
 0x48a   :  { %4058 = vmatprep.mubr.f32.mxu0 %v18420_v44 }
 0x48d   :  { %4059 = vmatmul.mubr.f32.gmra.mrb[164].mxu0 %v18420_v44  ;;  %11239 = vmatmul.mubr.msk.bf16.gmra.mrb[164].mxu1 %vm18517_vm14, %v18515_v21 }
 0x48e   :  { %11242 = vmatprep.mubr.msk.bf16.mxu1 %vm18520_vm0, %v18518_v41  ;;  %4063 = vmatprep.mubr.f32.mxu0 %v18420_v44 }
 0x491   :  { %4064 = vmatmul.mubr.f32.gmra.mrb[166].mxu0 %v18420_v44 }
 0x492   :  { %4068 = vmatprep.mubr.f32.mxu0 %v18420_v44 }
 0x495   :  { %4069 = vmatmul.mubr.f32.gmra.mrb[168].mxu0 %v18420_v44  ;;  %11243 = vmatmul.mubr.msk.bf16.gmra.mrb[168].mxu1 %vm18523_vm10, %v18521_v40 }
 0x496   :  { %11246 = vmatprep.mubr.msk.bf16.mxu1 %vm18405_vm6, %v18524_v63  ;;  %4073 = vmatprep.mubr.f32.mxu0 %v18420_v44  ;;  %v18531_v63 = vld [vmem:[#allocation124_spill] sm:$0xff] }
 0x497   :  { %vm18532_vm6 = vnez %v18531_v63  ;;  %v18535_v63 = vld [vmem:[#allocation6_spill] sm:$0xff] }
 0x498   :  { %v15225_v29 = vpop.f32.mrb[64].mxu1 }
 0x499   :  { %18526 = vst [vmem:[#allocation163_spill] sm:$0xff] %v15225_v29  ;;  %v3827_v41 = vpop.f32.mrb[65].mxu1  ;;  %4074 = vmatmul.mubr.f32.gmra.mrb[170].mxu0 %v18420_v44 }
 0x49a   :  { %4078 = vmatprep.mubr.f32.mxu0 %v18420_v44 }
 0x49c   :  { %v15229_v12 = vpop.f32.mrb[66].mxu1 }
 0x49d   :  { %18527 = vst [vmem:[#allocation164_spill] sm:$0xff] %v15229_v12  ;;  %v3832_v21 = vpop.f32.mrb[67].mxu1  ;;  %4079 = vmatmul.mubr.f32.gmra.mrb[172].mxu0 %v18420_v44  ;;  %11247 = vmatmul.mubr.msk.bf16.gmra.mrb[172].mxu1 %vm18411_vm9, %v18528_v5  ;;  %v12659_v12 = vld [vmem:[%s17411_s3 + $0x1c8] sm:$0xff]   ;;  %vm18556_vm9 = vnez %v18076_v24  ;;  %v18612_v5 = vld [vmem:[#allocation80_spill] sm:$0xff] }
 0x49e   :  { %11266 = vmatprep.mubr.msk.bf16.mxu1 %vm18532_vm6, %v18530_v22  ;;  %4083 = vmatprep.mubr.f32.mxu0 %v18420_v44  ;;  %v18536_v22 = vld [vmem:[#allocation125_spill] sm:$0xff] }
 0x49f   :  { %vm18537_vm6 = vnez %v18536_v22 }
 0x4a0   :  { %v15239_v41 = vpop.f32.mrb[68].mxu1 }
 0x4a1   :  { %18533 = vst [vmem:[#allocation165_spill] sm:$0xff] %v15239_v41  ;;  %v3837_v29 = vpop.f32.mrb[69].mxu1  ;;  %4084 = vmatmul.mubr.f32.gmra.mrb[174].mxu0 %v18420_v44 }
 0x4a2   :  { %4088 = vmatprep.mubr.f32.mxu0 %v18420_v44 }
 0x4a4   :  { %v15243_v21 = vpop.f32.mrb[70].mxu1 }
 0x4a5   :  { %18534 = vst [vmem:[#allocation166_spill] sm:$0xff] %v15243_v21  ;;  %v3842_v40 = vpop.f32.mrb[71].mxu1  ;;  %4089 = vmatmul.mubr.f32.gmra.mrb[176].mxu0 %v18420_v44  ;;  %11267 = vmatmul.mubr.msk.bf16.vlgmr.msra.gmra.mrb[112].mxu1 %vm18537_vm6, %v18535_v63  ;;  %vm18548_vm6 = vnez %v18034_v31 }
 0x4a6   :  { %11270 = vmatprep.mubr.msk.bf16.mxu1 %vm18473_vm3, %v18471_v16  ;;  %4093 = vmatprep.mubr.f32.mxu0 %v18420_v44  ;;  %v12660_v40 = vld [vmem:[%s17411_s3 + $0x1d0] sm:$0xff]   ;;  %vm18552_vm3 = vnez %v18062_v2 }
 0x4a7   :  { %11331 = vmatpush3.bf16.msra.mxu1 %v12658_v28  ;;  %v12661_v28 = vld [vmem:[%s17411_s3 + $0x1d8] sm:$0xff]  }
 0x4a8   :  { %v15256_v29 = vpop.f32.mrb[72].mxu1  ;;  %11332 = vmatprep.subr.bf16.mxu1 %v12659_v12 }
 0x4a9   :  { %18538 = vst [vmem:[#allocation167_spill] sm:$0xff] %v15256_v29  ;;  %v3847_v21 = vpop.f32.mrb[73].mxu1  ;;  %4094 = vmatmul.mubr.f32.gmra.mrb[178].mxu0 %v18420_v44 }
 0x4aa   :  { %4098 = vmatprep.mubr.f32.mxu0 %v18420_v44 }
 0x4ab   :  { %11333 = vmatpush3.bf16.msra.mxu1 %v12659_v12 }
 0x4ac   :  { %v15263_v22 = vpop.f32.mrb[74].mxu1  ;;  %11334 = vmatprep.subr.bf16.mxu1 %v12660_v40 }
 0x4ad   :  { %18539 = vst [vmem:[#allocation168_spill] sm:$0xff] %v15263_v22  ;;  %v3852_v63 = vpop.f32.mrb[75].mxu1  ;;  %4099 = vmatmul.mubr.f32.gmra.mrb[180].mxu0 %v18420_v44  ;;  %11271 = vmatmul.mubr.msk.bf16.gmra.mrb[116].mxu1 %vm18478_vm1, %v18476_v57  ;;  %vm18551_vm1 = vnez %v18048_v60  ;;  %v18605_v57 = vld [vmem:[#allocation110_spill] sm:$0xff] }
 0x4ae   :  { %11274 = vmatprep.mubr.msk.bf16.mxu1 %vm13142_vm4, %v13146_v48  ;;  %4103 = vmatprep.mubr.f32.mxu0 %v18420_v44  ;;  %v12662_v63 = vld [vmem:[%s17411_s3 + $0x1e0] sm:$0xff]  }
 0x4af   :  { %11335 = vmatpush3.bf16.msra.mxu1 %v12660_v40  ;;  %v12663_v40 = vld [vmem:[%s17411_s3 + $0x1e8] sm:$0xff]  }
 0x4b0   :  { %v15276_v12 = vpop.f32.mrb[76].mxu1  ;;  %11336 = vmatprep.subr.bf16.mxu1 %v12661_v28 }
 0x4b1   :  { %18540 = vst [vmem:[#allocation169_spill] sm:$0xff] %v15276_v12  ;;  %v3857_v21 = vpop.f32.mrb[77].mxu1  ;;  %4104 = vmatmul.mubr.f32.gmra.mrb[182].mxu0 %v18420_v44 }
 0x4b2   :  { %4108 = vmatprep.mubr.f32.mxu0 %v18420_v44 }
 0x4b3   :  { %11337 = vmatpush3.bf16.msra.mxu1 %v12661_v28 }
 0x4b4   :  { %v15283_v22 = vpop.f32.mrb[78].mxu1  ;;  %11338 = vmatprep.subr.bf16.mxu1 %v12662_v63 }
 0x4b5   :  { %18541 = vst [vmem:[#allocation170_spill] sm:$0xff] %v15283_v22  ;;  %v3862_v29 = vpop.f32.mrb[79].mxu1  ;;  %4109 = vmatmul.mubr.f32.gmra.mrb[184].mxu0 %v18420_v44  ;;  %11275 = vmatmul.mubr.msk.bf16.gmra.mrb[120].mxu1 %vm13191_vm12, %v13195_v9 }
 0x4b6   :  { %11278 = vmatprep.mubr.msk.bf16.mxu1 %vm18339_vm5, %v13241_v38  ;;  %4113 = vmatprep.mubr.f32.mxu0 %v18420_v44  ;;  %v12664_v29 = vld [vmem:[%s17411_s3 + $0x1f0] sm:$0xff]  }
 0x4b7   :  { %11339 = vmatpush3.bf16.msra.mxu1 %v12662_v63  ;;  %v12665_v63 = vld [vmem:[%s17411_s3 + $0x1f8] sm:$0xff]  }
 0x4b8   :  { %v15296_v28 = vpop.f32.mrb[80].mxu1  ;;  %11340 = vmatprep.subr.bf16.mxu1 %v12663_v40 }
 0x4b9   :  { %18542 = vst [vmem:[#allocation171_spill] sm:$0xff] %v15296_v28  ;;  %v3867_v21 = vpop.f32.mrb[81].mxu1  ;;  %4114 = vmatmul.mubr.f32.gmra.mrb[186].mxu0 %v18420_v44 }
 0x4ba   :  { %4118 = vmatprep.mubr.f32.mxu0 %v18420_v44 }
 0x4bb   :  { %11341 = vmatpush3.bf16.msra.mxu1 %v12663_v40 }
 0x4bc   :  { %v15303_v22 = vpop.f32.mrb[82].mxu1  ;;  %11342 = vmatprep.subr.bf16.mxu1 %v12664_v29 }
 0x4bd   :  { %18543 = vst [vmem:[#allocation172_spill] sm:$0xff] %v15303_v22  ;;  %v3872_v12 = vpop.f32.mrb[83].mxu1  ;;  %4119 = vmatmul.mubr.f32.gmra.mrb[188].mxu0 %v18420_v44  ;;  %11279 = vmatmul.mubr.msk.bf16.gmra.mrb[124].mxu1 %vm18487_vm15, %v13284_v1 }
 0x4be   :  { %11282 = vmatprep.mubr.msk.bf16.mxu1 %vm18488_vm13, %v13327_v35  ;;  %4123 = vmatprep.mubr.f32.mxu0 %v18420_v44 }
 0x4bf   :  { %11343 = vmatpush3.bf16.msra.mxu1 %v12664_v29 }
 0x4c0   :  { %v15316_v40 = vpop.f32.mrb[84].mxu1  ;;  %11344 = vmatprep.subr.bf16.mxu1 %v12665_v63 }
 0x4c1   :  { %18544 = vst [vmem:[#allocation173_spill] sm:$0xff] %v15316_v40  ;;  %v3877_v21 = vpop.f32.mrb[85].mxu1  ;;  %4124 = vmatmul.mubr.f32.gmra.mrb[190].mxu0 %v18420_v44 }
 0x4c2   :  { %4128 = vmatprep.mubr.f32.mxu0 %v18420_v44 }
 0x4c3   :  { %11345 = vmatpush3.bf16.msra.mxu1 %v12665_v63 }
 0x4c4   :  { %v15320_v12 = vpop.f32.mrb[86].mxu1 }
 0x4c5   :  { %18545 = vst [vmem:[#allocation174_spill] sm:$0xff] %v15320_v12  ;;  %v3882_v22 = vpop.f32.mrb[87].mxu1  ;;  %4129 = vmatmul.mubr.f32.gmra.mrb[192].mxu0 %v18420_v44  ;;  %11283 = vmatmul.mubr.msk.bf16.gmra.mrb[128].mxu1 %vm18492_vm8, %v13370_v6 }
 0x4c6   :  { %11286 = vmatprep.mubr.msk.bf16.mxu1 %vm18493_vm11, %v13413_v54  ;;  %4133 = vmatprep.mubr.f32.mxu0 %v18420_v44 }
 0x4c8   :  { %v15330_v29 = vpop.f32.mrb[88].mxu1 }
 0x4c9   :  { %18546 = vst [vmem:[#allocation175_spill] sm:$0xff] %v15330_v29  ;;  %v3887_v21 = vpop.f32.mrb[89].mxu1  ;;  %4134 = vmatmul.mubr.f32.gmra.mrb[194].mxu0 %v18420_v44 }
 0x4ca   :  { %4138 = vmatprep.mubr.f32.mxu0 %v18420_v44 }
 0x4cc   :  { %v15334_v22 = vpop.f32.mrb[90].mxu1 }
 0x4cd   :  { %18547 = vst [vmem:[#allocation176_spill] sm:$0xff] %v15334_v22  ;;  %v3892_v63 = vpop.f32.mrb[91].mxu1  ;;  %4139 = vmatmul.mubr.f32.gmra.mrb[196].mxu0 %v18420_v44  ;;  %11287 = vmatmul.mubr.msk.bf16.gmra.mrb[132].mxu1 %vm18494_vm2, %v13456_v39 }
 0x4ce   :  { %11290 = vmatprep.mubr.msk.bf16.mxu1 %vm18548_vm6, %v13499_v42  ;;  %4143 = vmatprep.mubr.f32.mxu0 %v18420_v44 }
 0x4d0   :  { %v15344_v21 = vpop.f32.mrb[92].mxu1 }
 0x4d1   :  { %18549 = vst [vmem:[#allocation177_spill] sm:$0xff] %v15344_v21  ;;  %v3897_v29 = vpop.f32.mrb[93].mxu1  ;;  %4144 = vmatmul.mubr.f32.gmra.mrb[198].mxu0 %v18420_v44 }
 0x4d2   :  { %4148 = vmatprep.mubr.f32.mxu0 %v18420_v44 }
 0x4d4   :  { %v15348_v63 = vpop.f32.mrb[94].mxu1 }
 0x4d5   :  { %18550 = vst [vmem:[#allocation178_spill] sm:$0xff] %v15348_v63  ;;  %v3902_v22 = vpop.f32.mrb[95].mxu1  ;;  %4149 = vmatmul.mubr.f32.gmra.mrb[200].mxu0 %v18420_v44  ;;  %11291 = vmatmul.mubr.msk.bf16.gmra.mrb[136].mxu1 %vm18551_vm1, %v13542_v43 }
 0x4d6   :  { %11294 = vmatprep.mubr.msk.bf16.mxu1 %vm18552_vm3, %v13585_v55  ;;  %4153 = vmatprep.mubr.f32.mxu0 %v18420_v44  ;;  %v15363_v22 = vadd.s32 256, %v14738_v52  ;;  %vm18557_vm3 = vnez %v18089_v59 }
 0x4d8   :  { %v15358_v29 = vpop.f32.mrb[96].mxu1  ;;  %18554 = vst [vmem:[#allocation180_spill] sm:$0xff] %v15363_v22  ;;  %v15542_v16 = vsub.s32 %v15363_v22, %v18612_v5 }
 0x4d9   :  { %18553 = vst [vmem:[#allocation179_spill] sm:$0xff] %v15358_v29  ;;  %v3907_v21 = vpop.f32.mrb[97].mxu1  ;;  %4154 = vmatmul.mubr.f32.gmra.mrb[202].mxu0 %v18420_v44 }
 0x4da   :  { %4158 = vmatprep.mubr.f32.mxu0 %v18420_v44  ;;  %v15377_v21 = vsub.s32 %v15363_v22, %v18491_v15  ;;  %v18568_v15 = vld [vmem:[#allocation56_spill] sm:$0xff]  ;;  %18613 = vst [vmem:[#allocation204_spill] sm:$0xff] %v15542_v16 }
 0x4dc   :  { %v15365_v63 = vpop.f32.mrb[98].mxu1  ;;  %18558 = vst [vmem:[#allocation182_spill] sm:$0xff] %v15377_v21  ;;  %vm3177_vm1 = vcmp.eq.s32.totalorder %v15377_v21, 4294967295 }
 0x4dd   :  { %18555 = vst [vmem:[#allocation181_spill] sm:$0xff] %v15365_v63  ;;  %v3912_v12 = vpop.f32.mrb[99].mxu1  ;;  %4159 = vmatmul.mubr.f32.gmra.mrb[204].mxu0 %v18420_v44  ;;  %11295 = vmatmul.mubr.msk.bf16.gmra.mrb[140].mxu1 %vm18556_vm9, %v13634_v61  ;;  %vm18564_vm9 = vnez %v18117_v17 }
 0x4de   :  { %11298 = vmatprep.mubr.msk.bf16.mxu1 %vm18557_vm3, %v13683_v23  ;;  %4163 = vmatprep.mubr.f32.mxu0 %v18420_v44  ;;  %v18560_v12 = vld [vmem:[#allocation53_spill] sm:$0xff]  ;;  %vm18563_vm3 = vnez %v18103_v10 }
 0x4df   :  { %v15386_v40 = vsub.s32 %v15363_v22, %v18560_v12 }
 0x4e0   :  { %v15379_v29 = vpop.f32.mrb[100].mxu1 }
 0x4e1   :  { %18559 = vst [vmem:[#allocation183_spill] sm:$0xff] %v15379_v29  ;;  %v3917_v63 = vpop.f32.mrb[101].mxu1  ;;  %4164 = vmatmul.mubr.f32.gmra.mrb[206].mxu0 %v18420_v44  ;;  %18561 = vst [vmem:[#allocation184_spill] sm:$0xff] %v15386_v40  ;;  %vm3181_vm6 = vcmp.eq.s32.totalorder %v15386_v40, 4294967295 }
 0x4e2   :  { %4168 = vmatprep.mubr.f32.mxu0 %v18420_v44  ;;  %v18565_v63 = vld [vmem:[#allocation55_spill] sm:$0xff] }
 0x4e3   :  { %v15401_v12 = vsub.s32 %v15363_v22, %v18565_v63 }
 0x4e4   :  { %v15388_v28 = vpop.f32.mrb[102].mxu1 }
 0x4e5   :  { %18562 = vst [vmem:[#allocation185_spill] sm:$0xff] %v15388_v28  ;;  %v3922_v41 = vpop.f32.mrb[103].mxu1  ;;  %9749 = vmatmul.mubr.msk.f32.gmra.mrb[208].mxu0 %vm3177_vm1, %v18452_v14  ;;  %11299 = vmatmul.mubr.msk.bf16.gmra.mrb[144].mxu1 %vm18563_vm3, %v13732_v50  ;;  %18566 = vst [vmem:[#allocation186_spill] sm:$0xff] %v15401_v12  ;;  %vm3185_vm1 = vcmp.eq.s32.totalorder %v15401_v12, 4294967295  ;;  %v15410_v28 = vsub.s32 %v15363_v22, %v18568_v15 }
 0x4e6   :  { %11302 = vmatprep.mubr.msk.bf16.mxu1 %vm18564_vm9, %v13781_v49  ;;  %4173 = vmatprep.mubr.f32.mxu0 %v18420_v44  ;;  %vm18571_vm9 = vnez %v18131_v18 }
 0x4e7   :  { %18569 = vst [vmem:[#allocation188_spill] sm:$0xff] %v15410_v28  ;;  %vm3189_vm3 = vcmp.eq.s32.totalorder %v15410_v28, 4294967295 }
 0x4e8   :  { %v15403_v21 = vpop.f32.mrb[104].mxu1 }
 0x4e9   :  { %18567 = vst [vmem:[#allocation187_spill] sm:$0xff] %v15403_v21  ;;  %v3927_v41 = vpop.f32.mrb[105].mxu1  ;;  %9750 = vmatmul.mubr.msk.f32.gmra.mrb[210].mxu0 %vm3181_vm6, %v18452_v14  ;;  %vm18572_vm6 = vnez %v18145_v56 }
 0x4ea   :  { %4178 = vmatprep.mubr.f32.mxu0 %v18420_v44  ;;  %v18573_v41 = vld [vmem:[#allocation59_spill] sm:$0xff] }
 0x4eb   :  { %v15425_v15 = vsub.s32 %v15363_v22, %v18573_v41  ;;  %v12666_v41 = vld [vmem:[%s17411_s3 + $0x140] sm:$0xff]  }
 0x4ec   :  { %v15412_v29 = vpop.f32.mrb[106].mxu1  ;;  %11410 = vmatprep.subr.bf16.mxu1 %v12666_v41 }
 0x4ed   :  { %18570 = vst [vmem:[#allocation189_spill] sm:$0xff] %v15412_v29  ;;  %v3932_v40 = vpop.f32.mrb[107].mxu1  ;;  %9751 = vmatmul.mubr.msk.f32.gmra.mrb[212].mxu0 %vm3185_vm1, %v18452_v14  ;;  %11303 = vmatmul.mubr.msk.bf16.gmra.mrb[148].mxu1 %vm18571_vm9, %v13824_v58  ;;  %18574 = vst [vmem:[#allocation190_spill] sm:$0xff] %v15425_v15  ;;  %vm3193_vm1 = vcmp.eq.s32.totalorder %v15425_v15, 4294967295  ;;  %v18576_v29 = vld [vmem:[#allocation60_spill] sm:$0xff] }
 0x4ee   :  { %11306 = vmatprep.mubr.msk.bf16.mxu1 %vm18572_vm6, %v13867_v11  ;;  %4183 = vmatprep.mubr.f32.mxu0 %v18420_v44  ;;  %v15434_v63 = vsub.s32 %v15363_v22, %v18576_v29  ;;  %vm18579_vm6 = vnez %v18159_v33 }
 0x4f0   :  { %v15427_v12 = vpop.f32.mrb[108].mxu1  ;;  %18577 = vst [vmem:[#allocation192_spill] sm:$0xff] %v15434_v63  ;;  %vm3197_vm9 = vcmp.eq.s32.totalorder %v15434_v63, 4294967295  ;;  %v18586_v63 = vld [vmem:[#allocation67_spill] sm:$0xff] }
 0x4f1   :  { %18575 = vst [vmem:[#allocation191_spill] sm:$0xff] %v15427_v12  ;;  %v3937_v40 = vpop.f32.mrb[109].mxu1  ;;  %9752 = vmatmul.mubr.msk.f32.gmra.mrb[214].mxu0 %vm3189_vm3, %v18452_v14  ;;  %vm18580_vm3 = vnez %v18173_v7  ;;  %v18601_v12 = vld [vmem:[#allocation75_spill] sm:$0xff] }
 0x4f2   :  { %4188 = vmatprep.mubr.f32.mxu0 %v18420_v44  ;;  %v18581_v40 = vld [vmem:[#allocation63_spill] sm:$0xff] }
 0x4f3   :  { %v15449_v29 = vsub.s32 %v15363_v22, %v18581_v40  ;;  %v18596_v40 = vld [vmem:[#allocation101_spill] sm:$0xff] }
 0x4f4   :  { %v15436_v21 = vpop.f32.mrb[110].mxu1 }
 0x4f5   :  { %18578 = vst [vmem:[#allocation193_spill] sm:$0xff] %v15436_v21  ;;  %v3942_v28 = vpop.f32.mrb[111].mxu1  ;;  %9753 = vmatmul.mubr.msk.f32.gmra.mrb[216].mxu0 %vm3193_vm1, %v18452_v14  ;;  %11307 = vmatmul.mubr.msk.bf16.gmra.mrb[152].mxu1 %vm18579_vm6, %v13916_v25  ;;  %18582 = vst [vmem:[#allocation194_spill] sm:$0xff] %v15449_v29  ;;  %vm3201_vm1 = vcmp.eq.s32.totalorder %v15449_v29, 4294967295  ;;  %v15469_v29 = vsub.s32 %v15363_v22, %v18586_v63 }
 0x4f6   :  { %11310 = vmatprep.mubr.msk.bf16.mxu1 %vm18580_vm3, %v13970_v3  ;;  %4193 = vmatprep.mubr.f32.mxu0 %v18420_v44  ;;  %v18583_v28 = vld [vmem:[#allocation64_spill] sm:$0xff]  ;;  %vm18585_vm3 = vnez %v18360_v13 }
 0x4f7   :  { %v15456_v15 = vsub.s32 %v15363_v22, %v18583_v28  ;;  %18587 = vst [vmem:[#allocation196_spill] sm:$0xff] %v15469_v29  ;;  %v18588_v28 = vld [vmem:[#allocation68_spill] sm:$0xff] }
 0x4f8   :  { %v15476_v21 = vsub.s32 %v15363_v22, %v18588_v28  ;;  %v18592_v28 = vld [vmem:[#allocation71_spill] sm:$0xff] }
 0x4f9   :  { %9754 = vmatmul.mubr.msk.f32.gmra.mrb[218].mxu0 %vm3197_vm9, %v18452_v14  ;;  %18584 = vst [vmem:[#allocation195_spill] sm:$0xff] %v15456_v15  ;;  %vm3205_vm9 = vcmp.eq.s32.totalorder %v15456_v15, 4294967295  ;;  %v18594_v15 = vld [vmem:[#allocation72_spill] sm:$0xff] }
 0x4fa   :  { %4198 = vmatprep.mubr.f32.mxu0 %v18420_v44  ;;  %18589 = vst [vmem:[#allocation197_spill] sm:$0xff] %v15476_v21  ;;  %v15499_v63 = vsub.s32 %v15363_v22, %v18594_v15  ;;  %v18603_v15 = vld [vmem:[#allocation76_spill] sm:$0xff] }
 0x4fb   :  { %v15519_v32 = vsub.s32 %v15363_v22, %v18603_v15  ;;  %v15535_v15 = vadd.s32 384, %v14738_v52 }
 0x4fc   :  { %18595 = vst [vmem:[#allocation199_spill] sm:$0xff] %v15499_v63 }
 0x4fd   :  { %9755 = vmatmul.mubr.msk.f32.gmra.mrb[220].mxu0 %vm3201_vm1, %v18452_v14  ;;  %11311 = vmatmul.mubr.msk.bf16.gmra.mrb[156].mxu1 %vm18506_vm7, %v18356_v51  ;;  %vm3209_vm1 = vcmp.eq.s32.totalorder %v15469_v29, 4294967295  ;;  %vm3213_vm7 = vcmp.eq.s32.totalorder %v15476_v21, 4294967295  ;;  %v15492_v29 = vsub.s32 %v15363_v22, %v18592_v28  ;;  %v18598_v21 = vld [vmem:[#allocation106_spill] sm:$0xff]  ;;  %v18599_v28 = vld [vmem:[#allocation105_spill] sm:$0xff]  ;;  %18604 = vst [vmem:[#allocation201_spill] sm:$0xff] %v15519_v32  ;;  %18611 = vst [vmem:[#allocation203_spill] sm:$0xff] %v15535_v15 }
 0x4fe   :  { %11314 = vmatprep.mubr.msk.bf16.mxu1 %vm18585_vm3, %v18359_v27  ;;  %4203 = vmatprep.mubr.f32.mxu0 %v18420_v44  ;;  %vm18590_vm3 = vnez %v18363_v20 }
 0x4ff   :  { %18593 = vst [vmem:[#allocation198_spill] sm:$0xff] %v15492_v29 }
 0x501   :  { %9756 = vmatmul.mubr.msk.f32.gmra.mrb[222].mxu0 %vm3205_vm9, %v18452_v14  ;;  %vm18591_vm9 = vnez %v18366_v19 }
 0x502   :  { %4208 = vmatprep.mubr.f32.mxu0 %v18420_v44 }
 0x505   :  { %9757 = vmatmul.mubr.msk.f32.gmra.mrb[224].mxu0 %vm3209_vm1, %v18452_v14  ;;  %11315 = vmatmul.mubr.msk.bf16.gmra.mrb[160].mxu1 %vm18590_vm3, %v18362_v30  ;;  %vm3217_vm1 = vcmp.eq.s32.totalorder %v15492_v29, 4294967295  ;;  %vm18600_vm3 = vnez %v18599_v28  ;;  %v15512_v29 = vsub.s32 %v15363_v22, %v18601_v12  ;;  %v18609_v12 = vld [vmem:[#allocation79_spill] sm:$0xff] }
 0x506   :  { %11318 = vmatprep.mubr.msk.bf16.mxu1 %vm18591_vm9, %v18365_v45  ;;  %4213 = vmatprep.mubr.f32.mxu0 %v18420_v44  ;;  %vm18597_vm9 = vnez %v18596_v40 }
 0x507   :  { %18602 = vst [vmem:[#allocation200_spill] sm:$0xff] %v15512_v29 }
 0x509   :  { %9758 = vmatmul.mubr.msk.f32.gmra.mrb[226].mxu0 %vm3213_vm7, %v18452_v14  ;;  %vm3221_vm7 = vcmp.eq.s32.totalorder %v15499_v63, 4294967295  ;;  %v18607_v63 = vld [vmem:[#allocation114_spill] sm:$0xff] }
 0x50a   :  { %4218 = vmatprep.mubr.f32.mxu0 %v18420_v44 }
 0x50d   :  { %9759 = vmatmul.mubr.msk.f32.gmra.mrb[228].mxu0 %vm3217_vm1, %v18452_v14  ;;  %11319 = vmatmul.mubr.msk.bf16.gmra.mrb[164].mxu1 %vm18597_vm9, %v18395_v26  ;;  %vm3225_vm1 = vcmp.eq.s32.totalorder %v15512_v29, 4294967295  ;;  %v15532_v29 = vsub.s32 %v15363_v22, %v18609_v12  ;;  %v18616_v12 = vld [vmem:[#allocation116_spill] sm:$0xff] }
 0x50e   :  { %11322 = vmatprep.mubr.msk.bf16.mxu1 %vm18600_vm3, %v18598_v21  ;;  %4223 = vmatprep.mubr.f32.mxu0 %v18420_v44 }
 0x50f   :  { %18610 = vst [vmem:[#allocation202_spill] sm:$0xff] %v15532_v29 }
 0x511   :  { %9760 = vmatmul.mubr.msk.f32.gmra.mrb[230].mxu0 %vm3221_vm7, %v18452_v14  ;;  %vm3229_vm7 = vcmp.eq.s32.totalorder %v15519_v32, 4294967295 }
 0x512   :  { %4228 = vmatprep.mubr.f32.mxu0 %v18420_v44 }
 0x515   :  { %9761 = vmatmul.mubr.msk.f32.gmra.mrb[232].mxu0 %vm3225_vm1, %v18452_v14  ;;  %11323 = vmatmul.mubr.msk.bf16.gmra.mrb[168].mxu1 %vm18517_vm14, %v18605_v57  ;;  %vm3233_vm1 = vcmp.eq.s32.totalorder %v15532_v29, 4294967295  ;;  %v18618_v29 = vld [vmem:[#allocation84_spill] sm:$0xff] }
 0x516   :  { %11326 = vmatprep.mubr.msk.bf16.mxu1 %vm18520_vm0, %v18607_v63  ;;  %4233 = vmatprep.mubr.f32.mxu0 %v18420_v44  ;;  %v18614_v63 = vld [vmem:[#allocation83_spill] sm:$0xff]  ;;  %v15562_v5 = vsub.s32 %v15535_v15, %v18618_v29 }
 0x517   :  { %v15546_v32 = vsub.s32 %v15535_v15, %v18614_v63  ;;  %v1860_v52 = vsub.s32 %v15363_v22, %v18614_v63 }
 0x518   :  { %18619 = vst [vmem:[#allocation206_spill] sm:$0xff] %v15562_v5 }
 0x519   :  { %9762 = vmatmul.mubr.msk.f32.gmra.mrb[234].mxu0 %vm3229_vm7, %v18452_v14  ;;  %18615 = vst [vmem:[#allocation205_spill] sm:$0xff] %v15546_v32  ;;  %vm3237_vm7 = vcmp.eq.s32.totalorder %v15542_v16, 4294967295  ;;  %vm3242_vm0 = vcmp.eq.s32.totalorder %v15546_v32, 4294967295  ;;  %v12667_v16 = vld [vmem:[%s17411_s3 + $0x148] sm:$0xff]  }
 0x51a   :  { %4238 = vmatprep.mubr.f32.mxu0 %v18420_v44  ;;  %v18624_v32 = vld [vmem:[#allocation91_spill] sm:$0xff] }
 0x51b   :  { %v15595_v22 = vsub.s32 %v15535_v15, %v18624_v32 }
 0x51d   :  { %9763 = vmatmul.mubr.msk.f32.gmra.mrb[236].mxu0 %vm3233_vm1, %v18452_v14  ;;  %11327 = vmatmul.mubr.msk.bf16.gmra.mrb[172].mxu1 %vm18523_vm10, %v18616_v12  ;;  %vm3241_vm1 = vcmp.eq.s32.totalorder %v1860_v52, 4294967295  ;;  %v18622_v52 = vld [vmem:[#allocation88_spill] sm:$0xff]  ;;  %18625 = vst [vmem:[#allocation209_spill] sm:$0xff] %v15595_v22 }
 0x51e   :  { %11346 = vmatprep.mubr.msk.bf16.mxu1 %vm13142_vm4, %v13146_v48  ;;  %4243 = vmatprep.mubr.f32.mxu0 %v18420_v44  ;;  %vm3246_vm4 = vcmp.eq.s32.totalorder %v15562_v5, 4294967295  ;;  %v15569_v48 = vsub.s32 %v15535_v15, %v18620_v46  ;;  %v15585_v29 = vsub.s32 %v15535_v15, %v18622_v52  ;;  %v12668_v5 = vld [vmem:[%s17411_s3 + $0x150] sm:$0xff]  }
 0x520   :  { %18621 = vst [vmem:[#allocation207_spill] sm:$0xff] %v15569_v48  ;;  %18623 = vst [vmem:[#allocation208_spill] sm:$0xff] %v15585_v29 }
 0x521   :  { %9764 = vmatmul.mubr.msk.f32.gmra.mrb[238].mxu0 %vm3237_vm7, %v18452_v14  ;;  %vm3254_vm7 = vcmp.eq.s32.totalorder %v15585_v29, 4294967295  ;;  %v12670_v29 = vld [vmem:[%s17411_s3 + $0x160] sm:$0xff]  }
 0x522   :  { %9765 = vmatprep.mubr.msk.f32.mxu0 %vm3242_vm0, %v18452_v14  ;;  %vm3250_vm0 = vcmp.eq.s32.totalorder %v15569_v48, 4294967295  ;;  %v18628_v48 = vld [vmem:[#allocation95_spill] sm:$0xff] }
 0x523   :  { %v15621_v32 = vsub.s32 %v15535_v15, %v18628_v48 }
 0x525   :  { %9766 = vmatmul.mubr.msk.f32.gmra.mrb[240].mxu0 %vm3241_vm1, %v18452_v14  ;;  %11347 = vmatmul.mubr.msk.bf16.vlgmr.msra.gmra.mrb[112].mxu1 %vm13191_vm12, %v13195_v9  ;;  %18629 = vst [vmem:[#allocation211_spill] sm:$0xff] %v15621_v32 }
 0x526   :  { %11350 = vmatprep.mubr.msk.bf16.mxu1 %vm18339_vm5, %v13241_v38  ;;  %9767 = vmatprep.mubr.msk.f32.mxu0 %vm3246_vm4, %v18452_v14  ;;  %vm3258_vm4 = vcmp.eq.s32.totalorder %v15595_v22, 4294967295  ;;  %v12672_v22 = vld [vmem:[%s17411_s3 + $0x170] sm:$0xff]  }
 0x527   :  { %11411 = vmatpush3.bf16.msra.mxu1 %v12666_v41  ;;  %v12669_v41 = vld [vmem:[%s17411_s3 + $0x158] sm:$0xff]  }
 0x528   :  { %11412 = vmatprep.subr.bf16.mxu1 %v12667_v16 }
 0x529   :  { %4254 = vmatmul.mubr.f32.gmra.mrb[242].mxu0 %v18420_v44 }
 0x52a   :  { %9768 = vmatprep.mubr.msk.f32.mxu0 %vm3250_vm0, %v18452_v14  ;;  %vm3266_vm0 = vcmp.eq.s32.totalorder %v15621_v32, 4294967295  ;;  %v18632_v32 = vld [vmem:[#allocation99_spill] sm:$0xff] }
 0x52b   :  { %11413 = vmatpush3.bf16.msra.mxu1 %v12667_v16  ;;  %v18626_v16 = vld [vmem:[#allocation92_spill] sm:$0xff]  ;;  %v15649_v63 = vsub.s32 %v15535_v15, %v18632_v32 }
 0x52c   :  { %11414 = vmatprep.subr.bf16.mxu1 %v12668_v5  ;;  %v15611_v52 = vsub.s32 %v15535_v15, %v18626_v16 }
 0x52d   :  { %4259 = vmatmul.mubr.f32.gmra.mrb[244].mxu0 %v18420_v44  ;;  %11351 = vmatmul.mubr.msk.bf16.gmra.mrb[116].mxu1 %vm18487_vm15, %v13284_v1  ;;  %18633 = vst [vmem:[#allocation213_spill] sm:$0xff] %v15649_v63 }
 0x52e   :  { %11354 = vmatprep.mubr.msk.bf16.mxu1 %vm18488_vm13, %v13327_v35  ;;  %9769 = vmatprep.mubr.msk.f32.mxu0 %vm3254_vm7, %v18452_v14  ;;  %18627 = vst [vmem:[#allocation210_spill] sm:$0xff] %v15611_v52  ;;  %vm3262_vm1 = vcmp.eq.s32.totalorder %v15611_v52, 4294967295 }
 0x52f   :  { %11415 = vmatpush3.bf16.msra.mxu1 %v12668_v5  ;;  %v12671_v5 = vld [vmem:[%s17411_s3 + $0x168] sm:$0xff]  }
 0x530   :  { %11416 = vmatprep.subr.bf16.mxu1 %v12669_v41 }
 0x531   :  { %4264 = vmatmul.mubr.f32.gmra.mrb[246].mxu0 %v18420_v44 }
 0x532   :  { %9770 = vmatprep.mubr.msk.f32.mxu0 %vm3258_vm4, %v18452_v14  ;;  %vm18635_vm4 = vnez %v18034_v31 }
 0x533   :  { %11417 = vmatpush3.bf16.msra.mxu1 %v12669_v41  ;;  %v18630_v41 = vld [vmem:[#allocation96_spill] sm:$0xff] }
 0x534   :  { %11418 = vmatprep.subr.bf16.mxu1 %v12670_v29  ;;  %v15637_v16 = vsub.s32 %v15535_v15, %v18630_v41  ;;  %v12673_v41 = vld [vmem:[%s17411_s3 + $0x178] sm:$0xff]  }
 0x535   :  { %4269 = vmatmul.mubr.f32.gmra.mrb[248].mxu0 %v18420_v44  ;;  %11355 = vmatmul.mubr.msk.bf16.gmra.mrb[120].mxu1 %vm18492_vm8, %v13370_v6 }
 0x536   :  { %11358 = vmatprep.mubr.msk.bf16.mxu1 %vm18493_vm11, %v13413_v54  ;;  %9771 = vmatprep.mubr.msk.f32.mxu0 %vm3262_vm1, %v18452_v14  ;;  %18631 = vst [vmem:[#allocation212_spill] sm:$0xff] %v15637_v16  ;;  %vm3270_vm7 = vcmp.eq.s32.totalorder %v15637_v16, 4294967295  ;;  %vm3274_vm1 = vcmp.eq.s32.totalorder %v15649_v63, 4294967295 }
 0x537   :  { %11419 = vmatpush3.bf16.msra.mxu1 %v12670_v29 }
 0x538   :  { %v15639_v52 = vpop.f32.mrb[144].mxu0  ;;  %11420 = vmatprep.subr.bf16.mxu1 %v12671_v5 }
 0x539   :  { %4274 = vmatmul.mubr.f32.gmra.mrb[250].mxu0 %v18420_v44  ;;  %v4012_v48 = vpop.f32.mrb[145].mxu0 }
 0x53a   :  { %9772 = vmatprep.mubr.msk.f32.mxu0 %vm3266_vm0, %v18452_v14 }
 0x53b   :  { %11421 = vmatpush3.bf16.msra.mxu1 %v12671_v5  ;;  %v18636_v5 = vld [vmem:[#allocation100_spill] sm:$0xff] }
 0x53c   :  { %v15651_v29 = vpop.f32.mrb[146].mxu0  ;;  %11422 = vmatprep.subr.bf16.mxu1 %v12672_v22  ;;  %v15667_v16 = vsub.s32 %v15535_v15, %v18636_v5 }
 0x53d   :  { %18634 = vst [vmem:[#allocation214_spill] sm:$0xff] %v15651_v29  ;;  %4279 = vmatmul.mubr.f32.gmra.mrb[252].mxu0 %v18420_v44  ;;  %11359 = vmatmul.mubr.msk.bf16.gmra.mrb[124].mxu1 %vm18494_vm2, %v13456_v39  ;;  %v4017_v48 = vpop.f32.mrb[147].mxu0 }
 0x53e   :  { %11362 = vmatprep.mubr.msk.bf16.mxu1 %vm18635_vm4, %v13499_v42  ;;  %9773 = vmatprep.mubr.msk.f32.mxu0 %vm3270_vm7, %v18452_v14  ;;  %18637 = vst [vmem:[#allocation215_spill] sm:$0xff] %v15667_v16  ;;  %vm3278_vm0 = vcmp.eq.s32.totalorder %v15667_v16, 4294967295  ;;  %v18638_v48 = vld [vmem:[#allocation103_spill] sm:$0xff]  ;;  %vm18641_vm7 = vnez %v18048_v60  ;;  %vm18642_vm4 = vnez %v18062_v2 }
 0x53f   :  { %11423 = vmatpush3.bf16.msra.mxu1 %v12672_v22  ;;  %v15676_v29 = vsub.s32 %v15535_v15, %v18638_v48 }
 0x540   :  { %v15669_v32 = vpop.f32.mrb[148].mxu0  ;;  %11424 = vmatprep.subr.bf16.mxu1 %v12673_v41 }
 0x541   :  { %4284 = vmatmul.mubr.f32.gmra.mrb[254].mxu0 %v18420_v44  ;;  %v4022_v46 = vpop.f32.mrb[149].mxu0  ;;  %18639 = vst [vmem:[#allocation216_spill] sm:$0xff] %v15676_v29 }
 0x542   :  { %9774 = vmatprep.mubr.msk.f32.mxu0 %vm3274_vm1, %v18452_v14  ;;  %vm3282_vm1 = vcmp.eq.s32.totalorder %v15676_v29, 4294967295  ;;  %v18643_v46 = vld [vmem:[#allocation104_spill] sm:$0xff] }
 0x543   :  { %11425 = vmatpush3.bf16.msra.mxu1 %v12673_v41  ;;  %v15691_v41 = vsub.s32 %v15535_v15, %v18643_v46 }
 0x544   :  { %v15678_v63 = vpop.f32.mrb[150].mxu0 }
 0x545   :  { %18640 = vst [vmem:[#allocation217_spill] sm:$0xff] %v15678_v63  ;;  %4289 = vmatmul.mubr.f32.gmra.mrb[0].mxu0 %v18420_v44  ;;  %11363 = vmatmul.mubr.msk.bf16.gmra.mrb[128].mxu1 %vm18641_vm7, %v13542_v43  ;;  %v4027_v22 = vpop.f32.mrb[151].mxu0  ;;  %18644 = vst [vmem:[#allocation218_spill] sm:$0xff] %v15691_v41  ;;  %vm3286_vm7 = vcmp.eq.s32.totalorder %v15691_v41, 4294967295 }
 0x546   :  { %11366 = vmatprep.mubr.msk.bf16.mxu1 %vm18642_vm4, %v13585_v55  ;;  %9775 = vmatprep.mubr.msk.f32.mxu0 %vm3278_vm0, %v18452_v14  ;;  %v18646_v22 = vld [vmem:[#allocation107_spill] sm:$0xff]  ;;  %vm18649_vm0 = vnez %v18076_v24  ;;  %vm18650_vm4 = vnez %v18089_v59 }
 0x547   :  { %v15700_v48 = vsub.s32 %v15535_v15, %v18646_v22 }
 0x548   :  { %v15693_v5 = vpop.f32.mrb[152].mxu0 }
 0x549   :  { %18645 = vst [vmem:[#allocation219_spill] sm:$0xff] %v15693_v5  ;;  %4294 = vmatmul.mubr.f32.gmra.mrb[2].mxu0 %v18420_v44  ;;  %v4032_v16 = vpop.f32.mrb[153].mxu0  ;;  %18647 = vst [vmem:[#allocation220_spill] sm:$0xff] %v15700_v48 }
 0x54a   :  { %9776 = vmatprep.mubr.msk.f32.mxu0 %vm3282_vm1, %v18452_v14  ;;  %vm3290_vm1 = vcmp.eq.s32.totalorder %v15700_v48, 4294967295  ;;  %v18651_v16 = vld [vmem:[#allocation108_spill] sm:$0xff] }
 0x54b   :  { %v15715_v41 = vsub.s32 %v15535_v15, %v18651_v16 }
 0x54c   :  { %v15702_v63 = vpop.f32.mrb[154].mxu0 }
 0x54d   :  { %18648 = vst [vmem:[#allocation221_spill] sm:$0xff] %v15702_v63  ;;  %4299 = vmatmul.mubr.f32.gmra.mrb[4].mxu0 %v18420_v44  ;;  %11367 = vmatmul.mubr.msk.bf16.gmra.mrb[132].mxu1 %vm18649_vm0, %v13634_v61  ;;  %v4037_v46 = vpop.f32.mrb[155].mxu0  ;;  %18652 = vst [vmem:[#allocation222_spill] sm:$0xff] %v15715_v41  ;;  %vm3294_vm0 = vcmp.eq.s32.totalorder %v15715_v41, 4294967295 }
 0x54e   :  { %11370 = vmatprep.mubr.msk.bf16.mxu1 %vm18650_vm4, %v13683_v23  ;;  %9777 = vmatprep.mubr.msk.f32.mxu0 %vm3286_vm7, %v18452_v14  ;;  %v18653_v46 = vld [vmem:[#allocation111_spill] sm:$0xff]  ;;  %vm18655_vm7 = vnez %v18103_v10  ;;  %vm18656_vm4 = vnez %v18117_v17 }
 0x54f   :  { %v15724_v63 = vsub.s32 %v15535_v15, %v18653_v46 }
 0x550   :  { %v15717_v29 = vpop.f32.mrb[156].mxu0 }
 0x551   :  { %4304 = vmatmul.mubr.f32.gmra.mrb[6].mxu0 %v18420_v44  ;;  %v4042_v22 = vpop.f32.mrb[157].mxu0  ;;  %18654 = vst [vmem:[#allocation223_spill] sm:$0xff] %v15724_v63 }
 0x552   :  { %9778 = vmatprep.mubr.msk.f32.mxu0 %vm3290_vm1, %v18452_v14  ;;  %vm3298_vm1 = vcmp.eq.s32.totalorder %v15724_v63, 4294967295  ;;  %v18657_v22 = vld [vmem:[#allocation112_spill] sm:$0xff] }
 0x553   :  { %v15739_v41 = vsub.s32 %v15535_v15, %v18657_v22 }
 0x554   :  { %v15726_v5 = vpop.f32.mrb[158].mxu0 }
 0x555   :  { %4309 = vmatmul.mubr.f32.gmra.mrb[8].mxu0 %v18420_v44  ;;  %11371 = vmatmul.mubr.msk.bf16.gmra.mrb[136].mxu1 %vm18655_vm7, %v13732_v50  ;;  %v4047_v16 = vpop.f32.mrb[159].mxu0  ;;  %18658 = vst [vmem:[#allocation224_spill] sm:$0xff] %v15739_v41  ;;  %vm3302_vm7 = vcmp.eq.s32.totalorder %v15739_v41, 4294967295 }
 0x556   :  { %11374 = vmatprep.mubr.msk.bf16.mxu1 %vm18656_vm4, %v13781_v49  ;;  %9779 = vmatprep.mubr.msk.f32.mxu0 %vm3294_vm0, %v18452_v14  ;;  %vm18661_vm0 = vnez %v18131_v18  ;;  %vm18662_vm4 = vnez %v18145_v56 }
 0x558   :  { %v15741_v48 = vpop.f32.mrb[160].mxu0 }
 0x559   :  { %18659 = vst [vmem:[#allocation225_spill] sm:$0xff] %v15741_v48  ;;  %4314 = vmatmul.mubr.f32.gmra.mrb[10].mxu0 %v18420_v44  ;;  %v4052_v46 = vpop.f32.mrb[161].mxu0  ;;  %v18680_v48 = vld [vmem:[#allocation113_spill] sm:$0xff] }
 0x55a   :  { %9780 = vmatprep.mubr.msk.f32.mxu0 %vm3298_vm1, %v18452_v14  ;;  %vm18665_vm1 = vnez %v18173_v7 }
 0x55c   :  { %v15746_v16 = vpop.f32.mrb[162].mxu0 }
 0x55d   :  { %18660 = vst [vmem:[#allocation226_spill] sm:$0xff] %v15746_v16  ;;  %4319 = vmatmul.mubr.f32.gmra.mrb[12].mxu0 %v18420_v44  ;;  %11375 = vmatmul.mubr.msk.bf16.gmra.mrb[140].mxu1 %vm18661_vm0, %v13824_v58  ;;  %v4057_v63 = vpop.f32.mrb[163].mxu0 }
 0x55e   :  { %11378 = vmatprep.mubr.msk.bf16.mxu1 %vm18662_vm4, %v13867_v11  ;;  %9781 = vmatprep.mubr.msk.f32.mxu0 %vm3302_vm7, %v18452_v14  ;;  %vm18668_vm7 = vnez %v18357_v47  ;;  %vm18669_vm4 = vnez %v18360_v13 }
 0x560   :  { %v15756_v46 = vpop.f32.mrb[164].mxu0 }
 0x561   :  { %18663 = vst [vmem:[#allocation227_spill] sm:$0xff] %v15756_v46  ;;  %4324 = vmatmul.mubr.f32.gmra.mrb[14].mxu0 %v18420_v44  ;;  %v4062_v22 = vpop.f32.mrb[165].mxu0  ;;  %v18685_v46 = vld [vmem:[#allocation118_spill] sm:$0xff] }
 0x562   :  { %7733 = vmatprep.mubr.f32.mxu0 %v18420_v44 }
 0x564   :  { %v15760_v41 = vpop.f32.mrb[166].mxu0 }
 0x565   :  { %18664 = vst [vmem:[#allocation228_spill] sm:$0xff] %v15760_v41  ;;  %11379 = vmatmul.mubr.msk.bf16.gmra.mrb[144].mxu1 %vm18579_vm6, %v13916_v25  ;;  %v4067_v63 = vpop.f32.mrb[167].mxu0  ;;  %vm18673_vm6 = vnez %v18366_v19  ;;  %v18765_v19 = vld [vmem:[#allocation226_spill] sm:$0xff] }
 0x566   :  { %11382 = vmatprep.mubr.msk.bf16.mxu1 %vm18665_vm1, %v13970_v3  ;;  %vm18672_vm1 = vnez %v18363_v20 }
 0x568   :  { %v15768_v15 = vpop.f32.mrb[168].mxu0 }
 0x569   :  { %18666 = vst [vmem:[#allocation229_spill] sm:$0xff] %v15768_v15  ;;  %v4072_v14 = vpop.f32.mrb[169].mxu0 }
 0x56c   :  { %v15770_v16 = vpop.f32.mrb[170].mxu0 }
 0x56d   :  { %18667 = vst [vmem:[#allocation230_spill] sm:$0xff] %v15770_v16  ;;  %11383 = vmatmul.mubr.msk.bf16.gmra.mrb[148].mxu1 %vm18668_vm7, %v18356_v51  ;;  %v4077_v22 = vpop.f32.mrb[171].mxu0 }
 0x56e   :  { %11386 = vmatprep.mubr.msk.bf16.mxu1 %vm18669_vm4, %v18359_v27 }
 0x570   :  { %v15778_v44 = vpop.f32.mrb[172].mxu0 }
 0x571   :  { %18670 = vst [vmem:[#allocation231_spill] sm:$0xff] %v15778_v44  ;;  %v4082_v63 = vpop.f32.mrb[173].mxu0  ;;  %v12674_v44 = vld [vmem:[%s17411_s3 + $0x80] sm:$0xff]  }
 0x572   :  { %11490 = vmatprep.subr.bf16.mxu1 %v12674_v44 }
 0x574   :  { %v15780_v41 = vpop.f32.mrb[174].mxu0  ;;  %v18783_v20 = vld [vmem:[#allocation230_spill] sm:$0xff] }
 0x575   :  { %18671 = vst [vmem:[#allocation232_spill] sm:$0xff] %v15780_v41  ;;  %11387 = vmatmul.mubr.msk.bf16.gmra.mrb[152].mxu1 %vm18672_vm1, %v18362_v30  ;;  %v4087_v14 = vpop.f32.mrb[175].mxu0 }
 0x576   :  { %11390 = vmatprep.mubr.msk.bf16.mxu1 %vm18673_vm6, %v18365_v45 }
 0x578   :  { %v15788_v16 = vpop.f32.mrb[176].mxu0 }
 0x579   :  { %18674 = vst [vmem:[#allocation233_spill] sm:$0xff] %v15788_v16  ;;  %v4092_v22 = vpop.f32.mrb[177].mxu0 }
 0x57c   :  { %v15790_v15 = vpop.f32.mrb[178].mxu0 }
 0x57d   :  { %18675 = vst [vmem:[#allocation234_spill] sm:$0xff] %v15790_v15  ;;  %11391 = vmatmul.mubr.msk.bf16.gmra.mrb[156].mxu1 %vm18597_vm9, %v18395_v26  ;;  %v4097_v63 = vpop.f32.mrb[179].mxu0  ;;  %vm18681_vm9 = vnez %v18680_v48  ;;  %v18689_v48 = vld [vmem:[#allocation123_spill] sm:$0xff] }
 0x57e   :  { %11394 = vmatprep.mubr.msk.bf16.mxu1 %vm18600_vm3, %v18598_v21  ;;  %v18679_v63 = vld [vmem:[#allocation114_spill] sm:$0xff]  ;;  %v18684_v21 = vld [vmem:[#allocation119_spill] sm:$0xff]  ;;  %vm18686_vm3 = vnez %v18685_v46 }
 0x57f   :  { %v18697_v46 = vld [vmem:[#allocation127_spill] sm:$0xff] }
 0x580   :  { %v15798_v41 = vpop.f32.mrb[180].mxu0 }
 0x581   :  { %18676 = vst [vmem:[#allocation235_spill] sm:$0xff] %v15798_v41  ;;  %v4102_v14 = vpop.f32.mrb[181].mxu0 }
 0x584   :  { %v15803_v16 = vpop.f32.mrb[182].mxu0 }
 0x585   :  { %18677 = vst [vmem:[#allocation236_spill] sm:$0xff] %v15803_v16  ;;  %11395 = vmatmul.mubr.msk.bf16.gmra.mrb[160].mxu1 %vm18517_vm14, %v18605_v57  ;;  %v4107_v15 = vpop.f32.mrb[183].mxu0 }
 0x586   :  { %11398 = vmatprep.mubr.msk.bf16.mxu1 %vm18681_vm9, %v18679_v63  ;;  %v18690_v63 = vld [vmem:[#allocation122_spill] sm:$0xff] }
 0x587   :  { %vm18691_vm9 = vnez %v18690_v63 }
 0x588   :  { %v15811_v28 = vpop.f32.mrb[184].mxu0 }
 0x589   :  { %18682 = vst [vmem:[#allocation237_spill] sm:$0xff] %v15811_v28  ;;  %v4112_v41 = vpop.f32.mrb[185].mxu0  ;;  %v18693_v28 = vld [vmem:[#allocation128_spill] sm:$0xff] }
 0x58a   :  { %vm18694_vm14 = vnez %v18693_v28  ;;  %v12675_v28 = vld [vmem:[%s17411_s3 + $0x88] sm:$0xff]  }
 0x58c   :  { %v15813_v14 = vpop.f32.mrb[186].mxu0 }
 0x58d   :  { %18683 = vst [vmem:[#allocation238_spill] sm:$0xff] %v15813_v14  ;;  %11399 = vmatmul.mubr.msk.bf16.gmra.mrb[164].mxu1 %vm18523_vm10, %v18616_v12  ;;  %v4117_v16 = vpop.f32.mrb[187].mxu0  ;;  %v18692_v14 = vld [vmem:[#allocation126_spill] sm:$0xff] }
 0x58e   :  { %11402 = vmatprep.mubr.msk.bf16.mxu1 %vm18686_vm3, %v18684_v21  ;;  %v18698_v21 = vld [vmem:[#allocation129_spill] sm:$0xff] }
 0x58f   :  { %vm18699_vm3 = vnez %v18698_v21 }
 0x590   :  { %v15821_v15 = vpop.f32.mrb[188].mxu0 }
 0x591   :  { %18687 = vst [vmem:[#allocation239_spill] sm:$0xff] %v15821_v15  ;;  %v4122_v22 = vpop.f32.mrb[189].mxu0  ;;  %v18701_v15 = vld [vmem:[#allocation9_spill] sm:$0xff] }
 0x592   :  { %vm18702_vm10 = vnez %v18701_v15 }
 0x594   :  { %v15823_v57 = vpop.f32.mrb[190].mxu0 }
 0x595   :  { %18688 = vst [vmem:[#allocation240_spill] sm:$0xff] %v15823_v57  ;;  %11403 = vmatmul.mubr.msk.bf16.gmra.mrb[168].mxu1 %vm18691_vm9, %v18689_v48  ;;  %v4127_v41 = vpop.f32.mrb[191].mxu0  ;;  %v18700_v57 = vld [vmem:[#allocation10_spill] sm:$0xff] }
 0x596   :  { %11406 = vmatprep.mubr.msk.bf16.mxu1 %vm18694_vm14, %v18692_v14 }
 0x598   :  { %v15831_v0 = vpop.f32.mrb[192].mxu0 }
 0x599   :  { %18695 = vst [vmem:[#allocation241_spill] sm:$0xff] %v15831_v0  ;;  %v4132_v16 = vpop.f32.mrb[193].mxu0 }
 0x59a   :  { %v18703_v16 = vld [vmem:[#allocation14_spill] sm:$0xff] }
 0x59c   :  { %v15833_v12 = vpop.f32.mrb[194].mxu0 }
 0x59d   :  { %18696 = vst [vmem:[#allocation242_spill] sm:$0xff] %v15833_v12  ;;  %11407 = vmatmul.mubr.msk.bf16.gmra.mrb[172].mxu1 %vm18699_vm3, %v18697_v46  ;;  %v4137_v22 = vpop.f32.mrb[195].mxu0  ;;  %v18704_v12 = vld [vmem:[#allocation13_spill] sm:$0xff]  ;;  %v18706_v46 = vld [vmem:[#allocation18_spill] sm:$0xff] }
 0x59e   :  { %11426 = vmatprep.mubr.msk.bf16.mxu1 %vm18702_vm10, %v18700_v57  ;;  %vm18705_vm14 = vnez %v18704_v12  ;;  %v18707_v22 = vld [vmem:[#allocation17_spill] sm:$0xff] }
 0x59f   :  { %vm18708_vm3 = vnez %v18707_v22  ;;  %v12677_v12 = vld [vmem:[%s17411_s3 + $0x98] sm:$0xff]  }
 0x5a0   :  { %v15841_v63 = vpop.f32.mrb[196].mxu0 }
 0x5a1   :  { %v4142_v41 = vpop.f32.mrb[197].mxu0 }
 0x5a2   :  { %v12676_v41 = vld [vmem:[%s17411_s3 + $0x90] sm:$0xff]  }
 0x5a4   :  { %v15846_v14 = vpop.f32.mrb[198].mxu0 }
 0x5a5   :  { %11427 = vmatmul.mubr.msk.bf16.vlgmr.msra.gmra.mrb[176].mxu1 %vm18705_vm14, %v18703_v16  ;;  %v4147_v21 = vpop.f32.mrb[199].mxu0 }
 0x5a6   :  { %11430 = vmatprep.mubr.msk.bf16.mxu1 %vm18708_vm3, %v18706_v46  ;;  %11491 = vmatpush3.bf16.msra.mxu1 %v12674_v44 }
 0x5a7   :  { %11492 = vmatprep.subr.bf16.mxu1 %v12675_v28 }
 0x5a8   :  { %v15857_v0 = vpop.f32.mrb[200].mxu0 }
 0x5a9   :  { %18709 = vst [vmem:[#allocation10_spill] sm:$0xff] %v15857_v0  ;;  %v4152_v15 = vpop.f32.mrb[201].mxu0 }
 0x5aa   :  { %11493 = vmatpush3.bf16.msra.mxu1 %v12675_v28  ;;  %v12678_v28 = vld [vmem:[%s17411_s3 + $0xa0] sm:$0xff]  }
 0x5ab   :  { %11494 = vmatprep.subr.bf16.mxu1 %v12676_v41 }
 0x5ac   :  { %v15862_v21 = vpop.f32.mrb[202].mxu0 }
 0x5ad   :  { %11431 = vmatmul.mubr.msk.bf16.gmra.mrb[180].mxu1 %vm13191_vm12, %v13195_v9  ;;  %v4157_v44 = vpop.f32.mrb[203].mxu0 }
 0x5ae   :  { %11434 = vmatprep.mubr.msk.bf16.mxu1 %vm18339_vm5, %v13241_v38  ;;  %11495 = vmatpush3.bf16.msra.mxu1 %v12676_v41 }
 0x5af   :  { %11496 = vmatprep.subr.bf16.mxu1 %v12677_v12 }
 0x5b0   :  { %v15873_v15 = vpop.f32.mrb[204].mxu0 }
 0x5b1   :  { %v4162_v0 = vpop.f32.mrb[205].mxu0 }
 0x5b2   :  { %11497 = vmatpush3.bf16.msra.mxu1 %v12677_v12  ;;  %v12680_v0 = vld [vmem:[%s17411_s3 + $0xb0] sm:$0xff]  }
 0x5b3   :  { %11498 = vmatprep.subr.bf16.mxu1 %v12678_v28 }
 0x5b4   :  { %v15878_v44 = vpop.f32.mrb[206].mxu0 }
 0x5b5   :  { %11435 = vmatmul.mubr.msk.bf16.gmra.mrb[184].mxu1 %vm18487_vm15, %v13284_v1  ;;  %v4167_v41 = vpop.f32.mrb[207].mxu0 }
 0x5b6   :  { %11438 = vmatprep.mubr.msk.bf16.mxu1 %vm18488_vm13, %v13327_v35  ;;  %11499 = vmatpush3.bf16.msra.mxu1 %v12678_v28  ;;  %vm18712_vm13 = vnez %v18062_v2 }
 0x5b7   :  { %11500 = vmatprep.subr.bf16.mxu1 %v12679_v8 }
 0x5b8   :  { %v15889_v12 = vpop.f32.mrb[208].mxu0 }
 0x5b9   :  { %v4172_v37 = vpop.f32.mrb[209].mxu0 }
 0x5ba   :  { %11501 = vmatpush3.bf16.msra.mxu1 %v12679_v8 }
 0x5bb   :  { %11502 = vmatprep.subr.bf16.mxu1 %v12680_v0 }
 0x5bc   :  { %v15894_v41 = vpop.f32.mrb[210].mxu0 }
 0x5bd   :  { %11439 = vmatmul.mubr.msk.bf16.gmra.mrb[188].mxu1 %vm18492_vm8, %v13370_v6  ;;  %v4177_v28 = vpop.f32.mrb[211].mxu0  ;;  %vm18710_vm8 = vnez %v18034_v31  ;;  %v18716_v31 = vld [vmem:[#allocation164_spill] sm:$0xff] }
 0x5be   :  { %11442 = vmatprep.mubr.msk.bf16.mxu1 %vm18493_vm11, %v13413_v54  ;;  %11503 = vmatpush3.bf16.msra.mxu1 %v12680_v0  ;;  %vm18711_vm11 = vnez %v18048_v60 }
 0x5bf   :  { %11504 = vmatprep.subr.bf16.mxu1 %v12681_v62 }
 0x5c0   :  { %v15902_v37 = vpop.f32.mrb[212].mxu0 }
 0x5c1   :  { %v4182_v8 = vpop.f32.mrb[213].mxu0 }
 0x5c2   :  { %11505 = vmatpush3.bf16.msra.mxu1 %v12681_v62 }
 0x5c4   :  { %v15904_v34 = vpop.f32.mrb[214].mxu0 }
 0x5c5   :  { %11443 = vmatmul.mubr.msk.bf16.gmra.mrb[192].mxu1 %vm18494_vm2, %v13456_v39  ;;  %v4187_v35 = vpop.f32.mrb[215].mxu0  ;;  %vm18714_vm2 = vnez %v18089_v59  ;;  %v18719_v59 = vld [vmem:[#allocation165_spill] sm:$0xff] }
 0x5c6   :  { %11446 = vmatprep.mubr.msk.bf16.mxu1 %vm18710_vm8, %v13499_v42  ;;  %vm18713_vm8 = vnez %v18076_v24 }
 0x5c8   :  { %v15912_v28 = vpop.f32.mrb[216].mxu0 }
 0x5c9   :  { %v4192_v53 = vpop.f32.mrb[217].mxu0 }
 0x5cc   :  { %v15914_v0 = vpop.f32.mrb[218].mxu0 }
 0x5cd   :  { %11447 = vmatmul.mubr.msk.bf16.gmra.mrb[196].mxu1 %vm18711_vm11, %v13542_v43  ;;  %v4197_v62 = vpop.f32.mrb[219].mxu0 }
 0x5ce   :  { %11450 = vmatprep.mubr.msk.bf16.mxu1 %vm18712_vm13, %v13585_v55  ;;  %v18715_v62 = vld [vmem:[#allocation163_spill] sm:$0xff]  ;;  %vm18717_vm13 = vnez %v18103_v10 }
 0x5d0   :  { %v15922_v8 = vpop.f32.mrb[220].mxu0 }
 0x5d1   :  { %v4202_v35 = vpop.f32.mrb[221].mxu0 }
 0x5d4   :  { %v15924_v36 = vpop.f32.mrb[222].mxu0 }
 0x5d5   :  { %11451 = vmatmul.mubr.msk.bf16.gmra.mrb[200].mxu1 %vm18713_vm8, %v13634_v61  ;;  %v4207_v53 = vpop.f32.mrb[223].mxu0  ;;  %vm18718_vm8 = vnez %v18117_v17 }
 0x5d6   :  { %11454 = vmatprep.mubr.msk.bf16.mxu1 %vm18714_vm2, %v13683_v23 }
 0x5d8   :  { %v4210_v60 = vpop.f32.mrb[224].mxu0 }
 0x5d9   :  { %v15933_v43 = vadd.f32 %v4210_v60, %v18715_v62  ;;  %v4212_v2 = vpop.f32.mrb[225].mxu0 }
 0x5da   :  { %v18720_v2 = vld [vmem:[#allocation166_spill] sm:$0xff] }
 0x5dc   :  { %v4215_v55 = vpop.f32.mrb[226].mxu0 }
 0x5dd   :  { %v15936_v42 = vadd.f32 %v4215_v55, %v18716_v31  ;;  %11455 = vmatmul.mubr.msk.bf16.gmra.mrb[204].mxu1 %vm18717_vm13, %v13732_v50  ;;  %v4217_v35 = vpop.f32.mrb[227].mxu0  ;;  %vm18721_vm13 = vnez %v18145_v56  ;;  %v18728_v56 = vld [vmem:[#allocation169_spill] sm:$0xff] }
 0x5de   :  { %11458 = vmatprep.mubr.msk.bf16.mxu1 %vm18718_vm8, %v13781_v49  ;;  %v18722_v35 = vld [vmem:[#allocation167_spill] sm:$0xff]  ;;  %v18724_v49 = vld [vmem:[#allocation2_spill] sm:$0xff] }
 0x5df   :  { %v1597_v10 = vand.u32 15, %v18724_v49 }
 0x5e0   :  { %v4220_v53 = vpop.f32.mrb[228].mxu0 }
 0x5e1   :  { %v15945_v23 = vadd.f32 %v4220_v53, %v18719_v59  ;;  %v4222_v60 = vpop.f32.mrb[229].mxu0  ;;  %v18723_v53 = vld [vmem:[#allocation120_spill] sm:$0xff] }
 0x5e2   :  { %v1599_v60 = vand.u32 15, %v18723_v53 }
 0x5e4   :  { %v4225_v62 = vpop.f32.mrb[230].mxu0 }
 0x5e5   :  { %v15948_v24 = vadd.f32 %v4225_v62, %v18720_v2  ;;  %11459 = vmatmul.mubr.msk.bf16.gmra.mrb[208].mxu1 %vm18661_vm0, %v13824_v58  ;;  %v4227_v31 = vpop.f32.mrb[231].mxu0  ;;  %v18725_v2 = vld [vmem:[#allocation168_spill] sm:$0xff]  ;;  %vm18726_vm0 = vnez %v18159_v33  ;;  %v18801_v58 = vld [vmem:[#allocation234_spill] sm:$0xff] }
 0x5e6   :  { %11462 = vmatprep.mubr.msk.bf16.mxu1 %vm18721_vm13, %v13867_v11  ;;  %vm18727_vm13 = vnez %v18173_v7  ;;  %v18729_v11 = vld [vmem:[#allocation7_spill] sm:$0xff] }
 0x5e8   :  { %v4230_v55 = vpop.f32.mrb[232].mxu0 }
 0x5e9   :  { %v15957_v17 = vadd.f32 %v4230_v55, %v18722_v35  ;;  %v4232_v59 = vpop.f32.mrb[233].mxu0  ;;  %v4331_v55 = vadd.s32 4294967295, %v1599_v60  ;;  %v4329_v35 = vadd.s32 4294967295, %v1597_v10 }
 0x5eb   :  { %vm4395_vm8 = vcmp.ge.s32.totalorder %v4331_v55, 0  ;;  %vm4393_vm2 = vcmp.ge.s32.totalorder %v4329_v35, 0 }
 0x5ec   :  { %v4235_v62 = vpop.f32.mrb[234].mxu0  ;;  %v4715_v60 = vsel %vm4395_vm8, %v15669_v32, 0.0 }
 0x5ed   :  { %v15962_v50 = vadd.f32 %v4235_v62, %v18725_v2  ;;  %11463 = vmatmul.mubr.msk.bf16.gmra.mrb[212].mxu1 %vm18726_vm0, %v13916_v25  ;;  %v4237_v31 = vpop.f32.mrb[235].mxu0  ;;  %v1603_v62 = vand.u32 15, %v18729_v11  ;;  %v18730_v2 = vld [vmem:[#allocation4_spill] sm:$0xff]  ;;  %v18731_v25 = vld [vmem:[#allocation170_spill] sm:$0xff] }
 0x5ee   :  { %11466 = vmatprep.mubr.msk.bf16.mxu1 %vm18727_vm13, %v13970_v3  ;;  %v1601_v18 = vand.u32 15, %v18730_v2  ;;  %v18739_v3 = vld [vmem:[#allocation214_spill] sm:$0xff] }
 0x5ef   :  { %v4335_v11 = vadd.s32 4294967295, %v1603_v62 }
 0x5f0   :  { %v4240_v59 = vpop.f32.mrb[236].mxu0  ;;  %v4333_v55 = vadd.s32 4294967295, %v1601_v18  ;;  %v18738_v18 = vld [vmem:[#allocation11_spill] sm:$0xff] }
 0x5f1   :  { %v15971_v53 = vadd.f32 %v4240_v59, %v18728_v56  ;;  %v4242_v49 = vpop.f32.mrb[237].mxu0  ;;  %v4713_v56 = vsel %vm4393_vm2, %v15639_v52, 0.0  ;;  %vm4399_vm8 = vcmp.ge.s32.totalorder %v4335_v11, 0  ;;  %v1605_v62 = vand.u32 15, %v18738_v18 }
 0x5f2   :  { %v18732_v49 = vld [vmem:[#allocation171_spill] sm:$0xff]  ;;  %vm4397_vm2 = vcmp.ge.s32.totalorder %v4333_v55, 0 }
 0x5f4   :  { %v4245_v33 = vpop.f32.mrb[238].mxu0 }
 0x5f5   :  { %v15976_v31 = vadd.f32 %v4245_v33, %v18731_v25  ;;  %11467 = vmatmul.mubr.msk.bf16.gmra.mrb[216].mxu1 %vm18668_vm7, %v18356_v51  ;;  %v4247_v10 = vpop.f32.mrb[239].mxu0  ;;  %v18735_v51 = vld [vmem:[#allocation15_spill] sm:$0xff] }
 0x5f6   :  { %11470 = vmatprep.mubr.msk.bf16.mxu1 %vm18669_vm4, %v18359_v27  ;;  %v1607_v13 = vand.u32 15, %v18735_v51  ;;  %v18736_v27 = vld [vmem:[#allocation217_spill] sm:$0xff]  ;;  %v4719_v51 = vsel %vm4399_vm8, %v15717_v29, 0.0 }
 0x5f8   :  { %v4250_v35 = vpop.f32.mrb[240].mxu0  ;;  %v11348_v59 = vpop.f32.mrb[112].mxu1  ;;  %v4339_v11 = vadd.s32 4294967295, %v1607_v13 }
 0x5f9   :  { %v15987_v25 = vadd.f32 %v4250_v35, %v18732_v49  ;;  %v15989_v33 = vadd.f32 %v11348_v59, %v4715_v60  ;;  %v5648_v2 = vpop.f32.mrb[113].mxu1  ;;  %v4252_v47 = vpop.f32.mrb[241].mxu0  ;;  %v18741_v59 = vld [vmem:[#allocation172_spill] sm:$0xff] }
 0x5fa   :  { %v15991_v10 = vadd.f32 %v5648_v2, %v4713_v56  ;;  %v11349_v32 = vpop.f32.mrb[114].mxu1  ;;  %vm4403_vm8 = vcmp.ge.s32.totalorder %v4339_v11, 0 }
 0x5fb   :  { %18733 = vst [vmem:[#allocation14_spill] sm:$0xff] %v15989_v33  ;;  %v15995_v7 = vadd.f32 %v11349_v32, %v18736_v27  ;;  %v5651_v52 = vpop.f32.mrb[115].mxu1  ;;  %v18742_v27 = vld [vmem:[#allocation219_spill] sm:$0xff]  ;;  %v18743_v32 = vld [vmem:[#allocation173_spill] sm:$0xff] }
 0x5fc   :  { %18734 = vst [vmem:[#allocation18_spill] sm:$0xff] %v15991_v10  ;;  %v15999_v35 = vadd.f32 %v5651_v52, %v18739_v3  ;;  %v4255_v60 = vpop.f32.mrb[242].mxu0  ;;  %v4717_v56 = vsel %vm4397_vm2, %v18742_v27, 0.0  ;;  %v4337_v3 = vadd.s32 4294967295, %v1605_v62  ;;  %v16026_v62 = vld [vmem:[%s17411_s3 + $0x200] sm:$0xff]  }
 0x5fd   :  { %18737 = vst [vmem:[#allocation17_spill] sm:$0xff] %v15995_v7  ;;  %v16002_v49 = vadd.f32 %v4255_v60, %v18741_v59  ;;  %11471 = vmatmul.mubr.msk.bf16.gmra.mrb[220].mxu1 %vm18672_vm1, %v18362_v30  ;;  %v4257_v47 = vpop.f32.mrb[243].mxu0  ;;  %v18746_v7 = vld [vmem:[#allocation22_spill] sm:$0xff]  ;;  %11570 = vmatprep.subr.bf16.mxu1 %v16026_v62 }
 0x5fe   :  { %18740 = vst [vmem:[#allocation163_spill] sm:$0xff] %v15999_v35  ;;  %11474 = vmatprep.mubr.msk.bf16.mxu1 %vm18673_vm6, %v18365_v45  ;;  %v1611_v33 = vand.u32 15, %v18746_v7  ;;  %vm4401_vm2 = vcmp.ge.s32.totalorder %v4337_v3, 0  ;;  %vm18752_vm6 = vnez %v18596_v40  ;;  %v18755_v3 = vld [vmem:[#allocation105_spill] sm:$0xff]  ;;  %v18761_v40 = vld [vmem:[#allocation28_spill] sm:$0xff] }
 0x5ff   :  { %vm18756_vm1 = vnez %v18755_v3  ;;  %v1615_v3 = vand.u32 15, %v18761_v40  ;;  %v18771_v40 = vld [vmem:[#allocation231_spill] sm:$0xff] }
 0x600   :  { %v4260_v55 = vpop.f32.mrb[244].mxu0  ;;  %v11352_v2 = vpop.f32.mrb[116].mxu1 }
 0x601   :  { %v16013_v52 = vadd.f32 %v4260_v55, %v18743_v32  ;;  %v16015_v18 = vadd.f32 %v11352_v2, %v4719_v51  ;;  %v5664_v60 = vpop.f32.mrb[117].mxu1  ;;  %v4262_v59 = vpop.f32.mrb[245].mxu0  ;;  %v18748_v51 = vld [vmem:[#allocation19_spill] sm:$0xff]  ;;  %v18749_v55 = vld [vmem:[#allocation221_spill] sm:$0xff]  ;;  %v18751_v32 = vld [vmem:[#allocation174_spill] sm:$0xff] }
 0x602   :  { %v16017_v47 = vadd.f32 %v5664_v60, %v4717_v56  ;;  %v11353_v29 = vpop.f32.mrb[118].mxu1  ;;  %v1609_v27 = vand.u32 15, %v18748_v51  ;;  %v18754_v59 = vld [vmem:[#allocation106_spill] sm:$0xff]  ;;  %v4343_v51 = vadd.s32 4294967295, %v1611_v33 }
 0x603   :  { %18744 = vst [vmem:[#allocation164_spill] sm:$0xff] %v16015_v18  ;;  %v16021_v35 = vadd.f32 %v11353_v29, %v15726_v5  ;;  %v5667_v13 = vpop.f32.mrb[119].mxu1  ;;  %v18753_v5 = vld [vmem:[#allocation227_spill] sm:$0xff]  ;;  %v18757_v29 = vld [vmem:[#allocation225_spill] sm:$0xff] }
 0x604   :  { %18745 = vst [vmem:[#allocation165_spill] sm:$0xff] %v16017_v47  ;;  %v16030_v2 = vadd.f32 %v5667_v13, %v18749_v55  ;;  %v4265_v56 = vpop.f32.mrb[246].mxu0  ;;  %v4723_v60 = vsel %vm4403_vm8, %v18753_v5, 0.0  ;;  %v4721_v13 = vsel %vm4401_vm2, %v18757_v29, 0.0  ;;  %v4341_v55 = vadd.s32 4294967295, %v1609_v27  ;;  %v18764_v27 = vld [vmem:[#allocation25_spill] sm:$0xff] }
 0x605   :  { %18747 = vst [vmem:[#allocation166_spill] sm:$0xff] %v16021_v35  ;;  %v16033_v11 = vadd.f32 %v4265_v56, %v18751_v32  ;;  %11475 = vmatmul.mubr.msk.bf16.gmra.mrb[224].mxu1 %vm18752_vm6, %v18395_v26  ;;  %v4267_v7 = vpop.f32.mrb[247].mxu0  ;;  %v18758_v32 = vld [vmem:[#allocation175_spill] sm:$0xff]  ;;  %vm4407_vm8 = vcmp.ge.s32.totalorder %v4343_v51, 0  ;;  %v1613_v29 = vand.u32 15, %v18764_v27 }
 0x606   :  { %18750 = vst [vmem:[#allocation167_spill] sm:$0xff] %v16030_v2  ;;  %11478 = vmatprep.mubr.msk.bf16.mxu1 %vm18756_vm1, %v18754_v59  ;;  %v18762_v59 = vld [vmem:[#allocation228_spill] sm:$0xff]  ;;  %vm4405_vm2 = vcmp.ge.s32.totalorder %v4341_v55, 0  ;;  %v18775_v55 = vld [vmem:[#allocation229_spill] sm:$0xff] }
 0x607   :  { %v4725_v27 = vsel %vm4405_vm2, %v18775_v55, 0.0 }
 0x608   :  { %v4270_v35 = vpop.f32.mrb[248].mxu0  ;;  %v11356_v56 = vpop.f32.mrb[120].mxu1 }
 0x609   :  { %v16045_v18 = vadd.f32 %v4270_v35, %v18758_v32  ;;  %v16047_v2 = vadd.f32 %v11356_v56, %v4723_v60  ;;  %v5680_v7 = vpop.f32.mrb[121].mxu1  ;;  %v4272_v47 = vpop.f32.mrb[249].mxu0  ;;  %v18767_v56 = vld [vmem:[#allocation176_spill] sm:$0xff] }
 0x60a   :  { %v16049_v10 = vadd.f32 %v5680_v7, %v4721_v13  ;;  %v11357_v5 = vpop.f32.mrb[122].mxu1  ;;  %v18768_v47 = vld [vmem:[#allocation110_spill] sm:$0xff]  ;;  %v18769_v13 = vld [vmem:[#allocation109_spill] sm:$0xff]  ;;  %v4727_v7 = vsel %vm4407_vm8, %v18771_v40, 0.0 }
 0x60b   :  { %18759 = vst [vmem:[#allocation120_spill] sm:$0xff] %v16047_v2  ;;  %v16053_v26 = vadd.f32 %v11357_v5, %v18762_v59  ;;  %v5683_v33 = vpop.f32.mrb[123].mxu1  ;;  %vm18770_vm1 = vnez %v18769_v13  ;;  %v18772_v59 = vld [vmem:[#allocation114_spill] sm:$0xff]  ;;  %v18773_v5 = vld [vmem:[#allocation113_spill] sm:$0xff] }
 0x60c   :  { %18760 = vst [vmem:[#allocation2_spill] sm:$0xff] %v16049_v10  ;;  %v16057_v35 = vadd.f32 %v5683_v33, %v18765_v19  ;;  %v4275_v60 = vpop.f32.mrb[250].mxu0  ;;  %vm18774_vm6 = vnez %v18773_v5  ;;  %v4345_v19 = vadd.s32 4294967295, %v1613_v29  ;;  %v18782_v29 = vld [vmem:[#allocation32_spill] sm:$0xff] }
 0x60d   :  { %18763 = vst [vmem:[#allocation168_spill] sm:$0xff] %v16053_v26  ;;  %v16060_v32 = vadd.f32 %v4275_v60, %v18767_v56  ;;  %11479 = vmatmul.mubr.msk.bf16.gmra.mrb[228].mxu1 %vm18770_vm1, %v18768_v47  ;;  %v4277_v51 = vpop.f32.mrb[251].mxu0  ;;  %v4347_v26 = vadd.s32 4294967295, %v1615_v3  ;;  %v18779_v47 = vld [vmem:[#allocation34_spill] sm:$0xff]  ;;  %v1617_v55 = vand.u32 15, %v18782_v29 }
 0x60e   :  { %18766 = vst [vmem:[#allocation169_spill] sm:$0xff] %v16057_v35  ;;  %11482 = vmatprep.mubr.msk.bf16.mxu1 %vm18774_vm6, %v18772_v59  ;;  %v18776_v35 = vld [vmem:[#allocation177_spill] sm:$0xff]  ;;  %v1619_v5 = vand.u32 15, %v18779_v47  ;;  %v18780_v59 = vld [vmem:[#allocation232_spill] sm:$0xff]  ;;  %vm4409_vm2 = vcmp.ge.s32.totalorder %v4345_v19, 0  ;;  %v18789_v47 = vld [vmem:[#allocation235_spill] sm:$0xff] }
 0x60f   :  { %vm4411_vm8 = vcmp.ge.s32.totalorder %v4347_v26, 0  ;;  %v18793_v19 = vld [vmem:[#allocation233_spill] sm:$0xff] }
 0x610   :  { %v4280_v33 = vpop.f32.mrb[252].mxu0  ;;  %v11360_v2 = vpop.f32.mrb[124].mxu1  ;;  %v4729_v29 = vsel %vm4409_vm2, %v18793_v19, 0.0 }
 0x611   :  { %v16071_v60 = vadd.f32 %v4280_v33, %v18776_v35  ;;  %v16073_v56 = vadd.f32 %v11360_v2, %v4727_v7  ;;  %v5696_v10 = vpop.f32.mrb[125].mxu1  ;;  %v4282_v13 = vpop.f32.mrb[253].mxu0  ;;  %v18785_v7 = vld [vmem:[#allocation178_spill] sm:$0xff] }
 0x612   :  { %v16075_v51 = vadd.f32 %v5696_v10, %v4725_v27  ;;  %v11361_v40 = vpop.f32.mrb[126].mxu1  ;;  %v18786_v10 = vld [vmem:[#allocation116_spill] sm:$0xff]  ;;  %v18787_v13 = vld [vmem:[#allocation115_spill] sm:$0xff]  ;;  %v4731_v27 = vsel %vm4411_vm8, %v18789_v47, 0.0 }
 0x613   :  { %18777 = vst [vmem:[#allocation7_spill] sm:$0xff] %v16073_v56  ;;  %v16079_v45 = vadd.f32 %v11361_v40, %v18780_v59  ;;  %v5699_v3 = vpop.f32.mrb[127].mxu1  ;;  %vm18788_vm6 = vnez %v18787_v13  ;;  %v18790_v59 = vld [vmem:[#allocation119_spill] sm:$0xff]  ;;  %v18791_v40 = vld [vmem:[#allocation118_spill] sm:$0xff] }
 0x614   :  { %18778 = vst [vmem:[#allocation4_spill] sm:$0xff] %v16075_v51  ;;  %v16083_v35 = vadd.f32 %v5699_v3, %v18783_v20  ;;  %v4285_v2 = vpop.f32.mrb[254].mxu0  ;;  %vm18792_vm1 = vnez %v18791_v40  ;;  %v4349_v20 = vadd.s32 4294967295, %v1617_v55  ;;  %v18800_v55 = vld [vmem:[#allocation37_spill] sm:$0xff] }
 0x615   :  { %18781 = vst [vmem:[#allocation170_spill] sm:$0xff] %v16079_v45  ;;  %v16086_v33 = vadd.f32 %v4285_v2, %v18785_v7  ;;  %11483 = vmatmul.mubr.msk.bf16.gmra.mrb[232].mxu1 %vm18788_vm6, %v18786_v10  ;;  %v4287_v26 = vpop.f32.mrb[255].mxu0  ;;  %v4351_v45 = vadd.s32 4294967295, %v1619_v5  ;;  %v18797_v10 = vld [vmem:[#allocation40_spill] sm:$0xff]  ;;  %v1621_v19 = vand.u32 15, %v18800_v55 }
 0x616   :  { %18784 = vst [vmem:[#allocation171_spill] sm:$0xff] %v16083_v35  ;;  %11486 = vmatprep.mubr.msk.bf16.mxu1 %vm18792_vm1, %v18790_v59  ;;  %v18794_v35 = vld [vmem:[#allocation179_spill] sm:$0xff]  ;;  %v1623_v40 = vand.u32 15, %v18797_v10  ;;  %v18798_v59 = vld [vmem:[#allocation236_spill] sm:$0xff]  ;;  %vm4413_vm2 = vcmp.ge.s32.totalorder %v4349_v20, 0  ;;  %v18809_v20 = vld [vmem:[#allocation237_spill] sm:$0xff] }
 0x617   :  { %vm4415_vm8 = vcmp.ge.s32.totalorder %v4351_v45, 0  ;;  %v18805_v10 = vld [vmem:[#allocation239_spill] sm:$0xff] }
 0x618   :  { %v4290_v3 = vpop.f32.mrb[0].mxu0  ;;  %v11364_v56 = vpop.f32.mrb[128].mxu1  ;;  %v4355_v55 = vadd.s32 4294967295, %v1623_v40 }
 0x619   :  { %v16097_v2 = vadd.f32 %v4290_v3, %v18794_v35  ;;  %v16099_v7 = vadd.f32 %v11364_v56, %v4731_v27  ;;  %v5712_v51 = vpop.f32.mrb[129].mxu1  ;;  %v4292_v13 = vpop.f32.mrb[1].mxu0  ;;  %v18803_v27 = vld [vmem:[#allocation181_spill] sm:$0xff] }
 0x61a   :  { %v16101_v26 = vadd.f32 %v5712_v51, %v4729_v29  ;;  %v11365_v47 = vpop.f32.mrb[130].mxu1  ;;  %v4735_v13 = vsel %vm4415_vm8, %v18805_v10, 0.0  ;;  %v18807_v29 = vld [vmem:[#allocation124_spill] sm:$0xff]  ;;  %vm4419_vm8 = vcmp.ge.s32.totalorder %v4355_v55, 0  ;;  %v18818_v55 = vld [vmem:[#allocation6_spill] sm:$0xff] }
 0x61b   :  { %18795 = vst [vmem:[#allocation15_spill] sm:$0xff] %v16099_v7  ;;  %v16105_v30 = vadd.f32 %v11365_v47, %v18798_v59  ;;  %v5715_v5 = vpop.f32.mrb[131].mxu1  ;;  %v18806_v59 = vld [vmem:[#allocation3_spill] sm:$0xff]  ;;  %vm18808_vm1 = vnez %v18807_v29  ;;  %v4733_v47 = vsel %vm4413_vm2, %v18809_v20, 0.0  ;;  %v18812_v51 = vld [vmem:[#allocation48_spill] sm:$0xff] }
 0x61c   :  { %18796 = vst [vmem:[#allocation217_spill] sm:$0xff] %v16101_v26  ;;  %v16109_v35 = vadd.f32 %v5715_v5, %v18801_v58  ;;  %v4295_v56 = vpop.f32.mrb[2].mxu0  ;;  %v4353_v58 = vadd.s32 4294967295, %v1621_v19  ;;  %v18810_v7 = vld [vmem:[#allocation183_spill] sm:$0xff]  ;;  %v1627_v29 = vand.u32 15, %v18812_v51  ;;  %v18819_v51 = vld [vmem:[#allocation125_spill] sm:$0xff] }
 0x61d   :  { %18799 = vst [vmem:[#allocation11_spill] sm:$0xff] %v16105_v30  ;;  %v16112_v3 = vadd.f32 %v4295_v56, %v18803_v27  ;;  %11487 = vmatmul.mubr.msk.bf16.gmra.mrb[236].mxu1 %vm18691_vm9, %v18689_v48  ;;  %v4297_v45 = vpop.f32.mrb[3].mxu0  ;;  %v12683_v19 = vld [vmem:[%s17411_s3 + $0x208] sm:$0xff]   ;;  %vm18820_vm2 = vnez %v18819_v51 }
 0x61e   :  { %18802 = vst [vmem:[#allocation214_spill] sm:$0xff] %v16109_v35  ;;  %11506 = vmatprep.mubr.msk.bf16.mxu1 %vm18808_vm1, %v18806_v59  ;;  %v18813_v59 = vld [vmem:[#allocation240_spill] sm:$0xff]  ;;  %vm4417_vm1 = vcmp.ge.s32.totalorder %v4353_v58, 0  ;;  %v18822_v58 = vld [vmem:[#allocation241_spill] sm:$0xff]  ;;  %v18823_v51 = vld [vmem:[#allocation187_spill] sm:$0xff] }
 0x620   :  { %v4300_v5 = vpop.f32.mrb[4].mxu0  ;;  %v11368_v30 = vpop.f32.mrb[132].mxu1 }
 0x621   :  { %v16123_v56 = vadd.f32 %v4300_v5, %v18810_v7  ;;  %v16125_v27 = vadd.f32 %v11368_v30, %v4735_v13  ;;  %v5728_v35 = vpop.f32.mrb[133].mxu1  ;;  %v4302_v26 = vpop.f32.mrb[5].mxu0  ;;  %v18815_v7 = vld [vmem:[#allocation44_spill] sm:$0xff]  ;;  %v18816_v13 = vld [vmem:[#allocation238_spill] sm:$0xff] }
 0x622   :  { %v16127_v45 = vadd.f32 %v5728_v35, %v4733_v47  ;;  %v11369_v10 = vpop.f32.mrb[134].mxu1  ;;  %v1625_v30 = vand.u32 15, %v18815_v7  ;;  %v18817_v35 = vld [vmem:[#allocation185_spill] sm:$0xff]  ;;  %v4359_v7 = vadd.s32 4294967295, %v1627_v29  ;;  %v18825_v29 = vld [vmem:[#allocation55_spill] sm:$0xff] }
 0x623   :  { %18811 = vst [vmem:[#allocation172_spill] sm:$0xff] %v16125_v27  ;;  %v16131_v48 = vadd.f32 %v11369_v10, %v18813_v59  ;;  %v5731_v40 = vpop.f32.mrb[135].mxu1  ;;  %v4739_v10 = vsel %vm4419_vm8, %v15841_v63, 0.0 }
 0x624   :  { %v16138_v20 = vadd.f32 %v5731_v40, %v18816_v13  ;;  %v4305_v26 = vpop.f32.mrb[6].mxu0  ;;  %v4737_v40 = vsel %vm4417_vm1, %v18822_v58, 0.0  ;;  %v12684_v13 = vld [vmem:[%s17411_s3 + $0x210] sm:$0xff]   ;;  %v1631_v58 = vand.u32 15, %v18825_v29 }
 0x625   :  { %18814 = vst [vmem:[#allocation219_spill] sm:$0xff] %v16131_v48  ;;  %v16141_v47 = vadd.f32 %v4305_v26, %v18817_v35  ;;  %11507 = vmatmul.mubr.msk.bf16.vlgmr.msra.gmra.mrb[176].mxu1 %vm18820_vm2, %v18818_v55  ;;  %v4307_v5 = vpop.f32.mrb[7].mxu0  ;;  %v4357_v26 = vadd.s32 4294967295, %v1625_v30 }
 0x626   :  { %11510 = vmatprep.mubr.msk.bf16.mxu1 %vm18702_vm10, %v18700_v57  ;;  %11571 = vmatpush3.bf16.msra.mxu1 %v16026_v62  ;;  %vm4423_vm10 = vcmp.ge.s32.totalorder %v4359_v7, 0 }
 0x627   :  { %11572 = vmatprep.subr.bf16.mxu1 %v12683_v19  ;;  %vm4421_vm8 = vcmp.ge.s32.totalorder %v4357_v26, 0  ;;  %v18832_v26 = vld [vmem:[#allocation10_spill] sm:$0xff] }
 0x628   :  { %v4310_v35 = vpop.f32.mrb[8].mxu0  ;;  %v11372_v55 = vpop.f32.mrb[136].mxu1  ;;  %v4741_v29 = vsel %vm4421_vm8, %v18832_v26, 0.0 }
 0x629   :  { %v16156_v5 = vadd.f32 %v4310_v35, %v18823_v51  ;;  %v16158_v63 = vadd.f32 %v11372_v55, %v4739_v10  ;;  %v5744_v59 = vpop.f32.mrb[137].mxu1  ;;  %v4312_v57 = vpop.f32.mrb[9].mxu0  ;;  %v12685_v35 = vld [vmem:[%s17411_s3 + $0x218] sm:$0xff]   ;;  %v18827_v10 = vld [vmem:[#allocation52_spill] sm:$0xff]  ;;  %v18828_v51 = vld [vmem:[#allocation242_spill] sm:$0xff] }
 0x62a   :  { %v16160_v48 = vadd.f32 %v5744_v59, %v4737_v40  ;;  %v11373_v62 = vpop.f32.mrb[138].mxu1  ;;  %11573 = vmatpush3.bf16.msra.mxu1 %v12683_v19  ;;  %v1629_v55 = vand.u32 15, %v18827_v10  ;;  %v18830_v19 = vld [vmem:[#allocation189_spill] sm:$0xff]  ;;  %v12686_v10 = vld [vmem:[%s17411_s3 + $0x220] sm:$0xff]  }
 0x62b   :  { %18824 = vst [vmem:[#allocation173_spill] sm:$0xff] %v16158_v63  ;;  %v16164_v27 = vadd.f32 %v11373_v62, %v15846_v14  ;;  %v5747_v30 = vpop.f32.mrb[139].mxu1  ;;  %11574 = vmatprep.subr.bf16.mxu1 %v12684_v13  ;;  %v4743_v62 = vsel %vm4423_vm10, %v15873_v15, 0.0 }
 0x62c   :  { %v16171_v40 = vadd.f32 %v5747_v30, %v18828_v51  ;;  %v4315_v59 = vpop.f32.mrb[10].mxu0  ;;  %v4363_v30 = vadd.s32 4294967295, %v1631_v58  ;;  %v4361_v51 = vadd.s32 4294967295, %v1629_v55  ;;  %v18834_v58 = vld [vmem:[#allocation63_spill] sm:$0xff] }
 0x62d   :  { %18826 = vst [vmem:[#allocation22_spill] sm:$0xff] %v16164_v27  ;;  %v16174_v7 = vadd.f32 %v4315_v59, %v18830_v19  ;;  %11511 = vmatmul.mubr.msk.bf16.gmra.mrb[180].mxu1 %vm18705_vm14, %v18703_v16  ;;  %v4317_v14 = vpop.f32.mrb[11].mxu0  ;;  %v18833_v16 = vld [vmem:[#allocation191_spill] sm:$0xff]  ;;  %v1635_v26 = vand.u32 15, %v18834_v58  ;;  %v12688_v58 = vld [vmem:[%s17411_s3 + $0x230] sm:$0xff]  }
 0x62e   :  { %18829 = vst [vmem:[#allocation19_spill] sm:$0xff] %v16171_v40  ;;  %11514 = vmatprep.mubr.msk.bf16.mxu1 %vm18708_vm3, %v18706_v46  ;;  %11575 = vmatpush3.bf16.msra.mxu1 %v12684_v13  ;;  %vm4427_vm14 = vcmp.ge.s32.totalorder %v4363_v30, 0  ;;  %vm4425_vm1 = vcmp.ge.s32.totalorder %v4361_v51, 0 }
 0x62f   :  { %11576 = vmatprep.subr.bf16.mxu1 %v12685_v35  ;;  %v4745_v51 = vsel %vm4425_vm1, %v15889_v12, 0.0 }
 0x630   :  { %v4320_v59 = vpop.f32.mrb[12].mxu0  ;;  %v11376_v19 = vpop.f32.mrb[140].mxu1 }
 0x631   :  { %v16188_v57 = vadd.f32 %v4320_v59, %v18833_v16  ;;  %v16190_v15 = vadd.f32 %v11376_v19, %v4743_v62  ;;  %v5760_v14 = vpop.f32.mrb[141].mxu1  ;;  %v4322_v27 = vpop.f32.mrb[13].mxu0  ;;  %v12687_v59 = vld [vmem:[%s17411_s3 + $0x228] sm:$0xff]  }
 0x632   :  { %v16192_v63 = vadd.f32 %v5760_v14, %v4741_v29  ;;  %v11377_v13 = vpop.f32.mrb[142].mxu1  ;;  %11577 = vmatpush3.bf16.msra.mxu1 %v12685_v35  ;;  %v18836_v62 = vld [vmem:[#allocation59_spill] sm:$0xff]  ;;  %v18837_v35 = vld [vmem:[#allocation193_spill] sm:$0xff]  ;;  %v4747_v14 = vsel %vm4427_vm14, %v15902_v37, 0.0  ;;  %vm18852_vm14 = vnez %v17996_v4  ;;  %v18960_v4 = vld [vmem:[#allocation122_spill] sm:$0xff] }
 0x633   :  { %v16196_v40 = vadd.f32 %v11377_v13, %v15878_v44  ;;  %v5763_v55 = vpop.f32.mrb[143].mxu1  ;;  %11578 = vmatprep.subr.bf16.mxu1 %v12686_v10  ;;  %v1633_v19 = vand.u32 15, %v18836_v62 }
 0x634   :  { %v16203_v27 = vadd.f32 %v5763_v55, %v15862_v21  ;;  %v4325_v29 = vpop.f32.mrb[14].mxu0  ;;  %v4367_v21 = vadd.s32 4294967295, %v1635_v26  ;;  %v12689_v26 = vld [vmem:[%s17411_s3 + $0x238] sm:$0xff]  }
 0x635   :  { %18835 = vst [vmem:[#allocation221_spill] sm:$0xff] %v16196_v40  ;;  %v16206_v30 = vadd.f32 %v4325_v29, %v18837_v35  ;;  %11515 = vmatmul.mubr.msk.bf16.gmra.mrb[184].mxu1 %vm13191_vm12, %v13195_v9  ;;  %v4327_v44 = vpop.f32.mrb[15].mxu0  ;;  %v4365_v55 = vadd.s32 4294967295, %v1633_v19 }
 0x636   :  { %11518 = vmatprep.mubr.msk.bf16.mxu1 %vm18339_vm5, %v13241_v38  ;;  %11579 = vmatpush3.bf16.msra.mxu1 %v12686_v10  ;;  %vm4431_vm2 = vcmp.ge.s32.totalorder %v4367_v21, 0 }
 0x637   :  { %11580 = vmatprep.subr.bf16.mxu1 %v12687_v59  ;;  %vm4429_vm10 = vcmp.ge.s32.totalorder %v4365_v55, 0  ;;  %v4751_v21 = vsel %vm4431_vm2, %v15922_v8, 0.0 }
 0x638   :  { %v11380_v62 = vpop.f32.mrb[144].mxu1  ;;  %v4749_v55 = vsel %vm4429_vm10, %v15912_v28, 0.0  ;;  %v18853_v28 = vld [vmem:[#allocation79_spill] sm:$0xff] }
 0x639   :  { %v16219_v29 = vadd.f32 %v11380_v62, %v4747_v14  ;;  %v5776_v35 = vpop.f32.mrb[145].mxu1  ;;  %v18847_v62 = vld [vmem:[#allocation30_spill] sm:$0xff] }
 0x63a   :  { %v16221_v44 = vadd.f32 %v5776_v35, %v4745_v51  ;;  %v11381_v37 = vpop.f32.mrb[146].mxu1  ;;  %11581 = vmatpush3.bf16.msra.mxu1 %v12687_v59  ;;  %v18845_v51 = vld [vmem:[#allocation71_spill] sm:$0xff]  ;;  %vm18848_vm8 = vnez %v18847_v62  ;;  %v18968_v62 = vmov 0.0|0.0  }
 0x63b   :  { %18840 = vst [vmem:[#allocation174_spill] sm:$0xff] %v16219_v29  ;;  %v16224_v10 = vadd.f32 %v11381_v37, %v15904_v34  ;;  %v5779_v12 = vpop.f32.mrb[147].mxu1  ;;  %11582 = vmatprep.subr.bf16.mxu1 %v12688_v58  ;;  %v1639_v59 = vand.u32 15, %v18845_v51  ;;  %v18846_v34 = vld [vmem:[#allocation31_spill] sm:$0xff] }
 0x63c   :  { %18841 = vst [vmem:[#allocation227_spill] sm:$0xff] %v16221_v44  ;;  %v16230_v19 = vadd.f32 %v5779_v12, %v15894_v41  ;;  %v18849_v35 = vld [vmem:[#allocation67_spill] sm:$0xff] }
 0x63d   :  { %18842 = vst [vmem:[#allocation225_spill] sm:$0xff] %v16224_v10  ;;  %11519 = vmatmul.mubr.msk.bf16.gmra.mrb[188].mxu1 %vm18487_vm15, %v13284_v1  ;;  %v1637_v37 = vand.u32 15, %v18849_v35  ;;  %v4371_v29 = vadd.s32 4294967295, %v1639_v59 }
 0x63e   :  { %18843 = vst [vmem:[#allocation175_spill] sm:$0xff] %v16230_v19  ;;  %11522 = vmatprep.mubr.msk.bf16.mxu1 %vm18848_vm8, %v18846_v34  ;;  %11583 = vmatpush3.bf16.msra.mxu1 %v12688_v58  ;;  %v1643_v58 = vand.u32 15, %v18853_v28 }
 0x63f   :  { %11584 = vmatprep.subr.bf16.mxu1 %v12689_v26  ;;  %v4369_v44 = vadd.s32 4294967295, %v1637_v37  ;;  %vm4435_vm1 = vcmp.ge.s32.totalorder %v4371_v29, 0 }
 0x640   :  { %v11384_v41 = vpop.f32.mrb[148].mxu1 }
 0x641   :  { %v16242_v12 = vadd.f32 %v11384_v41, %v4751_v21  ;;  %v5792_v10 = vpop.f32.mrb[149].mxu1  ;;  %vm4433_vm10 = vcmp.ge.s32.totalorder %v4369_v44, 0 }
 0x642   :  { %v16244_v19 = vadd.f32 %v5792_v10, %v4749_v55  ;;  %v11385_v51 = vpop.f32.mrb[150].mxu1  ;;  %11585 = vmatpush3.bf16.msra.mxu1 %v12689_v26  ;;  %v18854_v10 = vld [vmem:[#allocation36_spill] sm:$0xff]  ;;  %v18856_v26 = vld [vmem:[#allocation75_spill] sm:$0xff]  ;;  %v4375_v55 = vadd.s32 4294967295, %v1643_v58  ;;  %v18865_v58 = vld [vmem:[#allocation42_spill] sm:$0xff] }
 0x643   :  { %18850 = vst [vmem:[#allocation28_spill] sm:$0xff] %v16242_v12  ;;  %v16247_v8 = vadd.f32 %v11385_v51, %v15924_v36  ;;  %v5795_v40 = vpop.f32.mrb[151].mxu1  ;;  %vm18855_vm2 = vnez %v18854_v10  ;;  %v1641_v59 = vand.u32 15, %v18856_v26  ;;  %v4755_v36 = vsel %vm4435_vm1, %v15945_v23, 0.0  ;;  %v18861_v23 = vld [vmem:[#allocation39_spill] sm:$0xff] }
 0x644   :  { %v16250_v35 = vadd.f32 %v5795_v40, %v15914_v0  ;;  %v4753_v0 = vsel %vm4433_vm10, %v15933_v43, 0.0  ;;  %vm18862_vm1 = vnez %v18861_v23  ;;  %vm4439_vm9 = vcmp.ge.s32.totalorder %v4375_v55, 0  ;;  %v18863_v26 = vld [vmem:[#allocation87_spill] sm:$0xff] }
 0x645   :  { %18851 = vst [vmem:[#allocation228_spill] sm:$0xff] %v16247_v8  ;;  %11523 = vmatmul.mubr.msk.bf16.gmra.mrb[192].mxu1 %vm18852_vm14, %v13370_v6  ;;  %v4373_v51 = vadd.s32 4294967295, %v1641_v59  ;;  %v1647_v43 = vand.u32 15, %v18863_v26  ;;  %vm18866_vm10 = vnez %v18865_v58  ;;  %v18867_v59 = vld [vmem:[#allocation83_spill] sm:$0xff] }
 0x646   :  { %11526 = vmatprep.mubr.msk.bf16.mxu1 %vm18855_vm2, %v13413_v54 }
 0x647   :  { %vm4437_vm2 = vcmp.ge.s32.totalorder %v4373_v51, 0 }
 0x648   :  { %v11388_v21 = vpop.f32.mrb[152].mxu1 }
 0x649   :  { %v16261_v37 = vadd.f32 %v11388_v21, %v4755_v36  ;;  %v5808_v40 = vpop.f32.mrb[153].mxu1  ;;  %v18864_v36 = vld [vmem:[#allocation43_spill] sm:$0xff]  ;;  %v1645_v21 = vand.u32 15, %v18867_v59 }
 0x64a   :  { %v16264_v41 = vadd.f32 %v5808_v40, %v4753_v0  ;;  %v11389_v29 = vpop.f32.mrb[154].mxu1  ;;  %v18872_v59 = vld [vmem:[#allocation47_spill] sm:$0xff] }
 0x64b   :  { %18857 = vst [vmem:[#allocation25_spill] sm:$0xff] %v16261_v37  ;;  %v16267_v28 = vadd.f32 %v11389_v29, %v15948_v24  ;;  %v5811_v8 = vpop.f32.mrb[155].mxu1  ;;  %v4759_v24 = vsel %vm4439_vm9, %v15971_v53, 0.0  ;;  %v4379_v29 = vadd.s32 4294967295, %v1647_v43  ;;  %v4377_v26 = vadd.s32 4294967295, %v1645_v21  ;;  %v18873_v53 = vld [vmem:[#allocation46_spill] sm:$0xff] }
 0x64c   :  { %18858 = vst [vmem:[#allocation226_spill] sm:$0xff] %v16264_v41  ;;  %v16270_v44 = vadd.f32 %v5811_v8, %v15936_v42  ;;  %v4757_v42 = vsel %vm4437_vm2, %v15957_v17, 0.0  ;;  %v18876_v43 = vld [vmem:[#allocation50_spill] sm:$0xff]  ;;  %v18878_v21 = vld [vmem:[#allocation91_spill] sm:$0xff]  ;;  %v18942_v41 = vld [vmem:[#allocation116_spill] sm:$0xff] }
 0x64d   :  { %18859 = vst [vmem:[#allocation176_spill] sm:$0xff] %v16267_v28  ;;  %11527 = vmatmul.mubr.msk.bf16.gmra.mrb[196].mxu1 %vm18862_vm1, %v13456_v39  ;;  %vm4443_vm9 = vcmp.ge.s32.totalorder %v4379_v29, 0  ;;  %vm18877_vm2 = vnez %v18876_v43 }
 0x64e   :  { %18860 = vst [vmem:[#allocation231_spill] sm:$0xff] %v16270_v44  ;;  %11530 = vmatprep.mubr.msk.bf16.mxu1 %vm18866_vm10, %v18864_v36  ;;  %vm4441_vm10 = vcmp.ge.s32.totalorder %v4377_v26, 0 }
 0x650   :  { %v11392_v0 = vpop.f32.mrb[156].mxu1 }
 0x651   :  { %v16281_v40 = vadd.f32 %v11392_v0, %v4759_v24  ;;  %v5824_v8 = vpop.f32.mrb[157].mxu1  ;;  %v18874_v24 = vld [vmem:[#allocation95_spill] sm:$0xff] }
 0x652   :  { %v16284_v28 = vadd.f32 %v5824_v8, %v4757_v42  ;;  %v11393_v55 = vpop.f32.mrb[158].mxu1  ;;  %v1651_v17 = vand.u32 15, %v18874_v24  ;;  %v18875_v0 = vld [vmem:[#allocation51_spill] sm:$0xff]  ;;  %v1649_v42 = vand.u32 15, %v18878_v21 }
 0x653   :  { %18868 = vst [vmem:[#allocation229_spill] sm:$0xff] %v16281_v40  ;;  %v16287_v37 = vadd.f32 %v11393_v55, %v15976_v31  ;;  %v5827_v44 = vpop.f32.mrb[159].mxu1  ;;  %v4763_v31 = vsel %vm4443_vm9, %v16013_v52, 0.0  ;;  %v18883_v52 = vld [vmem:[#allocation54_spill] sm:$0xff]  ;;  %v18885_v21 = vld [vmem:[#allocation103_spill] sm:$0xff] }
 0x654   :  { %18869 = vst [vmem:[#allocation177_spill] sm:$0xff] %v16284_v28  ;;  %v16290_v51 = vadd.f32 %v5827_v44, %v15962_v50  ;;  %v4761_v50 = vsel %vm4441_vm10, %v15987_v25, 0.0  ;;  %v4381_v24 = vadd.s32 4294967295, %v1649_v42  ;;  %vm18884_vm9 = vnez %v18883_v52  ;;  %v18889_v42 = vld [vmem:[#allocation99_spill] sm:$0xff] }
 0x655   :  { %18870 = vst [vmem:[#allocation34_spill] sm:$0xff] %v16287_v37  ;;  %11531 = vmatmul.mubr.msk.bf16.gmra.mrb[200].mxu1 %vm18711_vm11, %v18872_v59  ;;  %v4383_v37 = vadd.s32 4294967295, %v1651_v17  ;;  %v1655_v25 = vand.u32 15, %v18885_v21  ;;  %v18887_v17 = vld [vmem:[#allocation57_spill] sm:$0xff] }
 0x656   :  { %18871 = vst [vmem:[#allocation232_spill] sm:$0xff] %v16290_v51  ;;  %11534 = vmatprep.mubr.msk.bf16.mxu1 %vm18877_vm2, %v18875_v0  ;;  %vm18888_vm10 = vnez %v18887_v17  ;;  %vm4445_vm11 = vcmp.ge.s32.totalorder %v4381_v24, 0 }
 0x657   :  { %vm4447_vm2 = vcmp.ge.s32.totalorder %v4383_v37, 0 }
 0x658   :  { %v11396_v8 = vpop.f32.mrb[160].mxu1 }
 0x659   :  { %v16301_v55 = vadd.f32 %v11396_v8, %v4763_v31  ;;  %v5840_v44 = vpop.f32.mrb[161].mxu1  ;;  %v18886_v31 = vld [vmem:[#allocation58_spill] sm:$0xff]  ;;  %v1653_v8 = vand.u32 15, %v18889_v42 }
 0x65a   :  { %v16304_v40 = vadd.f32 %v5840_v44, %v4761_v50  ;;  %v11397_v29 = vpop.f32.mrb[162].mxu1  ;;  %v18894_v42 = vld [vmem:[#allocation62_spill] sm:$0xff] }
 0x65b   :  { %18879 = vst [vmem:[#allocation32_spill] sm:$0xff] %v16301_v55  ;;  %v16307_v51 = vadd.f32 %v11397_v29, %v16033_v11  ;;  %v5843_v28 = vpop.f32.mrb[163].mxu1  ;;  %v4767_v11 = vsel %vm4447_vm2, %v16071_v60, 0.0  ;;  %v4387_v29 = vadd.s32 4294967295, %v1655_v25  ;;  %v4385_v21 = vadd.s32 4294967295, %v1653_v8  ;;  %v18895_v60 = vld [vmem:[#allocation61_spill] sm:$0xff] }
 0x65c   :  { %18880 = vst [vmem:[#allocation230_spill] sm:$0xff] %v16304_v40  ;;  %v16310_v26 = vadd.f32 %v5843_v28, %v16002_v49  ;;  %v4765_v49 = vsel %vm4445_vm11, %v16045_v18, 0.0  ;;  %vm18896_vm2 = vnez %v18895_v60  ;;  %v18899_v25 = vld [vmem:[#allocation65_spill] sm:$0xff]  ;;  %v18901_v8 = vld [vmem:[#allocation107_spill] sm:$0xff] }
 0x65d   :  { %18881 = vst [vmem:[#allocation178_spill] sm:$0xff] %v16307_v51  ;;  %11535 = vmatmul.mubr.msk.bf16.gmra.mrb[204].mxu1 %vm18884_vm9, %v13634_v61  ;;  %vm18900_vm11 = vnez %v18899_v25  ;;  %vm4449_vm9 = vcmp.ge.s32.totalorder %v4385_v21, 0  ;;  %v18940_v40 = vld [vmem:[#allocation113_spill] sm:$0xff] }
 0x65e   :  { %18882 = vst [vmem:[#allocation235_spill] sm:$0xff] %v16310_v26  ;;  %11538 = vmatprep.mubr.msk.bf16.mxu1 %vm18888_vm10, %v18886_v31  ;;  %vm4451_vm10 = vcmp.ge.s32.totalorder %v4387_v29, 0 }
 0x660   :  { %v11400_v50 = vpop.f32.mrb[164].mxu1 }
 0x661   :  { %v16321_v44 = vadd.f32 %v11400_v50, %v4767_v11  ;;  %v5856_v28 = vpop.f32.mrb[165].mxu1  ;;  %v18897_v11 = vld [vmem:[#allocation111_spill] sm:$0xff]  ;;  %v18898_v50 = vld [vmem:[#allocation66_spill] sm:$0xff] }
 0x662   :  { %v16324_v51 = vadd.f32 %v5856_v28, %v4765_v49  ;;  %v11401_v37 = vpop.f32.mrb[166].mxu1  ;;  %v1659_v18 = vand.u32 15, %v18897_v11  ;;  %v1657_v49 = vand.u32 15, %v18901_v8  ;;  %v18906_v8 = vld [vmem:[#allocation70_spill] sm:$0xff] }
 0x663   :  { %18890 = vst [vmem:[#allocation233_spill] sm:$0xff] %v16321_v44  ;;  %v16327_v55 = vadd.f32 %v11401_v37, %v16086_v33  ;;  %v5859_v26 = vpop.f32.mrb[167].mxu1  ;;  %v4771_v33 = vsel %vm4451_vm10, %v16123_v56, 0.0  ;;  %v18907_v56 = vld [vmem:[#allocation69_spill] sm:$0xff] }
 0x664   :  { %18891 = vst [vmem:[#allocation179_spill] sm:$0xff] %v16324_v51  ;;  %v16330_v24 = vadd.f32 %v5859_v26, %v16060_v32  ;;  %v4769_v32 = vsel %vm4449_vm9, %v16097_v2, 0.0  ;;  %v4389_v11 = vadd.s32 4294967295, %v1657_v49  ;;  %vm18908_vm10 = vnez %v18907_v56  ;;  %v18910_v2 = vld [vmem:[#allocation73_spill] sm:$0xff] }
 0x665   :  { %18892 = vst [vmem:[#allocation40_spill] sm:$0xff] %v16327_v55  ;;  %11539 = vmatmul.mubr.msk.bf16.gmra.mrb[208].mxu1 %vm18896_vm2, %v18894_v42  ;;  %v4391_v55 = vadd.s32 4294967295, %v1659_v18  ;;  %vm18911_vm9 = vnez %v18910_v2 }
 0x666   :  { %18893 = vst [vmem:[#allocation236_spill] sm:$0xff] %v16330_v24  ;;  %11542 = vmatprep.mubr.msk.bf16.mxu1 %vm18900_vm11, %v18898_v50  ;;  %vm4453_vm2 = vcmp.ge.s32.totalorder %v4389_v11, 0  ;;  %v18917_v11 = vld [vmem:[#allocation77_spill] sm:$0xff] }
 0x667   :  { %vm4455_vm11 = vcmp.ge.s32.totalorder %v4391_v55, 0 }
 0x668   :  { %v11404_v28 = vpop.f32.mrb[168].mxu1  ;;  %v4775_v18 = vsel %vm4455_vm11, %v16188_v57, 0.0  ;;  %v18918_v57 = vld [vmem:[#allocation82_spill] sm:$0xff] }
 0x669   :  { %v16341_v37 = vadd.f32 %v11404_v28, %v4771_v33  ;;  %v5872_v26 = vpop.f32.mrb[169].mxu1  ;;  %v18909_v33 = vld [vmem:[#allocation74_spill] sm:$0xff] }
 0x66a   :  { %v16344_v44 = vadd.f32 %v5872_v26, %v4769_v32  ;;  %v11405_v29 = vpop.f32.mrb[170].mxu1 }
 0x66b   :  { %18902 = vst [vmem:[#allocation37_spill] sm:$0xff] %v16341_v37  ;;  %v16347_v24 = vadd.f32 %v11405_v29, %v16141_v47  ;;  %v5875_v51 = vpop.f32.mrb[171].mxu1  ;;  %v4773_v47 = vsel %vm4453_vm2, %v16156_v5, 0.0  ;;  %v18920_v5 = vld [vmem:[#allocation86_spill] sm:$0xff] }
 0x66c   :  { %18903 = vst [vmem:[#allocation234_spill] sm:$0xff] %v16344_v44  ;;  %v16350_v21 = vadd.f32 %v5875_v51, %v16112_v3  ;;  %v18936_v37 = vld [vmem:[#allocation110_spill] sm:$0xff] }
 0x66d   :  { %18904 = vst [vmem:[#allocation181_spill] sm:$0xff] %v16347_v24  ;;  %11543 = vmatmul.mubr.msk.bf16.gmra.mrb[212].mxu1 %vm18908_vm10, %v18906_v8  ;;  %v18916_v24 = vld [vmem:[#allocation78_spill] sm:$0xff] }
 0x66e   :  { %18905 = vst [vmem:[#allocation239_spill] sm:$0xff] %v16350_v21  ;;  %11546 = vmatprep.mubr.msk.bf16.mxu1 %vm18911_vm9, %v18909_v33  ;;  %v18937_v21 = vld [vmem:[#allocation109_spill] sm:$0xff]  ;;  %v18939_v44 = vld [vmem:[#allocation114_spill] sm:$0xff] }
 0x670   :  { %v11408_v49 = vpop.f32.mrb[172].mxu1 }
 0x671   :  { %v16359_v28 = vadd.f32 %v11408_v49, %v4775_v18  ;;  %v5888_v32 = vpop.f32.mrb[173].mxu1  ;;  %v18919_v18 = vld [vmem:[#allocation81_spill] sm:$0xff] }
 0x672   :  { %v16362_v3 = vadd.f32 %v5888_v32, %v4773_v47  ;;  %v11409_v51 = vpop.f32.mrb[174].mxu1  ;;  %v18921_v49 = vld [vmem:[#allocation85_spill] sm:$0xff]  ;;  %v18922_v47 = vld [vmem:[#allocation90_spill] sm:$0xff] }
 0x673   :  { %18912 = vst [vmem:[#allocation3_spill] sm:$0xff] %v16359_v28  ;;  %v16365_v26 = vadd.f32 %v11409_v51, %v16206_v30  ;;  %v5891_v55 = vpop.f32.mrb[175].mxu1  ;;  %v18923_v32 = vld [vmem:[#allocation89_spill] sm:$0xff]  ;;  %v18924_v30 = vld [vmem:[#allocation94_spill] sm:$0xff] }
 0x674   :  { %18913 = vst [vmem:[#allocation124_spill] sm:$0xff] %v16362_v3  ;;  %v16368_v29 = vadd.f32 %v5891_v55, %v16174_v7  ;;  %v18925_v51 = vld [vmem:[#allocation93_spill] sm:$0xff]  ;;  %v18927_v7 = vld [vmem:[#allocation98_spill] sm:$0xff] }
 0x675   :  { %18914 = vst [vmem:[#allocation237_spill] sm:$0xff] %v16365_v26  ;;  %11547 = vmatmul.mubr.msk.bf16.gmra.mrb[216].mxu1 %vm18726_vm0, %v18916_v24  ;;  %vm18926_vm2 = vnez %v18925_v51  ;;  %v18928_v55 = vld [vmem:[#allocation97_spill] sm:$0xff]  ;;  %v18930_v26 = vld [vmem:[#allocation102_spill] sm:$0xff] }
 0x676   :  { %18915 = vst [vmem:[#allocation183_spill] sm:$0xff] %v16368_v29  ;;  %11550 = vmatprep.mubr.msk.bf16.mxu1 %vm18727_vm13, %v18918_v57  ;;  %vm18929_vm11 = vnez %v18928_v55  ;;  %v18931_v28 = vld [vmem:[#allocation101_spill] sm:$0xff]  ;;  %v18933_v29 = vld [vmem:[#allocation106_spill] sm:$0xff] }
 0x677   :  { %vm18932_vm0 = vnez %v18931_v28  ;;  %v18934_v3 = vld [vmem:[#allocation105_spill] sm:$0xff] }
 0x678   :  { %vm18935_vm13 = vnez %v18934_v3 }
 0x67d   :  { %11551 = vmatmul.mubr.msk.bf16.gmra.mrb[220].mxu1 %vm18668_vm7, %v18920_v5  ;;  %vm18938_vm7 = vnez %v18937_v21 }
 0x67e   :  { %11554 = vmatprep.mubr.msk.bf16.mxu1 %vm18669_vm4, %v18922_v47  ;;  %vm18941_vm4 = vnez %v18940_v40 }
 0x685   :  { %11555 = vmatmul.mubr.msk.bf16.gmra.mrb[224].mxu1 %vm18926_vm2, %v18924_v30 }
 0x686   :  { %11558 = vmatprep.mubr.msk.bf16.mxu1 %vm18929_vm11, %v18927_v7 }
 0x68d   :  { %11559 = vmatmul.mubr.msk.bf16.gmra.mrb[228].mxu1 %vm18932_vm0, %v18930_v26 }
 0x68e   :  { %11562 = vmatprep.mubr.msk.bf16.mxu1 %vm18935_vm13, %v18933_v29 }
 0x695   :  { %11563 = vmatmul.mubr.msk.bf16.gmra.mrb[232].mxu1 %vm18938_vm7, %v18936_v37 }
 0x696   :  { %11566 = vmatprep.mubr.msk.bf16.mxu1 %vm18941_vm4, %v18939_v44 }
 0x69d   :  { %11567 = vmatmul.mubr.msk.bf16.gmra.mrb[236].mxu1 %vm18788_vm6, %v18942_v41 }
 0x69e   :  { %11586 = vmatprep.mubr.msk.bf16.mxu1 %vm18708_vm3, %v18706_v46  ;;  %vm18944_vm3 = vnez %v18854_v10 }
 0x6a5   :  { %11587 = vmatmul.mubr.msk.bf16.vlgmr.msra.gmra.mrb[176].mxu1 %vm13191_vm12, %v13195_v9  ;;  %vm18945_vm12 = vnez %v18865_v58  ;;  %v18956_v9 = vld [vmem:[#allocation119_spill] sm:$0xff] }
 0x6a6   :  { %11590 = vmatprep.mubr.msk.bf16.mxu1 %vm18339_vm5, %v13241_v38  ;;  %vm18946_vm5 = vnez %v18873_v53  ;;  %v18957_v38 = vld [vmem:[#allocation118_spill] sm:$0xff] }
 0x6ad   :  { %11591 = vmatmul.mubr.msk.bf16.gmra.mrb[180].mxu1 %vm18487_vm15, %v13284_v1  ;;  %vm18947_vm15 = vnez %v18876_v43  ;;  %v18959_v1 = vld [vmem:[#allocation123_spill] sm:$0xff] }
 0x6ae   :  { %11594 = vmatprep.mubr.msk.bf16.mxu1 %vm18848_vm8, %v18846_v34  ;;  %vm18948_vm8 = vnez %v18883_v52 }
 0x6b5   :  { %11595 = vmatmul.mubr.msk.bf16.gmra.mrb[184].mxu1 %vm18852_vm14, %v13370_v6  ;;  %vm18949_vm14 = vnez %v18887_v17  ;;  %v18962_v6 = vld [vmem:[#allocation126_spill] sm:$0xff] }
 0x6b6   :  { %11598 = vmatprep.mubr.msk.bf16.mxu1 %vm18944_vm3, %v13413_v54  ;;  %vm18951_vm3 = vnez %v18899_v25  ;;  %v18963_v54 = vld [vmem:[#allocation128_spill] sm:$0xff] }
 0x6bd   :  { %11599 = vmatmul.mubr.msk.bf16.gmra.mrb[188].mxu1 %vm18862_vm1, %v13456_v39  ;;  %vm18950_vm1 = vnez %v18895_v60  ;;  %v18965_v39 = vld [vmem:[#allocation127_spill] sm:$0xff] }
 0x6be   :  { %11602 = vmatprep.mubr.msk.bf16.mxu1 %vm18945_vm12, %v18864_v36  ;;  %vm18952_vm12 = vnez %v18917_v11 }
 0x6c5   :  { %11603 = vmatmul.mubr.msk.bf16.gmra.mrb[192].mxu1 %vm18946_vm5, %v18872_v59  ;;  %vm18953_vm5 = vnez %v18919_v18 }
 0x6c6   :  { %11606 = vmatprep.mubr.msk.bf16.mxu1 %vm18947_vm15, %v18875_v0  ;;  %vm18954_vm15 = vnez %v18921_v49 }
 0x6cd   :  { %11607 = vmatmul.mubr.msk.bf16.gmra.mrb[196].mxu1 %vm18948_vm8, %v13634_v61  ;;  %vm18955_vm8 = vnez %v18923_v32  ;;  %v18966_v61 = vld [vmem:[#allocation129_spill] sm:$0xff] }
 0x6ce   :  { %11610 = vmatprep.mubr.msk.bf16.mxu1 %vm18949_vm14, %v18886_v31 }
 0x6d5   :  { %11611 = vmatmul.mubr.msk.bf16.gmra.mrb[200].mxu1 %vm18950_vm1, %v18894_v42 }
 0x6d6   :  { %11614 = vmatprep.mubr.msk.bf16.mxu1 %vm18951_vm3, %v18898_v50 }
 0x6dd   :  { %11615 = vmatmul.mubr.msk.bf16.gmra.mrb[204].mxu1 %vm18908_vm10, %v18906_v8  ;;  %vm18958_vm10 = vnez %v18957_v38 }
 0x6de   :  { %11618 = vmatprep.mubr.msk.bf16.mxu1 %vm18911_vm9, %v18909_v33 }
 0x6e5   :  { %11619 = vmatmul.mubr.msk.bf16.gmra.mrb[208].mxu1 %vm18952_vm12, %v18916_v24 }
 0x6e6   :  { %11622 = vmatprep.mubr.msk.bf16.mxu1 %vm18953_vm5, %v18918_v57 }
 0x6ed   :  { %11623 = vmatmul.mubr.msk.bf16.gmra.mrb[212].mxu1 %vm18954_vm15, %v18920_v5 }
 0x6ee   :  { %11626 = vmatprep.mubr.msk.bf16.mxu1 %vm18955_vm8, %v18922_v47 }
 0x6f5   :  { %11627 = vmatmul.mubr.msk.bf16.gmra.mrb[216].mxu1 %vm18926_vm2, %v18924_v30 }
 0x6f6   :  { %11630 = vmatprep.mubr.msk.bf16.mxu1 %vm18929_vm11, %v18927_v7 }
 0x6fd   :  { %11631 = vmatmul.mubr.msk.bf16.gmra.mrb[220].mxu1 %vm18932_vm0, %v18930_v26  ;;  %vm18961_vm0 = vnez %v18960_v4  ;;  %v18969_v4 = vld [vmem:[#allocation130_spill] sm:$0xff] }
 0x6fe   :  { %11634 = vmatprep.mubr.msk.bf16.mxu1 %vm18935_vm13, %v18933_v29  ;;  %vm18964_vm13 = vnez %v18963_v54 }
 0x705   :  { %11635 = vmatmul.mubr.msk.bf16.gmra.mrb[224].mxu1 %vm18938_vm7, %v18936_v37  ;;  %vm18967_vm7 = vnez %v18966_v61 }
 0x706   :  { %11638 = vmatprep.mubr.msk.bf16.mxu1 %vm18941_vm4, %v18939_v44 }
 0x70d   :  { %11639 = vmatmul.mubr.msk.bf16.gmra.mrb[228].mxu1 %vm18788_vm6, %v18942_v41  ;;  %vm7157_vm6 = vcmp.eq.s32.totalorder %v18969_v4, 1  ;;  %v18984_v4 = vld [vmem:[#allocation143_spill] sm:$0xff] }
 0x70e   :  { %11642 = vmatprep.mubr.msk.bf16.mxu1 %vm18958_vm10, %v18956_v9 }
 0x715   :  { %11643 = vmatmul.mubr.msk.bf16.gmra.mrb[232].mxu1 %vm18961_vm0, %v18959_v1  ;;  %vm7209_vm0 = vcmp.eq.s32.totalorder %v18984_v4, 1  ;;  %v19029_v4 = vld [vmem:[#allocation209_spill] sm:$0xff] }
 0x716   :  { %11646 = vmatprep.mubr.msk.bf16.mxu1 %vm18964_vm13, %v18962_v6 }
 0x71d   :  { %11647 = vmatmul.mubr.msk.bf16.gmra.mrb[236].mxu1 %vm18967_vm7, %v18965_v39 }
 0x778   :  { %v11588_v46 = vpop.f32.mrb[176].mxu1 }
 0x779   :  { %v6838_v22 = vpop.f32.mrb[177].mxu1 }
 0x77a   :  { %v11589_v16 = vpop.f32.mrb[178].mxu1 }
 0x77b   :  { %v11750_v13 = vpack.c.bf16 %v11589_v16, %v11588_v46  ;;  %v6841_v14 = vpop.f32.mrb[179].mxu1  ;;  %v18970_v46 = vmov 1.0   ;;  %v18972_v16 = vmov 0.0  }
 0x77c   :  { %v11747_v34 = vpack.c.bf16 %v6841_v14, %v6838_v22  ;;  %v18971_v22 = vld [vmem:[#allocation131_spill] sm:$0xff] }
 0x77d   :  { %vm7161_vm4 = vcmp.eq.s32.totalorder %v18971_v22, 1 }
 0x77e   :  { %11748 = vmatpush1.bf16.msra.mxu0 %v11747_v34  ;;  %v18973_v34 = vld [vmem:[#allocation132_spill] sm:$0xff] }
 0x77f   :  { %11749 = vmatprep.subr.bf16.mxu0 %v18968_v62  ;;  %vm7165_vm9 = vcmp.eq.s32.totalorder %v18973_v34, 1 }
 0x780   :  { %v11592_v12 = vpop.f32.mrb[180].mxu1 }
 0x781   :  { %v6854_v10 = vpop.f32.mrb[181].mxu1 }
 0x782   :  { %v11593_v41 = vpop.f32.mrb[182].mxu1  ;;  %11751 = vmatpush1.bf16.msra.mxu0 %v11750_v13 }
 0x783   :  { %v11756_v23 = vpack.c.bf16 %v11593_v41, %v11592_v12  ;;  %v6857_v36 = vpop.f32.mrb[183].mxu1  ;;  %11752 = vmatprep.subr.bf16.mxu0 %v18968_v62 }
 0x784   :  { %v11753_v58 = vpack.c.bf16 %v6857_v36, %v6854_v10  ;;  %v18974_v36 = vld [vmem:[#allocation133_spill] sm:$0xff] }
 0x785   :  { %vm7169_vm2 = vcmp.eq.s32.totalorder %v18974_v36, 1  ;;  %v18990_v36 = vld [vmem:[#allocation148_spill] sm:$0xff] }
 0x786   :  { %11754 = vmatpush1.bf16.msra.mxu0 %v11753_v58 }
 0x787   :  { %11755 = vmatprep.subr.bf16.mxu0 %v18968_v62 }
 0x788   :  { %v11596_v40 = vpop.f32.mrb[184].mxu1 }
 0x789   :  { %v6870_v59 = vpop.f32.mrb[185].mxu1 }
 0x78a   :  { %v11597_v53 = vpop.f32.mrb[186].mxu1  ;;  %11757 = vmatpush1.bf16.msra.mxu0 %v11756_v23 }
 0x78b   :  { %v11762_v0 = vpack.c.bf16 %v11597_v53, %v11596_v40  ;;  %v6873_v43 = vpop.f32.mrb[187].mxu1  ;;  %11758 = vmatprep.subr.bf16.mxu0 %v18968_v62 }
 0x78c   :  { %v11759_v52 = vpack.c.bf16 %v6873_v43, %v6870_v59  ;;  %v18975_v59 = vld [vmem:[#allocation134_spill] sm:$0xff] }
 0x78d   :  { %vm7173_vm11 = vcmp.eq.s32.totalorder %v18975_v59, 1  ;;  %v18994_v59 = vld [vmem:[#allocation152_spill] sm:$0xff] }
 0x78e   :  { %11760 = vmatpush1.bf16.msra.mxu0 %v11759_v52 }
 0x78f   :  { %11761 = vmatprep.subr.bf16.mxu0 %v18968_v62 }
 0x790   :  { %v11600_v31 = vpop.f32.mrb[188].mxu1 }
 0x791   :  { %v6886_v17 = vpop.f32.mrb[189].mxu1 }
 0x792   :  { %v11601_v44 = vpop.f32.mrb[190].mxu1  ;;  %11763 = vmatpush1.bf16.msra.mxu0 %v11762_v0 }
 0x793   :  { %v11768_v24 = vpack.c.bf16 %v11601_v44, %v11600_v31  ;;  %v6889_v42 = vpop.f32.mrb[191].mxu1  ;;  %11764 = vmatprep.subr.bf16.mxu0 %v18968_v62  ;;  %v18976_v31 = vld [vmem:[#allocation135_spill] sm:$0xff] }
 0x794   :  { %v11765_v60 = vpack.c.bf16 %v6889_v42, %v6886_v17  ;;  %vm7177_vm14 = vcmp.eq.s32.totalorder %v18976_v31, 1  ;;  %v18999_v31 = vld [vmem:[#allocation157_spill] sm:$0xff] }
 0x796   :  { %11766 = vmatpush1.bf16.msra.mxu0 %v11765_v60 }
 0x797   :  { %11767 = vmatprep.subr.bf16.mxu0 %v18968_v62 }
 0x798   :  { %v11604_v50 = vpop.f32.mrb[192].mxu1 }
 0x799   :  { %v6902_v25 = vpop.f32.mrb[193].mxu1 }
 0x79a   :  { %v11605_v37 = vpop.f32.mrb[194].mxu1  ;;  %11769 = vmatpush1.bf16.msra.mxu0 %v11768_v24  ;;  %v18977_v24 = vld [vmem:[#allocation136_spill] sm:$0xff] }
 0x79b   :  { %v11774_v21 = vpack.c.bf16 %v11605_v37, %v11604_v50  ;;  %v6905_v8 = vpop.f32.mrb[195].mxu1  ;;  %11770 = vmatprep.subr.bf16.mxu0 %v18968_v62  ;;  %vm7181_vm1 = vcmp.eq.s32.totalorder %v18977_v24, 1  ;;  %v18978_v37 = vld [vmem:[#allocation137_spill] sm:$0xff]  ;;  %v19002_v24 = vld [vmem:[#allocation160_spill] sm:$0xff] }
 0x79c   :  { %v11771_v56 = vpack.c.bf16 %v6905_v8, %v6902_v25  ;;  %vm7185_vm3 = vcmp.eq.s32.totalorder %v18978_v37, 1 }
 0x79e   :  { %11772 = vmatpush1.bf16.msra.mxu0 %v11771_v56  ;;  %v18979_v56 = vld [vmem:[#allocation138_spill] sm:$0xff] }
 0x79f   :  { %11773 = vmatprep.subr.bf16.mxu0 %v18968_v62  ;;  %vm7189_vm12 = vcmp.eq.s32.totalorder %v18979_v56, 1  ;;  %v19009_v56 = vld [vmem:[#allocation186_spill] sm:$0xff] }
 0x7a0   :  { %v11608_v33 = vpop.f32.mrb[196].mxu1 }
 0x7a1   :  { %v6918_v2 = vpop.f32.mrb[197].mxu1 }
 0x7a2   :  { %v11609_v28 = vpop.f32.mrb[198].mxu1  ;;  %11775 = vmatpush1.bf16.msra.mxu0 %v11774_v21 }
 0x7a3   :  { %v11780_v3 = vpack.c.bf16 %v11609_v28, %v11608_v33  ;;  %v6921_v26 = vpop.f32.mrb[199].mxu1  ;;  %11776 = vmatprep.subr.bf16.mxu0 %v18968_v62 }
 0x7a4   :  { %v11777_v29 = vpack.c.bf16 %v6921_v26, %v6918_v2  ;;  %v18980_v26 = vld [vmem:[#allocation139_spill] sm:$0xff] }
 0x7a5   :  { %vm7193_vm5 = vcmp.eq.s32.totalorder %v18980_v26, 1  ;;  %v19014_v26 = vld [vmem:[#allocation195_spill] sm:$0xff] }
 0x7a6   :  { %11778 = vmatpush1.bf16.msra.mxu0 %v11777_v29 }
 0x7a7   :  { %11779 = vmatprep.subr.bf16.mxu0 %v18968_v62 }
 0x7a8   :  { %v11612_v11 = vpop.f32.mrb[200].mxu1 }
 0x7a9   :  { %v6934_v57 = vpop.f32.mrb[201].mxu1 }
 0x7aa   :  { %v11613_v18 = vpop.f32.mrb[202].mxu1  ;;  %11781 = vmatpush1.bf16.msra.mxu0 %v11780_v3 }
 0x7ab   :  { %v11786_v5 = vpack.c.bf16 %v11613_v18, %v11612_v11  ;;  %v6937_v49 = vpop.f32.mrb[203].mxu1  ;;  %11782 = vmatprep.subr.bf16.mxu0 %v18968_v62 }
 0x7ac   :  { %v11783_v47 = vpack.c.bf16 %v6937_v49, %v6934_v57  ;;  %v18981_v57 = vld [vmem:[#allocation140_spill] sm:$0xff] }
 0x7ad   :  { %vm7197_vm15 = vcmp.eq.s32.totalorder %v18981_v57, 1  ;;  %v19017_v57 = vld [vmem:[#allocation198_spill] sm:$0xff] }
 0x7ae   :  { %11784 = vmatpush1.bf16.msra.mxu0 %v11783_v47 }
 0x7af   :  { %11785 = vmatprep.subr.bf16.mxu0 %v18968_v62 }
 0x7b0   :  { %v11616_v32 = vpop.f32.mrb[204].mxu1 }
 0x7b1   :  { %v6950_v30 = vpop.f32.mrb[205].mxu1 }
 0x7b2   :  { %v11617_v51 = vpop.f32.mrb[206].mxu1  ;;  %11787 = vmatpush1.bf16.msra.mxu0 %v11786_v5 }
 0x7b3   :  { %v11792_v7 = vpack.c.bf16 %v11617_v51, %v11616_v32  ;;  %v6953_v55 = vpop.f32.mrb[207].mxu1  ;;  %11788 = vmatprep.subr.bf16.mxu0 %v18968_v62  ;;  %v18982_v32 = vld [vmem:[#allocation141_spill] sm:$0xff] }
 0x7b4   :  { %v11789_v9 = vpack.c.bf16 %v6953_v55, %v6950_v30  ;;  %vm7201_vm8 = vcmp.eq.s32.totalorder %v18982_v32, 1  ;;  %v19022_v32 = vld [vmem:[#allocation203_spill] sm:$0xff] }
 0x7b6   :  { %11790 = vmatpush1.bf16.msra.mxu0 %v11789_v9 }
 0x7b7   :  { %11791 = vmatprep.subr.bf16.mxu0 %v18968_v62 }
 0x7b8   :  { %v11620_v38 = vpop.f32.mrb[208].mxu1 }
 0x7b9   :  { %v6966_v1 = vpop.f32.mrb[209].mxu1 }
 0x7ba   :  { %v11621_v6 = vpop.f32.mrb[210].mxu1  ;;  %11793 = vmatpush1.bf16.msra.mxu0 %v11792_v7  ;;  %v18983_v7 = vld [vmem:[#allocation142_spill] sm:$0xff] }
 0x7bb   :  { %v11798_v54 = vpack.c.bf16 %v11621_v6, %v11620_v38  ;;  %v6969_v39 = vpop.f32.mrb[211].mxu1  ;;  %11794 = vmatprep.subr.bf16.mxu0 %v18968_v62  ;;  %vm7205_vm10 = vcmp.eq.s32.totalorder %v18983_v7, 1  ;;  %v18985_v6 = vld [vmem:[#allocation23_spill] sm:$0xff]  ;;  %v19024_v7 = vld [vmem:[#allocation204_spill] sm:$0xff] }
 0x7bc   :  { %v11795_v61 = vpack.c.bf16 %v6969_v39, %v6966_v1 }
 0x7bd   :  { %10502 = vmatmul.mubr.msk.f32.vlgmr.msra.gmra.mrb[16].mxu0 %vm7157_vm6, %v18970_v46 }
 0x7be   :  { %11796 = vmatpush1.bf16.msra.mxu0 %v11795_v61  ;;  %7738 = vmatprep.mubr.f32.mxu0 %v18972_v16 }
 0x7bf   :  { %11797 = vmatprep.subr.bf16.mxu0 %v18968_v62 }
 0x7c0   :  { %v11624_v13 = vpop.f32.mrb[212].mxu1 }
 0x7c1   :  { %v6982_v14 = vpop.f32.mrb[213].mxu1  ;;  %10503 = vmatmul.mubr.msk.f32.gmra.mrb[18].mxu0 %vm7161_vm4, %v18970_v46 }
 0x7c2   :  { %v11625_v12 = vpop.f32.mrb[214].mxu1  ;;  %11799 = vmatpush1.bf16.msra.mxu0 %v11798_v54  ;;  %7743 = vmatprep.mubr.f32.mxu0 %v18972_v16  ;;  %v18986_v54 = vld [vmem:[#allocation145_spill] sm:$0xff] }
 0x7c3   :  { %v11804_v10 = vpack.c.bf16 %v11625_v12, %v11624_v13  ;;  %v6985_v41 = vpop.f32.mrb[215].mxu1  ;;  %11800 = vmatprep.subr.bf16.mxu0 %v18968_v62  ;;  %v1727_v39 = vsub.s32 %v18986_v54, %v18985_v6  ;;  %v18987_v13 = vld [vmem:[#allocation144_spill] sm:$0xff]  ;;  %v19030_v54 = vld [vmem:[#allocation117_spill] sm:$0xff] }
 0x7c4   :  { %v11801_v23 = vpack.c.bf16 %v6985_v41, %v6982_v14  ;;  %vm7213_vm13 = vcmp.eq.s32.totalorder %v18987_v13, 1  ;;  %v18988_v41 = vld [vmem:[#allocation146_spill] sm:$0xff]  ;;  %v19032_v13 = vld [vmem:[#allocation211_spill] sm:$0xff] }
 0x7c5   :  { %10504 = vmatmul.mubr.msk.f32.gmra.mrb[20].mxu0 %vm7165_vm9, %v18970_v46  ;;  %vm7218_vm7 = vcmp.eq.s32.totalorder %v1727_v39, 1  ;;  %vm7217_vm6 = vcmp.eq.s32.totalorder %v18988_v41, 1  ;;  %vm7226_vm9 = vcmp.eq.s32.totalorder %v18990_v36, 1  ;;  %v1598_v39 = vand.u32 15, %v19030_v54  ;;  %v19034_v36 = vld [vmem:[#allocation121_spill] sm:$0xff] }
 0x7c6   :  { %11802 = vmatpush1.bf16.msra.mxu0 %v11801_v23  ;;  %7748 = vmatprep.mubr.f32.mxu0 %v18972_v16  ;;  %v18989_v23 = vld [vmem:[#allocation147_spill] sm:$0xff] }
 0x7c7   :  { %11803 = vmatprep.subr.bf16.mxu0 %v18968_v62  ;;  %vm7222_vm4 = vcmp.eq.s32.totalorder %v18989_v23, 1  ;;  %v9022_v23 = vld [vmem:[%s17414_s5] sm:$0xff] }
 0x7c8   :  { %v11628_v58 = vpop.f32.mrb[216].mxu1 }
 0x7c9   :  { %v6998_v40 = vpop.f32.mrb[217].mxu1  ;;  %10505 = vmatmul.mubr.msk.f32.gmra.mrb[22].mxu0 %vm7169_vm2, %v18970_v46 }
 0x7ca   :  { %v11629_v53 = vpop.f32.mrb[218].mxu1  ;;  %11805 = vmatpush1.bf16.msra.mxu0 %v11804_v10  ;;  %7753 = vmatprep.mubr.f32.mxu0 %v18972_v16 }
 0x7cb   :  { %v11810_v0 = vpack.c.bf16 %v11629_v53, %v11628_v58  ;;  %v7001_v43 = vpop.f32.mrb[219].mxu1  ;;  %11806 = vmatprep.subr.bf16.mxu0 %v18968_v62  ;;  %v18991_v58 = vld [vmem:[#allocation149_spill] sm:$0xff] }
 0x7cc   :  { %v11807_v52 = vpack.c.bf16 %v7001_v43, %v6998_v40  ;;  %vm7230_vm2 = vcmp.eq.s32.totalorder %v18991_v58, 1  ;;  %v18993_v40 = vld [vmem:[#allocation151_spill] sm:$0xff]  ;;  %v18995_v53 = vld [vmem:[#allocation153_spill] sm:$0xff]  ;;  %v1600_v58 = vand.u32 15, %v19034_v36 }
 0x7cd   :  { %10506 = vmatmul.mubr.msk.f32.gmra.mrb[24].mxu0 %vm7173_vm11, %v18970_v46  ;;  %v18997_v43 = vld [vmem:[#allocation155_spill] sm:$0xff] }
 0x7ce   :  { %11808 = vmatpush1.bf16.msra.mxu0 %v11807_v52  ;;  %7758 = vmatprep.mubr.f32.mxu0 %v18972_v16  ;;  %v18998_v52 = vld [vmem:[#allocation156_spill] sm:$0xff] }
 0x7cf   :  { %11809 = vmatprep.subr.bf16.mxu0 %v18968_v62 }
 0x7d0   :  { %v11632_v17 = vpop.f32.mrb[220].mxu1 }
 0x7d1   :  { %v7014_v44 = vpop.f32.mrb[221].mxu1  ;;  %10507 = vmatmul.mubr.msk.f32.gmra.mrb[26].mxu0 %vm7177_vm14, %v18970_v46  ;;  %vm7238_vm14 = vcmp.eq.s32.totalorder %v18993_v40, 1  ;;  %v19035_v40 = vld [vmem:[#allocation212_spill] sm:$0xff] }
 0x7d2   :  { %v11633_v42 = vpop.f32.mrb[222].mxu1  ;;  %11811 = vmatpush1.bf16.msra.mxu0 %v11810_v0  ;;  %7763 = vmatprep.mubr.f32.mxu0 %v18972_v16  ;;  %v18996_v0 = vld [vmem:[#allocation154_spill] sm:$0xff] }
 0x7d3   :  { %v11816_v60 = vpack.c.bf16 %v11633_v42, %v11632_v17  ;;  %v7017_v50 = vpop.f32.mrb[223].mxu1  ;;  %11812 = vmatprep.subr.bf16.mxu0 %v18968_v62  ;;  %v19000_v17 = vld [vmem:[#allocation158_spill] sm:$0xff]  ;;  %v19003_v42 = vld [vmem:[#allocation161_spill] sm:$0xff] }
 0x7d4   :  { %v11813_v25 = vpack.c.bf16 %v7017_v50, %v7014_v44  ;;  %v19001_v44 = vld [vmem:[#allocation159_spill] sm:$0xff]  ;;  %v19005_v50 = vld [vmem:[#allocation49_spill] sm:$0xff] }
 0x7d5   :  { %10508 = vmatmul.mubr.msk.f32.gmra.mrb[28].mxu0 %vm7181_vm1, %v18970_v46  ;;  %vm7242_vm1 = vcmp.eq.s32.totalorder %v18994_v59, 1 }
 0x7d6   :  { %11814 = vmatpush1.bf16.msra.mxu0 %v11813_v25  ;;  %7768 = vmatprep.mubr.f32.mxu0 %v18972_v16  ;;  %v19006_v25 = vld [vmem:[#allocation180_spill] sm:$0xff] }
 0x7d7   :  { %11815 = vmatprep.subr.bf16.mxu0 %v18968_v62  ;;  %v1792_v37 = vsub.s32 %v19006_v25, %v19005_v50 }
 0x7d8   :  { %v11636_v21 = vpop.f32.mrb[224].mxu1 }
 0x7d9   :  { %v7030_v8 = vpop.f32.mrb[225].mxu1  ;;  %10509 = vmatmul.mubr.msk.f32.gmra.mrb[30].mxu0 %vm7185_vm3, %v18970_v46  ;;  %vm7246_vm3 = vcmp.eq.s32.totalorder %v18995_v53, 1 }
 0x7da   :  { %v11637_v33 = vpop.f32.mrb[226].mxu1  ;;  %11817 = vmatpush1.bf16.msra.mxu0 %v11816_v60  ;;  %7773 = vmatprep.mubr.f32.mxu0 %v18972_v16  ;;  %v19004_v60 = vld [vmem:[#allocation162_spill] sm:$0xff] }
 0x7db   :  { %v11822_v2 = vpack.c.bf16 %v11637_v33, %v11636_v21  ;;  %v7033_v28 = vpop.f32.mrb[227].mxu1  ;;  %11818 = vmatprep.subr.bf16.mxu0 %v18968_v62  ;;  %v19007_v21 = vld [vmem:[#allocation182_spill] sm:$0xff]  ;;  %v19010_v33 = vld [vmem:[#allocation188_spill] sm:$0xff] }
 0x7dc   :  { %v11819_v3 = vpack.c.bf16 %v7033_v28, %v7030_v8  ;;  %v19008_v8 = vld [vmem:[#allocation184_spill] sm:$0xff] }
 0x7dd   :  { %10510 = vmatmul.mubr.msk.f32.gmra.mrb[32].mxu0 %vm7189_vm12, %v18970_v46  ;;  %vm7250_vm12 = vcmp.eq.s32.totalorder %v18996_v0, 1  ;;  %v19012_v28 = vld [vmem:[#allocation192_spill] sm:$0xff] }
 0x7de   :  { %11820 = vmatpush1.bf16.msra.mxu0 %v11819_v3  ;;  %7778 = vmatprep.mubr.f32.mxu0 %v18972_v16  ;;  %v19013_v3 = vld [vmem:[#allocation194_spill] sm:$0xff] }
 0x7df   :  { %11821 = vmatprep.subr.bf16.mxu0 %v18968_v62 }
 0x7e0   :  { %v11640_v29 = vpop.f32.mrb[228].mxu1 }
 0x7e1   :  { %v7046_v11 = vpop.f32.mrb[229].mxu1  ;;  %10511 = vmatmul.mubr.msk.f32.gmra.mrb[34].mxu0 %vm7193_vm5, %v18970_v46  ;;  %vm7254_vm5 = vcmp.eq.s32.totalorder %v18997_v43, 1 }
 0x7e2   :  { %v11641_v18 = vpop.f32.mrb[230].mxu1  ;;  %11823 = vmatpush1.bf16.msra.mxu0 %v11822_v2  ;;  %7783 = vmatprep.mubr.f32.mxu0 %v18972_v16  ;;  %v19011_v2 = vld [vmem:[#allocation190_spill] sm:$0xff] }
 0x7e3   :  { %v11828_v5 = vpack.c.bf16 %v11641_v18, %v11640_v29  ;;  %v7049_v49 = vpop.f32.mrb[231].mxu1  ;;  %11824 = vmatprep.subr.bf16.mxu0 %v18968_v62  ;;  %v19015_v29 = vld [vmem:[#allocation196_spill] sm:$0xff]  ;;  %v19018_v18 = vld [vmem:[#allocation199_spill] sm:$0xff] }
 0x7e4   :  { %v11825_v47 = vpack.c.bf16 %v7049_v49, %v7046_v11  ;;  %v19016_v11 = vld [vmem:[#allocation197_spill] sm:$0xff] }
 0x7e5   :  { %10512 = vmatmul.mubr.msk.f32.gmra.mrb[36].mxu0 %vm7197_vm15, %v18970_v46  ;;  %vm7258_vm15 = vcmp.eq.s32.totalorder %v18998_v52, 1  ;;  %v19020_v49 = vld [vmem:[#allocation201_spill] sm:$0xff]  ;;  %v19036_v52 = vld [vmem:[#allocation163_spill] sm:$0xff] }
 0x7e6   :  { %11826 = vmatpush1.bf16.msra.mxu0 %v11825_v47  ;;  %7788 = vmatprep.mubr.f32.mxu0 %v18972_v16  ;;  %v19021_v47 = vld [vmem:[#allocation80_spill] sm:$0xff] }
 0x7e7   :  { %11827 = vmatprep.subr.bf16.mxu0 %v18968_v62 }
 0x7e8   :  { %v11644_v30 = vpop.f32.mrb[232].mxu1 }
 0x7e9   :  { %v7062_v51 = vpop.f32.mrb[233].mxu1  ;;  %10513 = vmatmul.mubr.msk.f32.gmra.mrb[38].mxu0 %vm7201_vm8, %v18970_v46  ;;  %vm7262_vm8 = vcmp.eq.s32.totalorder %v18999_v31, 1 }
 0x7ea   :  { %v11645_v55 = vpop.f32.mrb[234].mxu1  ;;  %11829 = vmatpush1.bf16.msra.mxu0 %v11828_v5  ;;  %7793 = vmatprep.mubr.f32.mxu0 %v18972_v16  ;;  %v19019_v5 = vld [vmem:[#allocation200_spill] sm:$0xff] }
 0x7eb   :  { %v11834_v9 = vpack.c.bf16 %v11645_v55, %v11644_v30  ;;  %v7065_v38 = vpop.f32.mrb[235].mxu1  ;;  %11830 = vmatprep.subr.bf16.mxu0 %v18968_v62  ;;  %v1857_v30 = vsub.s32 %v19022_v32, %v19021_v47  ;;  %v19025_v55 = vld [vmem:[#allocation205_spill] sm:$0xff] }
 0x7ec   :  { %v11831_v1 = vpack.c.bf16 %v7065_v38, %v7062_v51  ;;  %v19023_v51 = vld [vmem:[#allocation202_spill] sm:$0xff]  ;;  %v19027_v38 = vld [vmem:[#allocation207_spill] sm:$0xff] }
 0x7ed   :  { %10514 = vmatmul.mubr.msk.f32.gmra.mrb[40].mxu0 %vm7205_vm10, %v18970_v46  ;;  %vm7266_vm10 = vcmp.eq.s32.totalorder %v19000_v17, 1  ;;  %v8442_v17 = vadd.s32 1, %v1600_v58 }
 0x7ee   :  { %11832 = vmatpush1.bf16.msra.mxu0 %v11831_v1  ;;  %7798 = vmatprep.mubr.f32.mxu0 %v18972_v16  ;;  %v19028_v1 = vld [vmem:[#allocation208_spill] sm:$0xff] }
 0x7ef   :  { %11833 = vmatprep.subr.bf16.mxu0 %v18968_v62 }
 0x7f0   :  { %v11648_v61 = vpop.f32.mrb[236].mxu1 }
 0x7f1   :  { %v7078_v22 = vpop.f32.mrb[237].mxu1  ;;  %10515 = vmatmul.mubr.msk.f32.gmra.mrb[42].mxu0 %vm7209_vm0, %v18970_v46  ;;  %vm7270_vm0 = vcmp.eq.s32.totalorder %v19001_v44, 1 }
 0x7f2   :  { %v11649_v14 = vpop.f32.mrb[238].mxu1  ;;  %11835 = vmatpush1.bf16.msra.mxu0 %v11834_v9  ;;  %7803 = vmatprep.mubr.f32.mxu0 %v18972_v16  ;;  %v19026_v9 = vld [vmem:[#allocation206_spill] sm:$0xff] }
 0x7f3   :  { %v11840_v34 = vpack.c.bf16 %v11649_v14, %v11648_v61  ;;  %v7081_v12 = vpop.f32.mrb[239].mxu1  ;;  %11836 = vmatprep.subr.bf16.mxu0 %v18968_v62  ;;  %v19031_v61 = vld [vmem:[#allocation210_spill] sm:$0xff] }
 0x7f4   :  { %v11837_v10 = vpack.c.bf16 %v7081_v12, %v7078_v22  ;;  %v8440_v22 = vadd.s32 1, %v1598_v39  ;;  %v19033_v12 = vld [vmem:[#allocation18_spill] sm:$0xff] }
 0x7f5   :  { %10516 = vmatmul.mubr.msk.f32.gmra.mrb[44].mxu0 %vm7213_vm13, %v18970_v46  ;;  %vm7274_vm13 = vcmp.eq.s32.totalorder %v19002_v24, 1  ;;  %v9023_v24 = vld [vmem:[%s17414_s5 + $0x8] sm:$0xff] }
 0x7f6   :  { %11838 = vmatpush1.bf16.msra.mxu0 %v11837_v10  ;;  %10517 = vmatprep.mubr.msk.f32.mxu0 %vm7218_vm7, %v18970_v46  ;;  %vm7278_vm7 = vcmp.eq.s32.totalorder %v19003_v42, 1  ;;  %v19037_v42 = vld [vmem:[#allocation213_spill] sm:$0xff] }
 0x7f7   :  { %11839 = vmatprep.subr.bf16.mxu0 %v18968_v62  ;;  %v18992_v62 = vld [vmem:[#allocation150_spill] sm:$0xff] }
 0x7f8   :  { %vm7234_vm11 = vcmp.eq.s32.totalorder %v18992_v62, 1 }
 0x7f9   :  { %10518 = vmatmul.mubr.msk.f32.gmra.mrb[46].mxu0 %vm7217_vm6, %v18970_v46  ;;  %vm7282_vm6 = vcmp.eq.s32.totalorder %v19004_v60, 1 }
 0x7fa   :  { %11841 = vmatpush1.bf16.msra.mxu0 %v11840_v34  ;;  %10519 = vmatprep.mubr.msk.f32.mxu0 %vm7222_vm4, %v18970_v46  ;;  %vm7283_vm4 = vcmp.eq.s32.totalorder %v1792_v37, 1  ;;  %v16829_v34 = vld [vmem:[%s17413_s4] ss:$0 sm:$0xff] }
 0x7fb   :  { %v19038_v37 = vld [vmem:[#allocation14_spill] sm:$0xff] }
 0x7fd   :  { %7814 = vmatmul.mubr.f32.gmra.mrb[48].mxu0 %v18972_v16 }
 0x7fe   :  { %10520 = vmatprep.mubr.msk.f32.mxu0 %vm7226_vm9, %v18970_v46  ;;  %vm7287_vm9 = vcmp.eq.s32.totalorder %v19007_v21, 1 }
 0x801   :  { %7819 = vmatmul.mubr.f32.gmra.mrb[50].mxu0 %v18972_v16 }
 0x802   :  { %10521 = vmatprep.mubr.msk.f32.mxu0 %vm7230_vm2, %v18970_v46  ;;  %vm7291_vm2 = vcmp.eq.s32.totalorder %v19008_v8, 1 }
 0x805   :  { %7824 = vmatmul.mubr.f32.gmra.mrb[52].mxu0 %v18972_v16 }
 0x806   :  { %10522 = vmatprep.mubr.msk.f32.mxu0 %vm7234_vm11, %v18970_v46  ;;  %vm7295_vm11 = vcmp.eq.s32.totalorder %v19009_v56, 1 }
 0x809   :  { %7829 = vmatmul.mubr.f32.gmra.mrb[54].mxu0 %v18972_v16 }
 0x80a   :  { %10523 = vmatprep.mubr.msk.f32.mxu0 %vm7238_vm14, %v18970_v46  ;;  %vm7299_vm14 = vcmp.eq.s32.totalorder %v19010_v33, 1  ;;  %v9024_v33 = vld [vmem:[%s17414_s5 + $0x10] sm:$0xff] }
 0x80d   :  { %7834 = vmatmul.mubr.f32.gmra.mrb[56].mxu0 %v18972_v16 }
 0x80e   :  { %10524 = vmatprep.mubr.msk.f32.mxu0 %vm7242_vm1, %v18970_v46  ;;  %vm7303_vm1 = vcmp.eq.s32.totalorder %v19011_v2, 1  ;;  %v19039_v2 = vld [vmem:[#allocation5_spill] sm:$0xff] }
 0x811   :  { %7839 = vmatmul.mubr.f32.gmra.mrb[58].mxu0 %v18972_v16 }
 0x812   :  { %10525 = vmatprep.mubr.msk.f32.mxu0 %vm7246_vm3, %v18970_v46  ;;  %vm7307_vm3 = vcmp.eq.s32.totalorder %v19012_v28, 1  ;;  %v1602_v28 = vand.u32 15, %v19039_v2 }
 0x815   :  { %7844 = vmatmul.mubr.f32.gmra.mrb[60].mxu0 %v18972_v16 }
 0x816   :  { %10526 = vmatprep.mubr.msk.f32.mxu0 %vm7250_vm12, %v18970_v46  ;;  %vm7311_vm12 = vcmp.eq.s32.totalorder %v19013_v3, 1 }
 0x819   :  { %7849 = vmatmul.mubr.f32.gmra.mrb[62].mxu0 %v18972_v16 }
 0x81a   :  { %10527 = vmatprep.mubr.msk.f32.mxu0 %vm7254_vm5, %v18970_v46  ;;  %vm7315_vm5 = vcmp.eq.s32.totalorder %v19014_v26, 1  ;;  %v19040_v26 = vld [vmem:[#allocation215_spill] sm:$0xff] }
 0x81d   :  { %7854 = vmatmul.mubr.f32.gmra.mrb[64].mxu0 %v18972_v16 }
 0x81e   :  { %10528 = vmatprep.mubr.msk.f32.mxu0 %vm7258_vm15, %v18970_v46  ;;  %vm7319_vm15 = vcmp.eq.s32.totalorder %v19015_v29, 1 }
 0x821   :  { %7859 = vmatmul.mubr.f32.gmra.mrb[66].mxu0 %v18972_v16 }
 0x822   :  { %10529 = vmatprep.mubr.msk.f32.mxu0 %vm7262_vm8, %v18970_v46  ;;  %vm7323_vm8 = vcmp.eq.s32.totalorder %v19016_v11, 1 }
 0x825   :  { %7864 = vmatmul.mubr.f32.gmra.mrb[68].mxu0 %v18972_v16 }
 0x826   :  { %10530 = vmatprep.mubr.msk.f32.mxu0 %vm7266_vm10, %v18970_v46  ;;  %vm7327_vm10 = vcmp.eq.s32.totalorder %v19017_v57, 1 }
 0x829   :  { %7869 = vmatmul.mubr.f32.gmra.mrb[70].mxu0 %v18972_v16 }
 0x82a   :  { %10531 = vmatprep.mubr.msk.f32.mxu0 %vm7270_vm0, %v18970_v46  ;;  %vm7331_vm0 = vcmp.eq.s32.totalorder %v19018_v18, 1 }
 0x82d   :  { %7874 = vmatmul.mubr.f32.gmra.mrb[72].mxu0 %v18972_v16 }
 0x82e   :  { %10532 = vmatprep.mubr.msk.f32.mxu0 %vm7274_vm13, %v18970_v46  ;;  %vm7335_vm13 = vcmp.eq.s32.totalorder %v19019_v5, 1 }
 0x831   :  { %7879 = vmatmul.mubr.f32.gmra.mrb[74].mxu0 %v18972_v16 }
 0x832   :  { %10533 = vmatprep.mubr.msk.f32.mxu0 %vm7278_vm7, %v18970_v46  ;;  %vm7339_vm7 = vcmp.eq.s32.totalorder %v19020_v49, 1  ;;  %v19041_v49 = vld [vmem:[#allocation17_spill] sm:$0xff] }
 0x835   :  { %7884 = vmatmul.mubr.f32.gmra.mrb[76].mxu0 %v18972_v16 }
 0x836   :  { %10534 = vmatprep.mubr.msk.f32.mxu0 %vm7282_vm6, %v18970_v46  ;;  %vm7343_vm6 = vcmp.eq.s32.totalorder %v19023_v51, 1 }
 0x839   :  { %7889 = vmatmul.mubr.f32.gmra.mrb[78].mxu0 %v18972_v16 }
 0x83a   :  { %7893 = vmatprep.mubr.f32.mxu0 %v18972_v16 }
 0x83d   :  { %7894 = vmatmul.mubr.f32.gmra.mrb[80].mxu0 %v18972_v16 }
 0x83e   :  { %7898 = vmatprep.mubr.f32.mxu0 %v18972_v16 }
 0x841   :  { %7899 = vmatmul.mubr.f32.gmra.mrb[82].mxu0 %v18972_v16 }
 0x842   :  { %7903 = vmatprep.mubr.f32.mxu0 %v18972_v16 }
 0x845   :  { %7904 = vmatmul.mubr.f32.gmra.mrb[84].mxu0 %v18972_v16 }
 0x846   :  { %7908 = vmatprep.mubr.f32.mxu0 %v18972_v16 }
 0x849   :  { %7909 = vmatmul.mubr.f32.gmra.mrb[86].mxu0 %v18972_v16 }
 0x84a   :  { %7913 = vmatprep.mubr.f32.mxu0 %v18972_v16 }
 0x84d   :  { %7914 = vmatmul.mubr.f32.gmra.mrb[88].mxu0 %v18972_v16 }
 0x84e   :  { %7918 = vmatprep.mubr.f32.mxu0 %v18972_v16 }
 0x851   :  { %7919 = vmatmul.mubr.f32.gmra.mrb[90].mxu0 %v18972_v16 }
 0x852   :  { %7923 = vmatprep.mubr.f32.mxu0 %v18972_v16 }
 0x855   :  { %7924 = vmatmul.mubr.f32.gmra.mrb[92].mxu0 %v18972_v16 }
 0x856   :  { %7928 = vmatprep.mubr.f32.mxu0 %v18972_v16 }
 0x859   :  { %7929 = vmatmul.mubr.f32.gmra.mrb[94].mxu0 %v18972_v16 }
 0x85a   :  { %7933 = vmatprep.mubr.f32.mxu0 %v18972_v16 }
 0x85d   :  { %7934 = vmatmul.mubr.f32.gmra.mrb[96].mxu0 %v18972_v16 }
 0x85e   :  { %7938 = vmatprep.mubr.f32.mxu0 %v18972_v16 }
 0x861   :  { %7939 = vmatmul.mubr.f32.gmra.mrb[98].mxu0 %v18972_v16 }
 0x862   :  { %7943 = vmatprep.mubr.f32.mxu0 %v18972_v16 }
 0x865   :  { %7944 = vmatmul.mubr.f32.gmra.mrb[100].mxu0 %v18972_v16 }
 0x866   :  { %7948 = vmatprep.mubr.f32.mxu0 %v18972_v16 }
 0x869   :  { %7949 = vmatmul.mubr.f32.gmra.mrb[102].mxu0 %v18972_v16 }
 0x86a   :  { %7953 = vmatprep.mubr.f32.mxu0 %v18972_v16 }
 0x86d   :  { %7954 = vmatmul.mubr.f32.gmra.mrb[104].mxu0 %v18972_v16 }
 0x86e   :  { %7958 = vmatprep.mubr.f32.mxu0 %v18972_v16 }
 0x871   :  { %7959 = vmatmul.mubr.f32.gmra.mrb[106].mxu0 %v18972_v16 }
 0x872   :  { %7963 = vmatprep.mubr.f32.mxu0 %v18972_v16 }
 0x875   :  { %7964 = vmatmul.mubr.f32.gmra.mrb[108].mxu0 %v18972_v16 }
 0x876   :  { %7968 = vmatprep.mubr.f32.mxu0 %v18972_v16 }
 0x879   :  { %7969 = vmatmul.mubr.f32.gmra.mrb[110].mxu0 %v18972_v16 }
 0x87a   :  { %7973 = vmatprep.mubr.f32.mxu0 %v18972_v16 }
 0x87d   :  { %7974 = vmatmul.mubr.f32.gmra.mrb[112].mxu0 %v18972_v16 }
 0x87e   :  { %7978 = vmatprep.mubr.f32.mxu0 %v18972_v16 }
 0x881   :  { %7979 = vmatmul.mubr.f32.gmra.mrb[114].mxu0 %v18972_v16 }
 0x882   :  { %7983 = vmatprep.mubr.f32.mxu0 %v18972_v16 }
 0x885   :  { %7984 = vmatmul.mubr.f32.gmra.mrb[116].mxu0 %v18972_v16 }
 0x886   :  { %7988 = vmatprep.mubr.f32.mxu0 %v18972_v16 }
 0x889   :  { %7989 = vmatmul.mubr.f32.gmra.mrb[118].mxu0 %v18972_v16 }
 0x88a   :  { %7993 = vmatprep.mubr.f32.mxu0 %v18972_v16 }
 0x88d   :  { %7994 = vmatmul.mubr.f32.gmra.mrb[120].mxu0 %v18972_v16 }
 0x88e   :  { %7998 = vmatprep.mubr.f32.mxu0 %v18972_v16 }
 0x891   :  { %7999 = vmatmul.mubr.f32.gmra.mrb[122].mxu0 %v18972_v16 }
 0x892   :  { %8003 = vmatprep.mubr.f32.mxu0 %v18972_v16 }
 0x895   :  { %8004 = vmatmul.mubr.f32.gmra.mrb[124].mxu0 %v18972_v16 }
 0x896   :  { %8008 = vmatprep.mubr.f32.mxu0 %v18972_v16 }
 0x899   :  { %8009 = vmatmul.mubr.f32.gmra.mrb[126].mxu0 %v18972_v16 }
 0x89a   :  { %8013 = vmatprep.mubr.f32.mxu0 %v18972_v16 }
 0x89d   :  { %8014 = vmatmul.mubr.f32.gmra.mrb[128].mxu0 %v18972_v16 }
 0x89e   :  { %8018 = vmatprep.mubr.f32.mxu0 %v18972_v16 }
 0x8a1   :  { %8019 = vmatmul.mubr.f32.gmra.mrb[130].mxu0 %v18972_v16 }
 0x8a2   :  { %8023 = vmatprep.mubr.f32.mxu0 %v18972_v16 }
 0x8a5   :  { %8024 = vmatmul.mubr.f32.gmra.mrb[132].mxu0 %v18972_v16 }
 0x8a6   :  { %8028 = vmatprep.mubr.f32.mxu0 %v18972_v16 }
 0x8a9   :  { %8029 = vmatmul.mubr.f32.gmra.mrb[134].mxu0 %v18972_v16 }
 0x8aa   :  { %8033 = vmatprep.mubr.f32.mxu0 %v18972_v16 }
 0x8ad   :  { %8034 = vmatmul.mubr.f32.gmra.mrb[136].mxu0 %v18972_v16 }
 0x8ae   :  { %8038 = vmatprep.mubr.f32.mxu0 %v18972_v16 }
 0x8b1   :  { %8039 = vmatmul.mubr.f32.gmra.mrb[138].mxu0 %v18972_v16 }
 0x8b2   :  { %8043 = vmatprep.mubr.f32.mxu0 %v18972_v16 }
 0x8b5   :  { %8044 = vmatmul.mubr.f32.gmra.mrb[140].mxu0 %v18972_v16 }
 0x8b6   :  { %8048 = vmatprep.mubr.f32.mxu0 %v18972_v16 }
 0x8b9   :  { %8049 = vmatmul.mubr.f32.gmra.mrb[142].mxu0 %v18972_v16 }
 0x8ba   :  { %8118 = vmatprep.mubr.f32.mxu0 %v18972_v16 }
 0x8bd   :  { %8119 = vmatmul.mubr.f32.vlgmr.msra.gmra.mrb[16].mxu0 %v18972_v16 }
 0x8be   :  { %8123 = vmatprep.mubr.f32.mxu0 %v18972_v16 }
 0x8c1   :  { %8124 = vmatmul.mubr.f32.gmra.mrb[18].mxu0 %v18972_v16 }
 0x8c2   :  { %8128 = vmatprep.mubr.f32.mxu0 %v18972_v16 }
 0x8c5   :  { %8129 = vmatmul.mubr.f32.gmra.mrb[20].mxu0 %v18972_v16 }
 0x8c6   :  { %8133 = vmatprep.mubr.f32.mxu0 %v18972_v16 }
 0x8c9   :  { %8134 = vmatmul.mubr.f32.gmra.mrb[22].mxu0 %v18972_v16 }
 0x8ca   :  { %8138 = vmatprep.mubr.f32.mxu0 %v18972_v16 }
 0x8cd   :  { %8139 = vmatmul.mubr.f32.gmra.mrb[24].mxu0 %v18972_v16 }
 0x8ce   :  { %8143 = vmatprep.mubr.f32.mxu0 %v18972_v16 }
 0x8d1   :  { %8144 = vmatmul.mubr.f32.gmra.mrb[26].mxu0 %v18972_v16 }
 0x8d2   :  { %8148 = vmatprep.mubr.f32.mxu0 %v18972_v16 }
 0x8d5   :  { %8149 = vmatmul.mubr.f32.gmra.mrb[28].mxu0 %v18972_v16 }
 0x8d6   :  { %8153 = vmatprep.mubr.f32.mxu0 %v18972_v16 }
 0x8d9   :  { %8154 = vmatmul.mubr.f32.gmra.mrb[30].mxu0 %v18972_v16 }
 0x8da   :  { %8158 = vmatprep.mubr.f32.mxu0 %v18972_v16 }
 0x8dd   :  { %8159 = vmatmul.mubr.f32.gmra.mrb[32].mxu0 %v18972_v16 }
 0x8de   :  { %8163 = vmatprep.mubr.f32.mxu0 %v18972_v16 }
 0x8e1   :  { %8164 = vmatmul.mubr.f32.gmra.mrb[34].mxu0 %v18972_v16 }
 0x8e2   :  { %8168 = vmatprep.mubr.f32.mxu0 %v18972_v16 }
 0x8e5   :  { %8169 = vmatmul.mubr.f32.gmra.mrb[36].mxu0 %v18972_v16 }
 0x8e6   :  { %8173 = vmatprep.mubr.f32.mxu0 %v18972_v16 }
 0x8e9   :  { %8174 = vmatmul.mubr.f32.gmra.mrb[38].mxu0 %v18972_v16 }
 0x8ea   :  { %8178 = vmatprep.mubr.f32.mxu0 %v18972_v16 }
 0x8ed   :  { %8179 = vmatmul.mubr.f32.gmra.mrb[40].mxu0 %v18972_v16 }
 0x8ee   :  { %8183 = vmatprep.mubr.f32.mxu0 %v18972_v16 }
 0x8f1   :  { %8184 = vmatmul.mubr.f32.gmra.mrb[42].mxu0 %v18972_v16 }
 0x8f2   :  { %8188 = vmatprep.mubr.f32.mxu0 %v18972_v16 }
 0x8f5   :  { %8189 = vmatmul.mubr.f32.gmra.mrb[44].mxu0 %v18972_v16 }
 0x8f6   :  { %8193 = vmatprep.mubr.f32.mxu0 %v18972_v16 }
 0x8f9   :  { %8194 = vmatmul.mubr.f32.gmra.mrb[46].mxu0 %v18972_v16 }
 0x8fa   :  { %8198 = vmatprep.mubr.f32.mxu0 %v18972_v16 }
 0x8fd   :  { %8199 = vmatmul.mubr.f32.gmra.mrb[48].mxu0 %v18972_v16 }
 0x8fe   :  { %8203 = vmatprep.mubr.f32.mxu0 %v18972_v16 }
 0x901   :  { %8204 = vmatmul.mubr.f32.gmra.mrb[50].mxu0 %v18972_v16 }
 0x902   :  { %8208 = vmatprep.mubr.f32.mxu0 %v18972_v16 }
 0x905   :  { %8209 = vmatmul.mubr.f32.gmra.mrb[52].mxu0 %v18972_v16 }
 0x906   :  { %8213 = vmatprep.mubr.f32.mxu0 %v18972_v16 }
 0x909   :  { %8214 = vmatmul.mubr.f32.gmra.mrb[54].mxu0 %v18972_v16 }
 0x90a   :  { %8218 = vmatprep.mubr.f32.mxu0 %v18972_v16 }
 0x90d   :  { %8219 = vmatmul.mubr.f32.gmra.mrb[56].mxu0 %v18972_v16 }
 0x90e   :  { %8223 = vmatprep.mubr.f32.mxu0 %v18972_v16 }
 0x911   :  { %8224 = vmatmul.mubr.f32.gmra.mrb[58].mxu0 %v18972_v16 }
 0x912   :  { %8228 = vmatprep.mubr.f32.mxu0 %v18972_v16 }
 0x915   :  { %8229 = vmatmul.mubr.f32.gmra.mrb[60].mxu0 %v18972_v16 }
 0x916   :  { %8233 = vmatprep.mubr.f32.mxu0 %v18972_v16 }
 0x919   :  { %8234 = vmatmul.mubr.f32.gmra.mrb[62].mxu0 %v18972_v16 }
 0x91a   :  { %8238 = vmatprep.mubr.f32.mxu0 %v18972_v16 }
 0x91d   :  { %8239 = vmatmul.mubr.f32.gmra.mrb[64].mxu0 %v18972_v16 }
 0x91e   :  { %8243 = vmatprep.mubr.f32.mxu0 %v18972_v16 }
 0x921   :  { %8244 = vmatmul.mubr.f32.gmra.mrb[66].mxu0 %v18972_v16 }
 0x922   :  { %8248 = vmatprep.mubr.f32.mxu0 %v18972_v16 }
 0x925   :  { %8249 = vmatmul.mubr.f32.gmra.mrb[68].mxu0 %v18972_v16 }
 0x926   :  { %8253 = vmatprep.mubr.f32.mxu0 %v18972_v16 }
 0x929   :  { %8254 = vmatmul.mubr.f32.gmra.mrb[70].mxu0 %v18972_v16 }
 0x92a   :  { %8258 = vmatprep.mubr.f32.mxu0 %v18972_v16 }
 0x92d   :  { %8259 = vmatmul.mubr.f32.gmra.mrb[72].mxu0 %v18972_v16 }
 0x92e   :  { %8263 = vmatprep.mubr.f32.mxu0 %v18972_v16 }
 0x931   :  { %8264 = vmatmul.mubr.f32.gmra.mrb[74].mxu0 %v18972_v16 }
 0x932   :  { %8268 = vmatprep.mubr.f32.mxu0 %v18972_v16 }
 0x935   :  { %8269 = vmatmul.mubr.f32.gmra.mrb[76].mxu0 %v18972_v16 }
 0x936   :  { %8273 = vmatprep.mubr.f32.mxu0 %v18972_v16 }
 0x939   :  { %10535 = vmatmul.mubr.msk.f32.gmra.mrb[78].mxu0 %vm7283_vm4, %v18970_v46  ;;  %vm7348_vm4 = vcmp.eq.s32.totalorder %v1857_v30, 1  ;;  %v8444_v30 = vadd.s32 1, %v1602_v28 }
 0x93a   :  { %8278 = vmatprep.mubr.f32.mxu0 %v18972_v16 }
 0x93d   :  { %10536 = vmatmul.mubr.msk.f32.gmra.mrb[80].mxu0 %vm7287_vm9, %v18970_v46  ;;  %vm7347_vm9 = vcmp.eq.s32.totalorder %v19024_v7, 1  ;;  %v9025_v7 = vld [vmem:[%s17414_s5 + $0x18] sm:$0xff] }
 0x93e   :  { %8283 = vmatprep.mubr.f32.mxu0 %v18972_v16 }
 0x941   :  { %10537 = vmatmul.mubr.msk.f32.gmra.mrb[82].mxu0 %vm7291_vm2, %v18970_v46  ;;  %vm7352_vm2 = vcmp.eq.s32.totalorder %v19025_v55, 1  ;;  %v19042_v55 = vld [vmem:[#allocation216_spill] sm:$0xff] }
 0x942   :  { %8288 = vmatprep.mubr.f32.mxu0 %v18972_v16 }
 0x945   :  { %10538 = vmatmul.mubr.msk.f32.gmra.mrb[84].mxu0 %vm7295_vm11, %v18970_v46  ;;  %vm7356_vm11 = vcmp.eq.s32.totalorder %v19026_v9, 1 }
 0x946   :  { %8293 = vmatprep.mubr.f32.mxu0 %v18972_v16 }
 0x949   :  { %10539 = vmatmul.mubr.msk.f32.gmra.mrb[86].mxu0 %vm7299_vm14, %v18970_v46  ;;  %vm7360_vm14 = vcmp.eq.s32.totalorder %v19027_v38, 1 }
 0x94a   :  { %8298 = vmatprep.mubr.f32.mxu0 %v18972_v16 }
 0x94d   :  { %10540 = vmatmul.mubr.msk.f32.gmra.mrb[88].mxu0 %vm7303_vm1, %v18970_v46  ;;  %vm7364_vm1 = vcmp.eq.s32.totalorder %v19028_v1, 1  ;;  %v19043_v1 = vld [vmem:[#allocation165_spill] sm:$0xff] }
 0x94e   :  { %8303 = vmatprep.mubr.f32.mxu0 %v18972_v16 }
 0x951   :  { %10541 = vmatmul.mubr.msk.f32.gmra.mrb[90].mxu0 %vm7307_vm3, %v18970_v46  ;;  %vm7368_vm3 = vcmp.eq.s32.totalorder %v19029_v4, 1 }
 0x952   :  { %8308 = vmatprep.mubr.f32.mxu0 %v18972_v16 }
 0x955   :  { %10542 = vmatmul.mubr.msk.f32.gmra.mrb[92].mxu0 %vm7311_vm12, %v18970_v46  ;;  %vm7372_vm12 = vcmp.eq.s32.totalorder %v19031_v61, 1  ;;  %v9026_v61 = vld [vmem:[%s17414_s5 + $0x20] sm:$0xff] }
 0x956   :  { %8313 = vmatprep.mubr.f32.mxu0 %v18972_v16 }
 0x959   :  { %10543 = vmatmul.mubr.msk.f32.gmra.mrb[94].mxu0 %vm7315_vm5, %v18970_v46  ;;  %vm7376_vm5 = vcmp.eq.s32.totalorder %v19032_v13, 1 }
 0x95a   :  { %8318 = vmatprep.mubr.f32.mxu0 %v18972_v16 }
 0x95d   :  { %10544 = vmatmul.mubr.msk.f32.gmra.mrb[96].mxu0 %vm7319_vm15, %v18970_v46  ;;  %vm8568_vm15 = vcmp.lt.s32.totalorder %v8440_v22, 16  ;;  %v19044_v22 = vld [vmem:[#allocation8_spill] sm:$0xff] }
 0x95e   :  { %8323 = vmatprep.mubr.f32.mxu0 %v18972_v16  ;;  %v1604_v13 = vand.u32 15, %v19044_v22 }
 0x961   :  { %10545 = vmatmul.mubr.msk.f32.gmra.mrb[98].mxu0 %vm7323_vm8, %v18970_v46  ;;  %vm7380_vm8 = vcmp.eq.s32.totalorder %v19035_v40, 1 }
 0x962   :  { %8328 = vmatprep.mubr.f32.mxu0 %v18972_v16 }
 0x965   :  { %10546 = vmatmul.mubr.msk.f32.gmra.mrb[100].mxu0 %vm7327_vm10, %v18970_v46  ;;  %vm7384_vm10 = vcmp.eq.s32.totalorder %v19037_v42, 1 }
 0x966   :  { %8333 = vmatprep.mubr.f32.mxu0 %v18972_v16 }
 0x969   :  { %10547 = vmatmul.mubr.msk.f32.gmra.mrb[102].mxu0 %vm7331_vm0, %v18970_v46  ;;  %vm8570_vm0 = vcmp.lt.s32.totalorder %v8442_v17, 16  ;;  %v19048_v17 = vld [vmem:[#allocation164_spill] sm:$0xff] }
 0x96a   :  { %8338 = vmatprep.mubr.f32.mxu0 %v18972_v16 }
 0x96d   :  { %10548 = vmatmul.mubr.msk.f32.gmra.mrb[104].mxu0 %vm7335_vm13, %v18970_v46  ;;  %vm7388_vm13 = vcmp.eq.s32.totalorder %v19040_v26, 1  ;;  %v19051_v26 = vld [vmem:[#allocation166_spill] sm:$0xff] }
 0x96e   :  { %8343 = vmatprep.mubr.f32.mxu0 %v18972_v16 }
 0x971   :  { %10549 = vmatmul.mubr.msk.f32.gmra.mrb[106].mxu0 %vm7339_vm7, %v18970_v46  ;;  %vm7392_vm7 = vcmp.eq.s32.totalorder %v19042_v55, 1 }
 0x972   :  { %8348 = vmatprep.mubr.f32.mxu0 %v18972_v16 }
 0x975   :  { %10550 = vmatmul.mubr.msk.f32.gmra.mrb[108].mxu0 %vm7343_vm6, %v18970_v46  ;;  %vm8572_vm6 = vcmp.lt.s32.totalorder %v8444_v30, 16  ;;  %v19053_v30 = vld [vmem:[#allocation2_spill] sm:$0xff] }
 0x976   :  { %10551 = vmatprep.mubr.msk.f32.mxu0 %vm7348_vm4, %v18970_v46 }
 0x979   :  { %10552 = vmatmul.mubr.msk.f32.gmra.mrb[110].mxu0 %vm7347_vm9, %v18970_v46 }
 0x97a   :  { %10553 = vmatprep.mubr.msk.f32.mxu0 %vm7352_vm2, %v18970_v46 }
 0x97d   :  { %8359 = vmatmul.mubr.f32.gmra.mrb[112].mxu0 %v18972_v16 }
 0x97e   :  { %10554 = vmatprep.mubr.msk.f32.mxu0 %vm7356_vm11, %v18970_v46 }
 0x981   :  { %8364 = vmatmul.mubr.f32.gmra.mrb[114].mxu0 %v18972_v16 }
 0x982   :  { %10555 = vmatprep.mubr.msk.f32.mxu0 %vm7360_vm14, %v18970_v46 }
 0x985   :  { %8369 = vmatmul.mubr.f32.gmra.mrb[116].mxu0 %v18972_v16 }
 0x986   :  { %10556 = vmatprep.mubr.msk.f32.mxu0 %vm7364_vm1, %v18970_v46 }
 0x989   :  { %8374 = vmatmul.mubr.f32.gmra.mrb[118].mxu0 %v18972_v16 }
 0x98a   :  { %10557 = vmatprep.mubr.msk.f32.mxu0 %vm7368_vm3, %v18970_v46 }
 0x98d   :  { %8379 = vmatmul.mubr.f32.gmra.mrb[120].mxu0 %v18972_v16 }
 0x98e   :  { %10558 = vmatprep.mubr.msk.f32.mxu0 %vm7372_vm12, %v18970_v46 }
 0x990   :  { %v8120_v14 = vpop.f32.mrb[16].mxu0 }
 0x991   :  { %v8887_v10 = vadd.f32 %v8120_v14, %v19033_v12  ;;  %v8122_v41 = vpop.f32.mrb[17].mxu0  ;;  %8384 = vmatmul.mubr.f32.gmra.mrb[122].mxu0 %v18972_v16  ;;  %v19045_v12 = vld [vmem:[#allocation218_spill] sm:$0xff] }
 0x992   :  { %10559 = vmatprep.mubr.msk.f32.mxu0 %vm7376_vm5, %v18970_v46  ;;  %vm7396_vm4 = vcmp.eq.s32.totalorder %v19045_v12, 1  ;;  %v19056_v12 = vld [vmem:[#allocation169_spill] sm:$0xff] }
 0x993   :  { %v8958_v62 = vadd.f32 %v16829_v34, %v8887_v10 }
 0x994   :  { %v8125_v59 = vpop.f32.mrb[18].mxu0 }
 0x995   :  { %v9086_v53 = vadd.f32 %v9022_v23, %v8958_v62  ;;  %v8824_v0 = vsel %vm8568_vm15, %v8125_v59, 0.0  ;;  %v8127_v43 = vpop.f32.mrb[19].mxu0  ;;  %8389 = vmatmul.mubr.f32.gmra.mrb[124].mxu0 %v18972_v16  ;;  %v19046_v62 = vld [vmem:[#allocation167_spill] sm:$0xff]  ;;  %v8446_v59 = vadd.s32 1, %v1604_v13 }
 0x996   :  { %v8888_v31 = vadd.f32 %v8824_v0, %v19036_v52  ;;  %10560 = vmatprep.mubr.msk.f32.mxu0 %vm7380_vm8, %v18970_v46  ;;  %v9027_v0 = vld [vmem:[%s17414_s5 + $0x28] sm:$0xff]  ;;  %v19047_v43 = vld [vmem:[#allocation220_spill] sm:$0xff] }
 0x997   :  { %v9150_v44 = vmax.f32 %v9086_v53, 0.0  ;;  %vm7400_vm9 = vcmp.eq.s32.totalorder %v19047_v43, 1  ;;  %vm8574_vm2 = vcmp.lt.s32.totalorder %v8446_v59, 16  ;;  %v19058_v43 = vld [vmem:[#allocation20_spill] sm:$0xff] }
 0x998   :  { %v8959_v60 = vadd.f32 %v16829_v34, %v8888_v31  ;;  %v8130_v25 = vpop.f32.mrb[20].mxu0 }
 0x999   :  { %9214 = vst [vmem:[%s17415_s6] sm:$0xff] %v9150_v44  ;;  %v8889_v21 = vadd.f32 %v8130_v25, %v19038_v37  ;;  %v8132_v8 = vpop.f32.mrb[21].mxu0  ;;  %8394 = vmatmul.mubr.f32.gmra.mrb[126].mxu0 %v18972_v16  ;;  %v19049_v25 = vld [vmem:[#allocation12_spill] sm:$0xff] }
 0x99a   :  { %v9087_v56 = vadd.f32 %v9023_v24, %v8959_v60  ;;  %10561 = vmatprep.mubr.msk.f32.mxu0 %vm7384_vm10, %v18970_v46  ;;  %v9028_v60 = vld [vmem:[%s17414_s5 + $0x30] sm:$0xff]  ;;  %v1606_v37 = vand.u32 15, %v19049_v25  ;;  %v19050_v8 = vld [vmem:[#allocation222_spill] sm:$0xff] }
 0x99b   :  { %v8960_v3 = vadd.f32 %v16829_v34, %v8889_v21  ;;  %vm7404_vm11 = vcmp.eq.s32.totalorder %v19050_v8, 1  ;;  %v9033_v8 = vld [vmem:[%s17414_s5 + $0x58] sm:$0xff] }
 0x99c   :  { %v9151_v29 = vmax.f32 %v9087_v56, 0.0  ;;  %v8135_v11 = vpop.f32.mrb[22].mxu0 }
 0x99d   :  { %v9088_v57 = vadd.f32 %v9024_v33, %v8960_v3  ;;  %v8826_v18 = vsel %vm8570_vm0, %v8135_v11, 0.0  ;;  %v8137_v5 = vpop.f32.mrb[23].mxu0  ;;  %8399 = vmatmul.mubr.f32.gmra.mrb[128].mxu0 %v18972_v16  ;;  %v8448_v11 = vadd.s32 1, %v1606_v37 }
 0x99e   :  { %9215 = vst [vmem:[%s17415_s6 + $0x8] sm:$0xff] %v9151_v29  ;;  %v8890_v32 = vadd.f32 %v8826_v18, %v19041_v49  ;;  %10562 = vmatprep.mubr.msk.f32.mxu0 %vm7388_vm13, %v18970_v46  ;;  %v9029_v18 = vld [vmem:[%s17414_s5 + $0x38] sm:$0xff]  ;;  %v19052_v5 = vld [vmem:[#allocation223_spill] sm:$0xff] }
 0x99f   :  { %v9152_v51 = vmax.f32 %v9088_v57, 0.0  ;;  %vm7408_vm14 = vcmp.eq.s32.totalorder %v19052_v5, 1  ;;  %vm8576_vm1 = vcmp.lt.s32.totalorder %v8448_v11, 16  ;;  %v1612_v11 = vand.u32 15, %v18985_v6 }
 0x9a0   :  { %v8961_v9 = vadd.f32 %v16829_v34, %v8890_v32  ;;  %v8140_v38 = vpop.f32.mrb[24].mxu0 }
 0x9a1   :  { %9216 = vst [vmem:[%s17415_s6 + $0x10] sm:$0xff] %v9152_v51  ;;  %v8891_v4 = vadd.f32 %v8140_v38, %v19043_v1  ;;  %v8142_v54 = vpop.f32.mrb[25].mxu0  ;;  %8404 = vmatmul.mubr.f32.gmra.mrb[130].mxu0 %v18972_v16  ;;  %v19054_v38 = vld [vmem:[#allocation16_spill] sm:$0xff] }
 0x9a2   :  { %v9089_v39 = vadd.f32 %v9025_v7, %v8961_v9  ;;  %10563 = vmatprep.mubr.msk.f32.mxu0 %vm7392_vm7, %v18970_v46  ;;  %v9030_v9 = vld [vmem:[%s17414_s5 + $0x40] sm:$0xff]  ;;  %v1608_v1 = vand.u32 15, %v19054_v38  ;;  %v19055_v54 = vld [vmem:[#allocation224_spill] sm:$0xff]  ;;  %v9035_v38 = vld [vmem:[%s17414_s5 + $0x68] sm:$0xff] }
 0x9a3   :  { %v8962_v14 = vadd.f32 %v16829_v34, %v8891_v4  ;;  %vm7412_vm3 = vcmp.eq.s32.totalorder %v19055_v54, 1 }
 0x9a4   :  { %v9153_v10 = vmax.f32 %v9089_v39, 0.0  ;;  %v8145_v41 = vpop.f32.mrb[26].mxu0 }
 0x9a5   :  { %v9090_v23 = vadd.f32 %v9026_v61, %v8962_v14  ;;  %v8828_v36 = vsel %vm8572_vm6, %v8145_v41, 0.0  ;;  %v8147_v58 = vpop.f32.mrb[27].mxu0  ;;  %8409 = vmatmul.mubr.f32.gmra.mrb[132].mxu0 %v18972_v16  ;;  %v8450_v41 = vadd.s32 1, %v1608_v1 }
 0x9a6   :  { %9217 = vst [vmem:[%s17415_s6 + $0x18] sm:$0xff] %v9153_v10  ;;  %v8892_v40 = vadd.f32 %v8828_v36, %v19046_v62  ;;  %10564 = vmatprep.mubr.msk.f32.mxu0 %vm7396_vm4, %v18970_v46  ;;  %v9031_v36 = vld [vmem:[%s17414_s5 + $0x48] sm:$0xff] }
 0x9a7   :  { %v9154_v53 = vmax.f32 %v9090_v23, 0.0  ;;  %vm8578_vm12 = vcmp.lt.s32.totalorder %v8450_v41, 16 }
 0x9a8   :  { %v8963_v52 = vadd.f32 %v16829_v34, %v8892_v40  ;;  %v8150_v31 = vpop.f32.mrb[28].mxu0  ;;  %v19057_v40 = vld [vmem:[#allocation120_spill] sm:$0xff] }
 0x9a9   :  { %9218 = vst [vmem:[%s17415_s6 + $0x20] sm:$0xff] %v9154_v53  ;;  %v8893_v44 = vadd.f32 %v8150_v31, %v19048_v17  ;;  %v8152_v24 = vpop.f32.mrb[29].mxu0  ;;  %8414 = vmatmul.mubr.f32.gmra.mrb[134].mxu0 %v18972_v16 }
 0x9aa   :  { %v9091_v42 = vadd.f32 %v9027_v0, %v8963_v52  ;;  %10565 = vmatprep.mubr.msk.f32.mxu0 %vm7400_vm9, %v18970_v46  ;;  %v1610_v52 = vand.u32 15, %v19058_v43 }
 0x9ab   :  { %v8964_v21 = vadd.f32 %v16829_v34, %v8893_v44 }
 0x9ac   :  { %v9155_v56 = vmax.f32 %v9091_v42, 0.0  ;;  %v8155_v33 = vpop.f32.mrb[30].mxu0  ;;  %v8452_v37 = vadd.s32 1, %v1610_v52  ;;  %v19065_v52 = vld [vmem:[#allocation217_spill] sm:$0xff] }
 0x9ad   :  { %v9092_v2 = vadd.f32 %v9028_v60, %v8964_v21  ;;  %v8830_v28 = vsel %vm8574_vm2, %v8155_v33, 0.0  ;;  %v8157_v3 = vpop.f32.mrb[31].mxu0  ;;  %8419 = vmatmul.mubr.f32.gmra.mrb[136].mxu0 %v18972_v16 }
 0x9ae   :  { %9219 = vst [vmem:[%s17415_s6 + $0x28] sm:$0xff] %v9155_v56  ;;  %v8894_v29 = vadd.f32 %v8830_v28, %v19051_v26  ;;  %10566 = vmatprep.mubr.msk.f32.mxu0 %vm7404_vm11, %v18970_v46  ;;  %vm8580_vm5 = vcmp.lt.s32.totalorder %v8452_v37, 16 }
 0x9af   :  { %v9156_v57 = vmax.f32 %v9092_v2, 0.0  ;;  %v19060_v2 = vld [vmem:[#allocation4_spill] sm:$0xff] }
 0x9b0   :  { %v8965_v49 = vadd.f32 %v16829_v34, %v8894_v29  ;;  %v8160_v32 = vpop.f32.mrb[32].mxu0  ;;  %v9034_v29 = vld [vmem:[%s17414_s5 + $0x60] sm:$0xff] }
 0x9b1   :  { %9220 = vst [vmem:[%s17415_s6 + $0x30] sm:$0xff] %v9156_v57  ;;  %v8895_v51 = vadd.f32 %v8160_v32, %v19053_v30  ;;  %v8162_v7 = vpop.f32.mrb[33].mxu0  ;;  %8424 = vmatmul.mubr.f32.gmra.mrb[138].mxu0 %v18972_v16 }
 0x9b2   :  { %v9093_v55 = vadd.f32 %v9029_v18, %v8965_v49  ;;  %10567 = vmatprep.mubr.msk.f32.mxu0 %vm7408_vm14, %v18970_v46 }
 0x9b3   :  { %v8966_v4 = vadd.f32 %v16829_v34, %v8895_v51  ;;  %v19061_v51 = vld [vmem:[#allocation171_spill] sm:$0xff] }
 0x9b4   :  { %v9157_v39 = vmax.f32 %v9093_v55, 0.0  ;;  %v8165_v61 = vpop.f32.mrb[34].mxu0  ;;  %v8454_v55 = vadd.s32 1, %v1612_v11 }
 0x9b5   :  { %v9094_v22 = vadd.f32 %v9030_v9, %v8966_v4  ;;  %v8832_v13 = vsel %vm8576_vm1, %v8165_v61, 0.0  ;;  %v8167_v14 = vpop.f32.mrb[35].mxu0  ;;  %8429 = vmatmul.mubr.f32.gmra.mrb[140].mxu0 %v18972_v16  ;;  %v19062_v4 = vld [vmem:[#allocation7_spill] sm:$0xff] }
 0x9b6   :  { %9221 = vst [vmem:[%s17415_s6 + $0x38] sm:$0xff] %v9157_v39  ;;  %v8896_v10 = vadd.f32 %v8832_v13, %v19056_v12  ;;  %10568 = vmatprep.mubr.msk.f32.mxu0 %vm7412_vm3, %v18970_v46  ;;  %v9032_v46 = vld [vmem:[%s17414_s5 + $0x50] sm:$0xff]  ;;  %vm8582_vm15 = vcmp.lt.s32.totalorder %v8454_v55, 16  ;;  %v19063_v13 = vld [vmem:[#allocation26_spill] sm:$0xff] }
 0x9b7   :  { %v9158_v23 = vmax.f32 %v9094_v22, 0.0  ;;  %v9036_v22 = vld [vmem:[%s17414_s5 + $0x70] sm:$0xff]  ;;  %v1614_v14 = vand.u32 15, %v19063_v13 }
 0x9b8   :  { %v8967_v58 = vadd.f32 %v16829_v34, %v8896_v10  ;;  %v8170_v62 = vpop.f32.mrb[36].mxu0 }
 0x9b9   :  { %9222 = vst [vmem:[%s17415_s6 + $0x40] sm:$0xff] %v9158_v23  ;;  %v8897_v59 = vadd.f32 %v8170_v62, %v19057_v40  ;;  %v8172_v53 = vpop.f32.mrb[37].mxu0  ;;  %8434 = vmatmul.mubr.f32.gmra.mrb[142].mxu0 %v18972_v16  ;;  %v19059_v16 = vld [vmem:[#allocation168_spill] sm:$0xff]  ;;  %v19064_v62 = vld [vmem:[#allocation170_spill] sm:$0xff] }
 0x9ba   :  { %v9095_v0 = vadd.f32 %v9031_v36, %v8967_v58 }
 0x9bb   :  { %v8968_v31 = vadd.f32 %v16829_v34, %v8897_v59  ;;  %v8456_v59 = vadd.s32 1, %v1614_v14 }
 0x9bc   :  { %v9159_v17 = vmax.f32 %v9095_v0, 0.0  ;;  %v8175_v44 = vpop.f32.mrb[38].mxu0  ;;  %v9037_v0 = vld [vmem:[%s17414_s5 + $0x78] sm:$0xff] }
 0x9bd   :  { %v9096_v24 = vadd.f32 %v9032_v46, %v8968_v31  ;;  %v8834_v42 = vsel %vm8578_vm12, %v8175_v44, 0.0  ;;  %v8177_v60 = vpop.f32.mrb[39].mxu0  ;;  %vm8584_vm8 = vcmp.lt.s32.totalorder %v8456_v59, 16 }
 0x9be   :  { %9223 = vst [vmem:[%s17415_s6 + $0x48] sm:$0xff] %v9159_v17  ;;  %v8898_v25 = vadd.f32 %v8834_v42, %v19059_v16  ;;  %v19066_v42 = vld [vmem:[#allocation29_spill] sm:$0xff] }
 0x9bf   :  { %v9160_v21 = vmax.f32 %v9096_v24, 0.0  ;;  %v9038_v24 = vld [vmem:[%s17414_s5 + $0x80] sm:$0xff]  ;;  %v1616_v60 = vand.u32 15, %v19066_v42 }
 0x9c0   :  { %v8969_v56 = vadd.f32 %v16829_v34, %v8898_v25  ;;  %v8180_v33 = vpop.f32.mrb[40].mxu0 }
 0x9c1   :  { %9224 = vst [vmem:[%s17415_s6 + $0x50] sm:$0xff] %v9160_v21  ;;  %v8899_v28 = vadd.f32 %v8180_v33, %v19060_v2  ;;  %v8182_v3 = vpop.f32.mrb[41].mxu0  ;;  %v19067_v33 = vld [vmem:[#allocation214_spill] sm:$0xff] }
 0x9c2   :  { %v9097_v26 = vadd.f32 %v9033_v8, %v8969_v56 }
 0x9c3   :  { %v8970_v57 = vadd.f32 %v16829_v34, %v8899_v28  ;;  %v8458_v28 = vadd.s32 1, %v1616_v60 }
 0x9c4   :  { %v9161_v18 = vmax.f32 %v9097_v26, 0.0  ;;  %v8185_v5 = vpop.f32.mrb[42].mxu0  ;;  %v9039_v26 = vld [vmem:[%s17414_s5 + $0x88] sm:$0xff] }
 0x9c5   :  { %v9098_v49 = vadd.f32 %v9034_v29, %v8970_v57  ;;  %v8836_v32 = vsel %vm8580_vm5, %v8185_v5, 0.0  ;;  %v8187_v30 = vpop.f32.mrb[43].mxu0  ;;  %v19068_v57 = vld [vmem:[#allocation15_spill] sm:$0xff]  ;;  %vm8586_vm10 = vcmp.lt.s32.totalorder %v8458_v28, 16 }
 0x9c6   :  { %9225 = vst [vmem:[%s17415_s6 + $0x58] sm:$0xff] %v9161_v18  ;;  %v8900_v7 = vadd.f32 %v8836_v32, %v19061_v51  ;;  %v9040_v32 = vld [vmem:[%s17414_s5 + $0x90] sm:$0xff]  ;;  %v19069_v30 = vld [vmem:[#allocation33_spill] sm:$0xff] }
 0x9c7   :  { %v9162_v9 = vmax.f32 %v9098_v49, 0.0  ;;  %v1618_v51 = vand.u32 15, %v19069_v30 }
 0x9c8   :  { %v8971_v6 = vadd.f32 %v16829_v34, %v8900_v7  ;;  %v8190_v1 = vpop.f32.mrb[44].mxu0 }
 0x9c9   :  { %9226 = vst [vmem:[%s17415_s6 + $0x60] sm:$0xff] %v9162_v9  ;;  %v8901_v54 = vadd.f32 %v8190_v1, %v19062_v4  ;;  %v8192_v39 = vpop.f32.mrb[45].mxu0  ;;  %v19070_v4 = vld [vmem:[#allocation11_spill] sm:$0xff] }
 0x9ca   :  { %v9099_v61 = vadd.f32 %v9035_v38, %v8971_v6  ;;  %v8460_v39 = vadd.s32 1, %v1618_v51  ;;  %v9046_v51 = vld [vmem:[%s17414_s5 + $0xc0] sm:$0xff] }
 0x9cb   :  { %v8972_v12 = vadd.f32 %v16829_v34, %v8901_v54 }
 0x9cc   :  { %v9163_v10 = vmax.f32 %v9099_v61, 0.0  ;;  %v8195_v41 = vpop.f32.mrb[46].mxu0  ;;  %vm8588_vm0 = vcmp.lt.s32.totalorder %v8460_v39, 16 }
 0x9cd   :  { %v9100_v23 = vadd.f32 %v9036_v22, %v8972_v12  ;;  %v8838_v36 = vsel %vm8582_vm15, %v8195_v41, 0.0  ;;  %v8197_v58 = vpop.f32.mrb[47].mxu0  ;;  %v9041_v22 = vld [vmem:[%s17414_s5 + $0x98] sm:$0xff] }
 0x9ce   :  { %9227 = vst [vmem:[%s17415_s6 + $0x68] sm:$0xff] %v9163_v10  ;;  %v8902_v40 = vadd.f32 %v8838_v36, %v19064_v62  ;;  %v19071_v36 = vld [vmem:[#allocation35_spill] sm:$0xff] }
 0x9cf   :  { %v9164_v53 = vmax.f32 %v9100_v23, 0.0  ;;  %v9042_v23 = vld [vmem:[%s17414_s5 + $0xa0] sm:$0xff]  ;;  %v1620_v58 = vand.u32 15, %v19071_v36 }
 0x9d0   :  { %v8973_v46 = vadd.f32 %v16829_v34, %v8902_v40  ;;  %v8200_v43 = vpop.f32.mrb[48].mxu0 }
 0x9d1   :  { %9228 = vst [vmem:[%s17415_s6 + $0x70] sm:$0xff] %v9164_v53  ;;  %v8903_v31 = vadd.f32 %v8200_v43, %v19065_v52  ;;  %v8202_v17 = vpop.f32.mrb[49].mxu0  ;;  %v8462_v43 = vadd.s32 1, %v1620_v58  ;;  %v9048_v58 = vld [vmem:[%s17414_s5 + $0xd0] sm:$0xff] }
 0x9d2   :  { %v9101_v44 = vadd.f32 %v9037_v0, %v8973_v46 }
 0x9d3   :  { %v8974_v16 = vadd.f32 %v16829_v34, %v8903_v31  ;;  %v9043_v31 = vld [vmem:[%s17414_s5 + $0xa8] sm:$0xff]  ;;  %vm8590_vm13 = vcmp.lt.s32.totalorder %v8462_v43, 16 }
 0x9d4   :  { %v9165_v25 = vmax.f32 %v9101_v44, 0.0  ;;  %v8205_v37 = vpop.f32.mrb[50].mxu0 }
 0x9d5   :  { %v9102_v21 = vadd.f32 %v9038_v24, %v8974_v16  ;;  %v8840_v8 = vsel %vm8584_vm8, %v8205_v37, 0.0  ;;  %v8207_v56 = vpop.f32.mrb[51].mxu0  ;;  %v19072_v24 = vld [vmem:[#allocation172_spill] sm:$0xff] }
 0x9d6   :  { %9229 = vst [vmem:[%s17415_s6 + $0x78] sm:$0xff] %v9165_v25  ;;  %v8904_v2 = vadd.f32 %v8840_v8, %v19067_v33  ;;  %v19073_v25 = vld [vmem:[#allocation38_spill] sm:$0xff] }
 0x9d7   :  { %v9166_v3 = vmax.f32 %v9102_v21, 0.0  ;;  %v1622_v37 = vand.u32 15, %v19073_v25 }
 0x9d8   :  { %v8975_v29 = vadd.f32 %v16829_v34, %v8904_v2  ;;  %v8210_v11 = vpop.f32.mrb[52].mxu0 }
 0x9d9   :  { %9230 = vst [vmem:[%s17415_s6 + $0x80] sm:$0xff] %v9166_v3  ;;  %v8905_v18 = vadd.f32 %v8210_v11, %v19068_v57  ;;  %v8212_v5 = vpop.f32.mrb[53].mxu0  ;;  %v19074_v3 = vld [vmem:[#allocation219_spill] sm:$0xff]  ;;  %v9045_v57 = vld [vmem:[%s17414_s5 + $0xb8] sm:$0xff] }
 0x9da   :  { %v9103_v49 = vadd.f32 %v9039_v26, %v8975_v29  ;;  %v8464_v29 = vadd.s32 1, %v1622_v37  ;;  %v9050_v37 = vld [vmem:[%s17414_s5 + $0xe0] sm:$0xff] }
 0x9db   :  { %v8976_v7 = vadd.f32 %v16829_v34, %v8905_v18 }
 0x9dc   :  { %v9167_v55 = vmax.f32 %v9103_v49, 0.0  ;;  %v8215_v9 = vpop.f32.mrb[54].mxu0  ;;  %vm8592_vm7 = vcmp.lt.s32.totalorder %v8464_v29, 16 }
 0x9dd   :  { %v9104_v38 = vadd.f32 %v9040_v32, %v8976_v7  ;;  %v8842_v6 = vsel %vm8586_vm10, %v8215_v9, 0.0  ;;  %v8217_v1 = vpop.f32.mrb[55].mxu0  ;;  %v19075_v7 = vld [vmem:[#allocation41_spill] sm:$0xff] }
 0x9de   :  { %9231 = vst [vmem:[%s17415_s6 + $0x88] sm:$0xff] %v9167_v55  ;;  %v8906_v54 = vadd.f32 %v8842_v6, %v19070_v4  ;;  %v1624_v55 = vand.u32 15, %v19075_v7 }
 0x9df   :  { %v9168_v61 = vmax.f32 %v9104_v38, 0.0 }
 0x9e0   :  { %v8977_v13 = vadd.f32 %v16829_v34, %v8906_v54  ;;  %v8220_v14 = vpop.f32.mrb[56].mxu0 }
 0x9e1   :  { %9232 = vst [vmem:[%s17415_s6 + $0x90] sm:$0xff] %v9168_v61  ;;  %v8907_v12 = vadd.f32 %v8220_v14, %v16127_v45  ;;  %v8222_v10 = vpop.f32.mrb[57].mxu0  ;;  %v8466_v61 = vadd.s32 1, %v1624_v55 }
 0x9e2   :  { %v9105_v41 = vadd.f32 %v9041_v22, %v8977_v13  ;;  %v9047_v13 = vld [vmem:[%s17414_s5 + $0xc8] sm:$0xff]  ;;  %v19077_v10 = vld [vmem:[#allocation173_spill] sm:$0xff] }
 0x9e3   :  { %v8978_v62 = vadd.f32 %v16829_v34, %v8907_v12  ;;  %vm8594_vm6 = vcmp.lt.s32.totalorder %v8466_v61, 16 }
 0x9e4   :  { %v9169_v40 = vmax.f32 %v9105_v41, 0.0  ;;  %v8225_v59 = vpop.f32.mrb[58].mxu0 }
 0x9e5   :  { %v9106_v53 = vadd.f32 %v9042_v23, %v8978_v62  ;;  %v8844_v0 = vsel %vm8588_vm0, %v8225_v59, 0.0  ;;  %v8227_v46 = vpop.f32.mrb[59].mxu0  ;;  %v19078_v62 = vld [vmem:[#allocation45_spill] sm:$0xff] }
 0x9e6   :  { %9233 = vst [vmem:[%s17415_s6 + $0x98] sm:$0xff] %v9169_v40  ;;  %v8908_v45 = vadd.f32 %v8844_v0, %v16138_v20  ;;  %v9044_v20 = vld [vmem:[%s17414_s5 + $0xb0] sm:$0xff]  ;;  %v1626_v40 = vand.u32 15, %v19078_v62 }
 0x9e7   :  { %v9170_v52 = vmax.f32 %v9106_v53, 0.0 }
 0x9e8   :  { %v8979_v17 = vadd.f32 %v16829_v34, %v8908_v45  ;;  %v8230_v44 = vpop.f32.mrb[60].mxu0 }
 0x9e9   :  { %9234 = vst [vmem:[%s17415_s6 + $0xa0] sm:$0xff] %v9170_v52  ;;  %v8909_v42 = vadd.f32 %v8230_v44, %v19072_v24  ;;  %v8232_v60 = vpop.f32.mrb[61].mxu0  ;;  %v19079_v52 = vld [vmem:[#allocation22_spill] sm:$0xff]  ;;  %v9049_v24 = vld [vmem:[%s17414_s5 + $0xd8] sm:$0xff] }
 0x9ea   :  { %v9107_v16 = vadd.f32 %v9043_v31, %v8979_v17  ;;  %v8468_v17 = vadd.s32 1, %v1626_v40 }
 0x9eb   :  { %v8980_v21 = vadd.f32 %v16829_v34, %v8909_v42 }
 0x9ec   :  { %v9171_v8 = vmax.f32 %v9107_v16, 0.0  ;;  %v8235_v56 = vpop.f32.mrb[62].mxu0  ;;  %vm8596_vm4 = vcmp.lt.s32.totalorder %v8468_v17, 16 }
 0x9ed   :  { %v9108_v33 = vadd.f32 %v9044_v20, %v8980_v21  ;;  %v8846_v2 = vsel %vm8590_vm13, %v8235_v56, 0.0  ;;  %v8237_v28 = vpop.f32.mrb[63].mxu0  ;;  %v1628_v21 = vand.u32 15, %v19005_v50 }
 0x9ee   :  { %9235 = vst [vmem:[%s17415_s6 + $0xa8] sm:$0xff] %v9171_v8  ;;  %v8910_v26 = vadd.f32 %v8846_v2, %v19074_v3 }
 0x9ef   :  { %v9172_v11 = vmax.f32 %v9108_v33, 0.0 }
 0x9f0   :  { %v8981_v18 = vadd.f32 %v16829_v34, %v8910_v26  ;;  %v8240_v5 = vpop.f32.mrb[64].mxu0  ;;  %v8470_v26 = vadd.s32 1, %v1628_v21 }
 0x9f1   :  { %9236 = vst [vmem:[%s17415_s6 + $0xb0] sm:$0xff] %v9172_v11  ;;  %v8911_v49 = vadd.f32 %v8240_v5, %v16160_v48  ;;  %v8242_v32 = vpop.f32.mrb[65].mxu0  ;;  %v19076_v48 = vld [vmem:[#allocation19_spill] sm:$0xff] }
 0x9f2   :  { %v9109_v30 = vadd.f32 %v9045_v57, %v8981_v18  ;;  %v9051_v11 = vld [vmem:[%s17414_s5 + $0xe8] sm:$0xff]  ;;  %vm8598_vm9 = vcmp.lt.s32.totalorder %v8470_v26, 16  ;;  %v19080_v32 = vld [vmem:[#allocation53_spill] sm:$0xff] }
 0x9f3   :  { %v8982_v9 = vadd.f32 %v16829_v34, %v8911_v49 }
 0x9f4   :  { %v9173_v38 = vmax.f32 %v9109_v30, 0.0  ;;  %v8245_v6 = vpop.f32.mrb[66].mxu0  ;;  %v1630_v30 = vand.u32 15, %v19080_v32 }
 0x9f5   :  { %v9110_v1 = vadd.f32 %v9046_v51, %v8982_v9  ;;  %v8848_v4 = vsel %vm8592_vm7, %v8245_v6, 0.0  ;;  %v8247_v54 = vpop.f32.mrb[67].mxu0 }
 0x9f6   :  { %9237 = vst [vmem:[%s17415_s6 + $0xb8] sm:$0xff] %v9173_v38  ;;  %v8912_v39 = vadd.f32 %v8848_v4, %v19076_v48  ;;  %v8472_v4 = vadd.s32 1, %v1630_v30  ;;  %v9053_v48 = vld [vmem:[%s17414_s5 + $0xf8] sm:$0xff] }
 0x9f7   :  { %v9174_v22 = vmax.f32 %v9110_v1, 0.0 }
 0x9f8   :  { %v8983_v14 = vadd.f32 %v16829_v34, %v8912_v39  ;;  %v8250_v12 = vpop.f32.mrb[68].mxu0  ;;  %vm8600_vm2 = vcmp.lt.s32.totalorder %v8472_v4, 16 }
 0x9f9   :  { %9238 = vst [vmem:[%s17415_s6 + $0xc0] sm:$0xff] %v9174_v22  ;;  %v8913_v41 = vadd.f32 %v8250_v12, %v19077_v10  ;;  %v8252_v23 = vpop.f32.mrb[69].mxu0  ;;  %v19082_v22 = vld [vmem:[#allocation227_spill] sm:$0xff]  ;;  %v9054_v10 = vld [vmem:[%s17414_s5 + $0x100] sm:$0xff] }
 0x9fa   :  { %v9111_v36 = vadd.f32 %v9047_v13, %v8983_v14 }
 0x9fb   :  { %v8984_v59 = vadd.f32 %v16829_v34, %v8913_v41  ;;  %v19083_v41 = vld [vmem:[#allocation56_spill] sm:$0xff] }
 0x9fc   :  { %v9175_v53 = vmax.f32 %v9111_v36, 0.0  ;;  %v8255_v0 = vpop.f32.mrb[70].mxu0  ;;  %v1632_v23 = vand.u32 15, %v19083_v41 }
 0x9fd   :  { %v9112_v46 = vadd.f32 %v9048_v58, %v8984_v59  ;;  %v8850_v45 = vsel %vm8594_vm6, %v8255_v0, 0.0  ;;  %v8257_v43 = vpop.f32.mrb[71].mxu0  ;;  %v19084_v0 = vld [vmem:[#allocation175_spill] sm:$0xff] }
 0x9fe   :  { %9239 = vst [vmem:[%s17415_s6 + $0xc8] sm:$0xff] %v9175_v53  ;;  %v8914_v31 = vadd.f32 %v8850_v45, %v19079_v52  ;;  %v8474_v45 = vadd.s32 1, %v1632_v23  ;;  %v9055_v52 = vld [vmem:[%s17414_s5 + $0x108] sm:$0xff] }
 0x9ff   :  { %v9176_v44 = vmax.f32 %v9112_v46, 0.0 }
 0xa00   :  { %v8985_v42 = vadd.f32 %v16829_v34, %v8914_v31  ;;  %v8260_v60 = vpop.f32.mrb[72].mxu0  ;;  %vm8602_vm11 = vcmp.lt.s32.totalorder %v8474_v45, 16 }
 0xa01   :  { %9240 = vst [vmem:[%s17415_s6 + $0xd0] sm:$0xff] %v9176_v44  ;;  %v8915_v16 = vadd.f32 %v8260_v60, %v16192_v63  ;;  %v8262_v20 = vpop.f32.mrb[73].mxu0  ;;  %v19085_v44 = vld [vmem:[#allocation174_spill] sm:$0xff] }
 0xa02   :  { %v9113_v25 = vadd.f32 %v9049_v24, %v8985_v42  ;;  %v19086_v20 = vld [vmem:[#allocation60_spill] sm:$0xff] }
 0xa03   :  { %v8986_v8 = vadd.f32 %v16829_v34, %v8915_v16  ;;  %v9056_v16 = vld [vmem:[%s17414_s5 + $0x110] sm:$0xff] }
 0xa04   :  { %v9177_v56 = vmax.f32 %v9113_v25, 0.0  ;;  %v8265_v33 = vpop.f32.mrb[74].mxu0  ;;  %v1634_v25 = vand.u32 15, %v19086_v20 }
 0xa05   :  { %v9114_v2 = vadd.f32 %v9050_v37, %v8986_v8  ;;  %v8852_v28 = vsel %vm8596_vm4, %v8265_v33, 0.0  ;;  %v8267_v3 = vpop.f32.mrb[75].mxu0 }
 0xa06   :  { %9241 = vst [vmem:[%s17415_s6 + $0xd8] sm:$0xff] %v9177_v56  ;;  %v8916_v63 = vadd.f32 %v8852_v28, %v16203_v27  ;;  %v9052_v27 = vld [vmem:[%s17414_s5 + $0xf0] sm:$0xff]  ;;  %v19087_v28 = vld [vmem:[#allocation225_spill] sm:$0xff] }
 0xa07   :  { %v9178_v29 = vmax.f32 %v9114_v2, 0.0 }
 0xa08   :  { %v8987_v50 = vadd.f32 %v16829_v34, %v8916_v63  ;;  %v8270_v57 = vpop.f32.mrb[76].mxu0  ;;  %v8476_v63 = vadd.s32 1, %v1634_v25 }
 0xa09   :  { %9242 = vst [vmem:[%s17415_s6 + $0xe0] sm:$0xff] %v9178_v29  ;;  %v8917_v18 = vadd.f32 %v8270_v57, %v16190_v15  ;;  %v8272_v5 = vpop.f32.mrb[77].mxu0  ;;  %v19081_v15 = vld [vmem:[#allocation221_spill] sm:$0xff] }
 0xa0a   :  { %v9115_v49 = vadd.f32 %v9051_v11, %v8987_v50  ;;  %v9057_v29 = vld [vmem:[%s17414_s5 + $0x118] sm:$0xff]  ;;  %vm8604_vm14 = vcmp.lt.s32.totalorder %v8476_v63, 16 }
 0xa0b   :  { %v8988_v51 = vadd.f32 %v16829_v34, %v8917_v18 }
 0xa0c   :  { %v9179_v7 = vmax.f32 %v9115_v49, 0.0  ;;  %v8275_v55 = vpop.f32.mrb[78].mxu0  ;;  %v9058_v49 = vld [vmem:[%s17414_s5 + $0x120] sm:$0xff] }
 0xa0d   :  { %v9116_v9 = vadd.f32 %v9052_v27, %v8988_v51  ;;  %v8854_v38 = vsel %vm8598_vm9, %v8275_v55, 0.0  ;;  %v8277_v6 = vpop.f32.mrb[79].mxu0  ;;  %v19088_v27 = vld [vmem:[#allocation64_spill] sm:$0xff] }
 0xa0e   :  { %9243 = vst [vmem:[%s17415_s6 + $0xe8] sm:$0xff] %v9179_v7  ;;  %v8918_v1 = vadd.f32 %v8854_v38, %v19081_v15  ;;  %v1636_v32 = vand.u32 15, %v19088_v27 }
 0xa0f   :  { %v9180_v54 = vmax.f32 %v9116_v9, 0.0 }
 0xa10   :  { %v8989_v39 = vadd.f32 %v16829_v34, %v8918_v1  ;;  %v8280_v61 = vpop.f32.mrb[80].mxu0  ;;  %v8478_v6 = vadd.s32 1, %v1636_v32  ;;  %v9059_v1 = vld [vmem:[%s17414_s5 + $0x128] sm:$0xff] }
 0xa11   :  { %9244 = vst [vmem:[%s17415_s6 + $0xf0] sm:$0xff] %v9180_v54  ;;  %v8919_v13 = vadd.f32 %v8280_v61, %v19082_v22  ;;  %v8282_v14 = vpop.f32.mrb[81].mxu0 }
 0xa12   :  { %v9117_v12 = vadd.f32 %v9053_v48, %v8989_v39  ;;  %v19089_v48 = vld [vmem:[#allocation28_spill] sm:$0xff]  ;;  %vm8606_vm1 = vcmp.lt.s32.totalorder %v8478_v6, 16  ;;  %v9065_v6 = vld [vmem:[%s17414_s5 + $0x158] sm:$0xff] }
 0xa13   :  { %v8990_v36 = vadd.f32 %v16829_v34, %v8919_v13  ;;  %v19090_v13 = vld [vmem:[#allocation68_spill] sm:$0xff] }
 0xa14   :  { %v9181_v58 = vmax.f32 %v9117_v12, 0.0  ;;  %v8285_v62 = vpop.f32.mrb[82].mxu0  ;;  %v1638_v14 = vand.u32 15, %v19090_v13 }
 0xa15   :  { %v9118_v40 = vadd.f32 %v9054_v10, %v8990_v36  ;;  %v8856_v59 = vsel %vm8600_vm2, %v8285_v62, 0.0  ;;  %v8287_v53 = vpop.f32.mrb[83].mxu0  ;;  %v19091_v62 = vld [vmem:[#allocation228_spill] sm:$0xff] }
 0xa16   :  { %9245 = vst [vmem:[%s17415_s6 + $0xf8] sm:$0xff] %v9181_v58  ;;  %v8920_v46 = vadd.f32 %v8856_v59, %v19084_v0  ;;  %v8480_v59 = vadd.s32 1, %v1638_v14  ;;  %v9061_v0 = vld [vmem:[%s17414_s5 + $0x138] sm:$0xff] }
 0xa17   :  { %v9182_v43 = vmax.f32 %v9118_v40, 0.0 }
 0xa18   :  { %v8991_v31 = vadd.f32 %v16829_v34, %v8920_v46  ;;  %v8290_v17 = vpop.f32.mrb[84].mxu0  ;;  %vm8608_vm3 = vcmp.lt.s32.totalorder %v8480_v59, 16 }
 0xa19   :  { %9246 = vst [vmem:[%s17415_s6 + $0x100] sm:$0xff] %v9182_v43  ;;  %v8921_v24 = vadd.f32 %v8290_v17, %v19085_v44  ;;  %v8292_v42 = vpop.f32.mrb[85].mxu0  ;;  %v19092_v43 = vld [vmem:[#allocation226_spill] sm:$0xff] }
 0xa1a   :  { %v9119_v60 = vadd.f32 %v9055_v52, %v8991_v31  ;;  %v9062_v44 = vld [vmem:[%s17414_s5 + $0x140] sm:$0xff] }
 0xa1b   :  { %v8992_v37 = vadd.f32 %v16829_v34, %v8921_v24  ;;  %v19093_v24 = vld [vmem:[#allocation72_spill] sm:$0xff] }
 0xa1c   :  { %v9183_v21 = vmax.f32 %v9119_v60, 0.0  ;;  %v8295_v8 = vpop.f32.mrb[86].mxu0  ;;  %v1640_v42 = vand.u32 15, %v19093_v24 }
 0xa1d   :  { %v9120_v56 = vadd.f32 %v9056_v16, %v8992_v37  ;;  %v8858_v33 = vsel %vm8602_vm11, %v8295_v8, 0.0  ;;  %v8297_v2 = vpop.f32.mrb[87].mxu0  ;;  %v19094_v8 = vld [vmem:[#allocation231_spill] sm:$0xff] }
 0xa1e   :  { %9247 = vst [vmem:[%s17415_s6 + $0x108] sm:$0xff] %v9183_v21  ;;  %v8922_v3 = vadd.f32 %v8858_v33, %v19087_v28  ;;  %v8482_v33 = vadd.s32 1, %v1640_v42  ;;  %v9063_v28 = vld [vmem:[%s17414_s5 + $0x148] sm:$0xff] }
 0xa1f   :  { %v9184_v26 = vmax.f32 %v9120_v56, 0.0 }
 0xa20   :  { %v8993_v11 = vadd.f32 %v16829_v34, %v8922_v3  ;;  %v8300_v50 = vpop.f32.mrb[88].mxu0  ;;  %vm8610_vm12 = vcmp.lt.s32.totalorder %v8482_v33, 16 }
 0xa21   :  { %9248 = vst [vmem:[%s17415_s6 + $0x110] sm:$0xff] %v9184_v26  ;;  %v8923_v57 = vadd.f32 %v8300_v50, %v16244_v19  ;;  %v8302_v18 = vpop.f32.mrb[89].mxu0  ;;  %v19095_v26 = vld [vmem:[#allocation25_spill] sm:$0xff] }
 0xa22   :  { %v9121_v5 = vadd.f32 %v9057_v29, %v8993_v11  ;;  %v19096_v18 = vld [vmem:[#allocation76_spill] sm:$0xff] }
 0xa23   :  { %v8994_v30 = vadd.f32 %v16829_v34, %v8923_v57  ;;  %v9064_v57 = vld [vmem:[%s17414_s5 + $0x150] sm:$0xff] }
 0xa24   :  { %v9185_v51 = vmax.f32 %v9121_v5, 0.0  ;;  %v8305_v7 = vpop.f32.mrb[90].mxu0  ;;  %v1642_v5 = vand.u32 15, %v19096_v18 }
 0xa25   :  { %v9122_v55 = vadd.f32 %v9058_v49, %v8994_v30  ;;  %v8860_v9 = vsel %vm8604_vm14, %v8305_v7, 0.0  ;;  %v8307_v38 = vpop.f32.mrb[91].mxu0 }
 0xa26   :  { %9249 = vst [vmem:[%s17415_s6 + $0x118] sm:$0xff] %v9185_v51  ;;  %v8924_v19 = vadd.f32 %v8860_v9, %v16250_v35  ;;  %v9060_v35 = vld [vmem:[%s17414_s5 + $0x130] sm:$0xff]  ;;  %v8484_v38 = vadd.s32 1, %v1642_v5 }
 0xa27   :  { %v9186_v15 = vmax.f32 %v9122_v55, 0.0  ;;  %v19097_v55 = vld [vmem:[#allocation176_spill] sm:$0xff] }
 0xa28   :  { %v8995_v4 = vadd.f32 %v16829_v34, %v8924_v19  ;;  %v8310_v54 = vpop.f32.mrb[92].mxu0  ;;  %vm8612_vm5 = vcmp.lt.s32.totalorder %v8484_v38, 16 }
 0xa29   :  { %9250 = vst [vmem:[%s17415_s6 + $0x120] sm:$0xff] %v9186_v15  ;;  %v8925_v39 = vadd.f32 %v8310_v54, %v19089_v48  ;;  %v8312_v61 = vpop.f32.mrb[93].mxu0 }
 0xa2a   :  { %v9123_v22 = vadd.f32 %v9059_v1, %v8995_v4  ;;  %v19098_v4 = vld [vmem:[#allocation177_spill] sm:$0xff]  ;;  %v9066_v61 = vld [vmem:[%s17414_s5 + $0x160] sm:$0xff] }
 0xa2b   :  { %v8996_v12 = vadd.f32 %v16829_v34, %v8925_v39 }
 0xa2c   :  { %v9187_v10 = vmax.f32 %v9123_v22, 0.0  ;;  %v8315_v41 = vpop.f32.mrb[94].mxu0  ;;  %v1644_v22 = vand.u32 15, %v19021_v47 }
 0xa2d   :  { %v9124_v23 = vadd.f32 %v9060_v35, %v8996_v12  ;;  %v8862_v36 = vsel %vm8606_vm1, %v8315_v41, 0.0  ;;  %v8317_v58 = vpop.f32.mrb[95].mxu0 }
 0xa2e   :  { %9251 = vst [vmem:[%s17415_s6 + $0x128] sm:$0xff] %v9187_v10  ;;  %v8926_v40 = vadd.f32 %v8862_v36, %v19091_v62  ;;  %v8486_v58 = vadd.s32 1, %v1644_v22 }
 0xa2f   :  { %v9188_v53 = vmax.f32 %v9124_v23, 0.0  ;;  %v19099_v23 = vld [vmem:[#allocation232_spill] sm:$0xff] }
 0xa30   :  { %v8997_v46 = vadd.f32 %v16829_v34, %v8926_v40  ;;  %v8320_v45 = vpop.f32.mrb[96].mxu0  ;;  %v9067_v40 = vld [vmem:[%s17414_s5 + $0x168] sm:$0xff]  ;;  %vm8614_vm15 = vcmp.lt.s32.totalorder %v8486_v58, 16 }
 0xa31   :  { %9252 = vst [vmem:[%s17415_s6 + $0x130] sm:$0xff] %v9188_v53  ;;  %v8927_v52 = vadd.f32 %v8320_v45, %v19092_v43  ;;  %v8322_v31 = vpop.f32.mrb[97].mxu0  ;;  %v19100_v53 = vld [vmem:[#allocation229_spill] sm:$0xff]  ;;  %v9068_v43 = vld [vmem:[%s17414_s5 + $0x170] sm:$0xff] }
 0xa32   :  { %v9125_v17 = vadd.f32 %v9061_v0, %v8997_v46 }
 0xa33   :  { %v8998_v60 = vadd.f32 %v16829_v34, %v8927_v52  ;;  %v19101_v52 = vld [vmem:[#allocation84_spill] sm:$0xff] }
 0xa34   :  { %v9189_v16 = vmax.f32 %v9125_v17, 0.0  ;;  %v8325_v20 = vpop.f32.mrb[98].mxu0  ;;  %v1646_v31 = vand.u32 15, %v19101_v52 }
 0xa35   :  { %v9126_v25 = vadd.f32 %v9062_v44, %v8998_v60  ;;  %v8864_v37 = vsel %vm8608_vm3, %v8325_v20, 0.0  ;;  %v8327_v21 = vpop.f32.mrb[99].mxu0  ;;  %v19102_v20 = vld [vmem:[#allocation34_spill] sm:$0xff] }
 0xa36   :  { %9253 = vst [vmem:[%s17415_s6 + $0x138] sm:$0xff] %v9189_v16  ;;  %v8928_v56 = vadd.f32 %v8864_v37, %v19094_v8  ;;  %v8488_v37 = vadd.s32 1, %v1646_v31  ;;  %v9069_v8 = vld [vmem:[%s17414_s5 + $0x178] sm:$0xff] }
 0xa37   :  { %v9190_v2 = vmax.f32 %v9126_v25, 0.0 }
 0xa38   :  { %v8999_v3 = vadd.f32 %v16829_v34, %v8928_v56  ;;  %v8330_v63 = vpop.f32.mrb[100].mxu0  ;;  %vm8616_vm8 = vcmp.lt.s32.totalorder %v8488_v37, 16 }
 0xa39   :  { %9254 = vst [vmem:[%s17415_s6 + $0x140] sm:$0xff] %v9190_v2  ;;  %v8929_v29 = vadd.f32 %v8330_v63, %v19095_v26  ;;  %v8332_v11 = vpop.f32.mrb[101].mxu0  ;;  %v19103_v2 = vld [vmem:[#allocation230_spill] sm:$0xff] }
 0xa3a   :  { %v9127_v50 = vadd.f32 %v9063_v28, %v8999_v3  ;;  %v9070_v26 = vld [vmem:[%s17414_s5 + $0x180] sm:$0xff] }
 0xa3b   :  { %v9000_v49 = vadd.f32 %v16829_v34, %v8929_v29  ;;  %v19104_v29 = vld [vmem:[#allocation88_spill] sm:$0xff] }
 0xa3c   :  { %v9191_v27 = vmax.f32 %v9127_v50, 0.0  ;;  %v8335_v32 = vpop.f32.mrb[102].mxu0  ;;  %v1648_v11 = vand.u32 15, %v19104_v29 }
 0xa3d   :  { %v9128_v30 = vadd.f32 %v9064_v57, %v9000_v49  ;;  %v8866_v51 = vsel %vm8610_vm12, %v8335_v32, 0.0  ;;  %v8337_v7 = vpop.f32.mrb[103].mxu0  ;;  %v19105_v32 = vld [vmem:[#allocation235_spill] sm:$0xff] }
 0xa3e   :  { %9255 = vst [vmem:[%s17415_s6 + $0x148] sm:$0xff] %v9191_v27  ;;  %v8930_v9 = vadd.f32 %v8866_v51, %v19097_v55  ;;  %v8490_v51 = vadd.s32 1, %v1648_v11  ;;  %v9071_v55 = vld [vmem:[%s17414_s5 + $0x188] sm:$0xff] }
 0xa3f   :  { %v9192_v19 = vmax.f32 %v9128_v30, 0.0 }
 0xa40   :  { %v9001_v15 = vadd.f32 %v16829_v34, %v8930_v9  ;;  %v8340_v1 = vpop.f32.mrb[104].mxu0  ;;  %vm8618_vm10 = vcmp.lt.s32.totalorder %v8490_v51, 16 }
 0xa41   :  { %9256 = vst [vmem:[%s17415_s6 + $0x150] sm:$0xff] %v9192_v19  ;;  %v8931_v54 = vadd.f32 %v8340_v1, %v19098_v4  ;;  %v8342_v48 = vpop.f32.mrb[105].mxu0  ;;  %v19106_v19 = vld [vmem:[#allocation32_spill] sm:$0xff] }
 0xa42   :  { %v9129_v39 = vadd.f32 %v9065_v6, %v9001_v15  ;;  %v9072_v4 = vld [vmem:[%s17414_s5 + $0x190] sm:$0xff] }
 0xa43   :  { %v9002_v35 = vadd.f32 %v16829_v34, %v8931_v54  ;;  %v19107_v54 = vld [vmem:[#allocation92_spill] sm:$0xff] }
 0xa44   :  { %v9193_v13 = vmax.f32 %v9129_v39, 0.0  ;;  %v8345_v14 = vpop.f32.mrb[106].mxu0  ;;  %v1650_v48 = vand.u32 15, %v19107_v54 }
 0xa45   :  { %v9130_v12 = vadd.f32 %v9066_v61, %v9002_v35  ;;  %v8868_v10 = vsel %vm8612_vm5, %v8345_v14, 0.0  ;;  %v8347_v41 = vpop.f32.mrb[107].mxu0 }
 0xa46   :  { %9257 = vst [vmem:[%s17415_s6 + $0x158] sm:$0xff] %v9193_v13  ;;  %v8932_v36 = vadd.f32 %v8868_v10, %v19099_v23  ;;  %v8492_v41 = vadd.s32 1, %v1650_v48 }
 0xa47   :  { %v9194_v62 = vmax.f32 %v9130_v12, 0.0  ;;  %v19108_v12 = vld [vmem:[#allocation178_spill] sm:$0xff] }
 0xa48   :  { %v9003_v47 = vadd.f32 %v16829_v34, %v8932_v36  ;;  %v8350_v59 = vpop.f32.mrb[108].mxu0  ;;  %v9073_v36 = vld [vmem:[%s17414_s5 + $0x198] sm:$0xff]  ;;  %vm8620_vm0 = vcmp.lt.s32.totalorder %v8492_v41, 16 }
 0xa49   :  { %9258 = vst [vmem:[%s17415_s6 + $0x160] sm:$0xff] %v9194_v62  ;;  %v8933_v0 = vadd.f32 %v8350_v59, %v19100_v53  ;;  %v8352_v46 = vpop.f32.mrb[109].mxu0 }
 0xa4a   :  { %v9131_v45 = vadd.f32 %v9067_v40, %v9003_v47  ;;  %v19109_v40 = vld [vmem:[#allocation179_spill] sm:$0xff]  ;;  %v19110_v46 = vld [vmem:[#allocation96_spill] sm:$0xff] }
 0xa4b   :  { %v9004_v17 = vadd.f32 %v16829_v34, %v8933_v0  ;;  %v9074_v0 = vld [vmem:[%s17414_s5 + $0x1a0] sm:$0xff] }
 0xa4c   :  { %v9195_v44 = vmax.f32 %v9131_v45, 0.0  ;;  %v8355_v24 = vpop.f32.mrb[110].mxu0  ;;  %v1652_v45 = vand.u32 15, %v19110_v46 }
 0xa4d   :  { %v9132_v42 = vadd.f32 %v9068_v43, %v9004_v17  ;;  %v8870_v60 = vsel %vm8614_vm15, %v8355_v24, 0.0  ;;  %v8357_v16 = vpop.f32.mrb[111].mxu0 }
 0xa4e   :  { %9259 = vst [vmem:[%s17415_s6 + $0x168] sm:$0xff] %v9195_v44  ;;  %v8934_v25 = vadd.f32 %v8870_v60, %v19102_v20  ;;  %v8494_v16 = vadd.s32 1, %v1652_v45 }
 0xa4f   :  { %v9196_v21 = vmax.f32 %v9132_v42, 0.0  ;;  %v19111_v42 = vld [vmem:[#allocation236_spill] sm:$0xff] }
 0xa50   :  { %v9005_v56 = vadd.f32 %v16829_v34, %v8934_v25  ;;  %v8360_v33 = vpop.f32.mrb[112].mxu0  ;;  %v17274_v34 = vld [vmem:[%s17413_s4] ss:$0 sm:$0xff]  ;;  %v9075_v25 = vld [vmem:[%s17414_s5 + $0x1a8] sm:$0xff]  ;;  %vm8622_vm13 = vcmp.lt.s32.totalorder %v8494_v16, 16 }
 0xa51   :  { %9260 = vst [vmem:[%s17415_s6 + $0x170] sm:$0xff] %v9196_v21  ;;  %v8935_v28 = vadd.f32 %v8360_v33, %v19103_v2  ;;  %v8362_v3 = vpop.f32.mrb[113].mxu0 }
 0xa52   :  { %v9133_v63 = vadd.f32 %v9069_v8, %v9005_v56  ;;  %v19112_v8 = vld [vmem:[#allocation233_spill] sm:$0xff]  ;;  %v19113_v3 = vld [vmem:[#allocation100_spill] sm:$0xff] }
 0xa53   :  { %v9006_v50 = vadd.f32 %v17274_v34, %v8935_v28  ;;  %v9076_v28 = vld [vmem:[%s17414_s5 + $0x1b0] sm:$0xff] }
 0xa54   :  { %v9197_v57 = vmax.f32 %v9133_v63, 0.0  ;;  %v8365_v18 = vpop.f32.mrb[114].mxu0  ;;  %v1654_v63 = vand.u32 15, %v19113_v3 }
 0xa55   :  { %v9134_v5 = vadd.f32 %v9070_v26, %v9006_v50  ;;  %v8872_v49 = vsel %vm8616_vm8, %v8365_v18, 0.0  ;;  %v8367_v27 = vpop.f32.mrb[115].mxu0 }
 0xa56   :  { %9261 = vst [vmem:[%s17415_s6 + $0x178] sm:$0xff] %v9197_v57  ;;  %v8936_v30 = vadd.f32 %v8872_v49, %v19105_v32  ;;  %v8496_v27 = vadd.s32 1, %v1654_v63 }
 0xa57   :  { %v9198_v7 = vmax.f32 %v9134_v5, 0.0  ;;  %v19114_v5 = vld [vmem:[#allocation40_spill] sm:$0xff] }
 0xa58   :  { %v9007_v9 = vadd.f32 %v17274_v34, %v8936_v30  ;;  %v8370_v38 = vpop.f32.mrb[116].mxu0  ;;  %v9077_v30 = vld [vmem:[%s17414_s5 + $0x1b8] sm:$0xff]  ;;  %vm8624_vm7 = vcmp.lt.s32.totalorder %v8496_v27, 16 }
 0xa59   :  { %9262 = vst [vmem:[%s17415_s6 + $0x180] sm:$0xff] %v9198_v7  ;;  %v8937_v6 = vadd.f32 %v8370_v38, %v19106_v19  ;;  %v8372_v15 = vpop.f32.mrb[117].mxu0 }
 0xa5a   :  { %v9135_v1 = vadd.f32 %v9071_v55, %v9007_v9  ;;  %v19115_v55 = vld [vmem:[#allocation234_spill] sm:$0xff]  ;;  %v19116_v15 = vld [vmem:[#allocation104_spill] sm:$0xff] }
 0xa5b   :  { %v9008_v39 = vadd.f32 %v17274_v34, %v8937_v6  ;;  %v9078_v6 = vld [vmem:[%s17414_s5 + $0x1c0] sm:$0xff] }
 0xa5c   :  { %v9199_v61 = vmax.f32 %v9135_v1, 0.0  ;;  %v8375_v22 = vpop.f32.mrb[118].mxu0  ;;  %v1656_v1 = vand.u32 15, %v19116_v15 }
 0xa5d   :  { %v9136_v35 = vadd.f32 %v9072_v4, %v9008_v39  ;;  %v8874_v13 = vsel %vm8618_vm10, %v8375_v22, 0.0  ;;  %v8377_v14 = vpop.f32.mrb[119].mxu0 }
 0xa5e   :  { %9263 = vst [vmem:[%s17415_s6 + $0x188] sm:$0xff] %v9199_v61  ;;  %v8938_v10 = vadd.f32 %v8874_v13, %v19108_v12  ;;  %v8498_v14 = vadd.s32 1, %v1656_v1 }
 0xa5f   :  { %v9200_v23 = vmax.f32 %v9136_v35, 0.0  ;;  %v19117_v35 = vld [vmem:[#allocation239_spill] sm:$0xff] }
 0xa60   :  { %v9009_v58 = vadd.f32 %v17274_v34, %v8938_v10  ;;  %v8380_v62 = vpop.f32.mrb[120].mxu0  ;;  %v9079_v10 = vld [vmem:[%s17414_s5 + $0x1c8] sm:$0xff]  ;;  %vm8626_vm6 = vcmp.lt.s32.totalorder %v8498_v14, 16 }
 0xa61   :  { %9264 = vst [vmem:[%s17415_s6 + $0x190] sm:$0xff] %v9200_v23  ;;  %v8939_v47 = vadd.f32 %v8380_v62, %v19109_v40  ;;  %v8382_v59 = vpop.f32.mrb[121].mxu0 }
 0xa62   :  { %v9137_v53 = vadd.f32 %v9073_v36, %v9009_v58  ;;  %v19118_v36 = vld [vmem:[#allocation37_spill] sm:$0xff]  ;;  %v19119_v59 = vld [vmem:[#allocation108_spill] sm:$0xff] }
 0xa63   :  { %v9010_v43 = vadd.f32 %v17274_v34, %v8939_v47  ;;  %v9080_v47 = vld [vmem:[%s17414_s5 + $0x1d0] sm:$0xff] }
 0xa64   :  { %v9201_v52 = vmax.f32 %v9137_v53, 0.0  ;;  %v8385_v31 = vpop.f32.mrb[122].mxu0  ;;  %v1658_v53 = vand.u32 15, %v19119_v59 }
 0xa65   :  { %v9138_v17 = vadd.f32 %v9074_v0, %v9010_v43  ;;  %v8876_v44 = vsel %vm8620_vm0, %v8385_v31, 0.0  ;;  %v8387_v24 = vpop.f32.mrb[123].mxu0 }
 0xa66   :  { %9265 = vst [vmem:[%s17415_s6 + $0x198] sm:$0xff] %v9201_v52  ;;  %v8940_v60 = vadd.f32 %v8876_v44, %v19111_v42  ;;  %v8500_v24 = vadd.s32 1, %v1658_v53 }
 0xa67   :  { %v9202_v20 = vmax.f32 %v9138_v17, 0.0  ;;  %v19120_v17 = vld [vmem:[#allocation181_spill] sm:$0xff] }
 0xa68   :  { %v9011_v37 = vadd.f32 %v17274_v34, %v8940_v60  ;;  %v8390_v21 = vpop.f32.mrb[124].mxu0  ;;  %v9081_v60 = vld [vmem:[%s17414_s5 + $0x1d8] sm:$0xff]  ;;  %vm8628_vm4 = vcmp.lt.s32.totalorder %v8500_v24, 16 }
 0xa69   :  { %9266 = vst [vmem:[%s17415_s6 + $0x1a0] sm:$0xff] %v9202_v20  ;;  %v8941_v56 = vadd.f32 %v8390_v21, %v19112_v8  ;;  %v8392_v33 = vpop.f32.mrb[125].mxu0 }
 0xa6a   :  { %v9139_v2 = vadd.f32 %v9075_v25, %v9011_v37  ;;  %v19121_v25 = vld [vmem:[#allocation124_spill] sm:$0xff] }
 0xa6b   :  { %v9012_v26 = vadd.f32 %v17274_v34, %v8941_v56  ;;  %v9082_v56 = vld [vmem:[%s17414_s5 + $0x1e0] sm:$0xff]  ;;  %v19122_v33 = vld [vmem:[#allocation112_spill] sm:$0xff] }
 0xa6c   :  { %v9203_v29 = vmax.f32 %v9139_v2, 0.0  ;;  %v8395_v11 = vpop.f32.mrb[126].mxu0  ;;  %v1660_v2 = vand.u32 15, %v19122_v33 }
 0xa6d   :  { %v9140_v50 = vadd.f32 %v9076_v28, %v9012_v26  ;;  %v8878_v57 = vsel %vm8622_vm13, %v8395_v11, 0.0  ;;  %v8397_v18 = vpop.f32.mrb[127].mxu0 }
 0xa6e   :  { %9267 = vst [vmem:[%s17415_s6 + $0x1a8] sm:$0xff] %v9203_v29  ;;  %v8942_v49 = vadd.f32 %v8878_v57, %v19114_v5  ;;  %v8502_v18 = vadd.s32 1, %v1660_v2 }
 0xa6f   :  { %v9204_v32 = vmax.f32 %v9140_v50, 0.0  ;;  %v19123_v50 = vld [vmem:[#allocation183_spill] sm:$0xff] }
 0xa70   :  { %v9013_v51 = vadd.f32 %v17274_v34, %v8942_v49  ;;  %v8400_v7 = vpop.f32.mrb[128].mxu0  ;;  %v9083_v49 = vld [vmem:[%s17414_s5 + $0x1e8] sm:$0xff]  ;;  %vm8630_vm9 = vcmp.lt.s32.totalorder %v8502_v18, 16 }
 0xa71   :  { %9268 = vst [vmem:[%s17415_s6 + $0x1b0] sm:$0xff] %v9204_v32  ;;  %v8943_v9 = vadd.f32 %v8400_v7, %v19115_v55  ;;  %v8402_v38 = vpop.f32.mrb[129].mxu0 }
 0xa72   :  { %v9141_v19 = vadd.f32 %v9077_v30, %v9013_v51  ;;  %v19124_v30 = vld [vmem:[#allocation3_spill] sm:$0xff] }
 0xa73   :  { %v9014_v4 = vadd.f32 %v17274_v34, %v8943_v9  ;;  %v9084_v9 = vld [vmem:[%s17414_s5 + $0x1f0] sm:$0xff] }
 0xa74   :  { %v9205_v54 = vmax.f32 %v9141_v19, 0.0  ;;  %v8405_v48 = vpop.f32.mrb[130].mxu0 }
 0xa75   :  { %v9142_v39 = vadd.f32 %v9078_v6, %v9014_v4  ;;  %v8880_v61 = vsel %vm8624_vm7, %v8405_v48, 0.0  ;;  %v8407_v22 = vpop.f32.mrb[131].mxu0 }
 0xa76   :  { %9269 = vst [vmem:[%s17415_s6 + $0x1b8] sm:$0xff] %v9205_v54  ;;  %v8944_v13 = vadd.f32 %v8880_v61, %v19117_v35  ;;  %v19125_v54 = vld [vmem:[#allocation237_spill] sm:$0xff] }
 0xa77   :  { %v9206_v12 = vmax.f32 %v9142_v39, 0.0  ;;  %v9085_v61 = vld [vmem:[%s17414_s5 + $0x1f8] sm:$0xff] }
 0xa78   :  { %v9015_v41 = vadd.f32 %v17274_v34, %v8944_v13  ;;  %v8410_v23 = vpop.f32.mrb[132].mxu0 }
 0xa79   :  { %9270 = vst [vmem:[%s17415_s6 + $0x1c0] sm:$0xff] %v9206_v12  ;;  %v8945_v58 = vadd.f32 %v8410_v23, %v19118_v36  ;;  %v8412_v62 = vpop.f32.mrb[133].mxu0 }
 0xa7a   :  { %v9143_v40 = vadd.f32 %v9079_v10, %v9015_v41 }
 0xa7b   :  { %v9016_v0 = vadd.f32 %v17274_v34, %v8945_v58 }
 0xa7c   :  { %v9207_v46 = vmax.f32 %v9143_v40, 0.0  ;;  %v8415_v45 = vpop.f32.mrb[134].mxu0 }
 0xa7d   :  { %v9144_v43 = vadd.f32 %v9080_v47, %v9016_v0  ;;  %v8882_v52 = vsel %vm8626_vm6, %v8415_v45, 0.0  ;;  %v8417_v31 = vpop.f32.mrb[135].mxu0 }
 0xa7e   :  { %9271 = vst [vmem:[%s17415_s6 + $0x1c8] sm:$0xff] %v9207_v46  ;;  %v8946_v44 = vadd.f32 %v8882_v52, %v19120_v17 }
 0xa7f   :  { %v9208_v42 = vmax.f32 %v9144_v43, 0.0 }
 0xa80   :  { %v9017_v16 = vadd.f32 %v17274_v34, %v8946_v44  ;;  %v8420_v20 = vpop.f32.mrb[136].mxu0 }
 0xa81   :  { %9272 = vst [vmem:[%s17415_s6 + $0x1d0] sm:$0xff] %v9208_v42  ;;  %v8947_v37 = vadd.f32 %v8420_v20, %v19121_v25  ;;  %v8422_v21 = vpop.f32.mrb[137].mxu0 }
 0xa82   :  { %v9145_v8 = vadd.f32 %v9081_v60, %v9017_v16 }
 0xa83   :  { %v9018_v28 = vadd.f32 %v17274_v34, %v8947_v37 }
 0xa84   :  { %v9209_v3 = vmax.f32 %v9145_v8, 0.0  ;;  %v8425_v63 = vpop.f32.mrb[138].mxu0 }
 0xa85   :  { %v9146_v26 = vadd.f32 %v9082_v56, %v9018_v28  ;;  %v8884_v29 = vsel %vm8628_vm4, %v8425_v63, 0.0  ;;  %v8427_v11 = vpop.f32.mrb[139].mxu0 }
 0xa86   :  { %9273 = vst [vmem:[%s17415_s6 + $0x1d8] sm:$0xff] %v9209_v3  ;;  %v8948_v57 = vadd.f32 %v8884_v29, %v19123_v50 }
 0xa87   :  { %v9210_v5 = vmax.f32 %v9146_v26, 0.0 }
 0xa88   :  { %v9019_v27 = vadd.f32 %v17274_v34, %v8948_v57  ;;  %v8430_v32 = vpop.f32.mrb[140].mxu0 }
 0xa89   :  { %9274 = vst [vmem:[%s17415_s6 + $0x1e0] sm:$0xff] %v9210_v5  ;;  %v8949_v51 = vadd.f32 %v8430_v32, %v19124_v30  ;;  %v8432_v7 = vpop.f32.mrb[141].mxu0 }
 0xa8a   :  { %v9147_v55 = vadd.f32 %v9083_v49, %v9019_v27 }
 0xa8b   :  { %v9020_v38 = vadd.f32 %v17274_v34, %v8949_v51 }
 0xa8c   :  { %v9211_v19 = vmax.f32 %v9147_v55, 0.0  ;;  %v8435_v6 = vpop.f32.mrb[142].mxu0 }
 0xa8d   :  { %v9148_v15 = vadd.f32 %v9084_v9, %v9020_v38  ;;  %v8886_v1 = vsel %vm8630_vm9, %v8435_v6, 0.0  ;;  %v8437_v4 = vpop.f32.mrb[143].mxu0 }
 0xa8e   :  { %9275 = vst [vmem:[%s17415_s6 + $0x1e8] sm:$0xff] %v9211_v19  ;;  %v8950_v48 = vadd.f32 %v8886_v1, %v19125_v54 }
 0xa8f   :  { %v9212_v39 = vmax.f32 %v9148_v15, 0.0 }
 0xa90   :  { %v9021_v22 = vadd.f32 %v17274_v34, %v8950_v48 }
 0xa91   :  { %9276 = vst [vmem:[%s17415_s6 + $0x1f0] sm:$0xff] %v9212_v39 }
 0xa92   :  { %v9149_v35 = vadd.f32 %v9085_v61, %v9021_v22 }
 0xa94   :  { %v9213_v13 = vmax.f32 %v9149_v35, 0.0 }
 0xa96   :  { %9277 = vst [vmem:[%s17415_s6 + $0x1f8] sm:$0xff] %v9213_v13 }

</bundles_post_ra>
